<compile_context>
chip_gen: v6e
topology: v6e:2x2x1
jax: 0.10.0
libtpu: 0.0.40
codegen_flags: <defaults>
</compile_context>

<pallas_src>
import functools

import jax
import jax.numpy as jnp
from jax.experimental import pallas as pl
from jax.experimental.pallas import tpu as pltpu


# ----------------------------- helpers -------------------------------------

def _round_up(x, m):
    return ((x + m - 1) // m) * m


def _pick_row_chunk(L, cap=256):
    """8-aligned row-chunk length.  Prefers an exact multiple-of-8 divisor of L;
    otherwise returns an 8-aligned TL and the caller pads L to a multiple of it."""
    cap = max(8, min(cap, _round_up(L, 8)))
    best = 0
    for t in range(8, cap + 1, 8):
        if L % t == 0:
            best = t
    if best >= 64:
        return best
    n = -(-L // cap)                      # desired chunk count
    return _round_up(-(-L // n), 8)


def _conv_taps(w_oihw):
    """PyTorch (Cout, Cin, 3, 3) -> (9, Cin, Cout) taps, tap index = ky*3 + kx."""
    cout, cin = w_oihw.shape[0], w_oihw.shape[1]
    return jnp.transpose(w_oihw, (2, 3, 1, 0)).reshape(9, cin, cout)


# ----------------------------- fused kernel --------------------------------

def _fused_graph_kernel(mask_ref, patches_ref, wa_ref, ba_ref, wb_ref, bb_ref,
                        wc_ref, bc_ref, o_ref, pre_pad, d1a_pad, *,
                        Wr, TL, n_chunks, store_base, shift, C2):
    """Whole forward graph for ONE image, entirely in VMEM.

    Channel layout of every C2(=64)-wide tensor: lanes [0:F) carry the branch that
    feeds the next conv (pre, then deep_1_1); lanes [F:C2) carry the branch that
    goes straight to the output sum (short, then deep_2, then deep_1_2).
    o_ref accumulates stageA + stageB + stageC; the wrapper keeps lanes [F:C2).
    """
    f32 = jnp.float32
    Lr = n_chunks * TL
    Lpad = pre_pad.shape[0]

    # ---- zero ONLY the halo rows of the padded activation scratches ------------
    # (the interior [store_base, store_base+Lr) is fully overwritten below with
    #  garbage columns masked to zero, so it never needs pre-clearing)
    lo = store_base
    hi0 = store_base + Lr
    hi = Lpad - hi0
    for buf in (pre_pad, d1a_pad):
        buf[pl.ds(0, lo), :] = jnp.zeros((lo, C2), buf.dtype)
        buf[pl.ds(hi0, hi), :] = jnp.zeros((hi, C2), buf.dtype)

    # register budget check for holding all per-chunk f32 accumulators at once
    tap_outer = (n_chunks * TL * C2) <= 512 * 64

    def conv3x3(src_pad, w_ref, b_ref):
        """3x3 conv over the padded wide buffer -> list of per-chunk f32 accums."""
        bias_b = jnp.broadcast_to(b_ref[...], (TL, C2)).astype(f32)  # hoisted once
        if tap_outer:
            # Tap-outer order: each 64x64 RHS is loaded once and reused across all
            # chunks (MXU-resident RHS), instead of n_chunks reloads per tap.
            accs = [bias_b for _ in range(n_chunks)]
            for t in range(9):
                ky, kx = divmod(t, 3)
                off = ky * Wr + kx + shift          # ky offsets are 8-aligned (Wr%8==0)
                w_t = w_ref[t]
                for c in range(n_chunks):
                    accs[c] = accs[c] + jnp.dot(
                        src_pad[pl.ds(off + c * TL, TL), :], w_t,
                        preferred_element_type=f32)
            return accs
        # chunk-outer fallback (bounded register pressure); dual accumulators break
        # the 9-long serial MRF-pop -> add dependency chain.
        accs = []
        for c in range(n_chunks):
            acc0, acc1 = bias_b, jnp.zeros((TL, C2), f32)
            for t in range(9):
                ky, kx = divmod(t, 3)
                d = jnp.dot(src_pad[pl.ds(ky * Wr + kx + shift + c * TL, TL), :],
                            w_ref[t], preferred_element_type=f32)
                if t % 2 == 0:
                    acc0 = acc0 + d
                else:
                    acc1 = acc1 + d
            accs.append(acc0 + acc1)
        return accs

    # ---- stage A: x -> [pre | short] ; single K=Kp im2col matmul per chunk ------
    ba_b = jnp.broadcast_to(ba_ref[...], (TL, C2)).astype(f32)       # hoisted
    for c in range(n_chunks):
        r0 = c * TL
        acc = jnp.dot(patches_ref[0, pl.ds(r0, TL), :], wa_ref[...],
                      preferred_element_type=f32) + ba_b
        m = mask_ref[pl.ds(r0, TL), :]
        pre_pad[pl.ds(store_base + r0, TL), :] = (acc * m).astype(pre_pad.dtype)
        o_ref[0, pl.ds(r0, TL), :] = acc.astype(o_ref.dtype)         # `short` in lanes F:C2

    # ---- stage B: pre -> [deep_1_1 | deep_2] -------------------------------------
    accs_b = conv3x3(pre_pad, wb_ref, bb_ref)
    for c in range(n_chunks):
        r0 = c * TL
        m = mask_ref[pl.ds(r0, TL), :]
        d1a_pad[pl.ds(store_base + r0, TL), :] = (accs_b[c] * m).astype(d1a_pad.dtype)
        o_ref[0, pl.ds(r0, TL), :] = o_ref[0, pl.ds(r0, TL), :] + accs_b[c].astype(o_ref.dtype)

    # ---- stage C: deep_1_1 -> [0 | deep_1_2], residual add fused in epilogue -----
    accs_c = conv3x3(d1a_pad, wc_ref, bc_ref)
    for c in range(n_chunks):
        r0 = c * TL
        o_ref[0, pl.ds(r0, TL), :] = o_ref[0, pl.ds(r0, TL), :] + accs_c[c].astype(o_ref.dtype)


# ----------------------------- wrapper --------------------------------------

def model_forward(x_nchw, params, *, matmul_dtype=jnp.bfloat16):
    """Forward pass of the docstring graph (NCHW in / NCHW out), one fused Pallas call."""
    N, Cin, H, W = x_nchw.shape
    x = jnp.transpose(x_nchw, (0, 2, 3, 1)).astype(jnp.float32)      # NCHW -> NHWC
    Hp, Wp = H + 2, W + 2
    Wr = _round_up(Wp, 8)                     # 8-aligned wide row stride (W valid + garbage cols)
    L = H * Wr                                # wide rows of one image
    TL = _pick_row_chunk(L)
    n_chunks = -(-L // TL)
    Lr = n_chunks * TL                        # (possibly) tail-padded row count
    store_base = _round_up(Wr + 1, 8)         # sublane-aligned interior origin
    shift = store_base - (Wr + 1)
    Lpad = _round_up(max(store_base, 2 * Wr + 2 + shift) + Lr + 8, 8)

    w_pre, b_pre = params["deep_pre_conv"]
    w_d11, b_d11 = params["deep_1_1_conv"]
    w_d12, b_d12 = params["deep_1_2_conv"]
    w_d2,  b_d2  = params["deep_2_conv"]
    w_sh,  b_sh  = params["short_conv"]
    F = w_pre.shape[0]
    C2 = 2 * F

    # ---- weight packing: branches sharing an input are concatenated on Cout -------
    # stage A: x -> [pre | short]   (K = 9*Cin, im2col order = tap-major, cin-minor)
    K9 = 9 * Cin
    Kp = _round_up(K9, 8)
    wa = jnp.concatenate([_conv_taps(w_pre).reshape(K9, F),
                          _conv_taps(w_sh).reshape(K9, F)], axis=1)
    wa = jnp.pad(wa, ((0, Kp - K9), (0, 0)))
    ba = jnp.concatenate([b_pre, b_sh]).reshape(1, C2)
    # stage B: [pre | short] -> [deep_1_1 | deep_2]; `short` rows zeroed so the unused
    # half of the fused activation is routed away without in-kernel lane slicing.
    wb = jnp.zeros((9, C2, C2), jnp.float32)
    wb = wb.at[:, :F, :F].set(_conv_taps(w_d11))
    wb = wb.at[:, :F, F:].set(_conv_taps(w_d2))
    bb = jnp.concatenate([b_d11, b_d2]).reshape(1, C2)
    # stage C: [deep_1_1 | deep_2] -> [0 | deep_1_2]
    wc = jnp.zeros((9, C2, C2), jnp.float32)
    wc = wc.at[:, :F, F:].set(_conv_taps(w_d12))
    bc = jnp.concatenate([jnp.zeros_like(b_d12), b_d12]).reshape(1, C2)

    wa, wb, wc = (t.astype(matmul_dtype) for t in (wa, wb, wc))
    ba, bb, bc = (t.astype(jnp.float32) for t in (ba, bb, bc))

    # ---- im2col patches of the zero-padded input, 8-aligned wide row stride -------
    xp = jnp.pad(x, ((0, 0), (1, 1), (1, 1), (0, 0)))                # (N, Hp, Wp, Cin)
    xp = jnp.pad(xp, ((0, 0), (0, 0), (0, Wr - Wp), (0, 0)))         # (N, Hp, Wr, Cin)
    xp = xp.reshape(N, Hp * Wr, Cin)
    tail = max(0, 2 * Wr + 2 + Lr - Hp * Wr)
    xp = jnp.pad(xp, ((0, 0), (0, tail), (0, 0)))
    patches = jnp.concatenate(
        [xp[:, ky * Wr + kx: ky * Wr + kx + Lr, :] for ky in range(3) for kx in range(3)],
        axis=-1)                                                     # (N, Lr, 9*Cin)
    patches = jnp.pad(patches, ((0, 0), (0, 0), (0, Kp - K9))).astype(matmul_dtype)

    # valid-row/column mask: zero on garbage cols [W, Wr) of each wide row and on
    # any tail-padded rows (>= L).
    idx = jnp.arange(Lr, dtype=jnp.int32)
    mask = (((idx % Wr) < W) & (idx < L)).astype(jnp.float32).reshape(Lr, 1)

    kernel = functools.partial(_fused_graph_kernel, Wr=Wr, TL=TL, n_chunks=n_chunks,
                               store_base=store_base, shift=shift, C2=C2)
    out_wide = pl.pallas_call(
        kernel,
        out_shape=jax.ShapeDtypeStruct((N, Lr, C2), jnp.float32),
        grid=(N,),
        in_specs=[
            pl.BlockSpec((Lr, 1), lambda n: (0, 0)),              # mask
            pl.BlockSpec((1, Lr, Kp), lambda n: (n, 0, 0)),       # im2col patches
            pl.BlockSpec((Kp, C2), lambda n: (0, 0)),             # wa
            pl.BlockSpec((1, C2), lambda n: (0, 0)),              # ba
            pl.BlockSpec((9, C2, C2), lambda n: (0, 0, 0)),       # wb
            pl.BlockSpec((1, C2), lambda n: (0, 0)),              # bb
            pl.BlockSpec((9, C2, C2), lambda n: (0, 0, 0)),       # wc
            pl.BlockSpec((1, C2), lambda n: (0, 0)),              # bc
        ],
        out_specs=pl.BlockSpec((1, Lr, C2), lambda n: (n, 0, 0)),
        scratch_shapes=[pltpu.VMEM((Lpad, C2), matmul_dtype),     # padded `pre`
                        pltpu.VMEM((Lpad, C2), matmul_dtype)],    # padded `deep_1_1`
        compiler_params=pltpu.CompilerParams(
            dimension_semantics=("parallel",),
            vmem_limit_bytes=32 * 1024 * 1024),
    )(mask, patches, wa, ba, wb, bb, wc, bc)

    # lanes [F:C2) hold short + deep_2 + deep_1_2; drop padded rows / garbage cols.
    out = out_wide[:, :L, F:].reshape(N, H, Wr, F)[:, :, :W, :]
    return jnp.transpose(out, (0, 3, 1, 2))                          # NHWC -> NCHW


# ----------------------------- reference (plain JAX) ------------------------

def _ref_conv(x_nchw, w, b):
    y = jax.lax.conv_general_dilated(
        x_nchw, w, window_strides=(1, 1), padding="SAME",
        dimension_numbers=("NCHW", "OIHW", "NCHW"),
        precision=jax.lax.Precision.HIGHEST)
    return y + b[None, :, None, None]


def ref_forward(x, params):
    pre = _ref_conv(x, *params["deep_pre_conv"])
    d1 = _ref_conv(_ref_conv(pre, *params["deep_1_1_conv"]), *params["deep_1_2_conv"])
    d2 = _ref_conv(pre, *params["deep_2_conv"])
    short = _ref_conv(x, *params["short_conv"])
    return short + (d1 + d2)


# ----------------------------- main ------------------------------------------

def _init_conv(key, cin, cout):
    kw, kb = jax.random.split(key)
    w = 0.1 * jax.random.normal(kw, (cout, cin, 3, 3), jnp.float32)   # PyTorch OIHW
    b = 0.1 * jax.random.normal(kb, (cout,), jnp.float32)
    return (w, b)


if __name__ == "__main__":
    key = jax.random.PRNGKey(0)
    kx, k0, k1, k2, k3, k4 = jax.random.split(key, 6)

    N, CIN, H, W = 2, 4, 16, 16
    FILTERS = 32

    x = jax.random.normal(kx, (N, CIN, H, W), jnp.float32)            # NCHW input

    params = {
        "deep_pre_conv": _init_conv(k0, CIN, FILTERS),
        "deep_1_1_conv": _init_conv(k1, FILTERS, FILTERS),
        "deep_1_2_conv": _init_conv(k2, FILTERS, FILTERS),
        "deep_2_conv":   _init_conv(k3, FILTERS, FILTERS),
        "short_conv":    _init_conv(k4, CIN, FILTERS),
    }

    fwd = jax.jit(model_forward)
    out = jax.block_until_ready(fwd(x, params))
    ref = jax.block_until_ready(ref_forward(x, params))

    assert out.shape == (N, FILTERS, H, W), out.shape
    err = jnp.abs(out - ref)
    max_err = float(jnp.max(err))
    mean_err = float(jnp.mean(err))
    # bf16 matmul operands (f32 accumulation) across 3 chained convs vs. an f32
    # HIGHEST-precision reference: observed error is ~1e-2 typical; bounds below
    # leave headroom.  Pass matmul_dtype=jnp.float32 for a near-exact path.
    assert max_err < 1.2e-1 and mean_err < 2e-2, (max_err, mean_err)

    print("KERNEL_OK")
</pallas_src>

<mosaic_0001>
module attributes {stable_mosaic.version = 11 : i64} {
  func.func @_fused_graph_kernel(%arg0: i32, %arg1: memref<384x1xf32, #tpu.memory_space<vmem>>, %arg2: memref<1x384x40xbf16, #tpu.memory_space<vmem>>, %arg3: memref<40x64xbf16, #tpu.memory_space<vmem>>, %arg4: memref<1x64xf32, #tpu.memory_space<vmem>>, %arg5: memref<9x64x64xbf16, #tpu.memory_space<vmem>>, %arg6: memref<1x64xf32, #tpu.memory_space<vmem>>, %arg7: memref<9x64x64xbf16, #tpu.memory_space<vmem>>, %arg8: memref<1x64xf32, #tpu.memory_space<vmem>>, %arg9: memref<1x384x64xf32, #tpu.memory_space<vmem>>, %arg10: memref<456x64xbf16, #tpu.memory_space<vmem>>, %arg11: memref<456x64xbf16, #tpu.memory_space<vmem>>) attributes {dimension_semantics = [#tpu.dimension_semantics<parallel>], iteration_bounds = array<i64: 2>, scalar_prefetch = 0 : i64, scratch_operands = 2 : i64, tpu.core_type = #tpu.core_type<tc>, window_params = [{pipeline_mode = #tpu.pipeline_mode<synchronous>, transform_indices = @transform_0, window_bounds = array<i64: 384, 1>}, {transform_indices = @transform_1, window_bounds = array<i64: 1, 384, 40>}, {pipeline_mode = #tpu.pipeline_mode<synchronous>, transform_indices = @transform_2, window_bounds = array<i64: 40, 64>}, {pipeline_mode = #tpu.pipeline_mode<synchronous>, transform_indices = @transform_3, window_bounds = array<i64: 1, 64>}, {pipeline_mode = #tpu.pipeline_mode<synchronous>, transform_indices = @transform_4, window_bounds = array<i64: 9, 64, 64>}, {pipeline_mode = #tpu.pipeline_mode<synchronous>, transform_indices = @transform_5, window_bounds = array<i64: 1, 64>}, {pipeline_mode = #tpu.pipeline_mode<synchronous>, transform_indices = @transform_6, window_bounds = array<i64: 9, 64, 64>}, {pipeline_mode = #tpu.pipeline_mode<synchronous>, transform_indices = @transform_7, window_bounds = array<i64: 1, 64>}, {transform_indices = @transform_8, window_bounds = array<i64: 1, 384, 64>}]} {
    %cst = arith.constant 0.000000e+00 : bf16
    %0 = vector.broadcast %cst : bf16 to vector<32x64xbf16>
    %c0 = arith.constant 0 : index
    %c0_0 = arith.constant 0 : index
    %1 = vector.load %arg10[%c0, %c0_0] : memref<456x64xbf16, #tpu.memory_space<vmem>>, vector<32x64xbf16>
    tpu.vector_store %arg10[%c0, %c0_0], %0 {strides = array<i32>} : memref<456x64xbf16, #tpu.memory_space<vmem>>, vector<32x64xbf16>,
    %cst_1 = arith.constant 0.000000e+00 : bf16
    %2 = vector.broadcast %cst_1 : bf16 to vector<40x64xbf16>
    %c416 = arith.constant 416 : index
    %c0_2 = arith.constant 0 : index
    %3 = vector.load %arg10[%c416, %c0_2] : memref<456x64xbf16, #tpu.memory_space<vmem>>, vector<40x64xbf16>
    tpu.vector_store %arg10[%c416, %c0_2], %2 {strides = array<i32>} : memref<456x64xbf16, #tpu.memory_space<vmem>>, vector<40x64xbf16>,
    %cst_3 = arith.constant 0.000000e+00 : bf16
    %4 = vector.broadcast %cst_3 : bf16 to vector<32x64xbf16>
    %c0_4 = arith.constant 0 : index
    %c0_5 = arith.constant 0 : index
    %5 = vector.load %arg11[%c0_4, %c0_5] : memref<456x64xbf16, #tpu.memory_space<vmem>>, vector<32x64xbf16>
    tpu.vector_store %arg11[%c0_4, %c0_5], %4 {strides = array<i32>} : memref<456x64xbf16, #tpu.memory_space<vmem>>, vector<32x64xbf16>,
    %cst_6 = arith.constant 0.000000e+00 : bf16
    %6 = vector.broadcast %cst_6 : bf16 to vector<40x64xbf16>
    %c416_7 = arith.constant 416 : index
    %c0_8 = arith.constant 0 : index
    %7 = vector.load %arg11[%c416_7, %c0_8] : memref<456x64xbf16, #tpu.memory_space<vmem>>, vector<40x64xbf16>
    tpu.vector_store %arg11[%c416_7, %c0_8], %6 {strides = array<i32>} : memref<456x64xbf16, #tpu.memory_space<vmem>>, vector<40x64xbf16>,
    %c0_9 = arith.constant 0 : index
    %c0_10 = arith.constant 0 : index
    %8 = vector.load %arg4[%c0_9, %c0_10] : memref<1x64xf32, #tpu.memory_space<vmem>>, vector<1x64xf32>
    %9 = vector.shape_cast %8 : vector<1x64xf32> to vector<1x64xf32>
    %10 = vector.broadcast %9 : vector<1x64xf32> to vector<192x64xf32>
    %c0_11 = arith.constant 0 : index
    %c0_12 = arith.constant 0 : index
    %c0_13 = arith.constant 0 : index
    %11 = vector.load %arg2[%c0_11, %c0_12, %c0_13] : memref<1x384x40xbf16, #tpu.memory_space<vmem>>, vector<1x192x40xbf16>
    %12 = vector.shape_cast %11 : vector<1x192x40xbf16> to vector<192x40xbf16>
    %c0_14 = arith.constant 0 : index
    %c0_15 = arith.constant 0 : index
    %13 = vector.load %arg3[%c0_14, %c0_15] : memref<40x64xbf16, #tpu.memory_space<vmem>>, vector<40x64xbf16>
    %cst_16 = arith.constant dense<0.000000e+00> : vector<192x64xf32>
    %14 = tpu.matmul %12, %13, %cst_16 {dimension_numbers = #tpu.dot_dimension_numbers<[1], [0], [0], [1], [0, 0, 1, 1], [], []>} : vector<192x40xbf16>, vector<40x64xbf16>, vector<192x64xf32> -> vector<192x64xf32>
    %15 = arith.addf %14, %10 : vector<192x64xf32>
    %c0_17 = arith.constant 0 : index
    %c0_18 = arith.constant 0 : index
    %16 = vector.load %arg1[%c0_17, %c0_18] : memref<384x1xf32, #tpu.memory_space<vmem>>, vector<192x1xf32>
    %17 = vector.broadcast %16 : vector<192x1xf32> to vector<192x64xf32>
    %18 = arith.mulf %15, %17 : vector<192x64xf32>
    %19 = arith.truncf %18 : vector<192x64xf32> to vector<192x64xbf16>
    %c32 = arith.constant 32 : index
    %c0_19 = arith.constant 0 : index
    %20 = vector.load %arg10[%c32, %c0_19] : memref<456x64xbf16, #tpu.memory_space<vmem>>, vector<192x64xbf16>
    tpu.vector_store %arg10[%c32, %c0_19], %19 {strides = array<i32>} : memref<456x64xbf16, #tpu.memory_space<vmem>>, vector<192x64xbf16>,
    %c0_20 = arith.constant 0 : index
    %c0_21 = arith.constant 0 : index
    %c0_22 = arith.constant 0 : index
    %21 = vector.load %arg9[%c0_20, %c0_21, %c0_22] : memref<1x384x64xf32, #tpu.memory_space<vmem>>, vector<1x192x64xf32>
    %22 = vector.shape_cast %21 : vector<1x192x64xf32> to vector<192x64xf32>
    %23 = vector.shape_cast %15 : vector<192x64xf32> to vector<1x192x64xf32>
    tpu.vector_store %arg9[%c0_20, %c0_21, %c0_22], %23 {strides = array<i32>} : memref<1x384x64xf32, #tpu.memory_space<vmem>>, vector<1x192x64xf32>,
    %c0_23 = arith.constant 0 : index
    %c192 = arith.constant 192 : index
    %c0_24 = arith.constant 0 : index
    %24 = vector.load %arg2[%c0_23, %c192, %c0_24] : memref<1x384x40xbf16, #tpu.memory_space<vmem>>, vector<1x192x40xbf16>
    %25 = vector.shape_cast %24 : vector<1x192x40xbf16> to vector<192x40xbf16>
    %c0_25 = arith.constant 0 : index
    %c0_26 = arith.constant 0 : index
    %26 = vector.load %arg3[%c0_25, %c0_26] : memref<40x64xbf16, #tpu.memory_space<vmem>>, vector<40x64xbf16>
    %cst_27 = arith.constant dense<0.000000e+00> : vector<192x64xf32>
    %27 = tpu.matmul %25, %26, %cst_27 {dimension_numbers = #tpu.dot_dimension_numbers<[1], [0], [0], [1], [0, 0, 1, 1], [], []>} : vector<192x40xbf16>, vector<40x64xbf16>, vector<192x64xf32> -> vector<192x64xf32>
    %28 = arith.addf %27, %10 : vector<192x64xf32>
    %c192_28 = arith.constant 192 : index
    %c0_29 = arith.constant 0 : index
    %29 = vector.load %arg1[%c192_28, %c0_29] : memref<384x1xf32, #tpu.memory_space<vmem>>, vector<192x1xf32>
    %30 = vector.broadcast %29 : vector<192x1xf32> to vector<192x64xf32>
    %31 = arith.mulf %28, %30 : vector<192x64xf32>
    %32 = arith.truncf %31 : vector<192x64xf32> to vector<192x64xbf16>
    %c224 = arith.constant 224 : index
    %c0_30 = arith.constant 0 : index
    %33 = vector.load %arg10[%c224, %c0_30] : memref<456x64xbf16, #tpu.memory_space<vmem>>, vector<192x64xbf16>
    tpu.vector_store %arg10[%c224, %c0_30], %32 {strides = array<i32>} : memref<456x64xbf16, #tpu.memory_space<vmem>>, vector<192x64xbf16>,
    %c0_31 = arith.constant 0 : index
    %c192_32 = arith.constant 192 : index
    %c0_33 = arith.constant 0 : index
    %34 = vector.load %arg9[%c0_31, %c192_32, %c0_33] : memref<1x384x64xf32, #tpu.memory_space<vmem>>, vector<1x192x64xf32>
    %35 = vector.shape_cast %34 : vector<1x192x64xf32> to vector<192x64xf32>
    %36 = vector.shape_cast %28 : vector<192x64xf32> to vector<1x192x64xf32>
    tpu.vector_store %arg9[%c0_31, %c192_32, %c0_33], %36 {strides = array<i32>} : memref<1x384x64xf32, #tpu.memory_space<vmem>>, vector<1x192x64xf32>,
    %c0_34 = arith.constant 0 : index
    %c0_35 = arith.constant 0 : index
    %37 = vector.load %arg6[%c0_34, %c0_35] : memref<1x64xf32, #tpu.memory_space<vmem>>, vector<1x64xf32>
    %38 = vector.shape_cast %37 : vector<1x64xf32> to vector<1x64xf32>
    %39 = vector.broadcast %38 : vector<1x64xf32> to vector<192x64xf32>
    %c0_36 = arith.constant 0 : index
    %c0_37 = arith.constant 0 : index
    %c0_38 = arith.constant 0 : index
    %40 = vector.load %arg5[%c0_36, %c0_37, %c0_38] : memref<9x64x64xbf16, #tpu.memory_space<vmem>>, vector<1x64x64xbf16>
    %41 = vector.shape_cast %40 : vector<1x64x64xbf16> to vector<64x64xbf16>
    %c7 = arith.constant 7 : index
    %c0_39 = arith.constant 0 : index
    %42 = vector.load %arg10[%c7, %c0_39] : memref<456x64xbf16, #tpu.memory_space<vmem>>, vector<192x64xbf16>
    %cst_40 = arith.constant dense<0.000000e+00> : vector<192x64xf32>
    %43 = tpu.matmul %42, %41, %cst_40 {dimension_numbers = #tpu.dot_dimension_numbers<[1], [0], [0], [1], [0, 0, 1, 1], [], []>} : vector<192x64xbf16>, vector<64x64xbf16>, vector<192x64xf32> -> vector<192x64xf32>
    %44 = arith.addf %39, %43 : vector<192x64xf32>
    %c199 = arith.constant 199 : index
    %c0_41 = arith.constant 0 : index
    %45 = vector.load %arg10[%c199, %c0_41] : memref<456x64xbf16, #tpu.memory_space<vmem>>, vector<192x64xbf16>
    %cst_42 = arith.constant dense<0.000000e+00> : vector<192x64xf32>
    %46 = tpu.matmul %45, %41, %cst_42 {dimension_numbers = #tpu.dot_dimension_numbers<[1], [0], [0], [1], [0, 0, 1, 1], [], []>} : vector<192x64xbf16>, vector<64x64xbf16>, vector<192x64xf32> -> vector<192x64xf32>
    %47 = arith.addf %39, %46 : vector<192x64xf32>
    %c1 = arith.constant 1 : index
    %c0_43 = arith.constant 0 : index
    %c0_44 = arith.constant 0 : index
    %48 = vector.load %arg5[%c1, %c0_43, %c0_44] : memref<9x64x64xbf16, #tpu.memory_space<vmem>>, vector<1x64x64xbf16>
    %49 = vector.shape_cast %48 : vector<1x64x64xbf16> to vector<64x64xbf16>
    %c8 = arith.constant 8 : index
    %c0_45 = arith.constant 0 : index
    %50 = vector.load %arg10[%c8, %c0_45] : memref<456x64xbf16, #tpu.memory_space<vmem>>, vector<192x64xbf16>
    %cst_46 = arith.constant dense<0.000000e+00> : vector<192x64xf32>
    %51 = tpu.matmul %50, %49, %cst_46 {dimension_numbers = #tpu.dot_dimension_numbers<[1], [0], [0], [1], [0, 0, 1, 1], [], []>} : vector<192x64xbf16>, vector<64x64xbf16>, vector<192x64xf32> -> vector<192x64xf32>
    %52 = arith.addf %44, %51 : vector<192x64xf32>
    %c200 = arith.constant 200 : index
    %c0_47 = arith.constant 0 : index
    %53 = vector.load %arg10[%c200, %c0_47] : memref<456x64xbf16, #tpu.memory_space<vmem>>, vector<192x64xbf16>
    %cst_48 = arith.constant dense<0.000000e+00> : vector<192x64xf32>
    %54 = tpu.matmul %53, %49, %cst_48 {dimension_numbers = #tpu.dot_dimension_numbers<[1], [0], [0], [1], [0, 0, 1, 1], [], []>} : vector<192x64xbf16>, vector<64x64xbf16>, vector<192x64xf32> -> vector<192x64xf32>
    %55 = arith.addf %47, %54 : vector<192x64xf32>
    %c2 = arith.constant 2 : index
    %c0_49 = arith.constant 0 : index
    %c0_50 = arith.constant 0 : index
    %56 = vector.load %arg5[%c2, %c0_49, %c0_50] : memref<9x64x64xbf16, #tpu.memory_space<vmem>>, vector<1x64x64xbf16>
    %57 = vector.shape_cast %56 : vector<1x64x64xbf16> to vector<64x64xbf16>
    %c9 = arith.constant 9 : index
    %c0_51 = arith.constant 0 : index
    %58 = vector.load %arg10[%c9, %c0_51] : memref<456x64xbf16, #tpu.memory_space<vmem>>, vector<192x64xbf16>
    %cst_52 = arith.constant dense<0.000000e+00> : vector<192x64xf32>
    %59 = tpu.matmul %58, %57, %cst_52 {dimension_numbers = #tpu.dot_dimension_numbers<[1], [0], [0], [1], [0, 0, 1, 1], [], []>} : vector<192x64xbf16>, vector<64x64xbf16>, vector<192x64xf32> -> vector<192x64xf32>
    %60 = arith.addf %52, %59 : vector<192x64xf32>
    %c201 = arith.constant 201 : index
    %c0_53 = arith.constant 0 : index
    %61 = vector.load %arg10[%c201, %c0_53] : memref<456x64xbf16, #tpu.memory_space<vmem>>, vector<192x64xbf16>
    %cst_54 = arith.constant dense<0.000000e+00> : vector<192x64xf32>
    %62 = tpu.matmul %61, %57, %cst_54 {dimension_numbers = #tpu.dot_dimension_numbers<[1], [0], [0], [1], [0, 0, 1, 1], [], []>} : vector<192x64xbf16>, vector<64x64xbf16>, vector<192x64xf32> -> vector<192x64xf32>
    %63 = arith.addf %55, %62 : vector<192x64xf32>
    %c3 = arith.constant 3 : index
    %c0_55 = arith.constant 0 : index
    %c0_56 = arith.constant 0 : index
    %64 = vector.load %arg5[%c3, %c0_55, %c0_56] : memref<9x64x64xbf16, #tpu.memory_space<vmem>>, vector<1x64x64xbf16>
    %65 = vector.shape_cast %64 : vector<1x64x64xbf16> to vector<64x64xbf16>
    %c31 = arith.constant 31 : index
    %c0_57 = arith.constant 0 : index
    %66 = vector.load %arg10[%c31, %c0_57] : memref<456x64xbf16, #tpu.memory_space<vmem>>, vector<192x64xbf16>
    %cst_58 = arith.constant dense<0.000000e+00> : vector<192x64xf32>
    %67 = tpu.matmul %66, %65, %cst_58 {dimension_numbers = #tpu.dot_dimension_numbers<[1], [0], [0], [1], [0, 0, 1, 1], [], []>} : vector<192x64xbf16>, vector<64x64xbf16>, vector<192x64xf32> -> vector<192x64xf32>
    %68 = arith.addf %60, %67 : vector<192x64xf32>
    %c223 = arith.constant 223 : index
    %c0_59 = arith.constant 0 : index
    %69 = vector.load %arg10[%c223, %c0_59] : memref<456x64xbf16, #tpu.memory_space<vmem>>, vector<192x64xbf16>
    %cst_60 = arith.constant dense<0.000000e+00> : vector<192x64xf32>
    %70 = tpu.matmul %69, %65, %cst_60 {dimension_numbers = #tpu.dot_dimension_numbers<[1], [0], [0], [1], [0, 0, 1, 1], [], []>} : vector<192x64xbf16>, vector<64x64xbf16>, vector<192x64xf32> -> vector<192x64xf32>
    %71 = arith.addf %63, %70 : vector<192x64xf32>
    %c4 = arith.constant 4 : index
    %c0_61 = arith.constant 0 : index
    %c0_62 = arith.constant 0 : index
    %72 = vector.load %arg5[%c4, %c0_61, %c0_62] : memref<9x64x64xbf16, #tpu.memory_space<vmem>>, vector<1x64x64xbf16>
    %73 = vector.shape_cast %72 : vector<1x64x64xbf16> to vector<64x64xbf16>
    %c32_63 = arith.constant 32 : index
    %c0_64 = arith.constant 0 : index
    %74 = vector.load %arg10[%c32_63, %c0_64] : memref<456x64xbf16, #tpu.memory_space<vmem>>, vector<192x64xbf16>
    %cst_65 = arith.constant dense<0.000000e+00> : vector<192x64xf32>
    %75 = tpu.matmul %74, %73, %cst_65 {dimension_numbers = #tpu.dot_dimension_numbers<[1], [0], [0], [1], [0, 0, 1, 1], [], []>} : vector<192x64xbf16>, vector<64x64xbf16>, vector<192x64xf32> -> vector<192x64xf32>
    %76 = arith.addf %68, %75 : vector<192x64xf32>
    %c224_66 = arith.constant 224 : index
    %c0_67 = arith.constant 0 : index
    %77 = vector.load %arg10[%c224_66, %c0_67] : memref<456x64xbf16, #tpu.memory_space<vmem>>, vector<192x64xbf16>
    %cst_68 = arith.constant dense<0.000000e+00> : vector<192x64xf32>
    %78 = tpu.matmul %77, %73, %cst_68 {dimension_numbers = #tpu.dot_dimension_numbers<[1], [0], [0], [1], [0, 0, 1, 1], [], []>} : vector<192x64xbf16>, vector<64x64xbf16>, vector<192x64xf32> -> vector<192x64xf32>
    %79 = arith.addf %71, %78 : vector<192x64xf32>
    %c5 = arith.constant 5 : index
    %c0_69 = arith.constant 0 : index
    %c0_70 = arith.constant 0 : index
    %80 = vector.load %arg5[%c5, %c0_69, %c0_70] : memref<9x64x64xbf16, #tpu.memory_space<vmem>>, vector<1x64x64xbf16>
    %81 = vector.shape_cast %80 : vector<1x64x64xbf16> to vector<64x64xbf16>
    %c33 = arith.constant 33 : index
    %c0_71 = arith.constant 0 : index
    %82 = vector.load %arg10[%c33, %c0_71] : memref<456x64xbf16, #tpu.memory_space<vmem>>, vector<192x64xbf16>
    %cst_72 = arith.constant dense<0.000000e+00> : vector<192x64xf32>
    %83 = tpu.matmul %82, %81, %cst_72 {dimension_numbers = #tpu.dot_dimension_numbers<[1], [0], [0], [1], [0, 0, 1, 1], [], []>} : vector<192x64xbf16>, vector<64x64xbf16>, vector<192x64xf32> -> vector<192x64xf32>
    %84 = arith.addf %76, %83 : vector<192x64xf32>
    %c225 = arith.constant 225 : index
    %c0_73 = arith.constant 0 : index
    %85 = vector.load %arg10[%c225, %c0_73] : memref<456x64xbf16, #tpu.memory_space<vmem>>, vector<192x64xbf16>
    %cst_74 = arith.constant dense<0.000000e+00> : vector<192x64xf32>
    %86 = tpu.matmul %85, %81, %cst_74 {dimension_numbers = #tpu.dot_dimension_numbers<[1], [0], [0], [1], [0, 0, 1, 1], [], []>} : vector<192x64xbf16>, vector<64x64xbf16>, vector<192x64xf32> -> vector<192x64xf32>
    %87 = arith.addf %79, %86 : vector<192x64xf32>
    %c6 = arith.constant 6 : index
    %c0_75 = arith.constant 0 : index
    %c0_76 = arith.constant 0 : index
    %88 = vector.load %arg5[%c6, %c0_75, %c0_76] : memref<9x64x64xbf16, #tpu.memory_space<vmem>>, vector<1x64x64xbf16>
    %89 = vector.shape_cast %88 : vector<1x64x64xbf16> to vector<64x64xbf16>
    %c55 = arith.constant 55 : index
    %c0_77 = arith.constant 0 : index
    %90 = vector.load %arg10[%c55, %c0_77] : memref<456x64xbf16, #tpu.memory_space<vmem>>, vector<192x64xbf16>
    %cst_78 = arith.constant dense<0.000000e+00> : vector<192x64xf32>
    %91 = tpu.matmul %90, %89, %cst_78 {dimension_numbers = #tpu.dot_dimension_numbers<[1], [0], [0], [1], [0, 0, 1, 1], [], []>} : vector<192x64xbf16>, vector<64x64xbf16>, vector<192x64xf32> -> vector<192x64xf32>
    %92 = arith.addf %84, %91 : vector<192x64xf32>
    %c247 = arith.constant 247 : index
    %c0_79 = arith.constant 0 : index
    %93 = vector.load %arg10[%c247, %c0_79] : memref<456x64xbf16, #tpu.memory_space<vmem>>, vector<192x64xbf16>
    %cst_80 = arith.constant dense<0.000000e+00> : vector<192x64xf32>
    %94 = tpu.matmul %93, %89, %cst_80 {dimension_numbers = #tpu.dot_dimension_numbers<[1], [0], [0], [1], [0, 0, 1, 1], [], []>} : vector<192x64xbf16>, vector<64x64xbf16>, vector<192x64xf32> -> vector<192x64xf32>
    %95 = arith.addf %87, %94 : vector<192x64xf32>
    %c7_81 = arith.constant 7 : index
    %c0_82 = arith.constant 0 : index
    %c0_83 = arith.constant 0 : index
    %96 = vector.load %arg5[%c7_81, %c0_82, %c0_83] : memref<9x64x64xbf16, #tpu.memory_space<vmem>>, vector<1x64x64xbf16>
    %97 = vector.shape_cast %96 : vector<1x64x64xbf16> to vector<64x64xbf16>
    %c56 = arith.constant 56 : index
    %c0_84 = arith.constant 0 : index
    %98 = vector.load %arg10[%c56, %c0_84] : memref<456x64xbf16, #tpu.memory_space<vmem>>, vector<192x64xbf16>
    %cst_85 = arith.constant dense<0.000000e+00> : vector<192x64xf32>
    %99 = tpu.matmul %98, %97, %cst_85 {dimension_numbers = #tpu.dot_dimension_numbers<[1], [0], [0], [1], [0, 0, 1, 1], [], []>} : vector<192x64xbf16>, vector<64x64xbf16>, vector<192x64xf32> -> vector<192x64xf32>
    %100 = arith.addf %92, %99 : vector<192x64xf32>
    %c248 = arith.constant 248 : index
    %c0_86 = arith.constant 0 : index
    %101 = vector.load %arg10[%c248, %c0_86] : memref<456x64xbf16, #tpu.memory_space<vmem>>, vector<192x64xbf16>
    %cst_87 = arith.constant dense<0.000000e+00> : vector<192x64xf32>
    %102 = tpu.matmul %101, %97, %cst_87 {dimension_numbers = #tpu.dot_dimension_numbers<[1], [0], [0], [1], [0, 0, 1, 1], [], []>} : vector<192x64xbf16>, vector<64x64xbf16>, vector<192x64xf32> -> vector<192x64xf32>
    %103 = arith.addf %95, %102 : vector<192x64xf32>
    %c8_88 = arith.constant 8 : index
    %c0_89 = arith.constant 0 : index
    %c0_90 = arith.constant 0 : index
    %104 = vector.load %arg5[%c8_88, %c0_89, %c0_90] : memref<9x64x64xbf16, #tpu.memory_space<vmem>>, vector<1x64x64xbf16>
    %105 = vector.shape_cast %104 : vector<1x64x64xbf16> to vector<64x64xbf16>
    %c57 = arith.constant 57 : index
    %c0_91 = arith.constant 0 : index
    %106 = vector.load %arg10[%c57, %c0_91] : memref<456x64xbf16, #tpu.memory_space<vmem>>, vector<192x64xbf16>
    %cst_92 = arith.constant dense<0.000000e+00> : vector<192x64xf32>
    %107 = tpu.matmul %106, %105, %cst_92 {dimension_numbers = #tpu.dot_dimension_numbers<[1], [0], [0], [1], [0, 0, 1, 1], [], []>} : vector<192x64xbf16>, vector<64x64xbf16>, vector<192x64xf32> -> vector<192x64xf32>
    %108 = arith.addf %100, %107 : vector<192x64xf32>
    %c249 = arith.constant 249 : index
    %c0_93 = arith.constant 0 : index
    %109 = vector.load %arg10[%c249, %c0_93] : memref<456x64xbf16, #tpu.memory_space<vmem>>, vector<192x64xbf16>
    %cst_94 = arith.constant dense<0.000000e+00> : vector<192x64xf32>
    %110 = tpu.matmul %109, %105, %cst_94 {dimension_numbers = #tpu.dot_dimension_numbers<[1], [0], [0], [1], [0, 0, 1, 1], [], []>} : vector<192x64xbf16>, vector<64x64xbf16>, vector<192x64xf32> -> vector<192x64xf32>
    %111 = arith.addf %103, %110 : vector<192x64xf32>
    %c0_95 = arith.constant 0 : index
    %c0_96 = arith.constant 0 : index
    %112 = vector.load %arg1[%c0_95, %c0_96] : memref<384x1xf32, #tpu.memory_space<vmem>>, vector<192x1xf32>
    %113 = vector.broadcast %112 : vector<192x1xf32> to vector<192x64xf32>
    %114 = arith.mulf %108, %113 : vector<192x64xf32>
    %115 = arith.truncf %114 : vector<192x64xf32> to vector<192x64xbf16>
    %c32_97 = arith.constant 32 : index
    %c0_98 = arith.constant 0 : index
    %116 = vector.load %arg11[%c32_97, %c0_98] : memref<456x64xbf16, #tpu.memory_space<vmem>>, vector<192x64xbf16>
    tpu.vector_store %arg11[%c32_97, %c0_98], %115 {strides = array<i32>} : memref<456x64xbf16, #tpu.memory_space<vmem>>, vector<192x64xbf16>,
    %c0_99 = arith.constant 0 : index
    %c0_100 = arith.constant 0 : index
    %c0_101 = arith.constant 0 : index
    %117 = vector.load %arg9[%c0_99, %c0_100, %c0_101] : memref<1x384x64xf32, #tpu.memory_space<vmem>>, vector<1x192x64xf32>
    %118 = vector.shape_cast %117 : vector<1x192x64xf32> to vector<192x64xf32>
    %119 = arith.addf %118, %108 : vector<192x64xf32>
    %c0_102 = arith.constant 0 : index
    %c0_103 = arith.constant 0 : index
    %c0_104 = arith.constant 0 : index
    %120 = vector.load %arg9[%c0_102, %c0_103, %c0_104] : memref<1x384x64xf32, #tpu.memory_space<vmem>>, vector<1x192x64xf32>
    %121 = vector.shape_cast %120 : vector<1x192x64xf32> to vector<192x64xf32>
    %122 = vector.shape_cast %119 : vector<192x64xf32> to vector<1x192x64xf32>
    tpu.vector_store %arg9[%c0_102, %c0_103, %c0_104], %122 {strides = array<i32>} : memref<1x384x64xf32, #tpu.memory_space<vmem>>, vector<1x192x64xf32>,
    %c192_105 = arith.constant 192 : index
    %c0_106 = arith.constant 0 : index
    %123 = vector.load %arg1[%c192_105, %c0_106] : memref<384x1xf32, #tpu.memory_space<vmem>>, vector<192x1xf32>
    %124 = vector.broadcast %123 : vector<192x1xf32> to vector<192x64xf32>
    %125 = arith.mulf %111, %124 : vector<192x64xf32>
    %126 = arith.truncf %125 : vector<192x64xf32> to vector<192x64xbf16>
    %c224_107 = arith.constant 224 : index
    %c0_108 = arith.constant 0 : index
    %127 = vector.load %arg11[%c224_107, %c0_108] : memref<456x64xbf16, #tpu.memory_space<vmem>>, vector<192x64xbf16>
    tpu.vector_store %arg11[%c224_107, %c0_108], %126 {strides = array<i32>} : memref<456x64xbf16, #tpu.memory_space<vmem>>, vector<192x64xbf16>,
    %c0_109 = arith.constant 0 : index
    %c192_110 = arith.constant 192 : index
    %c0_111 = arith.constant 0 : index
    %128 = vector.load %arg9[%c0_109, %c192_110, %c0_111] : memref<1x384x64xf32, #tpu.memory_space<vmem>>, vector<1x192x64xf32>
    %129 = vector.shape_cast %128 : vector<1x192x64xf32> to vector<192x64xf32>
    %130 = arith.addf %129, %111 : vector<192x64xf32>
    %c0_112 = arith.constant 0 : index
    %c192_113 = arith.constant 192 : index
    %c0_114 = arith.constant 0 : index
    %131 = vector.load %arg9[%c0_112, %c192_113, %c0_114] : memref<1x384x64xf32, #tpu.memory_space<vmem>>, vector<1x192x64xf32>
    %132 = vector.shape_cast %131 : vector<1x192x64xf32> to vector<192x64xf32>
    %133 = vector.shape_cast %130 : vector<192x64xf32> to vector<1x192x64xf32>
    tpu.vector_store %arg9[%c0_112, %c192_113, %c0_114], %133 {strides = array<i32>} : memref<1x384x64xf32, #tpu.memory_space<vmem>>, vector<1x192x64xf32>,
    %c0_115 = arith.constant 0 : index
    %c0_116 = arith.constant 0 : index
    %134 = vector.load %arg8[%c0_115, %c0_116] : memref<1x64xf32, #tpu.memory_space<vmem>>, vector<1x64xf32>
    %135 = vector.shape_cast %134 : vector<1x64xf32> to vector<1x64xf32>
    %136 = vector.broadcast %135 : vector<1x64xf32> to vector<192x64xf32>
    %c0_117 = arith.constant 0 : index
    %c0_118 = arith.constant 0 : index
    %c0_119 = arith.constant 0 : index
    %137 = vector.load %arg7[%c0_117, %c0_118, %c0_119] : memref<9x64x64xbf16, #tpu.memory_space<vmem>>, vector<1x64x64xbf16>
    %138 = vector.shape_cast %137 : vector<1x64x64xbf16> to vector<64x64xbf16>
    %c7_120 = arith.constant 7 : index
    %c0_121 = arith.constant 0 : index
    %139 = vector.load %arg11[%c7_120, %c0_121] : memref<456x64xbf16, #tpu.memory_space<vmem>>, vector<192x64xbf16>
    %cst_122 = arith.constant dense<0.000000e+00> : vector<192x64xf32>
    %140 = tpu.matmul %139, %138, %cst_122 {dimension_numbers = #tpu.dot_dimension_numbers<[1], [0], [0], [1], [0, 0, 1, 1], [], []>} : vector<192x64xbf16>, vector<64x64xbf16>, vector<192x64xf32> -> vector<192x64xf32>
    %141 = arith.addf %136, %140 : vector<192x64xf32>
    %c199_123 = arith.constant 199 : index
    %c0_124 = arith.constant 0 : index
    %142 = vector.load %arg11[%c199_123, %c0_124] : memref<456x64xbf16, #tpu.memory_space<vmem>>, vector<192x64xbf16>
    %cst_125 = arith.constant dense<0.000000e+00> : vector<192x64xf32>
    %143 = tpu.matmul %142, %138, %cst_125 {dimension_numbers = #tpu.dot_dimension_numbers<[1], [0], [0], [1], [0, 0, 1, 1], [], []>} : vector<192x64xbf16>, vector<64x64xbf16>, vector<192x64xf32> -> vector<192x64xf32>
    %144 = arith.addf %136, %143 : vector<192x64xf32>
    %c1_126 = arith.constant 1 : index
    %c0_127 = arith.constant 0 : index
    %c0_128 = arith.constant 0 : index
    %145 = vector.load %arg7[%c1_126, %c0_127, %c0_128] : memref<9x64x64xbf16, #tpu.memory_space<vmem>>, vector<1x64x64xbf16>
    %146 = vector.shape_cast %145 : vector<1x64x64xbf16> to vector<64x64xbf16>
    %c8_129 = arith.constant 8 : index
    %c0_130 = arith.constant 0 : index
    %147 = vector.load %arg11[%c8_129, %c0_130] : memref<456x64xbf16, #tpu.memory_space<vmem>>, vector<192x64xbf16>
    %cst_131 = arith.constant dense<0.000000e+00> : vector<192x64xf32>
    %148 = tpu.matmul %147, %146, %cst_131 {dimension_numbers = #tpu.dot_dimension_numbers<[1], [0], [0], [1], [0, 0, 1, 1], [], []>} : vector<192x64xbf16>, vector<64x64xbf16>, vector<192x64xf32> -> vector<192x64xf32>
    %149 = arith.addf %141, %148 : vector<192x64xf32>
    %c200_132 = arith.constant 200 : index
    %c0_133 = arith.constant 0 : index
    %150 = vector.load %arg11[%c200_132, %c0_133] : memref<456x64xbf16, #tpu.memory_space<vmem>>, vector<192x64xbf16>
    %cst_134 = arith.constant dense<0.000000e+00> : vector<192x64xf32>
    %151 = tpu.matmul %150, %146, %cst_134 {dimension_numbers = #tpu.dot_dimension_numbers<[1], [0], [0], [1], [0, 0, 1, 1], [], []>} : vector<192x64xbf16>, vector<64x64xbf16>, vector<192x64xf32> -> vector<192x64xf32>
    %152 = arith.addf %144, %151 : vector<192x64xf32>
    %c2_135 = arith.constant 2 : index
    %c0_136 = arith.constant 0 : index
    %c0_137 = arith.constant 0 : index
    %153 = vector.load %arg7[%c2_135, %c0_136, %c0_137] : memref<9x64x64xbf16, #tpu.memory_space<vmem>>, vector<1x64x64xbf16>
    %154 = vector.shape_cast %153 : vector<1x64x64xbf16> to vector<64x64xbf16>
    %c9_138 = arith.constant 9 : index
    %c0_139 = arith.constant 0 : index
    %155 = vector.load %arg11[%c9_138, %c0_139] : memref<456x64xbf16, #tpu.memory_space<vmem>>, vector<192x64xbf16>
    %cst_140 = arith.constant dense<0.000000e+00> : vector<192x64xf32>
    %156 = tpu.matmul %155, %154, %cst_140 {dimension_numbers = #tpu.dot_dimension_numbers<[1], [0], [0], [1], [0, 0, 1, 1], [], []>} : vector<192x64xbf16>, vector<64x64xbf16>, vector<192x64xf32> -> vector<192x64xf32>
    %157 = arith.addf %149, %156 : vector<192x64xf32>
    %c201_141 = arith.constant 201 : index
    %c0_142 = arith.constant 0 : index
    %158 = vector.load %arg11[%c201_141, %c0_142] : memref<456x64xbf16, #tpu.memory_space<vmem>>, vector<192x64xbf16>
    %cst_143 = arith.constant dense<0.000000e+00> : vector<192x64xf32>
    %159 = tpu.matmul %158, %154, %cst_143 {dimension_numbers = #tpu.dot_dimension_numbers<[1], [0], [0], [1], [0, 0, 1, 1], [], []>} : vector<192x64xbf16>, vector<64x64xbf16>, vector<192x64xf32> -> vector<192x64xf32>
    %160 = arith.addf %152, %159 : vector<192x64xf32>
    %c3_144 = arith.constant 3 : index
    %c0_145 = arith.constant 0 : index
    %c0_146 = arith.constant 0 : index
    %161 = vector.load %arg7[%c3_144, %c0_145, %c0_146] : memref<9x64x64xbf16, #tpu.memory_space<vmem>>, vector<1x64x64xbf16>
    %162 = vector.shape_cast %161 : vector<1x64x64xbf16> to vector<64x64xbf16>
    %c31_147 = arith.constant 31 : index
    %c0_148 = arith.constant 0 : index
    %163 = vector.load %arg11[%c31_147, %c0_148] : memref<456x64xbf16, #tpu.memory_space<vmem>>, vector<192x64xbf16>
    %cst_149 = arith.constant dense<0.000000e+00> : vector<192x64xf32>
    %164 = tpu.matmul %163, %162, %cst_149 {dimension_numbers = #tpu.dot_dimension_numbers<[1], [0], [0], [1], [0, 0, 1, 1], [], []>} : vector<192x64xbf16>, vector<64x64xbf16>, vector<192x64xf32> -> vector<192x64xf32>
    %165 = arith.addf %157, %164 : vector<192x64xf32>
    %c223_150 = arith.constant 223 : index
    %c0_151 = arith.constant 0 : index
    %166 = vector.load %arg11[%c223_150, %c0_151] : memref<456x64xbf16, #tpu.memory_space<vmem>>, vector<192x64xbf16>
    %cst_152 = arith.constant dense<0.000000e+00> : vector<192x64xf32>
    %167 = tpu.matmul %166, %162, %cst_152 {dimension_numbers = #tpu.dot_dimension_numbers<[1], [0], [0], [1], [0, 0, 1, 1], [], []>} : vector<192x64xbf16>, vector<64x64xbf16>, vector<192x64xf32> -> vector<192x64xf32>
    %168 = arith.addf %160, %167 : vector<192x64xf32>
    %c4_153 = arith.constant 4 : index
    %c0_154 = arith.constant 0 : index
    %c0_155 = arith.constant 0 : index
    %169 = vector.load %arg7[%c4_153, %c0_154, %c0_155] : memref<9x64x64xbf16, #tpu.memory_space<vmem>>, vector<1x64x64xbf16>
    %170 = vector.shape_cast %169 : vector<1x64x64xbf16> to vector<64x64xbf16>
    %c32_156 = arith.constant 32 : index
    %c0_157 = arith.constant 0 : index
    %171 = vector.load %arg11[%c32_156, %c0_157] : memref<456x64xbf16, #tpu.memory_space<vmem>>, vector<192x64xbf16>
    %cst_158 = arith.constant dense<0.000000e+00> : vector<192x64xf32>
    %172 = tpu.matmul %171, %170, %cst_158 {dimension_numbers = #tpu.dot_dimension_numbers<[1], [0], [0], [1], [0, 0, 1, 1], [], []>} : vector<192x64xbf16>, vector<64x64xbf16>, vector<192x64xf32> -> vector<192x64xf32>
    %173 = arith.addf %165, %172 : vector<192x64xf32>
    %c224_159 = arith.constant 224 : index
    %c0_160 = arith.constant 0 : index
    %174 = vector.load %arg11[%c224_159, %c0_160] : memref<456x64xbf16, #tpu.memory_space<vmem>>, vector<192x64xbf16>
    %cst_161 = arith.constant dense<0.000000e+00> : vector<192x64xf32>
    %175 = tpu.matmul %174, %170, %cst_161 {dimension_numbers = #tpu.dot_dimension_numbers<[1], [0], [0], [1], [0, 0, 1, 1], [], []>} : vector<192x64xbf16>, vector<64x64xbf16>, vector<192x64xf32> -> vector<192x64xf32>
    %176 = arith.addf %168, %175 : vector<192x64xf32>
    %c5_162 = arith.constant 5 : index
    %c0_163 = arith.constant 0 : index
    %c0_164 = arith.constant 0 : index
    %177 = vector.load %arg7[%c5_162, %c0_163, %c0_164] : memref<9x64x64xbf16, #tpu.memory_space<vmem>>, vector<1x64x64xbf16>
    %178 = vector.shape_cast %177 : vector<1x64x64xbf16> to vector<64x64xbf16>
    %c33_165 = arith.constant 33 : index
    %c0_166 = arith.constant 0 : index
    %179 = vector.load %arg11[%c33_165, %c0_166] : memref<456x64xbf16, #tpu.memory_space<vmem>>, vector<192x64xbf16>
    %cst_167 = arith.constant dense<0.000000e+00> : vector<192x64xf32>
    %180 = tpu.matmul %179, %178, %cst_167 {dimension_numbers = #tpu.dot_dimension_numbers<[1], [0], [0], [1], [0, 0, 1, 1], [], []>} : vector<192x64xbf16>, vector<64x64xbf16>, vector<192x64xf32> -> vector<192x64xf32>
    %181 = arith.addf %173, %180 : vector<192x64xf32>
    %c225_168 = arith.constant 225 : index
    %c0_169 = arith.constant 0 : index
    %182 = vector.load %arg11[%c225_168, %c0_169] : memref<456x64xbf16, #tpu.memory_space<vmem>>, vector<192x64xbf16>
    %cst_170 = arith.constant dense<0.000000e+00> : vector<192x64xf32>
    %183 = tpu.matmul %182, %178, %cst_170 {dimension_numbers = #tpu.dot_dimension_numbers<[1], [0], [0], [1], [0, 0, 1, 1], [], []>} : vector<192x64xbf16>, vector<64x64xbf16>, vector<192x64xf32> -> vector<192x64xf32>
    %184 = arith.addf %176, %183 : vector<192x64xf32>
    %c6_171 = arith.constant 6 : index
    %c0_172 = arith.constant 0 : index
    %c0_173 = arith.constant 0 : index
    %185 = vector.load %arg7[%c6_171, %c0_172, %c0_173] : memref<9x64x64xbf16, #tpu.memory_space<vmem>>, vector<1x64x64xbf16>
    %186 = vector.shape_cast %185 : vector<1x64x64xbf16> to vector<64x64xbf16>
    %c55_174 = arith.constant 55 : index
    %c0_175 = arith.constant 0 : index
    %187 = vector.load %arg11[%c55_174, %c0_175] : memref<456x64xbf16, #tpu.memory_space<vmem>>, vector<192x64xbf16>
    %cst_176 = arith.constant dense<0.000000e+00> : vector<192x64xf32>
    %188 = tpu.matmul %187, %186, %cst_176 {dimension_numbers = #tpu.dot_dimension_numbers<[1], [0], [0], [1], [0, 0, 1, 1], [], []>} : vector<192x64xbf16>, vector<64x64xbf16>, vector<192x64xf32> -> vector<192x64xf32>
    %189 = arith.addf %181, %188 : vector<192x64xf32>
    %c247_177 = arith.constant 247 : index
    %c0_178 = arith.constant 0 : index
    %190 = vector.load %arg11[%c247_177, %c0_178] : memref<456x64xbf16, #tpu.memory_space<vmem>>, vector<192x64xbf16>
    %cst_179 = arith.constant dense<0.000000e+00> : vector<192x64xf32>
    %191 = tpu.matmul %190, %186, %cst_179 {dimension_numbers = #tpu.dot_dimension_numbers<[1], [0], [0], [1], [0, 0, 1, 1], [], []>} : vector<192x64xbf16>, vector<64x64xbf16>, vector<192x64xf32> -> vector<192x64xf32>
    %192 = arith.addf %184, %191 : vector<192x64xf32>
    %c7_180 = arith.constant 7 : index
    %c0_181 = arith.constant 0 : index
    %c0_182 = arith.constant 0 : index
    %193 = vector.load %arg7[%c7_180, %c0_181, %c0_182] : memref<9x64x64xbf16, #tpu.memory_space<vmem>>, vector<1x64x64xbf16>
    %194 = vector.shape_cast %193 : vector<1x64x64xbf16> to vector<64x64xbf16>
    %c56_183 = arith.constant 56 : index
    %c0_184 = arith.constant 0 : index
    %195 = vector.load %arg11[%c56_183, %c0_184] : memref<456x64xbf16, #tpu.memory_space<vmem>>, vector<192x64xbf16>
    %cst_185 = arith.constant dense<0.000000e+00> : vector<192x64xf32>
    %196 = tpu.matmul %195, %194, %cst_185 {dimension_numbers = #tpu.dot_dimension_numbers<[1], [0], [0], [1], [0, 0, 1, 1], [], []>} : vector<192x64xbf16>, vector<64x64xbf16>, vector<192x64xf32> -> vector<192x64xf32>
    %197 = arith.addf %189, %196 : vector<192x64xf32>
    %c248_186 = arith.constant 248 : index
    %c0_187 = arith.constant 0 : index
    %198 = vector.load %arg11[%c248_186, %c0_187] : memref<456x64xbf16, #tpu.memory_space<vmem>>, vector<192x64xbf16>
    %cst_188 = arith.constant dense<0.000000e+00> : vector<192x64xf32>
    %199 = tpu.matmul %198, %194, %cst_188 {dimension_numbers = #tpu.dot_dimension_numbers<[1], [0], [0], [1], [0, 0, 1, 1], [], []>} : vector<192x64xbf16>, vector<64x64xbf16>, vector<192x64xf32> -> vector<192x64xf32>
    %200 = arith.addf %192, %199 : vector<192x64xf32>
    %c8_189 = arith.constant 8 : index
    %c0_190 = arith.constant 0 : index
    %c0_191 = arith.constant 0 : index
    %201 = vector.load %arg7[%c8_189, %c0_190, %c0_191] : memref<9x64x64xbf16, #tpu.memory_space<vmem>>, vector<1x64x64xbf16>
    %202 = vector.shape_cast %201 : vector<1x64x64xbf16> to vector<64x64xbf16>
    %c57_192 = arith.constant 57 : index
    %c0_193 = arith.constant 0 : index
    %203 = vector.load %arg11[%c57_192, %c0_193] : memref<456x64xbf16, #tpu.memory_space<vmem>>, vector<192x64xbf16>
    %cst_194 = arith.constant dense<0.000000e+00> : vector<192x64xf32>
    %204 = tpu.matmul %203, %202, %cst_194 {dimension_numbers = #tpu.dot_dimension_numbers<[1], [0], [0], [1], [0, 0, 1, 1], [], []>} : vector<192x64xbf16>, vector<64x64xbf16>, vector<192x64xf32> -> vector<192x64xf32>
    %205 = arith.addf %197, %204 : vector<192x64xf32>
    %c249_195 = arith.constant 249 : index
    %c0_196 = arith.constant 0 : index
    %206 = vector.load %arg11[%c249_195, %c0_196] : memref<456x64xbf16, #tpu.memory_space<vmem>>, vector<192x64xbf16>
    %cst_197 = arith.constant dense<0.000000e+00> : vector<192x64xf32>
    %207 = tpu.matmul %206, %202, %cst_197 {dimension_numbers = #tpu.dot_dimension_numbers<[1], [0], [0], [1], [0, 0, 1, 1], [], []>} : vector<192x64xbf16>, vector<64x64xbf16>, vector<192x64xf32> -> vector<192x64xf32>
    %208 = arith.addf %200, %207 : vector<192x64xf32>
    %c0_198 = arith.constant 0 : index
    %c0_199 = arith.constant 0 : index
    %c0_200 = arith.constant 0 : index
    %209 = vector.load %arg9[%c0_198, %c0_199, %c0_200] : memref<1x384x64xf32, #tpu.memory_space<vmem>>, vector<1x192x64xf32>
    %210 = vector.shape_cast %209 : vector<1x192x64xf32> to vector<192x64xf32>
    %211 = arith.addf %210, %205 : vector<192x64xf32>
    %c0_201 = arith.constant 0 : index
    %c0_202 = arith.constant 0 : index
    %c0_203 = arith.constant 0 : index
    %212 = vector.load %arg9[%c0_201, %c0_202, %c0_203] : memref<1x384x64xf32, #tpu.memory_space<vmem>>, vector<1x192x64xf32>
    %213 = vector.shape_cast %212 : vector<1x192x64xf32> to vector<192x64xf32>
    %214 = vector.shape_cast %211 : vector<192x64xf32> to vector<1x192x64xf32>
    tpu.vector_store %arg9[%c0_201, %c0_202, %c0_203], %214 {strides = array<i32>} : memref<1x384x64xf32, #tpu.memory_space<vmem>>, vector<1x192x64xf32>,
    %c0_204 = arith.constant 0 : index
    %c192_205 = arith.constant 192 : index
    %c0_206 = arith.constant 0 : index
    %215 = vector.load %arg9[%c0_204, %c192_205, %c0_206] : memref<1x384x64xf32, #tpu.memory_space<vmem>>, vector<1x192x64xf32>
    %216 = vector.shape_cast %215 : vector<1x192x64xf32> to vector<192x64xf32>
    %217 = arith.addf %216, %208 : vector<192x64xf32>
    %c0_207 = arith.constant 0 : index
    %c192_208 = arith.constant 192 : index
    %c0_209 = arith.constant 0 : index
    %218 = vector.load %arg9[%c0_207, %c192_208, %c0_209] : memref<1x384x64xf32, #tpu.memory_space<vmem>>, vector<1x192x64xf32>
    %219 = vector.shape_cast %218 : vector<1x192x64xf32> to vector<192x64xf32>
    %220 = vector.shape_cast %217 : vector<192x64xf32> to vector<1x192x64xf32>
    tpu.vector_store %arg9[%c0_207, %c192_208, %c0_209], %220 {strides = array<i32>} : memref<1x384x64xf32, #tpu.memory_space<vmem>>, vector<1x192x64xf32>,
    return
  }
  func.func @transform_0(%arg0: i32) -> (i32, i32) {
    %c0_i32 = arith.constant 0 : i32
    %c0_i32_0 = arith.constant 0 : i32
    %c0_i32_1 = arith.constant 0 : i32
    return %c0_i32, %c0_i32_0 : i32, i32
  }
  func.func @transform_1(%arg0: i32) -> (i32, i32, i32) {
    %c0_i32 = arith.constant 0 : i32
    %c0_i32_0 = arith.constant 0 : i32
    %c0_i32_1 = arith.constant 0 : i32
    return %arg0, %c0_i32, %c0_i32_0 : i32, i32, i32
  }
  func.func @transform_2(%arg0: i32) -> (i32, i32) {
    %c0_i32 = arith.constant 0 : i32
    %c0_i32_0 = arith.constant 0 : i32
    %c0_i32_1 = arith.constant 0 : i32
    return %c0_i32, %c0_i32_0 : i32, i32
  }
  func.func @transform_3(%arg0: i32) -> (i32, i32) {
    %c0_i32 = arith.constant 0 : i32
    %c0_i32_0 = arith.constant 0 : i32
    %c0_i32_1 = arith.constant 0 : i32
    return %c0_i32, %c0_i32_0 : i32, i32
  }
  func.func @transform_4(%arg0: i32) -> (i32, i32, i32) {
    %c0_i32 = arith.constant 0 : i32
    %c0_i32_0 = arith.constant 0 : i32
    %c0_i32_1 = arith.constant 0 : i32
    %c0_i32_2 = arith.constant 0 : i32
    return %c0_i32, %c0_i32_0, %c0_i32_1 : i32, i32, i32
  }
  func.func @transform_5(%arg0: i32) -> (i32, i32) {
    %c0_i32 = arith.constant 0 : i32
    %c0_i32_0 = arith.constant 0 : i32
    %c0_i32_1 = arith.constant 0 : i32
    return %c0_i32, %c0_i32_0 : i32, i32
  }
  func.func @transform_6(%arg0: i32) -> (i32, i32, i32) {
    %c0_i32 = arith.constant 0 : i32
    %c0_i32_0 = arith.constant 0 : i32
    %c0_i32_1 = arith.constant 0 : i32
    %c0_i32_2 = arith.constant 0 : i32
    return %c0_i32, %c0_i32_0, %c0_i32_1 : i32, i32, i32
  }
  func.func @transform_7(%arg0: i32) -> (i32, i32) {
    %c0_i32 = arith.constant 0 : i32
    %c0_i32_0 = arith.constant 0 : i32
    %c0_i32_1 = arith.constant 0 : i32
    return %c0_i32, %c0_i32_0 : i32, i32
  }
  func.func @transform_8(%arg0: i32) -> (i32, i32, i32) {
    %c0_i32 = arith.constant 0 : i32
    %c0_i32_0 = arith.constant 0 : i32
    %c0_i32_1 = arith.constant 0 : i32
    return %arg0, %c0_i32, %c0_i32_0 : i32, i32, i32
  }
}

</mosaic_0001>

<bundles_post_ra>
// kernel: model_forward.1
= control target key start
LH: loop header
LB: loop body
LE: loop exit
PB: predicated region body
PF: predicated region fallthrough
CT: control target
= control target key end

     0   :  { %s18474_s27 = smov 0   ;;  %s25260_s0 = inlined_call_operand.vmem [shape: f32[384,1], index: 0, kind: input, shape index: {}]   ;;  %s25261_s1 = inlined_call_operand.vmem [shape: bf16[2,384,40], index: 1, kind: input, shape index: {}]   ;;  %s25262_s2 = inlined_call_operand.vmem [shape: bf16[40,64], index: 2, kind: input, shape index: {}]   ;;  %s25263_s3 = inlined_call_operand.vmem [shape: f32[1,64], index: 3, kind: input, shape index: {}]   ;;  %s25264_s4 = inlined_call_operand.vmem [shape: bf16[9,64,64], index: 4, kind: input, shape index: {}]   ;;  %s25265_s5 = inlined_call_operand.vmem [shape: f32[1,64], index: 5, kind: input, shape index: {}]   ;;  %s25266_s6 = inlined_call_operand.vmem [shape: bf16[9,64,64], index: 6, kind: input, shape index: {}]   ;;  %s25267_s7 = inlined_call_operand.vmem [shape: f32[1,64], index: 7, kind: input, shape index: {}]   ;;  %s25268_s8 = inlined_call_operand.vmem [shape: f32[2,384,64], index: 8, kind: output, shape index: {}]  }
   0x1 LB: > { %s14683_s28 = sadd.s32 4294967295, %s18426_s27   ;;  %p14687_p0 = scmp.ge.s32.totalorder %s18426_s27, 1  ;;  %s18426_s27 = sphi %s18474_s27, %s18_s27  }
   0x2   : > { %p262_p1 = scmp.lt.s32.totalorder %s18426_s27, 3 }
   0x4   : > { %p263_p2 = pnand %p14687_p0, %p262_p1 }
   0x6   : > { %266 = sbr.rel (%p263_p2) target bundleno = 1557 (0x615), region = 52 }
   0xb   : > { %vm307_vm0 = vcmask 519168   ;;  %v18485_v0 = vld [vmem:[%s25260_s0 + $0x10] sm:$0xff]  ;;  %v18490_v1 = vld [vmem:[%s25260_s0] sm:$0xff]  ;;  %v18428_v2 = vmov 0   ;;  %vm474_vm1 = vcmask 1043456   ;;  %v18514_v4 = vld [vmem:[%s25260_s0 + $0x18] sm:$0xff] }
   0xc   : > { %17861 = vset.pattern.permute.xlu1 %v18428_v2  ;;  %308 = vst.msk [vmem:[#allocation2] sm:$0xf] %vm307_vm0, %v18428_v2  ;;  %309 = vst.msk [vmem:[#allocation2 + $0x4] sm:$0xf] %vm307_vm0, %v18428_v2  ;;  %17860 = vset.pattern.permute.xlu0 %v18428_v2  ;;  %v17862_v3 = vld [vmem:[%s25262_s2 + $0x10] ss:$0 sps:$4 sm:$0xff]  }
   0xd   : > { %310 = vst.msk [vmem:[#allocation2 + $0x8] sm:$0xf] %vm307_vm0, %v18428_v2  ;;  %311 = vst.msk [vmem:[#allocation2 + $0xc] sm:$0xf] %vm307_vm0, %v18428_v2  ;;  %643 = vperm.xlu1 %17861, %v18485_v0   ;;  %633 = vperm.xlu0 %17860, %v18490_v1   ;;  %v17863_v5 = vld [vmem:[%s25262_s2 + $0x10] ss:$0 sps:$4 sm:$0xff]  }
   0xe   : > { %312 = vst.msk [vmem:[#allocation2 + $0xd0] sm:$0xf] %vm307_vm0, %v18428_v2  ;;  %313 = vst.msk [vmem:[#allocation2 + $0xd4] sm:$0xf] %vm307_vm0, %v18428_v2  ;;  %v18524_v6 = vld [vmem:[%s25260_s0 + $0x8] sm:$0xff]  ;;  %p296_p3 = scmp.lt.s32.totalorder %s14683_s28, 1  ;;  %17847 = vmatprep.subr.msk.bf16.mxu0 %vm474_vm1, %v17862_v3  ;;  %17848 = vmatprep.subr.msk.bf16.mxu1 %vm474_vm1, %v17863_v5 }
   0xf   : > { %314 = vst.msk [vmem:[#allocation2 + $0xd8] sm:$0xf] %vm307_vm0, %v18428_v2  ;;  %315 = vst.msk [vmem:[#allocation2 + $0xdc] sm:$0xf] %vm307_vm0, %v18428_v2  ;;  %v476_v7 = vsel %vm474_vm1, %v17862_v3, 0  ;;  %v17864_v8 = vld [vmem:[%s25262_s2 + $0x8] sm:$0xff]  }
  0x10   : > { %317 = vst.msk [vmem:[#allocation3] sm:$0xf] %vm307_vm0, %v18428_v2  ;;  %318 = vst.msk [vmem:[#allocation3 + $0x4] sm:$0xf] %vm307_vm0, %v18428_v2  ;;  %16636 = vmatpush3.bf16.msra.mxu0 %v476_v7  ;;  %v1061_v9 = vsel %vm474_vm1, %v17863_v5, 0  ;;  %v17865_v10 = vld [vmem:[%s25262_s2 + $0x8] sm:$0xff]  }
  0x11   : > { %319 = vst.msk [vmem:[#allocation3 + $0x8] sm:$0xf] %vm307_vm0, %v18428_v2  ;;  %320 = vst.msk [vmem:[#allocation3 + $0xc] sm:$0xf] %vm307_vm0, %v18428_v2  ;;  %s26076_s28 = smov (!%p296_p3, %s14683_s28), 1  ;;  %16666 = vmatpush3.bf16.msra.mxu1 %v1061_v9  ;;  %16637 = vmatprep.subr.bf16.mxu0 %v17864_v8  ;;  %v17866_v11 = vld [vmem:[%s25262_s2] sm:$0xff]  }
  0x12   : > { %321 = vst.msk [vmem:[#allocation3 + $0xd0] sm:$0xf] %vm307_vm0, %v18428_v2  ;;  %322 = vst.msk [vmem:[#allocation3 + $0xd4] sm:$0xf] %vm307_vm0, %v18428_v2  ;;  %648 = vperm.xlu1 %17861, %v18514_v4   ;;  %638 = vperm.xlu0 %17860, %v18524_v6   ;;  %s17849_s25 = smul.u32 192, %s26076_s28  ;;  %v18547_v12 = vld [vmem:[%s25260_s0 + $0x28] sm:$0xff] }
  0x13   : > { %323 = vst.msk [vmem:[#allocation3 + $0xd8] sm:$0xf] %vm307_vm0, %v18428_v2  ;;  %324 = vst.msk [vmem:[#allocation3 + $0xdc] sm:$0xf] %vm307_vm0, %v18428_v2  ;;  %16667 = vmatprep.subr.bf16.mxu1 %v17865_v10  ;;  %v18552_v13 = vld [vmem:[%s25260_s0 + $0x20] sm:$0xff]  ;;  %vm437_vm2 = vcmask 326656  }
  0x14   : > { %v17867_v14 = vld [vmem:[%s25262_s2] sm:$0xff]   ;;  %16638 = vmatpush3.bf16.msra.mxu0 %v17864_v8  ;;  %s18560_s14 = scalar_lea.vmem %s25261_s1, %s17849_s25  ;;  %v18565_v15 = vld [vmem:[%s25260_s0 + $0x38] sm:$0xff]  ;;  %v18570_v16 = vld [vmem:[%s25260_s0 + $0x30] sm:$0xff]  ;;  %vm1607_vm3 = vsmask.f32 4352  ;;  %vm895_vm4 = vcmask 523264  }
  0x15   : > { %16668 = vmatpush3.bf16.msra.mxu1 %v17865_v10  ;;  %16639 = vmatprep.subr.bf16.mxu0 %v17866_v11  ;;  %v17868_v17 = vld [vmem:[%s18560_s14] sm:$0xff]   ;;  %v17870_v19 = vld [vmem:[%s18560_s14 + $0x8] sm:$0xff]   ;;  %v17872_v23 = vld [vmem:[%s18560_s14 + $0x10] sm:$0xff]   ;;  %s17850_s10 = smul.u32 384, %s26076_s28  ;;  %vm2862_vm5 = vsmask.f32 7424 }
  0x16   : > { %658 = vperm.xlu1 %17861, %v18547_v12   ;;  %653 = vperm.xlu0 %17860, %v18552_v13   ;;  %v17869_v18 = vld [vmem:[%s18560_s14 + $0x60] sm:$0xff]   ;;  %v17871_v20 = vld [vmem:[%s18560_s14 + $0x68] sm:$0xff]   ;;  %v17873_v24 = vld [vmem:[%s18560_s14 + $0x70] sm:$0xff]  }
  0x17   : > { %16669 = vmatprep.subr.bf16.mxu1 %v17867_v14  ;;  %16641 = vmatprep.mubr.msk.bf16.mxu0 %vm437_vm2, %v17868_v17  ;;  %v18583_v21 = vld [vmem:[%s25260_s0 + $0x48] sm:$0xff]  ;;  %v18588_v22 = vld [vmem:[%s25260_s0 + $0x40] sm:$0xff]  ;;  %v18600_v25 = vld [vmem:[%s25260_s0 + $0x58] sm:$0xff]  ;;  %s19007_s16 = scalar_lea.vmem %s25268_s8, %s17850_s10 }
  0x18   : > { %16640 = vmatpush3.bf16.msra.mxu0 %v17866_v11  ;;  %16671 = vmatprep.mubr.msk.bf16.mxu1 %vm437_vm2, %v17869_v18  ;;  %v18608_v26 = vld [vmem:[%s25260_s0 + $0x50] sm:$0xff]  ;;  %v17874_v27 = vld [vmem:[%s18560_s14 + $0x18] sm:$0xff]   ;;  %v17876_v29 = vld [vmem:[%s18560_s14 + $0x20] sm:$0xff]  }
  0x19   : > { %16670 = vmatpush3.bf16.msra.mxu1 %v17867_v14  ;;  %v17875_v28 = vld [vmem:[%s18560_s14 + $0x78] sm:$0xff]   ;;  %v17877_v30 = vld [vmem:[%s18560_s14 + $0x80] sm:$0xff]   ;;  %v18620_v31 = vld [vmem:[%s25260_s0 + $0x68] sm:$0xff] }
  0x1a   : > { %668 = vperm.xlu1 %17861, %v18565_v15   ;;  %663 = vperm.xlu0 %17860, %v18570_v16   ;;  %v18625_v32 = vld [vmem:[%s25260_s0 + $0x60] sm:$0xff]  ;;  %v18632_v33 = vld [vmem:[%s25260_s0 + $0x78] sm:$0xff]  ;;  %v18640_v34 = vld [vmem:[%s25260_s0 + $0x70] sm:$0xff] }
  0x1b   : > { %16642 = vmatmul.mubr.msk.bf16.vlgmr.msra.gmra.mxu0 %vm437_vm2, %v17870_v19  ;;  %v17878_v35 = vld [vmem:[%s18560_s14 + $0x28] sm:$0xff]   ;;  %v17880_v37 = vld [vmem:[%s18560_s14 + $0x30] sm:$0xff]   ;;  %v18657_v40 = vld [vmem:[%s25260_s0 + $0x80] sm:$0xff] }
  0x1c   : > { %16672 = vmatmul.mubr.msk.bf16.vlgmr.msra.gmra.mxu1 %vm437_vm2, %v17871_v20  ;;  %16645 = vmatprep.mubr.msk.bf16.mxu0 %vm437_vm2, %v17872_v23  ;;  %v17879_v36 = vld [vmem:[%s18560_s14 + $0x88] sm:$0xff]   ;;  %v17881_v38 = vld [vmem:[%s18560_s14 + $0x90] sm:$0xff]   ;;  %v18664_v41 = vld [vmem:[%s25260_s0 + $0x98] sm:$0xff] }
  0x1d   : > { %16675 = vmatprep.mubr.msk.bf16.mxu1 %vm437_vm2, %v17873_v24  ;;  %v18651_v39 = vld [vmem:[%s25260_s0 + $0x88] sm:$0xff]  ;;  %v18672_v42 = vld [vmem:[%s25260_s0 + $0x90] sm:$0xff]  ;;  %v17882_v43 = vld [vmem:[%s18560_s14 + $0x38] sm:$0xff]  }
  0x1e   : > { %678 = vperm.xlu1 %17861, %v18583_v21   ;;  %673 = vperm.xlu0 %17860, %v18588_v22   ;;  %v17883_v44 = vld [vmem:[%s18560_s14 + $0x98] sm:$0xff]   ;;  %v17884_v45 = vld [vmem:[%s18560_s14 + $0x40] sm:$0xff]   ;;  %v18684_v47 = vld [vmem:[%s25260_s0 + $0xa8] sm:$0xff] }
  0x1f   : > { %v17885_v46 = vld [vmem:[%s18560_s14 + $0xa0] sm:$0xff]   ;;  %v18699_v49 = vld [vmem:[%s25260_s0 + $0xb8] sm:$0xff]  ;;  %v18704_v50 = vld [vmem:[%s25260_s0 + $0xb0] sm:$0xff] }
  0x20   : > { %v18689_v48 = vld [vmem:[%s25260_s0 + $0xa0] sm:$0xff]  ;;  %v17886_v51 = vld [vmem:[%s18560_s14 + $0x48] sm:$0xff]   ;;  %v17888_v53 = vld [vmem:[%s18560_s14 + $0x50] sm:$0xff]  }
  0x21   : > { %v17887_v52 = vld [vmem:[%s18560_s14 + $0xa8] sm:$0xff]   ;;  %v18717_v55 = vld [vmem:[%s25260_s0 + $0xc0] sm:$0xff]  ;;  %v17889_v56 = vld [vmem:[%s18560_s14 + $0xb0] sm:$0xff]  }
  0x22   : > { %688 = vperm.xlu1 %17861, %v18600_v25   ;;  %683 = vperm.xlu0 %17860, %v18608_v26   ;;  %v18712_v54 = vld [vmem:[%s25260_s0 + $0xc8] sm:$0xff]  ;;  %v18728_v57 = vld [vmem:[%s25260_s0 + $0xd8] sm:$0xff]  ;;  %v18733_v58 = vld [vmem:[%s25260_s0 + $0xd0] sm:$0xff] }
  0x23   : > { %16646 = vmatmul.mubr.msk.bf16.gmra.mxu0 %vm437_vm2, %v17874_v27  ;;  %v17890_v59 = vld [vmem:[%s18560_s14 + $0x58] sm:$0xff]   ;;  %v18743_v61 = vld [vmem:[%s25260_s0 + $0xe8] sm:$0xff]  ;;  %v18748_v62 = vld [vmem:[%s25260_s0 + $0xe0] sm:$0xff] }
  0x24   : > { %16676 = vmatmul.mubr.msk.bf16.gmra.mxu1 %vm437_vm2, %v17875_v28  ;;  %16649 = vmatprep.mubr.msk.bf16.mxu0 %vm437_vm2, %v17876_v29  ;;  %v17891_v60 = vld [vmem:[%s18560_s14 + $0xb8] sm:$0xff]   ;;  %v18762_v2 = vld [vmem:[%s25260_s0 + $0xf0] sm:$0xff]  ;;  %v18772_v5 = vld [vmem:[%s25260_s0 + $0x108] sm:$0xff] }
  0x25   : > { %16679 = vmatprep.mubr.msk.bf16.mxu1 %vm437_vm2, %v17877_v30  ;;  %v18757_v63 = vld [vmem:[%s25260_s0 + $0xf8] sm:$0xff]  ;;  %v18777_v7 = vld [vmem:[%s25260_s0 + $0x100] sm:$0xff]  ;;  %v18789_v9 = vld [vmem:[%s25260_s0 + $0x110] sm:$0xff] }
  0x26   : > { %698 = vperm.xlu1 %17861, %v18620_v31   ;;  %693 = vperm.xlu0 %17860, %v18625_v32   ;;  %v17892_v3 = vld [vmem:[%s25264_s4 + $0x18] sm:$0xff]   ;;  %v18796_v10 = vld [vmem:[%s25260_s0 + $0x128] sm:$0xff]  ;;  %v18801_v11 = vld [vmem:[%s25260_s0 + $0x120] sm:$0xff] }
  0x27   : > { %16695 = vmatprep.subr.bf16.mxu0 %v17892_v3  ;;  %16727 = vmatprep.subr.bf16.mxu1 %v17892_v3  ;;  %v18784_v8 = vld [vmem:[%s25260_s0 + $0x118] sm:$0xff]  ;;  %v17893_v14 = vld [vmem:[%s25264_s4 + $0x10] sm:$0xff]   ;;  %v18823_v19 = vld [vmem:[%s25260_s0 + $0x148] sm:$0xff] }
  0x28   : > { %16696 = vmatpush3.bf16.msra.mxu0 %v17892_v3  ;;  %16728 = vmatpush3.bf16.msra.mxu1 %v17892_v3  ;;  %v18811_v17 = vld [vmem:[%s25260_s0 + $0x138] sm:$0xff]  ;;  %v18816_v18 = vld [vmem:[%s25260_s0 + $0x130] sm:$0xff]  ;;  %v18830_v20 = vld [vmem:[%s25260_s0 + $0x140] sm:$0xff] }
  0x29   : > { %16697 = vmatprep.subr.bf16.mxu0 %v17893_v14  ;;  %16729 = vmatprep.subr.bf16.mxu1 %v17893_v14  ;;  %v18835_v23 = vld [vmem:[%s25260_s0 + $0x158] sm:$0xff]  ;;  %v18842_v24 = vld [vmem:[%s25260_s0 + $0x150] sm:$0xff]  ;;  %v18847_v27 = vld [vmem:[%s25260_s0 + $0x168] sm:$0xff] }
  0x2a   : > { %708 = vperm.xlu1 %17861, %v18632_v33   ;;  %703 = vperm.xlu0 %17860, %v18640_v34   ;;  %v18852_v28 = vld [vmem:[%s25260_s0 + $0x160] sm:$0xff]  ;;  %v18859_v29 = vld [vmem:[%s25260_s0 + $0x178] sm:$0xff]  ;;  %v18864_v30 = vld [vmem:[%s25260_s0 + $0x170] sm:$0xff] }
  0x2b   : > { %16650 = vmatmul.mubr.msk.bf16.gmra.mxu0 %vm437_vm2, %v17878_v35  ;;  %v17894_v35 = vld [vmem:[%s25264_s4 + $0x8] sm:$0xff]  }
  0x2c   : > { %16680 = vmatmul.mubr.msk.bf16.gmra.mxu1 %vm437_vm2, %v17879_v36  ;;  %16653 = vmatprep.mubr.msk.bf16.mxu0 %vm437_vm2, %v17880_v37  ;;  %v1522_v36 = vld [vmem:[#allocation2 + $0xc] sm:$0xf]  ;;  %v1519_v37 = vld [vmem:[#allocation2] sm:$0x8] }
  0x2d   : > { %16683 = vmatprep.mubr.msk.bf16.mxu1 %vm437_vm2, %v17881_v38  ;;  %16698 = vmatpush3.bf16.msra.mxu0 %v17893_v14  ;;  %v18875_v38 = vld [vmem:[#allocation2 + $0x4] sm:$0xf] }
  0x2e   : > { %718 = vperm.xlu1 %17861, %v18651_v39   ;;  %713 = vperm.xlu0 %17860, %v18657_v40  }
  0x2f   : > { %16730 = vmatpush3.bf16.msra.mxu1 %v17893_v14  ;;  %16699 = vmatprep.subr.bf16.mxu0 %v17894_v35  ;;  %v19002_v14 = vld [vmem:[%s25263_s3] ss:$0 sm:$0xff] }
  0x30   : > { %16731 = vmatprep.subr.bf16.mxu1 %v17894_v35 }
  0x31   : > { %16700 = vmatpush3.bf16.msra.mxu0 %v17894_v35 }
  0x32   : > { %728 = vperm.xlu1 %17861, %v18664_v41   ;;  %723 = vperm.xlu0 %17860, %v18672_v42  }
  0x33   : > { %16654 = vmatmul.mubr.msk.bf16.gmra.mxu0 %vm437_vm2, %v17882_v43  ;;  %16732 = vmatpush3.bf16.msra.mxu1 %v17894_v35  ;;  %v18877_v43 = vld [vmem:[#allocation2 + $0x8] sm:$0xf] }
  0x34   : > { %16684 = vmatmul.mubr.msk.bf16.gmra.mxu1 %vm437_vm2, %v17883_v44  ;;  %16657 = vmatprep.mubr.msk.bf16.mxu0 %vm437_vm2, %v17884_v45  ;;  %v14794_v44 = vcombine.low %v1519_v37, %v18875_v38  ;;  %v14795_v45 = vcombine.low %v18877_v43, %v1522_v36 }
  0x35   : > { %16687 = vmatprep.mubr.msk.bf16.mxu1 %vm437_vm2, %v17885_v46 }
  0x36   : > { %738 = vperm.xlu1 %17861, %v18684_v47   ;;  %733 = vperm.xlu0 %17860, %v18689_v48   ;;  %v1609_v46 = vshrl.u32 %v14794_v44, 16 }
  0x3a   : > { %748 = vperm.xlu1 %17861, %v18699_v49   ;;  %743 = vperm.xlu0 %17860, %v18704_v50  }
  0x3b   : > { %16658 = vmatmul.mubr.msk.bf16.gmra.mxu0 %vm437_vm2, %v17886_v51  ;;  %v1612_v51 = vshll.u32 %v14794_v44, 16 }
  0x3c   : > { %16688 = vmatmul.mubr.msk.bf16.gmra.mxu1 %vm437_vm2, %v17887_v52  ;;  %16661 = vmatprep.mubr.msk.bf16.mxu0 %vm437_vm2, %v17888_v53  ;;  %v1617_v52 = vshrl.u32 %v14795_v45, 16  ;;  %v1611_v53 = vrot.slane %v1609_v46, 3 }
  0x3d   : > { %16691 = vmatprep.mubr.msk.bf16.mxu1 %vm437_vm2, %v17889_v56  ;;  %v1614_v56 = vrot.slane %v1612_v51, 4 }
  0x3e   : > { %1223 = vperm.xlu1 %17861, %v18712_v54   ;;  %1218 = vperm.xlu0 %17860, %v18717_v55  }
  0x42   : > { %1233 = vperm.xlu1 %17861, %v18728_v57   ;;  %1228 = vperm.xlu0 %17860, %v18733_v58  }
  0x43   : > { %16662 = vmatmul.mubr.msk.bf16.gmra.mxu0 %vm437_vm2, %v17890_v59  ;;  %v1619_v59 = vrot.slane %v1617_v52, 3 }
  0x44   : > { %16692 = vmatmul.mubr.msk.bf16.gmra.mxu1 %vm437_vm2, %v17891_v60 }
  0x46   : > { %1243 = vperm.xlu1 %17861, %v18743_v61   ;;  %1238 = vperm.xlu0 %17860, %v18748_v62  }
  0x4a   : > { %1253 = vperm.xlu1 %17861, %v18757_v63   ;;  %1248 = vperm.xlu0 %17860, %v18762_v2  }
  0x4e   : > { %1263 = vperm.xlu1 %17861, %v18772_v5   ;;  %1258 = vperm.xlu0 %17860, %v18777_v7  }
  0x52   : > { %1273 = vperm.xlu1 %17861, %v18784_v8   ;;  %1268 = vperm.xlu0 %17860, %v18789_v9  }
  0x56   : > { %1283 = vperm.xlu1 %17861, %v18796_v10   ;;  %1278 = vperm.xlu0 %17860, %v18801_v11  }
  0x5a   : > { %1293 = vperm.xlu1 %17861, %v18811_v17   ;;  %1288 = vperm.xlu0 %17860, %v18816_v18  }
  0x5e   : > { %1303 = vperm.xlu1 %17861, %v18823_v19   ;;  %1298 = vperm.xlu0 %17860, %v18830_v20  }
  0x62   : > { %1313 = vperm.xlu1 %17861, %v18835_v23   ;;  %1308 = vperm.xlu0 %17860, %v18842_v24  }
  0x66   : > { %1323 = vperm.xlu1 %17861, %v18847_v27   ;;  %1318 = vperm.xlu0 %17860, %v18852_v28  }
  0x6a   : > { %1333 = vperm.xlu1 %17861, %v18859_v29   ;;  %1328 = vperm.xlu0 %17860, %v18864_v30  }
  0x6e   : > { %7766 = vperm.xlu1 %17861, %v18684_v47   ;;  %7761 = vperm.xlu0 %17860, %v18689_v48   ;;  %v1620_v47 = vshll.u32 %v14795_v45, 16  ;;  %v17895_v48 = vld [vmem:[%s25264_s4] sm:$0xff]  }
  0x6f   : > { %16701 = vmatprep.subr.bf16.mxu0 %v17895_v48  ;;  %16733 = vmatprep.subr.bf16.mxu1 %v17895_v48 }
  0x70   : > { %v1622_v60 = vrot.slane %v1620_v47, 4  ;;  %16702 = vmatpush3.bf16.msra.mxu0 %v17895_v48  ;;  %16734 = vmatpush3.bf16.msra.mxu1 %v17895_v48 }
  0x72   : > { %7776 = vperm.xlu1 %17861, %v18699_v49   ;;  %7771 = vperm.xlu0 %17860, %v18704_v50   ;;  %v1615_v49 = vor.u32 %v1614_v56, %v1611_v53  ;;  %v18888_v3 = vor.u32 %v1622_v60, %v1619_v59 }
  0x74   : > { %v1624_v50 = vsel %vm1607_vm3, %v1615_v49, %v18888_v3 }
  0x75   : > { %16703 = vmatprep.mubr.msk.bf16.mxu0 %vm895_vm4, %v1624_v50 }
  0x76   : > { %7666 = vperm.xlu1 %17861, %v18524_v6   ;;  %7661 = vperm.xlu0 %17860, %v18490_v1   ;;  %v18900_v1 = vld [vmem:[%s25264_s4 + $0x38] sm:$0xff]  }
  0x77   : > { %16759 = vmatprep.subr.bf16.mxu0 %v18900_v1  ;;  %16791 = vmatprep.subr.bf16.mxu1 %v18900_v1 }
  0x7a   : > { %8026 = vperm.xlu1 %17861, %v18712_v54   ;;  %8021 = vperm.xlu0 %17860, %v18717_v55  }
  0x7e   : > { %7676 = vperm.xlu1 %17861, %v18514_v4   ;;  %7671 = vperm.xlu0 %17860, %v18485_v0  }
  0x82   : > { %8036 = vperm.xlu1 %17861, %v18728_v57   ;;  %8031 = vperm.xlu0 %17860, %v18733_v58  }
  0x86   : > { %7686 = vperm.xlu1 %17861, %v18547_v12   ;;  %7681 = vperm.xlu0 %17860, %v18552_v13  }
  0x88   : > { %v18908_v4 = vpop.permute.xlu1 %643  ;;  %v18910_v0 = vpop.permute.xlu0 %633 }
  0x8a   : > { %8046 = vperm.xlu1 %17861, %v18743_v61   ;;  %8041 = vperm.xlu0 %17860, %v18748_v62  }
  0x8d   : > { %v18914_v6 = vpop.permute.xlu1 %648  ;;  %v18916_v54 = vpop.permute.xlu0 %638 }
  0x8e   : > { %7696 = vperm.xlu1 %17861, %v18565_v15   ;;  %7691 = vperm.xlu0 %17860, %v18570_v16  }
  0x91   : > { %v18920_v55 = vpop.permute.xlu1 %658  ;;  %v18922_v12 = vpop.permute.xlu0 %653 }
  0x92   : > { %8056 = vperm.xlu1 %17861, %v18757_v63   ;;  %8051 = vperm.xlu0 %17860, %v18762_v2  }
  0x95   : > { %v18926_v13 = vpop.permute.xlu1 %668  ;;  %v18928_v57 = vpop.permute.xlu0 %663 }
  0x96   : > { %7706 = vperm.xlu1 %17861, %v18583_v21   ;;  %7701 = vperm.xlu0 %17860, %v18588_v22  }
  0x99   : > { %v18932_v58 = vpop.permute.xlu1 %678  ;;  %v18934_v15 = vpop.permute.xlu0 %673 }
  0x9a   : > { %8066 = vperm.xlu1 %17861, %v18772_v5   ;;  %8061 = vperm.xlu0 %17860, %v18777_v7  }
  0x9d   : > { %v18938_v16 = vpop.permute.xlu1 %688  ;;  %v18940_v61 = vpop.permute.xlu0 %683 }
  0x9e   : > { %7716 = vperm.xlu1 %17861, %v18600_v25   ;;  %7711 = vperm.xlu0 %17860, %v18608_v26  }
  0xa1   : > { %v18944_v62 = vpop.permute.xlu0 %693  ;;  %v18948_v21 = vpop.permute.xlu1 %698 }
  0xa2   : > { %8076 = vperm.xlu1 %17861, %v18784_v8   ;;  %8071 = vperm.xlu0 %17860, %v18789_v9  }
  0xa5   : > { %v18952_v22 = vpop.permute.xlu0 %703  ;;  %v18954_v63 = vpop.permute.xlu1 %708 }
  0xa6   : > { %7726 = vperm.xlu1 %17861, %v18620_v31   ;;  %7721 = vperm.xlu0 %17860, %v18625_v32  }
  0xa9   : > { %v18960_v26 = vpop.permute.xlu0 %713  ;;  %v18964_v31 = vpop.permute.xlu1 %718 }
  0xaa   : > { %8086 = vperm.xlu1 %17861, %v18796_v10   ;;  %8081 = vperm.xlu0 %17860, %v18801_v11  }
  0xad   : > { %v18968_v32 = vpop.permute.xlu0 %723  ;;  %v18970_v2 = vpop.permute.xlu1 %728 }
  0xae   : > { %7736 = vperm.xlu1 %17861, %v18632_v33   ;;  %7731 = vperm.xlu0 %17860, %v18640_v34  }
  0xb1   : > { %v18974_v5 = vpop.permute.xlu0 %733  ;;  %v18978_v33 = vpop.permute.xlu1 %738 }
  0xb2   : > { %8096 = vperm.xlu1 %17861, %v18811_v17   ;;  %8091 = vperm.xlu0 %17860, %v18816_v18  }
  0xb5   : > { %v18982_v34 = vpop.permute.xlu0 %743  ;;  %v18984_v7 = vpop.permute.xlu1 %748 }
  0xb6   : > { %7746 = vperm.xlu1 %17861, %v18651_v39   ;;  %7741 = vperm.xlu0 %17860, %v18657_v40  }
  0xb9   : > { %v1219_v39 = vpop.permute.xlu0 %1218  ;;  %v1224_v40 = vpop.permute.xlu1 %1223 }
  0xba   : > { %8106 = vperm.xlu1 %17861, %v18823_v19   ;;  %8101 = vperm.xlu0 %17860, %v18830_v20  }
  0xbe   : > { %7756 = vperm.xlu1 %17861, %v18664_v41   ;;  %7751 = vperm.xlu0 %17860, %v18672_v42   ;;  %v1229_v41 = vpop.permute.xlu0 %1228  ;;  %v1234_v42 = vpop.permute.xlu1 %1233 }
  0xc2   : > { %8116 = vperm.xlu1 %17861, %v18835_v23   ;;  %8111 = vperm.xlu0 %17860, %v18842_v24   ;;  %v18992_v8 = vpop.permute.xlu0 %1238  ;;  %v18994_v9 = vpop.permute.xlu1 %1243 }
  0xc6   : > { %8126 = vperm.xlu1 %17861, %v18847_v27   ;;  %8121 = vperm.xlu0 %17860, %v18852_v28   ;;  %v1249_v10 = vpop.permute.xlu0 %1248  ;;  %v18997_v11 = vpop.permute.xlu1 %1253 }
  0xca   : > { %8136 = vperm.xlu1 %17861, %v18859_v29   ;;  %8131 = vperm.xlu0 %17860, %v18864_v30   ;;  %v19010_v20 = vpop.permute.xlu0 %1258  ;;  %v19016_v29 = vpop.permute.xlu1 %1263 }
  0xce   : > { %v19030_v59 = vpop.permute.xlu0 %1268 }
  0xdb   : > { %v16643_v17 = vpop.f32.mrf.mxu0 }
  0xdc   : > { %v521_v18 = vadd.f32 %v16643_v17, %v19002_v14  ;;  %v16673_v19 = vpop.f32.mrf.mxu1 }
  0xdd   : > { %v1106_v23 = vadd.f32 %v16673_v19, %v19002_v14  ;;  %v512_v27 = vpop.f32.mrf.mxu0 }
  0xde   : > { %v753_v24 = vmul.f32 %v18908_v4, %v521_v18  ;;  %898 = vst.msk [vmem:[%s19007_s16 + $0x10] sm:$0xff] %vm895_vm4, %v521_v18  ;;  %v1097_v28 = vpop.f32.mrf.mxu1  ;;  %v513_v35 = vadd.f32 %v19002_v14, %v512_v27  ;;  %v19040_v18 = vpop.permute.xlu1 %1273 }
  0xdf   : > { %v1338_v30 = vmul.f32 %v1229_v41, %v1106_v23  ;;  %1482 = vst.msk [vmem:[%s19007_s16 + $0xd0] sm:$0xff] %vm895_vm4, %v1106_v23  ;;  %v1098_v36 = vadd.f32 %v19002_v14, %v1097_v28  ;;  %v16644_v44 = vpop.f32.mrf.mxu0 }
  0xe0   : > { %v15935_v37 = vpack.c.bf16 %v753_v24, %v753_v24  ;;  %v16674_v45 = vpop.f32.mrf.mxu1  ;;  %v751_v51 = vmul.f32 %v18910_v0, %v513_v35  ;;  %896 = vst.msk [vmem:[%s19007_s16] sm:$0xff] %vm895_vm4, %v513_v35  ;;  %v524_v47 = vadd.f32 %v16644_v44, %v19002_v14 }
  0xe1   : > { %v15959_v46 = vpack.c.bf16 %v1338_v30, %v1338_v30  ;;  %v1336_v52 = vmul.f32 %v1219_v39, %v1098_v36  ;;  %1480 = vst.msk [vmem:[%s19007_s16 + $0xc0] sm:$0xff] %vm895_vm4, %v1098_v36  ;;  %v1109_v48 = vadd.f32 %v16674_v45, %v19002_v14  ;;  %v515_v53 = vpop.f32.mrf.mxu0 }
  0xe2   : > { %873 = vst.msk [vmem:[#allocation2 + $0x18] sm:$0xf] %vm307_vm0, %v15935_v37  ;;  %v1100_v56 = vpop.f32.mrf.mxu1  ;;  %v15933_v60 = vpack.c.bf16 %v751_v51, %v751_v51  ;;  %v754_v50 = vmul.f32 %v18914_v6, %v524_v47  ;;  %v516_v4 = vadd.f32 %v19002_v14, %v515_v53  ;;  %v19060_v51 = vpop.permute.xlu0 %1278 }
  0xe3   : > { %1458 = vst.msk [vmem:[#allocation2 + $0x78] sm:$0xf] %vm307_vm0, %v15959_v46  ;;  %v15957_v49 = vpack.c.bf16 %v1336_v52, %v1336_v52  ;;  %v1339_v0 = vmul.f32 %v1234_v42, %v1109_v48  ;;  %v1101_v39 = vadd.f32 %v19002_v14, %v1100_v56  ;;  %v16647_v41 = vpop.f32.mrf.mxu0 }
  0xe4   : > { %899 = vst.msk [vmem:[%s19007_s16 + $0x18] sm:$0xff] %vm895_vm4, %v524_v47  ;;  %1483 = vst.msk [vmem:[%s19007_s16 + $0xd8] sm:$0xff] %vm895_vm4, %v1109_v48  ;;  %v16677_v17 = vpop.f32.mrf.mxu1  ;;  %v15936_v6 = vpack.c.bf16 %v754_v50, %v754_v50  ;;  %v752_v19 = vmul.f32 %v18916_v54, %v516_v4  ;;  %v537_v42 = vadd.f32 %v16647_v41, %v19002_v14 }
  0xe5   : > { %871 = vst.msk [vmem:[#allocation2 + $0x10] sm:$0xf] %vm307_vm0, %v15933_v60  ;;  %1456 = vst.msk [vmem:[#allocation2 + $0x70] sm:$0xf] %vm307_vm0, %v15957_v49  ;;  %v1122_v23 = vadd.f32 %v16677_v17, %v19002_v14  ;;  %v15960_v24 = vpack.c.bf16 %v1339_v0, %v1339_v0  ;;  %v1337_v27 = vmul.f32 %v1224_v40, %v1101_v39  ;;  %v528_v28 = vpop.f32.mrf.mxu0  ;;  %v19072_v49 = vpop.permute.xlu1 %1283 }
  0xe6   : > { %897 = vst.msk [vmem:[%s19007_s16 + $0x8] sm:$0xff] %vm895_vm4, %v516_v4  ;;  %1481 = vst.msk [vmem:[%s19007_s16 + $0xc8] sm:$0xff] %vm895_vm4, %v1101_v39  ;;  %v1113_v30 = vpop.f32.mrf.mxu1  ;;  %v15934_v35 = vpack.c.bf16 %v752_v19, %v752_v19  ;;  %v757_v36 = vmul.f32 %v18928_v57, %v537_v42  ;;  %v529_v37 = vadd.f32 %v19002_v14, %v528_v28 }
  0xe7   : > { %874 = vst.msk [vmem:[#allocation2 + $0x1c] sm:$0xf] %vm307_vm0, %v15936_v6  ;;  %v1342_v54 = vmul.f32 %v1249_v10, %v1122_v23  ;;  %1459 = vst.msk [vmem:[#allocation2 + $0x7c] sm:$0xf] %vm307_vm0, %v15960_v24  ;;  %v15958_v40 = vpack.c.bf16 %v1337_v27, %v1337_v27  ;;  %v1114_v44 = vadd.f32 %v19002_v14, %v1113_v30  ;;  %v16648_v45 = vpop.f32.mrf.mxu0 }
  0xe8   : > { %902 = vst.msk [vmem:[%s19007_s16 + $0x30] sm:$0xff] %vm895_vm4, %v537_v42  ;;  %1486 = vst.msk [vmem:[%s19007_s16 + $0xf0] sm:$0xff] %vm895_vm4, %v1122_v23  ;;  %v16678_v46 = vpop.f32.mrf.mxu1  ;;  %v15939_v57 = vpack.c.bf16 %v757_v36, %v757_v36  ;;  %v755_v10 = vmul.f32 %v18922_v12, %v529_v37  ;;  %v540_v47 = vadd.f32 %v16648_v45, %v19002_v14 }
  0xe9   : > { %872 = vst.msk [vmem:[#allocation2 + $0x14] sm:$0xf] %vm307_vm0, %v15934_v35  ;;  %v15963_v52 = vpack.c.bf16 %v1342_v54, %v1342_v54  ;;  %1457 = vst.msk [vmem:[#allocation2 + $0x74] sm:$0xf] %vm307_vm0, %v15958_v40  ;;  %v1340_v48 = vmul.f32 %v18992_v8, %v1114_v44  ;;  %v1125_v53 = vadd.f32 %v16678_v46, %v19002_v14  ;;  %v531_v56 = vpop.f32.mrf.mxu0  ;;  %v19103_v54 = vld [vmem:[#allocation2 + $0x18] sm:$0xf] }
  0xea   : > { %900 = vst.msk [vmem:[%s19007_s16 + $0x20] sm:$0xff] %vm895_vm4, %v529_v37  ;;  %1484 = vst.msk [vmem:[%s19007_s16 + $0xe0] sm:$0xff] %vm895_vm4, %v1114_v44  ;;  %v1116_v60 = vpop.f32.mrf.mxu1  ;;  %v15937_v12 = vpack.c.bf16 %v755_v10, %v755_v10  ;;  %v758_v50 = vmul.f32 %v18926_v13, %v540_v47  ;;  %v532_v8 = vadd.f32 %v19002_v14, %v531_v56 }
  0xeb   : > { %877 = vst.msk [vmem:[#allocation2 + $0x28] sm:$0xf] %vm307_vm0, %v15939_v57  ;;  %1462 = vst.msk [vmem:[#allocation2 + $0x88] sm:$0xf] %vm307_vm0, %v15963_v52  ;;  %v1117_v4 = vadd.f32 %v19002_v14, %v1116_v60  ;;  %v15961_v0 = vpack.c.bf16 %v1340_v48, %v1340_v48  ;;  %v1343_v39 = vmul.f32 %v18997_v11, %v1125_v53  ;;  %v16651_v41 = vpop.f32.mrf.mxu0  ;;  %v19116_v57 = vpop.permute.xlu1 %1293 }
  0xec   : > { %903 = vst.msk [vmem:[%s19007_s16 + $0x38] sm:$0xff] %vm895_vm4, %v540_v47  ;;  %1487 = vst.msk [vmem:[%s19007_s16 + $0xf8] sm:$0xff] %vm895_vm4, %v1125_v53  ;;  %v16681_v17 = vpop.f32.mrf.mxu1  ;;  %v15940_v6 = vpack.c.bf16 %v758_v50, %v758_v50  ;;  %v756_v19 = vmul.f32 %v18920_v55, %v532_v8  ;;  %v553_v42 = vadd.f32 %v16651_v41, %v19002_v14  ;;  %v19096_v55 = vpop.permute.xlu0 %1288  ;;  %v19125_v48 = vld [vmem:[#allocation2 + $0x10] sm:$0xf] }
  0xed   : > { %875 = vst.msk [vmem:[#allocation2 + $0x20] sm:$0xf] %vm307_vm0, %v15937_v12  ;;  %v1341_v13 = vmul.f32 %v18994_v9, %v1117_v4  ;;  %1460 = vst.msk [vmem:[#allocation2 + $0x80] sm:$0xf] %vm307_vm0, %v15961_v0  ;;  %v15964_v11 = vpack.c.bf16 %v1343_v39, %v1343_v39  ;;  %v1138_v23 = vadd.f32 %v16681_v17, %v19002_v14  ;;  %v544_v24 = vpop.f32.mrf.mxu0 }
  0xee   : > { %901 = vst.msk [vmem:[%s19007_s16 + $0x28] sm:$0xff] %vm895_vm4, %v532_v8  ;;  %1485 = vst.msk [vmem:[%s19007_s16 + $0xe8] sm:$0xff] %vm895_vm4, %v1117_v4  ;;  %v1129_v27 = vpop.f32.mrf.mxu1  ;;  %v19094_v28 = vld [vmem:[#allocation2 + $0x1c] sm:$0xf]  ;;  %v15938_v30 = vpack.c.bf16 %v756_v19, %v756_v19  ;;  %v761_v35 = vmul.f32 %v18940_v61, %v553_v42  ;;  %v545_v36 = vadd.f32 %v19002_v14, %v544_v24 }
  0xef   : > { %878 = vst.msk [vmem:[#allocation2 + $0x2c] sm:$0xf] %vm307_vm0, %v15940_v6  ;;  %v15962_v9 = vpack.c.bf16 %v1341_v13, %v1341_v13  ;;  %1463 = vst.msk [vmem:[#allocation2 + $0x8c] sm:$0xf] %vm307_vm0, %v15964_v11  ;;  %v1346_v37 = vmul.f32 %v19030_v59, %v1138_v23  ;;  %v1130_v40 = vadd.f32 %v19002_v14, %v1129_v27  ;;  %v16652_v44 = vpop.f32.mrf.mxu0 }
  0xf0   : > { %906 = vst.msk [vmem:[%s19007_s16 + $0x50] sm:$0xff] %vm895_vm4, %v553_v42  ;;  %1490 = vst.msk [vmem:[%s19007_s16 + $0x110] sm:$0xff] %vm895_vm4, %v1138_v23  ;;  %v16682_v45 = vpop.f32.mrf.mxu1  ;;  %v19110_v46 = vld [vmem:[#allocation2 + $0x14] sm:$0xf]  ;;  %v19114_v61 = vcombine.low %v19103_v54, %v19094_v28  ;;  %v15943_v59 = vpack.c.bf16 %v761_v35, %v761_v35  ;;  %v759_v52 = vmul.f32 %v18934_v15, %v545_v36 }
  0xf1   : > { %876 = vst.msk [vmem:[#allocation2 + $0x24] sm:$0xf] %vm307_vm0, %v15938_v30  ;;  %1461 = vst.msk [vmem:[#allocation2 + $0x84] sm:$0xf] %vm307_vm0, %v15962_v9  ;;  %v556_v10 = vadd.f32 %v16652_v44, %v19002_v14  ;;  %v1141_v47 = vadd.f32 %v16682_v45, %v19002_v14  ;;  %v15967_v53 = vpack.c.bf16 %v1346_v37, %v1346_v37  ;;  %v547_v60 = vpop.f32.mrf.mxu0  ;;  %v19155_v37 = vpop.permute.xlu1 %1303 }
  0xf2   : > { %904 = vst.msk [vmem:[%s19007_s16 + $0x40] sm:$0xff] %vm895_vm4, %v545_v36  ;;  %v1344_v56 = vmul.f32 %v19010_v20, %v1130_v40  ;;  %1488 = vst.msk [vmem:[%s19007_s16 + $0x100] sm:$0xff] %vm895_vm4, %v1130_v40  ;;  %v1132_v12 = vpop.f32.mrf.mxu1  ;;  %v14796_v50 = vcombine.low %v19125_v48, %v19110_v46  ;;  %v1635_v15 = vshrl.u32 %v19114_v61, 16  ;;  %v15941_v8 = vpack.c.bf16 %v759_v52, %v759_v52 }
  0xf3   : > { %881 = vst.msk [vmem:[#allocation2 + $0x38] sm:$0xf] %vm307_vm0, %v15943_v59  ;;  %v762_v4 = vmul.f32 %v18938_v16, %v556_v10  ;;  %v1347_v0 = vmul.f32 %v19040_v18, %v1141_v47  ;;  %v548_v20 = vadd.f32 %v19002_v14, %v547_v60  ;;  %1466 = vst.msk [vmem:[#allocation2 + $0x98] sm:$0xf] %vm307_vm0, %v15967_v53  ;;  %v16655_v17 = vpop.f32.mrf.mxu0  ;;  %v19143_v16 = vpop.permute.xlu0 %1298 }
  0xf4   : > { %907 = vst.msk [vmem:[%s19007_s16 + $0x58] sm:$0xff] %vm895_vm4, %v556_v10  ;;  %1491 = vst.msk [vmem:[%s19007_s16 + $0x118] sm:$0xff] %vm895_vm4, %v1141_v47  ;;  %v15965_v39 = vpack.c.bf16 %v1344_v56, %v1344_v56  ;;  %v1133_v41 = vadd.f32 %v19002_v14, %v1132_v12  ;;  %v16685_v6 = vpop.f32.mrf.mxu1  ;;  %v1626_v19 = vshrl.u32 %v14796_v50, 16  ;;  %v1629_v13 = vshll.u32 %v14796_v50, 16 }
  0xf5   : > { %879 = vst.msk [vmem:[#allocation2 + $0x30] sm:$0xf] %vm307_vm0, %v15941_v8  ;;  %v15944_v42 = vpack.c.bf16 %v762_v4, %v762_v4  ;;  %v15968_v18 = vpack.c.bf16 %v1347_v0, %v1347_v0  ;;  %v760_v11 = vmul.f32 %v18932_v58, %v548_v20  ;;  %v569_v23 = vadd.f32 %v16655_v17, %v19002_v14  ;;  %v560_v30 = vpop.f32.mrf.mxu0 }
  0xf6   : > { %905 = vst.msk [vmem:[%s19007_s16 + $0x48] sm:$0xff] %vm895_vm4, %v548_v20  ;;  %v1345_v24 = vmul.f32 %v19016_v29, %v1133_v41  ;;  %1489 = vst.msk [vmem:[%s19007_s16 + $0x108] sm:$0xff] %vm895_vm4, %v1133_v41  ;;  %v1154_v27 = vadd.f32 %v16685_v6, %v19002_v14  ;;  %v1145_v9 = vpop.f32.mrf.mxu1  ;;  %v1628_v35 = vrot.slane %v1626_v19, 3  ;;  %v1631_v36 = vrot.slane %v1629_v13, 4  ;;  %v19196_v19 = vld [vmem:[#allocation2 + $0x20] sm:$0xf] }
  0xf7   : > { %1464 = vst.msk [vmem:[#allocation2 + $0x90] sm:$0xf] %vm307_vm0, %v15965_v39  ;;  %882 = vst.msk [vmem:[#allocation2 + $0x3c] sm:$0xf] %vm307_vm0, %v15944_v42  ;;  %v15942_v58 = vpack.c.bf16 %v760_v11, %v760_v11  ;;  %v765_v40 = vmul.f32 %v18952_v22, %v569_v23  ;;  %v561_v29 = vadd.f32 %v19002_v14, %v560_v30  ;;  %v16656_v52 = vpop.f32.mrf.mxu0  ;;  %v1637_v53 = vrot.slane %v1635_v15, 3  ;;  %v19172_v22 = vld [vmem:[%s25264_s4 + $0x30] sm:$0xff]   ;;  %v1309_v20 = vpop.permute.xlu0 %1308 }
  0xf8   : > { %1467 = vst.msk [vmem:[#allocation2 + $0x9c] sm:$0xf] %vm307_vm0, %v15968_v18  ;;  %v1146_v44 = vadd.f32 %v19002_v14, %v1145_v9  ;;  %v15966_v45 = vpack.c.bf16 %v1345_v24, %v1345_v24  ;;  %v1350_v59 = vmul.f32 %v19096_v55, %v1154_v27  ;;  %v16686_v10 = vpop.f32.mrf.mxu1  ;;  %v19167_v47 = vor.u32 %v1631_v36, %v1628_v35  ;;  %v19182_v50 = vld [vmem:[#allocation2 + $0x24] sm:$0xf]  ;;  %v1314_v11 = vpop.permute.xlu1 %1313 }
  0xf9   : > { %910 = vst.msk [vmem:[%s19007_s16 + $0x70] sm:$0xff] %vm895_vm4, %v569_v23  ;;  %1494 = vst.msk [vmem:[%s19007_s16 + $0x130] sm:$0xff] %vm895_vm4, %v1154_v27  ;;  %v15947_v56 = vpack.c.bf16 %v765_v40, %v765_v40  ;;  %v763_v60 = vmul.f32 %v18944_v62, %v561_v29  ;;  %v572_v12 = vadd.f32 %v16656_v52, %v19002_v14  ;;  %v563_v4 = vpop.f32.mrf.mxu0 }
  0xfa   : > { %880 = vst.msk [vmem:[#allocation2 + $0x34] sm:$0xf] %vm307_vm0, %v15942_v58  ;;  %v1348_v55 = vmul.f32 %v19060_v51, %v1146_v44  ;;  %1465 = vst.msk [vmem:[#allocation2 + $0x94] sm:$0xf] %vm307_vm0, %v15966_v45  ;;  %v15971_v15 = vpack.c.bf16 %v1350_v59, %v1350_v59  ;;  %v1157_v8 = vadd.f32 %v16686_v10, %v19002_v14  ;;  %v1148_v0 = vpop.f32.mrf.mxu1  ;;  %v1638_v51 = vshll.u32 %v19114_v61, 16  ;;  %v19225_v58 = vld [vmem:[%s25264_s4 + $0x28] sm:$0xff]  }
  0xfb   : > { %908 = vst.msk [vmem:[%s19007_s16 + $0x60] sm:$0xff] %vm895_vm4, %v561_v29  ;;  %1492 = vst.msk [vmem:[%s19007_s16 + $0x120] sm:$0xff] %vm895_vm4, %v1146_v44  ;;  %v1633_v62 = vsel %vm1607_vm3, %v18888_v3, %v19167_v47  ;;  %v15945_v39 = vpack.c.bf16 %v763_v60, %v763_v60  ;;  %v766_v17 = vmul.f32 %v18954_v63, %v572_v12  ;;  %v16659_v13 = vpop.f32.mrf.mxu0  ;;  %v19234_v45 = vld [vmem:[#allocation2 + $0x2c] sm:$0xf]  ;;  %v19245_v60 = vld [vmem:[%s25264_s4 + $0x20] sm:$0xff]  }
  0xfc   : > { %885 = vst.msk [vmem:[#allocation2 + $0x48] sm:$0xf] %vm307_vm0, %v15947_v56  ;;  %v15969_v41 = vpack.c.bf16 %v1348_v55, %v1348_v55  ;;  %v564_v6 = vadd.f32 %v19002_v14, %v563_v4  ;;  %16704 = vmatmul.mubr.msk.bf16.vlgmr.msra.gmra.mxu0 %vm895_vm4, %v1633_v62  ;;  %1470 = vst.msk [vmem:[#allocation2 + $0xa8] sm:$0xf] %vm307_vm0, %v15971_v15  ;;  %v1351_v3 = vmul.f32 %v19116_v57, %v1157_v8  ;;  %v16689_v42 = vpop.f32.mrf.mxu1  ;;  %v19247_v55 = vpop.permute.xlu0 %1318  ;;  %v19255_v4 = vld [vmem:[#allocation2 + $0x28] sm:$0xf] }
  0xfd   : > { %911 = vst.msk [vmem:[%s19007_s16 + $0x78] sm:$0xff] %vm895_vm4, %v572_v12  ;;  %1495 = vst.msk [vmem:[%s19007_s16 + $0x138] sm:$0xff] %vm895_vm4, %v1157_v8  ;;  %v1149_v61 = vadd.f32 %v19002_v14, %v1148_v0  ;;  %16760 = vmatpush3.bf16.msra.mxu0 %v18900_v1  ;;  %v1640_v63 = vrot.slane %v1638_v51, 4  ;;  %v19206_v18 = vcombine.low %v19196_v19, %v19182_v50  ;;  %v576_v35 = vpop.f32.mrf.mxu0 }
  0xfe   : > { %883 = vst.msk [vmem:[#allocation2 + $0x40] sm:$0xf] %vm307_vm0, %v15945_v39  ;;  %1468 = vst.msk [vmem:[#allocation2 + $0xa0] sm:$0xf] %vm307_vm0, %v15969_v41  ;;  %v15948_v57 = vpack.c.bf16 %v766_v17, %v766_v17  ;;  %v764_v23 = vmul.f32 %v18948_v21, %v564_v6  ;;  %v585_v1 = vadd.f32 %v16659_v13, %v19002_v14  ;;  %16761 = vmatprep.subr.bf16.mxu0 %v19172_v22  ;;  %v1161_v36 = vpop.f32.mrf.mxu1  ;;  %v19266_v41 = vpop.permute.xlu1 %1323 }
  0xff   : > { %909 = vst.msk [vmem:[%s19007_s16 + $0x68] sm:$0xff] %vm895_vm4, %v564_v6  ;;  %v1170_v24 = vadd.f32 %v16689_v42, %v19002_v14  ;;  %v15972_v27 = vpack.c.bf16 %v1351_v3, %v1351_v3  ;;  %v1349_v30 = vmul.f32 %v19072_v49, %v1149_v61  ;;  %1493 = vst.msk [vmem:[%s19007_s16 + $0x128] sm:$0xff] %vm895_vm4, %v1149_v61  ;;  %v1644_v21 = vshrl.u32 %v19206_v18, 16 }
 0x100   : > { %v19219_v9 = vor.u32 %v1640_v63, %v1637_v53  ;;  %886 = vst.msk [vmem:[#allocation2 + $0x4c] sm:$0xf] %vm307_vm0, %v15948_v57  ;;  %v15946_v40 = vpack.c.bf16 %v764_v23, %v764_v23  ;;  %v769_v29 = vmul.f32 %v18968_v32, %v585_v1  ;;  %v577_v44 = vadd.f32 %v19002_v14, %v576_v35  ;;  %v16660_v32 = vpop.f32.mrf.mxu0  ;;  %v16690_v53 = vpop.f32.mrf.mxu1 }
 0x101   : > { %914 = vst.msk [vmem:[%s19007_s16 + $0x90] sm:$0xff] %vm895_vm4, %v585_v1  ;;  %v1354_v49 = vmul.f32 %v1309_v20, %v1170_v24  ;;  %1498 = vst.msk [vmem:[%s19007_s16 + $0x150] sm:$0xff] %vm895_vm4, %v1170_v24  ;;  %v15970_v59 = vpack.c.bf16 %v1349_v30, %v1349_v30  ;;  %v1162_v10 = vadd.f32 %v19002_v14, %v1161_v36  ;;  %v1646_v56 = vrot.slane %v1644_v21, 3 }
 0x102   : > { %1471 = vst.msk [vmem:[#allocation2 + $0xac] sm:$0xf] %vm307_vm0, %v15972_v27  ;;  %v1642_v52 = vsel %vm1607_vm3, %v19167_v47, %v19219_v9  ;;  %16762 = vmatpush3.bf16.msra.mxu0 %v19172_v22  ;;  %884 = vst.msk [vmem:[#allocation2 + $0x44] sm:$0xf] %vm307_vm0, %v15946_v40  ;;  %v15951_v47 = vpack.c.bf16 %v769_v29, %v769_v29  ;;  %v767_v15 = vmul.f32 %v18960_v26, %v577_v44  ;;  %v579_v51 = vpop.f32.mrf.mxu0  ;;  %v1164_v20 = vpop.f32.mrf.mxu1 }
 0x103   : > { %16707 = vmatprep.mubr.msk.bf16.mxu0 %vm895_vm4, %v1642_v52  ;;  %v15975_v12 = vpack.c.bf16 %v1354_v49, %v1354_v49  ;;  %912 = vst.msk [vmem:[%s19007_s16 + $0x80] sm:$0xff] %vm895_vm4, %v577_v44  ;;  %v588_v8 = vadd.f32 %v16660_v32, %v19002_v14  ;;  %v1352_v0 = vmul.f32 %v19143_v16, %v1162_v10  ;;  %1496 = vst.msk [vmem:[%s19007_s16 + $0x140] sm:$0xff] %vm895_vm4, %v1162_v10 }
 0x104   : > { %1469 = vst.msk [vmem:[#allocation2 + $0xa4] sm:$0xf] %vm307_vm0, %v15970_v59  ;;  %v1173_v62 = vadd.f32 %v16690_v53, %v19002_v14  ;;  %v1647_v26 = vshll.u32 %v19206_v18, 16  ;;  %v14799_v39 = vcombine.low %v19255_v4, %v19234_v45  ;;  %16763 = vmatprep.subr.bf16.mxu0 %v19225_v58  ;;  %889 = vst.msk [vmem:[#allocation2 + $0x58] sm:$0xf] %vm307_vm0, %v15951_v47  ;;  %v16663_v18 = vpop.f32.mrf.mxu0  ;;  %v16693_v57 = vpop.f32.mrf.mxu1 }
 0x105   : > { %1474 = vst.msk [vmem:[#allocation2 + $0xb8] sm:$0xf] %vm307_vm0, %v15975_v12  ;;  %v15949_v16 = vpack.c.bf16 %v767_v15, %v767_v15  ;;  %v770_v17 = vmul.f32 %v18970_v2, %v588_v8  ;;  %v580_v6 = vadd.f32 %v19002_v14, %v579_v51  ;;  %v1165_v3 = vadd.f32 %v19002_v14, %v1164_v20  ;;  %v19295_v59 = vld [vmem:[#allocation2 + $0x34] sm:$0xf]  ;;  %v1334_v12 = vpop.permute.xlu1 %1333 }
 0x106   : > { %915 = vst.msk [vmem:[%s19007_s16 + $0x98] sm:$0xff] %vm895_vm4, %v588_v8  ;;  %v15973_v61 = vpack.c.bf16 %v1352_v0, %v1352_v0  ;;  %v1355_v63 = vmul.f32 %v1314_v11, %v1173_v62  ;;  %1499 = vst.msk [vmem:[%s19007_s16 + $0x158] sm:$0xff] %vm895_vm4, %v1173_v62  ;;  %v1649_v13 = vrot.slane %v1647_v26, 4  ;;  %v1653_v42 = vshrl.u32 %v14799_v39, 16  ;;  %16764 = vmatpush3.bf16.msra.mxu0 %v19225_v58  ;;  %v592_v36 = vpop.f32.mrf.mxu0  ;;  %v1177_v21 = vpop.f32.mrf.mxu1  ;;  %v19315_v0 = vld [vmem:[#allocation2 + $0x30] sm:$0xf] }
 0x107   : > { %887 = vst.msk [vmem:[#allocation2 + $0x50] sm:$0xf] %vm307_vm0, %v15949_v16  ;;  %v15952_v2 = vpack.c.bf16 %v770_v17, %v770_v17  ;;  %v768_v23 = vmul.f32 %v18964_v31, %v580_v6  ;;  %v1353_v1 = vmul.f32 %v19155_v37, %v1165_v3  ;;  %v1656_v11 = vshll.u32 %v14799_v39, 16  ;;  %16765 = vmatprep.subr.bf16.mxu0 %v19245_v60  ;;  %v19291_v31 = vld [vmem:[%s25264_s4 + $0x58] sm:$0xff]   ;;  %v1329_v37 = vpop.permute.xlu0 %1328 }
 0x108   : > { %913 = vst.msk [vmem:[%s19007_s16 + $0x88] sm:$0xff] %vm895_vm4, %v580_v6  ;;  %1497 = vst.msk [vmem:[%s19007_s16 + $0x148] sm:$0xff] %vm895_vm4, %v1165_v3  ;;  %v15976_v24 = vpack.c.bf16 %v1355_v63, %v1355_v63  ;;  %v1650_v27 = vor.u32 %v1649_v13, %v1646_v56  ;;  %v1655_v30 = vrot.slane %v1653_v42, 3  ;;  %v601_v35 = vadd.f32 %v16663_v18, %v19002_v14  ;;  %v16664_v56 = vpop.f32.mrf.mxu0  ;;  %v16694_v47 = vpop.f32.mrf.mxu1  ;;  %v19325_v17 = vld [vmem:[#allocation2 + $0x3c] sm:$0xf] }
 0x109   : > { %1472 = vst.msk [vmem:[#allocation2 + $0xb0] sm:$0xf] %vm307_vm0, %v15973_v61  ;;  %890 = vst.msk [vmem:[#allocation2 + $0x5c] sm:$0xf] %vm307_vm0, %v15952_v2  ;;  %v15950_v40 = vpack.c.bf16 %v768_v23, %v768_v23  ;;  %v15974_v29 = vpack.c.bf16 %v1353_v1, %v1353_v1  ;;  %v1658_v49 = vrot.slane %v1656_v11, 4  ;;  %v1186_v44 = vadd.f32 %v16693_v57, %v19002_v14 }
 0x10a   : > { %1475 = vst.msk [vmem:[#allocation2 + $0xbc] sm:$0xf] %vm307_vm0, %v15976_v24  ;;  %v1651_v52 = vsel %vm1607_vm3, %v19219_v9, %v1650_v27  ;;  %v773_v10 = vmul.f32 %v18982_v34, %v601_v35  ;;  %v593_v32 = vadd.f32 %v19002_v14, %v592_v36  ;;  %v1178_v53 = vadd.f32 %v19002_v14, %v1177_v21  ;;  %v595_v26 = vpop.f32.mrf.mxu0  ;;  %v1180_v39 = vpop.f32.mrf.mxu1  ;;  %v19335_v61 = vld [vmem:[#allocation2 + $0x44] sm:$0xf]  ;;  %v19343_v57 = vld [vmem:[#allocation2 + $0x4c] sm:$0xf] }
 0x10b   : > { %918 = vst.msk [vmem:[%s19007_s16 + $0xb0] sm:$0xff] %vm895_vm4, %v601_v35  ;;  %16766 = vmatpush3.bf16.msra.mxu0 %v19245_v60  ;;  %v19309_v34 = vor.u32 %v1658_v49, %v1655_v30  ;;  %v1358_v9 = vmul.f32 %v1329_v37, %v1186_v44  ;;  %1502 = vst.msk [vmem:[%s19007_s16 + $0x170] sm:$0xff] %vm895_vm4, %v1186_v44  ;;  %v604_v15 = vadd.f32 %v16664_v56, %v19002_v14  ;;  %v19346_v24 = vld [vmem:[#allocation2 + $0x40] sm:$0xf]  ;;  %v19362_v21 = vld [vmem:[#allocation2 + $0x58] sm:$0xf] }
 0x10c   : > { %888 = vst.msk [vmem:[#allocation2 + $0x54] sm:$0xf] %vm307_vm0, %v15950_v40  ;;  %1473 = vst.msk [vmem:[#allocation2 + $0xb4] sm:$0xf] %vm307_vm0, %v15974_v29  ;;  %16708 = vmatmul.mubr.msk.bf16.gmra.mxu0 %vm895_vm4, %v1651_v52  ;;  %v1189_v8 = vadd.f32 %v16694_v47, %v19002_v14  ;;  %v15955_v62 = vpack.c.bf16 %v773_v10, %v773_v10  ;;  %v771_v51 = vmul.f32 %v18974_v5, %v593_v32  ;;  %v19376_v56 = vld [vmem:[#allocation2 + $0x74] sm:$0xf] }
 0x10d   : > { %916 = vst.msk [vmem:[%s19007_s16 + $0xa0] sm:$0xff] %vm895_vm4, %v593_v32  ;;  %v1356_v20 = vmul.f32 %v19247_v55, %v1178_v53  ;;  %1500 = vst.msk [vmem:[%s19007_s16 + $0x160] sm:$0xff] %vm895_vm4, %v1178_v53  ;;  %v14800_v16 = vcombine.low %v19315_v0, %v19295_v59  ;;  %16823 = vmatprep.subr.bf16.mxu0 %v19291_v31  ;;  %v1660_v6 = vsel %vm1607_vm3, %v1650_v27, %v19309_v34  ;;  %v19348_v27 = vld [vmem:[#allocation2 + $0x48] sm:$0xf] }
 0x10e   : > { %v15979_v3 = vpack.c.bf16 %v1358_v9, %v1358_v9  ;;  %v774_v5 = vmul.f32 %v18984_v7, %v604_v15  ;;  %919 = vst.msk [vmem:[%s19007_s16 + $0xb8] sm:$0xff] %vm895_vm4, %v604_v15  ;;  %v1359_v55 = vmul.f32 %v1334_v12, %v1189_v8  ;;  %1503 = vst.msk [vmem:[%s19007_s16 + $0x178] sm:$0xff] %vm895_vm4, %v1189_v8  ;;  %16711 = vmatprep.mubr.msk.bf16.mxu0 %vm895_vm4, %v1660_v6  ;;  %v19341_v7 = vld [vmem:[#allocation2 + $0x38] sm:$0xf]  ;;  %v19372_v32 = vld [vmem:[#allocation2 + $0x50] sm:$0xf] }
 0x10f   : > { %893 = vst.msk [vmem:[#allocation2 + $0x68] sm:$0xf] %vm307_vm0, %v15955_v62  ;;  %v15953_v63 = vpack.c.bf16 %v771_v51, %v771_v51  ;;  %v15977_v13 = vpack.c.bf16 %v1356_v20, %v1356_v20  ;;  %v596_v42 = vadd.f32 %v19002_v14, %v595_v26  ;;  %v1181_v18 = vadd.f32 %v19002_v14, %v1180_v39 }
 0x110   : > { %1478 = vst.msk [vmem:[#allocation2 + $0xc8] sm:$0xf] %vm307_vm0, %v15979_v3  ;;  %v15956_v2 = vpack.c.bf16 %v774_v5, %v774_v5  ;;  %v15980_v23 = vpack.c.bf16 %v1359_v55, %v1359_v55  ;;  %v1662_v1 = vshrl.u32 %v14800_v16, 16  ;;  %v1665_v11 = vshll.u32 %v14800_v16, 16  ;;  %v19364_v37 = vld [vmem:[#allocation2 + $0x5c] sm:$0xf] }
 0x111   : > { %891 = vst.msk [vmem:[#allocation2 + $0x60] sm:$0xf] %vm307_vm0, %v15953_v63  ;;  %1476 = vst.msk [vmem:[#allocation2 + $0xc0] sm:$0xf] %vm307_vm0, %v15977_v13  ;;  %v772_v14 = vmul.f32 %v18978_v33, %v596_v42  ;;  %v1357_v30 = vmul.f32 %v19266_v41, %v1181_v18  ;;  %v14801_v35 = vcombine.low %v19341_v7, %v19325_v17  ;;  %v19384_v3 = vld [vmem:[#allocation2 + $0x70] sm:$0xf] }
 0x112   : > { %917 = vst.msk [vmem:[%s19007_s16 + $0xa8] sm:$0xff] %vm895_vm4, %v596_v42  ;;  %1501 = vst.msk [vmem:[%s19007_s16 + $0x168] sm:$0xff] %vm895_vm4, %v1181_v18  ;;  %v14802_v36 = vcombine.low %v19346_v24, %v19335_v61  ;;  %v1664_v33 = vrot.slane %v1662_v1, 3  ;;  %v1667_v40 = vrot.slane %v1665_v11, 4  ;;  %v14803_v41 = vcombine.low %v19348_v27, %v19343_v57 }
 0x113   : > { %894 = vst.msk [vmem:[#allocation2 + $0x6c] sm:$0xf] %vm307_vm0, %v15956_v2  ;;  %1479 = vst.msk [vmem:[#allocation2 + $0xcc] sm:$0xf] %vm307_vm0, %v15980_v23  ;;  %v14805_v29 = vcombine.low %v19362_v21, %v19364_v37  ;;  %v15954_v49 = vpack.c.bf16 %v772_v14, %v772_v14  ;;  %v15978_v44 = vpack.c.bf16 %v1357_v30, %v1357_v30  ;;  %v1671_v52 = vshrl.u32 %v14801_v35, 16 }
 0x114   : > { %v1674_v10 = vshll.u32 %v14801_v35, 16  ;;  %v19374_v53 = vld [vmem:[#allocation2 + $0x54] sm:$0xf]  ;;  %v1668_v47 = vor.u32 %v1667_v40, %v1664_v33  ;;  %v1680_v12 = vshrl.u32 %v14802_v36, 16  ;;  %v1683_v9 = vshll.u32 %v14802_v36, 16 }
 0x115   : > { %v1689_v15 = vshrl.u32 %v14803_v41, 16  ;;  %892 = vst.msk [vmem:[#allocation2 + $0x64] sm:$0xf] %vm307_vm0, %v15954_v49  ;;  %1477 = vst.msk [vmem:[#allocation2 + $0xc4] sm:$0xf] %vm307_vm0, %v15978_v44  ;;  %v1673_v8 = vrot.slane %v1671_v52, 3  ;;  %v14804_v20 = vcombine.low %v19372_v32, %v19374_v53  ;;  %v14825_v1 = vcombine.low %v19384_v3, %v19376_v56 }
 0x116   : > { %v1676_v62 = vrot.slane %v1674_v10, 4  ;;  %v1692_v51 = vshll.u32 %v14803_v41, 16  ;;  %v1669_v26 = vsel %vm1607_vm3, %v19309_v34, %v1668_v47  ;;  %v1682_v39 = vrot.slane %v1680_v12, 3  ;;  %v19394_v35 = vld [vmem:[#allocation2 + $0x7c] sm:$0xf] }
 0x117   : > { %v1685_v16 = vrot.slane %v1683_v9, 4  ;;  %v1691_v6 = vrot.slane %v1689_v15, 3  ;;  %16712 = vmatmul.mubr.msk.bf16.gmra.mxu0 %vm895_vm4, %v1669_v26  ;;  %v1698_v63 = vshrl.u32 %v14804_v20, 16  ;;  %v1701_v13 = vshll.u32 %v14804_v20, 16  ;;  %25380 = vst [vmem:[#allocation4_spill] sm:$0xff] %v19394_v35 }
 0x118   : > { %v1677_v5 = vor.u32 %v1676_v62, %v1673_v8  ;;  %v1694_v55 = vrot.slane %v1692_v51, 4  ;;  %v1707_v18 = vshrl.u32 %v14805_v29, 16  ;;  %v1710_v2 = vshll.u32 %v14805_v29, 16  ;;  %v19387_v23 = vld [vmem:[#allocation2 + $0x60] sm:$0xf] }
 0x119   : > { %v1686_v42 = vor.u32 %v1685_v16, %v1682_v39  ;;  %v1700_v11 = vrot.slane %v1698_v63, 3  ;;  %v1703_v14 = vrot.slane %v1701_v13, 4  ;;  %v14806_v41 = vcombine.low %v19387_v23, %v19387_v23  ;;  %v19399_v29 = vld [vmem:[#allocation2 + $0x68] sm:$0xf]  ;;  %v19403_v44 = vld [vmem:[#allocation2 + $0x78] sm:$0xf] }
 0x11a   : > { %v1678_v34 = vsel %vm1607_vm3, %v1668_v47, %v1677_v5  ;;  %v19392_v30 = vld [vmem:[#allocation2 + $0x6c] sm:$0xf]  ;;  %v1695_v36 = vor.u32 %v1694_v55, %v1691_v6  ;;  %v1709_v33 = vrot.slane %v1707_v18, 3  ;;  %v1712_v40 = vrot.slane %v1710_v2, 4  ;;  %v1937_v47 = vld [vmem:[#allocation2 + $0x60] sm:$0x8] }
 0x11b   : > { %16715 = vmatprep.mubr.msk.bf16.mxu0 %vm895_vm4, %v1678_v34  ;;  %v14824_v49 = vcombine.low %v19399_v29, %v19392_v30  ;;  %v1687_v52 = vsel %vm1607_vm3, %v1677_v5, %v1686_v42  ;;  %v2043_v9 = vshrl.u32 %v14825_v1, 16  ;;  %v14826_v15 = vcombine.low %v19403_v44, %v19394_v35  ;;  %v19414_v6 = vld [vmem:[#allocation2 + $0x84] sm:$0xf]  ;;  %v19433_v35 = vld [vmem:[#allocation2 + $0x90] sm:$0xf] }
 0x11c   : > { %v1696_v10 = vsel %vm1607_vm3, %v1686_v42, %v1695_v36  ;;  %v19407_v12 = vld [vmem:[#allocation2 + $0x64] sm:$0xf]  ;;  %v1704_v8 = vor.u32 %v1703_v14, %v1700_v11  ;;  %v19412_v26 = vor.u32 %v1712_v40, %v1709_v33  ;;  %v1716_v39 = vshrl.u32 %v14806_v41, 16  ;;  %25381 = vst [vmem:[#allocation5_spill] sm:$0xff] %v19414_v6  ;;  %v19417_v42 = vld [vmem:[#allocation2 + $0x80] sm:$0xf] }
 0x11d   : > { %v14823_v62 = vcombine.low %v1937_v47, %v19407_v12  ;;  %v2034_v51 = vshrl.u32 %v14824_v49, 16  ;;  %v2037_v20 = vshll.u32 %v14824_v49, 16  ;;  %v1719_v16 = vshll.u32 %v14806_v41, 16  ;;  %v19423_v49 = vld [vmem:[#allocation2 + $0x88] sm:$0xf] }
 0x11e   : > { %v2045_v18 = vrot.slane %v2043_v9, 3  ;;  %v2046_v2 = vshll.u32 %v14825_v1, 16  ;;  %v2052_v34 = vshrl.u32 %v14826_v15, 16  ;;  %v2055_v11 = vshll.u32 %v14826_v15, 16 }
 0x11f   : > { %16716 = vmatmul.mubr.msk.bf16.gmra.mxu0 %vm895_vm4, %v1687_v52  ;;  %v2026_v5 = vshrl.u32 %v14823_v62, 16  ;;  %v2029_v55 = vshll.u32 %v14823_v62, 16  ;;  %v2036_v63 = vrot.slane %v2034_v51, 3  ;;  %v2039_v13 = vrot.slane %v2037_v20, 4  ;;  %v19425_v52 = vld [vmem:[#allocation2 + $0x8c] sm:$0xf] }
 0x120   : > { %16719 = vmatprep.mubr.msk.bf16.mxu0 %vm895_vm4, %v1696_v10  ;;  %v1705_v14 = vsel %vm1607_vm3, %v1695_v36, %v1704_v8  ;;  %v14827_v41 = vcombine.low %v19417_v42, %v19414_v6  ;;  %v2048_v62 = vrot.slane %v2046_v2, 4  ;;  %v2054_v51 = vrot.slane %v2052_v34, 3  ;;  %v19427_v10 = vld [vmem:[#allocation2 + $0x94] sm:$0xf] }
 0x121   : > { %v2028_v33 = vrot.slane %v2026_v5, 3  ;;  %v2031_v40 = vrot.slane %v2029_v55, 4  ;;  %v2040_v47 = vor.u32 %v2039_v13, %v2036_v63  ;;  %v2057_v20 = vrot.slane %v2055_v11, 4 }
 0x122   : > { %v1714_v1 = vsel %vm1607_vm3, %v1704_v8, %v19412_v26  ;;  %v2061_v36 = vshrl.u32 %v14827_v41, 16  ;;  %v2064_v15 = vshll.u32 %v14827_v41, 16  ;;  %v1718_v5 = vrot.slane %v1716_v39, 3 }
 0x123   : > { %v2032_v9 = vor.u32 %v2031_v40, %v2028_v33  ;;  %v1721_v55 = vrot.slane %v1719_v16, 4  ;;  %v2049_v25 = vor.u32 %v2048_v62, %v2045_v18  ;;  %v14828_v6 = vcombine.low %v19423_v49, %v19425_v52  ;;  %v19442_v18 = vld [vmem:[#allocation2 + $0x9c] sm:$0xf] }
 0x124   : > { %v2058_v13 = vor.u32 %v2057_v20, %v2054_v51  ;;  %v2063_v2 = vrot.slane %v2061_v36, 3  ;;  %v14829_v34 = vcombine.low %v19433_v35, %v19427_v10  ;;  %v2066_v11 = vrot.slane %v2064_v15, 4  ;;  %v18399_v40 = vld [vmem:[%s25264_s4 + $0x38] sm:$0xff]  }
 0x125   : > { %v2041_v63 = vsel %vm1607_vm3, %v2032_v9, %v2040_v47  ;;  %v2050_v8 = vsel %vm1607_vm3, %v2040_v47, %v2049_v25  ;;  %v2070_v39 = vshrl.u32 %v14828_v6, 16  ;;  %v2073_v16 = vshll.u32 %v14828_v6, 16  ;;  %v19451_v51 = vld [vmem:[#allocation2 + $0x98] sm:$0xf]  ;;  %v19455_v9 = vld [vmem:[#allocation2 + $0xa4] sm:$0xf] }
 0x126   : > { %16735 = vmatprep.mubr.msk.bf16.mxu1 %vm895_vm4, %v2041_v63  ;;  %v1722_v33 = vor.u32 %v1721_v55, %v1718_v5  ;;  %v2059_v41 = vsel %vm1607_vm3, %v2049_v25, %v2058_v13  ;;  %v2082_v62 = vshll.u32 %v14829_v34, 16  ;;  %v2067_v20 = vor.u32 %v2066_v11, %v2063_v2  ;;  %v19461_v55 = vld [vmem:[#allocation2 + $0xa0] sm:$0xf]  ;;  %v19466_v11 = vld [vmem:[#allocation2 + $0xac] sm:$0xf] }
 0x127   : > { %16720 = vmatmul.mubr.msk.bf16.gmra.mxu0 %vm895_vm4, %v1705_v14  ;;  %16736 = vmatmul.mubr.msk.bf16.vlgmr.msra.gmra.mxu1 %vm895_vm4, %v2050_v8  ;;  %v2072_v47 = vrot.slane %v2070_v39, 3  ;;  %v2075_v6 = vrot.slane %v2073_v16, 4  ;;  %v2079_v14 = vshrl.u32 %v14829_v34, 16  ;;  %v14831_v8 = vcombine.low %v19461_v55, %v19455_v9 }
 0x128   : > { %16723 = vmatprep.mubr.msk.bf16.mxu0 %vm895_vm4, %v1714_v1  ;;  %16792 = vmatpush3.bf16.msra.mxu1 %v18399_v40  ;;  %v14830_v1 = vcombine.low %v19451_v51, %v19442_v18  ;;  %v1723_v25 = vsel %vm1607_vm3, %v19412_v26, %v1722_v33  ;;  %v2084_v5 = vrot.slane %v2082_v62, 4  ;;  %v2068_v63 = vsel %vm1607_vm3, %v2058_v13, %v2067_v20  ;;  %v19476_v13 = vld [vmem:[#allocation2 + $0xa8] sm:$0xf] }
 0x129   : > { %16739 = vmatprep.mubr.msk.bf16.mxu1 %vm895_vm4, %v2059_v41  ;;  %16793 = vmatprep.subr.bf16.mxu1 %v19172_v22  ;;  %v2076_v36 = vor.u32 %v2075_v6, %v2072_v47  ;;  %v2081_v15 = vrot.slane %v2079_v14, 3  ;;  %v25382_v26 = vcombine.low %v18875_v38, %v18877_v43  ;;  %v14832_v16 = vcombine.low %v19476_v13, %v19466_v11  ;;  %v19482_v6 = vld [vmem:[#allocation2 + $0xb4] sm:$0xf]  ;;  %v18400_v38 = vld [vmem:[#allocation2 + $0xc] sm:$0xf] }
 0x12a   : > { %v2088_v2 = vshrl.u32 %v14830_v1, 16  ;;  %v2091_v34 = vshll.u32 %v14830_v1, 16  ;;  %v2097_v41 = vshrl.u32 %v14831_v8, 16  ;;  %v2100_v47 = vshll.u32 %v14831_v8, 16  ;;  %v19488_v14 = vld [vmem:[%s25264_s4 + $0x50] sm:$0xff]  }
 0x12b   : > { %v2085_v39 = vor.u32 %v2084_v5, %v2081_v15  ;;  %v14857_v43 = vcombine.low %v18400_v38, %v19125_v48  ;;  %v14858_v62 = vcombine.low %v19110_v46, %v19103_v54  ;;  %v2106_v1 = vshrl.u32 %v14832_v16, 16  ;;  %v19495_v15 = vld [vmem:[#allocation2 + $0xbc] sm:$0xf]  ;;  %v19509_v46 = vld [vmem:[%s25264_s4 + $0x48] sm:$0xff]  }
 0x12c   : > { %16794 = vmatpush3.bf16.msra.mxu1 %v19172_v22  ;;  %v2077_v22 = vsel %vm1607_vm3, %v2067_v20, %v2076_v36  ;;  %v2090_v33 = vrot.slane %v2088_v2, 3  ;;  %v2093_v40 = vrot.slane %v2091_v34, 4  ;;  %v2099_v48 = vrot.slane %v2097_v41, 3 }
 0x12d   : > { %16795 = vmatprep.subr.bf16.mxu1 %v19225_v58  ;;  %v2086_v20 = vsel %vm1607_vm3, %v2076_v36, %v2085_v39  ;;  %v2108_v36 = vrot.slane %v2106_v1, 3 }
 0x12e   : > { %v2094_v5 = vor.u32 %v2093_v40, %v2090_v33  ;;  %v14859_v33 = vcombine.low %v19094_v28, %v19196_v19  ;;  %v14860_v40 = vcombine.low %v19182_v50, %v19255_v4  ;;  %v19541_v19 = vld [vmem:[%s25264_s4 + $0x78] sm:$0xff]  }
 0x12f   : > { %16724 = vmatmul.mubr.msk.bf16.gmra.mxu0 %vm895_vm4, %v1723_v25  ;;  %16740 = vmatmul.mubr.msk.bf16.gmra.mxu1 %vm895_vm4, %v2068_v63  ;;  %v2109_v25 = vshll.u32 %v14832_v16, 16  ;;  %v2102_v63 = vrot.slane %v2100_v47, 4 }
 0x130   : > { %16767 = vmatprep.mubr.msk.bf16.mxu0 %vm895_vm4, %v25382_v26  ;;  %16743 = vmatprep.mubr.msk.bf16.mxu1 %vm895_vm4, %v2077_v22  ;;  %v2095_v54 = vsel %vm1607_vm3, %v2085_v39, %v2094_v5  ;;  %v19517_v39 = vld [vmem:[#allocation2 + $0xc0] sm:$0xf] }
 0x131   : > { %16796 = vmatpush3.bf16.msra.mxu1 %v19225_v58  ;;  %v19490_v58 = vld [vmem:[#allocation2 + $0xb0] sm:$0xf]  ;;  %v2111_v34 = vrot.slane %v2109_v25, 4  ;;  %v2103_v22 = vor.u32 %v2102_v63, %v2099_v48  ;;  %v14835_v28 = vcombine.low %v19517_v39, %v19517_v39 }
 0x132   : > { %16797 = vmatprep.subr.bf16.mxu1 %v19245_v60  ;;  %v14833_v2 = vcombine.low %v19490_v58, %v19482_v6 }
 0x133   : > { %v2112_v41 = vor.u32 %v2111_v34, %v2108_v36  ;;  %v2133_v48 = vshrl.u32 %v14835_v28, 16  ;;  %v2136_v63 = vshll.u32 %v14835_v28, 16  ;;  %v14862_v36 = vcombine.low %v19295_v59, %v19341_v7 }
 0x134   : > { %v2115_v26 = vshrl.u32 %v14833_v2, 16  ;;  %v2118_v16 = vshll.u32 %v14833_v2, 16  ;;  %v14861_v2 = vcombine.low %v19234_v45, %v19315_v0  ;;  %v14863_v59 = vcombine.low %v19325_v17, %v19346_v24 }
 0x135   : > { %16798 = vmatpush3.bf16.msra.mxu1 %v19245_v60  ;;  %v19511_v60 = vld [vmem:[#allocation2 + $0xb8] sm:$0xf]  ;;  %v2113_v50 = vsel %vm1607_vm3, %v2103_v22, %v2112_v41  ;;  %v14864_v0 = vcombine.low %v19335_v61, %v19348_v27  ;;  %v14885_v17 = vcombine.low %v19392_v30, %v19384_v3  ;;  %v14865_v61 = vcombine.low %v19343_v57, %v19372_v32 }
 0x136   : > { %16855 = vmatprep.subr.bf16.mxu1 %v19291_v31  ;;  %v14834_v8 = vcombine.low %v19511_v60, %v19495_v15  ;;  %v2120_v1 = vrot.slane %v2118_v16, 4  ;;  %v14884_v16 = vcombine.low %v19407_v12, %v19399_v29  ;;  %v14866_v24 = vcombine.low %v19374_v53, %v19362_v21  ;;  %v17943_v57 = vld [vmem:[#allocation2 + $0x14] sm:$0xff]   ;;  %v17945_v53 = vld [vmem:[#allocation2 + $0x1c] sm:$0xff]  }
 0x137   : > { %16768 = vmatmul.mubr.msk.bf16.vlgmr.msra.gmra.mxu0 %vm895_vm4, %v14857_v43  ;;  %16744 = vmatmul.mubr.msk.bf16.gmra.mxu1 %vm895_vm4, %v2086_v20  ;;  %v19528_v43 = vld [vmem:[%s25264_s4 + $0x40] sm:$0xff]   ;;  %v2117_v20 = vrot.slane %v2115_v26, 3  ;;  %v14867_v3 = vcombine.low %v19364_v37, %v19387_v23  ;;  %v2879_v30 = vshll.u32 %v17943_v57, 16 }
 0x138   : > { %16824 = vmatpush3.bf16.msra.mxu0 %v19291_v31  ;;  %16771 = vmatprep.mubr.msk.bf16.mxu0 %vm895_vm4, %v14858_v62  ;;  %v2124_v47 = vshrl.u32 %v14834_v8, 16  ;;  %v2127_v38 = vshll.u32 %v14834_v8, 16  ;;  %v2104_v62 = vsel %vm1607_vm3, %v2094_v5, %v2103_v22  ;;  %v2135_v8 = vrot.slane %v2133_v48, 3  ;;  %v17947_v23 = vld [vmem:[#allocation2 + $0x24] sm:$0xff]  }
 0x139   : > { %16747 = vmatprep.mubr.msk.bf16.mxu1 %vm895_vm4, %v2095_v54  ;;  %16825 = vmatprep.subr.bf16.mxu0 %v19488_v14  ;;  %v2121_v5 = vor.u32 %v2120_v1, %v2117_v20  ;;  %v2138_v22 = vrot.slane %v2136_v63, 4  ;;  %v2887_v20 = vshll.u32 %v17945_v53, 16  ;;  %v2881_v37 = vrot.slane %v2879_v30, 1  ;;  %v17949_v1 = vld [vmem:[#allocation2 + $0x2c] sm:$0xff]   ;;  %v17968_v30 = vld [vmem:[#allocation2 + $0x74] sm:$0xff]  }
 0x13a   : > { %v2126_v4 = vrot.slane %v2124_v47, 3  ;;  %v2129_v25 = vrot.slane %v2127_v38, 4  ;;  %v14886_v47 = vcombine.low %v19376_v56, %v19403_v44  ;;  %v25383_v56 = vld [vmem:[#allocation4_spill] sm:$0xff]  ;;  %v2903_v63 = vshll.u32 %v17949_v1, 16 }
 0x13b   : > { %v2122_v34 = vsel %vm1607_vm3, %v2112_v41, %v2121_v5  ;;  %v2139_v45 = vor.u32 %v2138_v22, %v2135_v8  ;;  %v14887_v44 = vcombine.low %v25383_v56, %v19417_v42  ;;  %v17954_v8 = vld [vmem:[#allocation2 + $0x3c] sm:$0xff]  }
 0x13c   : > { %16826 = vmatpush3.bf16.msra.mxu0 %v19488_v14  ;;  %v2130_v54 = vor.u32 %v2129_v25, %v2126_v4  ;;  %v2895_v4 = vshll.u32 %v17947_v23, 16  ;;  %v14889_v25 = vcombine.low %v19425_v52, %v19433_v35  ;;  %v14890_v35 = vcombine.low %v19427_v10, %v19451_v51 }
 0x13d   : > { %16827 = vmatprep.subr.bf16.mxu0 %v19509_v46 }
 0x13e   : > { %v2131_v26 = vsel %vm1607_vm3, %v2121_v5, %v2130_v54  ;;  %v2140_v7 = vsel %vm1607_vm3, %v2130_v54, %v2139_v45  ;;  %v19602_v5 = vld [vmem:[%s25264_s4 + $0x70] sm:$0xff]   ;;  %v2897_v52 = vrot.slane %v2895_v4, 1  ;;  %v2891_v54 = vshrl.u32 %v17945_v53, 16 }
 0x13f   : > { %16772 = vmatmul.mubr.msk.bf16.gmra.mxu0 %vm895_vm4, %v14859_v33  ;;  %16748 = vmatmul.mubr.msk.bf16.gmra.mxu1 %vm895_vm4, %v2104_v62  ;;  %v17939_v33 = vld [vmem:[#allocation2 + $0x4] sm:$0xff]  }
 0x140   : > { %16775 = vmatprep.mubr.msk.bf16.mxu0 %vm895_vm4, %v14860_v40  ;;  %16751 = vmatprep.mubr.msk.bf16.mxu1 %vm895_vm4, %v2113_v50  ;;  %v17940_v40 = vld [vmem:[#allocation2 + $0xc] sm:$0xff]   ;;  %v2866_v41 = vshll.u32 %v17939_v33, 16  ;;  %v2864_v27 = vshrl.u32 %v17939_v33, 16  ;;  %v17957_v33 = vld [vmem:[#allocation2 + $0x44] sm:$0xff]  }
 0x141   : > { %16828 = vmatpush3.bf16.msra.mxu0 %v19509_v46  ;;  %v2871_v12 = vshll.u32 %v17940_v40, 16  ;;  %v2875_v42 = vshrl.u32 %v17940_v40, 16  ;;  %v2907_v40 = vshrl.u32 %v17949_v1, 16 }
 0x142   : > { %16829 = vmatprep.subr.bf16.mxu0 %v19528_v43  ;;  %v2868_v29 = vrot.slane %v2866_v41, 1 }
 0x143   : > { %v2873_v32 = vrot.slane %v2871_v12, 1  ;;  %v2927_v12 = vshll.u32 %v17957_v33, 16 }
 0x144   : > { %v2869_v21 = vor.u32 %v2868_v29, %v2864_v27  ;;  %v17965_v27 = vld [vmem:[#allocation2 + $0x6c] sm:$0xff]  }
 0x145   : > { %16830 = vmatpush3.bf16.msra.mxu0 %v19528_v43  ;;  %v2877_v28 = vor.u32 %v2875_v42, %v2873_v32  ;;  %v2929_v56 = vrot.slane %v2927_v12, 1 }
 0x146   : > { %16887 = vmatprep.subr.bf16.mxu0 %v19541_v19  ;;  %v2874_v62 = vsel %vm2862_vm5, %v2869_v21, %v2873_v32  ;;  %v14894_v21 = vcombine.low %v19482_v6, %v19511_v60  ;;  %v19660_v60 = vld [vmem:[#allocation2 + $0x14] sm:$0xf] }
 0x147   : > { %16776 = vmatmul.mubr.msk.bf16.gmra.mxu0 %vm895_vm4, %v14861_v2  ;;  %16752 = vmatmul.mubr.msk.bf16.gmra.mxu1 %vm895_vm4, %v2122_v34  ;;  %v19619_v2 = vld [vmem:[%s25264_s4 + $0x68] sm:$0xff]   ;;  %v2905_v34 = vrot.slane %v2903_v63, 1  ;;  %v3280_v63 = vshll.u32 %v17968_v30, 16 }
 0x148   : > { %16779 = vmatprep.mubr.msk.bf16.mxu0 %vm895_vm4, %v14862_v36  ;;  %16755 = vmatprep.mubr.msk.bf16.mxu1 %vm895_vm4, %v2131_v26  ;;  %v2899_v36 = vshrl.u32 %v17947_v23, 16  ;;  %v14891_v26 = vcombine.low %v19442_v18, %v19461_v55  ;;  %v17964_v18 = vld [vmem:[#allocation2 + $0x64] sm:$0xff]   ;;  %v19664_v23 = vld [vmem:[#allocation2 + $0x18] sm:$0xf] }
 0x149   : > { %v3265_v6 = vshrl.u32 %v17964_v18, 16 }
 0x14a   : > { %v2901_v51 = vor.u32 %v2899_v36, %v2897_v52  ;;  %v17967_v36 = vld [vmem:[#allocation2 + $0x64] ss:$0 sps:$4 sm:$0x11]  }
 0x14f   : > { %16780 = vmatmul.mubr.msk.bf16.gmra.mxu0 %vm895_vm4, %v14863_v59  ;;  %16756 = vmatmul.mubr.msk.bf16.gmra.mxu1 %vm895_vm4, %v2140_v7  ;;  %v14892_v59 = vcombine.low %v19455_v9, %v19476_v13  ;;  %v2906_v7 = vsel %vm2862_vm5, %v2901_v51, %v2905_v34  ;;  %v19639_v9 = vld [vmem:[#allocation2 + $0x4c] sm:$0xff]   ;;  %v19644_v13 = vld [vmem:[%s25264_s4 + $0x98] sm:$0xff]  }
 0x150   : > { %16783 = vmatprep.mubr.msk.bf16.mxu0 %vm895_vm4, %v14864_v0  ;;  %16799 = vmatprep.mubr.msk.bf16.mxu1 %vm895_vm4, %v14884_v16  ;;  %v19631_v0 = vld [vmem:[%s25264_s4 + $0x60] sm:$0xff]   ;;  %v2919_v16 = vshll.u32 %v17954_v8, 16  ;;  %v2935_v53 = vshll.u32 %v19639_v9, 16 }
 0x157   : > { %16784 = vmatmul.mubr.msk.bf16.gmra.mxu0 %vm895_vm4, %v14865_v61  ;;  %16800 = vmatmul.mubr.msk.bf16.vlgmr.msra.gmra.mxu1 %vm895_vm4, %v14885_v17  ;;  %v2921_v17 = vrot.slane %v2919_v16, 1  ;;  %v3267_v61 = vshll.u32 %v17964_v18, 16 }
 0x158   : > { %16787 = vmatprep.mubr.msk.bf16.mxu0 %vm895_vm4, %v14866_v24  ;;  %16856 = vmatpush3.bf16.msra.mxu1 %v19291_v31  ;;  %v25384_v31 = vld [vmem:[#allocation5_spill] sm:$0xff]  ;;  %v2909_v24 = vor.u32 %v2907_v40, %v2905_v34  ;;  %v19684_v34 = vld [vmem:[#allocation2 + $0x20] sm:$0xf]  ;;  %v19691_v40 = vld [vmem:[#allocation2 + $0x28] sm:$0xf] }
 0x159   : > { %16803 = vmatprep.mubr.msk.bf16.mxu1 %vm895_vm4, %v14886_v47  ;;  %16857 = vmatprep.subr.bf16.mxu1 %v19488_v14  ;;  %v14888_v38 = vcombine.low %v25384_v31, %v19423_v49  ;;  %v2889_v49 = vrot.slane %v2887_v20, 1  ;;  %v14893_v47 = vcombine.low %v19466_v11, %v19490_v58  ;;  %v17961_v11 = vld [vmem:[#allocation2 + $0x54] sm:$0xff]   ;;  %v3272_v58 = vshll.u32 %v17965_v27, 16  ;;  %v19662_v31 = vld [vmem:[#allocation2 + $0x5c] sm:$0xff]  }
 0x15a   : > { %v2937_v20 = vrot.slane %v2935_v53, 1 }
 0x15b   : > { %v2893_v10 = vor.u32 %v2891_v54, %v2889_v49  ;;  %v3274_v1 = vrot.slane %v3272_v58, 1  ;;  %v3276_v54 = vshrl.u32 %v17965_v27, 16  ;;  %v2955_v58 = vshrl.u32 %v19662_v31, 16 }
 0x15c   : > { %16858 = vmatpush3.bf16.msra.mxu1 %v19488_v14  ;;  %v2883_v14 = vshrl.u32 %v17943_v57, 16 }
 0x15d   : > { %16859 = vmatprep.subr.bf16.mxu1 %v19509_v46  ;;  %v2898_v45 = vsel %vm2862_vm5, %v2893_v10, %v2897_v52  ;;  %v2947_v10 = vshrl.u32 %v17961_v11, 16  ;;  %v3278_v51 = vor.u32 %v3276_v54, %v3274_v1 }
 0x15e   : > { %v2885_v50 = vor.u32 %v2883_v14, %v2881_v37  ;;  %v2939_v14 = vshrl.u32 %v19639_v9, 16 }
 0x15f   : > { %16788 = vmatmul.mubr.msk.bf16.gmra.mxu0 %vm895_vm4, %v14867_v3  ;;  %16804 = vmatmul.mubr.msk.bf16.gmra.mxu1 %vm895_vm4, %v14887_v44  ;;  %v3269_v3 = vrot.slane %v3267_v61, 1  ;;  %v2923_v44 = vshrl.u32 %v17954_v8, 16 }
 0x160   : > { %16831 = vmatprep.mubr.msk.bf16.mxu0 %vm895_vm4, %v2874_v62  ;;  %16807 = vmatprep.mubr.msk.bf16.mxu1 %vm895_vm4, %v14888_v38  ;;  %v2890_v48 = vsel %vm2862_vm5, %v2885_v50, %v2889_v49  ;;  %v3562_v38 = vld [vmem:[#allocation2 + $0xc] sm:$0x8]  ;;  %v2931_v62 = vshrl.u32 %v17957_v33, 16  ;;  %v2943_v49 = vshll.u32 %v17961_v11, 16  ;;  %v19669_v50 = vld [vmem:[#allocation2 + $0x7c] sm:$0xff]  }
 0x161   : > { %16860 = vmatpush3.bf16.msra.mxu1 %v19509_v46  ;;  %v2882_v46 = vsel %vm2862_vm5, %v2877_v28, %v2881_v37  ;;  %v3270_v37 = vor.u32 %v3269_v3, %v3265_v6  ;;  %v2925_v42 = vor.u32 %v2923_v44, %v2921_v17  ;;  %v19667_v28 = vld [vmem:[#allocation2 + $0x10] sm:$0xf]  ;;  %v3288_v8 = vshll.u32 %v19669_v50, 16 }
 0x162   : > { %16861 = vmatprep.subr.bf16.mxu1 %v19528_v43  ;;  %v2933_v4 = vor.u32 %v2931_v62, %v2929_v56 }
 0x163   : > { %v3290_v27 = vrot.slane %v3288_v8, 1 }
 0x164   : > { %v2938_v52 = vsel %vm2862_vm5, %v2933_v4, %v2937_v20  ;;  %v19714_v4 = vld [vmem:[#allocation2 + $0x2c] sm:$0xf] }
 0x165   : > { %16862 = vmatpush3.bf16.msra.mxu1 %v19528_v43  ;;  %v17952_v43 = vld [vmem:[#allocation2 + $0x34] sm:$0xff]  }
 0x166   : > { %16919 = vmatprep.subr.bf16.mxu1 %v19541_v19  ;;  %v2911_v22 = vshll.u32 %v17952_v43, 16  ;;  %v2915_v41 = vshrl.u32 %v17952_v43, 16  ;;  %v3275_v43 = vsel %vm2862_vm5, %v3270_v37, %v3274_v1 }
 0x167   : > { %16832 = vmatmul.mubr.msk.bf16.vlgmr.msra.gmra.mxu0 %vm895_vm4, %v2882_v46  ;;  %16808 = vmatmul.mubr.msk.bf16.gmra.mxu1 %vm895_vm4, %v14889_v25  ;;  %v14895_v25 = vcombine.low %v19495_v15, %v19517_v39  ;;  %v2930_v46 = vsel %vm2862_vm5, %v2925_v42, %v2929_v56  ;;  %v14978_v15 = vcombine.low %v3562_v38, %v19667_v28  ;;  %v2945_v39 = vrot.slane %v2943_v49, 1  ;;  %v19709_v38 = vld [vmem:[#allocation2 + $0x30] sm:$0xf] }
 0x168   : > { %16888 = vmatpush3.bf16.msra.mxu0 %v19541_v19  ;;  %16835 = vmatprep.mubr.msk.bf16.mxu0 %vm895_vm4, %v2890_v48  ;;  %v2913_v55 = vrot.slane %v2911_v22, 1  ;;  %v2951_v48 = vshll.u32 %v19662_v31, 16  ;;  %v17975_v22 = vld [vmem:[#allocation2 + $0x84] sm:$0xff]  }
 0x169   : > { %16811 = vmatprep.mubr.msk.bf16.mxu1 %vm895_vm4, %v14890_v35  ;;  %16889 = vmatprep.subr.bf16.mxu0 %v19602_v5  ;;  %v14979_v35 = vcombine.low %v19660_v60, %v19664_v23  ;;  %v3651_v33 = vshrl.u32 %v14978_v15, 16  ;;  %v3654_v9 = vshll.u32 %v14978_v15, 16  ;;  %v2949_v61 = vor.u32 %v2947_v10, %v2945_v39 }
 0x16a   : > { %v2917_v29 = vor.u32 %v2915_v41, %v2913_v55  ;;  %v2914_v57 = vsel %vm2862_vm5, %v2909_v24, %v2913_v55  ;;  %v2953_v55 = vrot.slane %v2951_v48, 1  ;;  %v19693_v41 = vld [vmem:[#allocation2 + $0x8c] sm:$0xff]   ;;  %v3284_v24 = vshrl.u32 %v17968_v30, 16 }
 0x16b   : > { %v3659_v16 = vshrl.u32 %v14979_v35, 16  ;;  %v3662_v18 = vshll.u32 %v14979_v35, 16  ;;  %v3304_v30 = vshll.u32 %v19693_v41, 16  ;;  %v3653_v56 = vrot.slane %v3651_v33, 3  ;;  %v19739_v33 = vld [vmem:[#allocation2 + $0x3c] sm:$0xf] }
 0x16c   : > { %16890 = vmatpush3.bf16.msra.mxu0 %v19602_v5  ;;  %v2922_v32 = vsel %vm2862_vm5, %v2917_v29, %v2921_v17  ;;  %v2959_v29 = vshll.u32 %v17967_v36, 16  ;;  %v2954_v11 = vsel %vm2862_vm5, %v2949_v61, %v2953_v55  ;;  %v3656_v6 = vrot.slane %v3654_v9, 4 }
 0x16d   : > { %16891 = vmatprep.subr.bf16.mxu0 %v19619_v2  ;;  %v3300_v1 = vshrl.u32 %v17975_v22, 16  ;;  %v3306_v48 = vrot.slane %v3304_v30, 1 }
 0x16e   : > { %v2961_v62 = vrot.slane %v2959_v29, 1  ;;  %v3657_v35 = vor.u32 %v3656_v6, %v3653_v56  ;;  %v3308_v29 = vshrl.u32 %v19693_v41, 16 }
 0x16f   : > { %16836 = vmatmul.mubr.msk.bf16.gmra.mxu0 %vm895_vm4, %v2898_v45  ;;  %16812 = vmatmul.mubr.msk.bf16.gmra.mxu1 %vm895_vm4, %v14891_v26  ;;  %v19687_v26 = vld [vmem:[#allocation2 + $0x24] sm:$0xf]  ;;  %v2941_v45 = vor.u32 %v2939_v14, %v2937_v20  ;;  %v3292_v14 = vshrl.u32 %v19669_v50, 16  ;;  %v14982_v50 = vcombine.low %v19714_v4, %v19709_v38 }
 0x170   : > { %16839 = vmatprep.mubr.msk.bf16.mxu0 %vm895_vm4, %v2906_v7  ;;  %16815 = vmatprep.mubr.msk.bf16.mxu1 %vm895_vm4, %v14892_v59  ;;  %v3282_v59 = vrot.slane %v3280_v63, 1  ;;  %v19689_v7 = vld [vmem:[#allocation2 + $0x1c] sm:$0xf]  ;;  %v14981_v3 = vcombine.low %v19687_v26, %v19691_v40  ;;  %v2957_v63 = vor.u32 %v2955_v58, %v2953_v55 }
 0x171   : > { %16892 = vmatpush3.bf16.msra.mxu0 %v19619_v2  ;;  %v2946_v17 = vsel %vm2862_vm5, %v2941_v45, %v2945_v39  ;;  %v19723_v39 = vld [vmem:[#allocation2 + $0x38] sm:$0xf]  ;;  %v3689_v61 = vshll.u32 %v14982_v50, 16 }
 0x172   : > { %16893 = vmatprep.subr.bf16.mxu0 %v19631_v0  ;;  %v3283_v12 = vsel %vm2862_vm5, %v3278_v51, %v3282_v59  ;;  %v3286_v53 = vor.u32 %v3284_v24, %v3282_v59  ;;  %v3677_v49 = vshrl.u32 %v14981_v3, 16  ;;  %v2962_v8 = vsel %vm2862_vm5, %v2957_v63, %v2961_v62  ;;  %v19741_v24 = vld [vmem:[#allocation2 + $0xa4] sm:$0xff]  }
 0x173   : > { %v3691_v6 = vrot.slane %v3689_v61, 4  ;;  %v3328_v62 = vshll.u32 %v19741_v24, 16 }
 0x174   : > { %v3291_v44 = vsel %vm2862_vm5, %v3286_v53, %v3290_v27  ;;  %v19750_v53 = vld [vmem:[#allocation2 + $0x48] sm:$0xf] }
 0x175   : > { %16894 = vmatpush3.bf16.msra.mxu0 %v19631_v0 }
 0x176   : > { %16951 = vmatprep.subr.bf16.mxu0 %v19644_v13 }
 0x177   : > { %16840 = vmatmul.mubr.msk.bf16.gmra.mxu0 %vm895_vm4, %v2914_v57  ;;  %16816 = vmatmul.mubr.msk.bf16.gmra.mxu1 %vm895_vm4, %v14893_v47  ;;  %v14980_v47 = vcombine.low %v19689_v7, %v19684_v34  ;;  %v3296_v57 = vshll.u32 %v17975_v22, 16 }
 0x178   : > { %16843 = vmatprep.mubr.msk.bf16.mxu0 %vm895_vm4, %v2922_v32  ;;  %16819 = vmatprep.mubr.msk.bf16.mxu1 %vm895_vm4, %v14894_v21  ;;  %v3661_v21 = vrot.slane %v3659_v16, 3  ;;  %v3664_v32 = vrot.slane %v3662_v18, 4  ;;  %v19734_v18 = vld [vmem:[#allocation2 + $0x40] sm:$0xf] }
 0x179   : > { %v3668_v20 = vshrl.u32 %v14980_v47, 16  ;;  %v3671_v37 = vshll.u32 %v14980_v47, 16  ;;  %v3298_v31 = vrot.slane %v3296_v57, 1  ;;  %v14984_v47 = vcombine.low %v19739_v33, %v19734_v18 }
 0x17a   : > { %v3665_v42 = vor.u32 %v3664_v32, %v3661_v21 }
 0x17b   : > { %v3670_v54 = vrot.slane %v3668_v20, 3  ;;  %v3673_v36 = vrot.slane %v3671_v37, 4  ;;  %v3302_v15 = vor.u32 %v3300_v1, %v3298_v31 }
 0x17c   : > { %v3666_v10 = vsel %vm1607_vm3, %v3657_v35, %v3665_v42  ;;  %v19775_v35 = vld [vmem:[#allocation2 + $0xb4] sm:$0xff]  }
 0x17d   : > { %v3307_v59 = vsel %vm2862_vm5, %v3302_v15, %v3306_v48  ;;  %v3674_v9 = vor.u32 %v3673_v36, %v3670_v54  ;;  %v3330_v54 = vrot.slane %v3328_v62, 1  ;;  %v19782_v36 = vld [vmem:[%s25264_s4 + $0x88] sm:$0xff]  }
 0x17e   : > { %v19784_v15 = vld [vmem:[#allocation2 + $0x4c] sm:$0xf] }
 0x17f   : > { %16844 = vmatmul.mubr.msk.bf16.gmra.mxu0 %vm895_vm4, %v2930_v46  ;;  %16820 = vmatmul.mubr.msk.bf16.gmra.mxu1 %vm895_vm4, %v14895_v25  ;;  %v19716_v25 = vld [vmem:[#allocation2 + $0x34] sm:$0xf]  ;;  %v3680_v46 = vshll.u32 %v14981_v3, 16  ;;  %v19752_v3 = vld [vmem:[#allocation2 + $0xac] sm:$0xff]   ;;  %v3675_v41 = vsel %vm1607_vm3, %v3665_v42, %v3674_v9 }
 0x180   : > { %16847 = vmatprep.mubr.msk.bf16.mxu0 %vm895_vm4, %v2938_v52  ;;  %16863 = vmatprep.mubr.msk.bf16.mxu1 %vm895_vm4, %v3275_v43  ;;  %v3294_v52 = vor.u32 %v3292_v14, %v3290_v27  ;;  %v19719_v43 = vld [vmem:[#allocation2 + $0x9c] sm:$0xff]   ;;  %v14983_v16 = vcombine.low %v19716_v25, %v19723_v39  ;;  %v19743_v27 = vld [vmem:[#allocation2 + $0x44] sm:$0xf]  ;;  %v3707_v14 = vshll.u32 %v14984_v47, 16 }
 0x181   : > { %v3682_v45 = vrot.slane %v3680_v46, 4  ;;  %v3320_v55 = vshll.u32 %v19719_v43, 16  ;;  %v19770_v46 = vld [vmem:[#allocation2 + $0x50] sm:$0xf] }
 0x182   : > { %v3299_v51 = vsel %vm2862_vm5, %v3294_v52, %v3298_v31  ;;  %v3695_v21 = vshrl.u32 %v14983_v16, 16  ;;  %v3698_v32 = vshll.u32 %v14983_v16, 16  ;;  %v3704_v31 = vshrl.u32 %v14984_v47, 16  ;;  %v19792_v16 = vld [vmem:[#allocation2 + $0x58] sm:$0xf] }
 0x183   : > { %v3322_v30 = vrot.slane %v3320_v55, 1  ;;  %v19794_v55 = vld [vmem:[#allocation2 + $0xbc] sm:$0xff]  }
 0x184   : > { %v3700_v1 = vrot.slane %v3698_v32, 4 }
 0x187   : > { %16848 = vmatmul.mubr.msk.bf16.gmra.mxu0 %vm895_vm4, %v2946_v17  ;;  %16864 = vmatmul.mubr.msk.bf16.vlgmr.msra.gmra.mxu1 %vm895_vm4, %v3283_v12  ;;  %v3686_v17 = vshrl.u32 %v14982_v50, 16  ;;  %v19786_v50 = vld [vmem:[#allocation2 + $0x54] sm:$0xf] }
 0x188   : > { %16851 = vmatprep.mubr.msk.bf16.mxu0 %vm895_vm4, %v2954_v11  ;;  %16920 = vmatpush3.bf16.msra.mxu1 %v19541_v19  ;;  %v17979_v19 = vld [vmem:[#allocation2 + $0x94] sm:$0xff]   ;;  %v3310_v11 = vor.u32 %v3308_v29, %v3306_v48  ;;  %v14987_v29 = vcombine.low %v19786_v50, %v19792_v16 }
 0x189   : > { %16867 = vmatprep.mubr.msk.bf16.mxu1 %vm895_vm4, %v3291_v44  ;;  %16921 = vmatprep.subr.bf16.mxu1 %v19602_v5  ;;  %v3312_v22 = vshll.u32 %v17979_v19, 16  ;;  %v3316_v58 = vshrl.u32 %v17979_v19, 16  ;;  %v3688_v56 = vrot.slane %v3686_v17, 3  ;;  %v19760_v44 = vld [vmem:[%s25264_s4 + $0x90] sm:$0xff]   ;;  %v3336_v19 = vshll.u32 %v19752_v3, 16 }
 0x18b   : > { %v3314_v12 = vrot.slane %v3312_v22, 1  ;;  %v3692_v52 = vor.u32 %v3691_v6, %v3688_v56  ;;  %v14986_v22 = vcombine.low %v19784_v15, %v19770_v46  ;;  %v3352_v6 = vshll.u32 %v19794_v55, 16 }
 0x18c   : > { %16922 = vmatpush3.bf16.msra.mxu1 %v19602_v5  ;;  %v3679_v5 = vrot.slane %v3677_v49, 3  ;;  %v3697_v49 = vrot.slane %v3695_v21, 3  ;;  %v19802_v21 = vld [vmem:[#allocation2 + $0x70] sm:$0xf] }
 0x18d   : > { %16923 = vmatprep.subr.bf16.mxu1 %v19619_v2  ;;  %v3315_v20 = vsel %vm2862_vm5, %v3310_v11, %v3314_v12  ;;  %v3318_v37 = vor.u32 %v3316_v58, %v3314_v12  ;;  %v3722_v58 = vshrl.u32 %v14986_v22, 16 }
 0x18e   : > { %v3683_v57 = vor.u32 %v3682_v45, %v3679_v5  ;;  %v3701_v5 = vor.u32 %v3700_v1, %v3697_v49  ;;  %v3332_v45 = vshrl.u32 %v19741_v24, 16  ;;  %v3344_v24 = vshll.u32 %v19775_v35, 16  ;;  %v19824_v1 = vld [vmem:[#allocation2 + $0x5c] sm:$0xf] }
 0x18f   : > { %16852 = vmatmul.mubr.msk.bf16.gmra.mxu0 %vm895_vm4, %v2962_v8  ;;  %16868 = vmatmul.mubr.msk.bf16.gmra.mxu1 %vm895_vm4, %v3299_v51  ;;  %v3706_v8 = vrot.slane %v3704_v31, 3  ;;  %v3324_v51 = vshrl.u32 %v19719_v43, 16  ;;  %v3979_v43 = vld [vmem:[#allocation2 + $0x6c] sm:$0x8]  ;;  %v3731_v31 = vshrl.u32 %v14987_v29, 16 }
 0x190   : > { %16895 = vmatprep.mubr.msk.bf16.mxu0 %vm895_vm4, %v3666_v10  ;;  %16871 = vmatprep.mubr.msk.bf16.mxu1 %vm895_vm4, %v3307_v59  ;;  %v3684_v42 = vsel %vm1607_vm3, %v3674_v9, %v3683_v57  ;;  %v3709_v10 = vrot.slane %v3707_v14, 4  ;;  %v3338_v59 = vrot.slane %v3336_v19, 1  ;;  %v3693_v12 = vsel %vm1607_vm3, %v3683_v57, %v3692_v52  ;;  %v19826_v19 = vld [vmem:[#allocation2 + $0x60] sm:$0xf] }
 0x191   : > { %16924 = vmatpush3.bf16.msra.mxu1 %v19619_v2  ;;  %v14985_v2 = vcombine.low %v19743_v27, %v19750_v53  ;;  %v3326_v9 = vor.u32 %v3324_v51, %v3322_v30  ;;  %v3334_v47 = vor.u32 %v3332_v45, %v3330_v54  ;;  %v3702_v57 = vsel %vm1607_vm3, %v3692_v52, %v3701_v5  ;;  %v19840_v45 = vld [vmem:[#allocation2 + $0x80] sm:$0xf] }
 0x192   : > { %16925 = vmatprep.subr.bf16.mxu1 %v19631_v0  ;;  %v3710_v32 = vor.u32 %v3709_v10, %v3706_v8  ;;  %v15007_v62 = vcombine.low %v3979_v43, %v19802_v21  ;;  %v3734_v14 = vshll.u32 %v14987_v29, 16  ;;  %v3346_v49 = vrot.slane %v3344_v24, 1  ;;  %v19831_v8 = vld [vmem:[#allocation2 + $0x64] sm:$0xf]  ;;  %v19837_v10 = vld [vmem:[%s25264_s4 + $0xb8] sm:$0xff]   ;;  %25385 = vst [vmem:[#allocation4_spill] sm:$0xff] %v19840_v45 }
 0x193   : > { %v3713_v48 = vshrl.u32 %v14985_v2, 16  ;;  %v3716_v63 = vshll.u32 %v14985_v2, 16  ;;  %v3331_v11 = vsel %vm2862_vm5, %v3326_v9, %v3330_v54  ;;  %v19805_v2 = vld [vmem:[#allocation2 + $0x74] sm:$0xf]  ;;  %v3339_v56 = vsel %vm2862_vm5, %v3334_v47, %v3338_v59  ;;  %v19845_v43 = vld [vmem:[#allocation2 + $0x68] sm:$0xf] }
 0x194   : > { %v3724_v52 = vrot.slane %v3722_v58, 3  ;;  %v3348_v51 = vshrl.u32 %v19775_v35, 16  ;;  %v4068_v9 = vshrl.u32 %v15007_v62, 16  ;;  %v14988_v29 = vcombine.low %v19824_v1, %v19826_v19  ;;  %25386 = vst [vmem:[#allocation5_spill] sm:$0xff] %v19845_v43  ;;  %v19849_v24 = vld [vmem:[#allocation2 + $0x7c] sm:$0xf] }
 0x195   : > { %16926 = vmatpush3.bf16.msra.mxu1 %v19631_v0  ;;  %v3323_v0 = vsel %vm2862_vm5, %v3318_v37, %v3322_v30  ;;  %v3715_v17 = vrot.slane %v3713_v48, 3  ;;  %v3718_v61 = vrot.slane %v3716_v63, 4  ;;  %v3725_v30 = vshll.u32 %v14986_v22, 16  ;;  %v19852_v58 = vld [vmem:[#allocation2 + $0x84] sm:$0xf] }
 0x196   : > { %16983 = vmatprep.subr.bf16.mxu1 %v19644_v13  ;;  %v3340_v37 = vshrl.u32 %v19752_v3, 16  ;;  %v3711_v63 = vsel %vm1607_vm3, %v3701_v5, %v3710_v32  ;;  %v3354_v22 = vrot.slane %v3352_v6, 1  ;;  %v14989_v47 = vcombine.low %v19831_v8, %v19845_v43 }
 0x197   : > { %16896 = vmatmul.mubr.msk.bf16.vlgmr.msra.gmra.mxu0 %vm895_vm4, %v3675_v41  ;;  %16872 = vmatmul.mubr.msk.bf16.gmra.mxu1 %vm895_vm4, %v3315_v20  ;;  %v19810_v41 = vld [vmem:[%s25264_s4 + $0x80] sm:$0xff]   ;;  %v3719_v20 = vor.u32 %v3718_v61, %v3715_v17  ;;  %v3727_v54 = vrot.slane %v3725_v30, 4  ;;  %v4071_v17 = vshll.u32 %v15007_v62, 16  ;;  %v3733_v61 = vrot.slane %v3731_v31, 3 }
 0x198   : > { %16952 = vmatpush3.bf16.msra.mxu0 %v19644_v13  ;;  %16899 = vmatprep.mubr.msk.bf16.mxu0 %vm895_vm4, %v3684_v42  ;;  %v19821_v42 = vld [vmem:[#allocation2 + $0x78] sm:$0xf]  ;;  %v3342_v3 = vor.u32 %v3340_v37, %v3338_v59  ;;  %v3736_v59 = vrot.slane %v3734_v14, 4  ;;  %v3356_v62 = vshrl.u32 %v19794_v55, 16  ;;  %v4070_v37 = vrot.slane %v4068_v9, 3 }
 0x199   : > { %16875 = vmatprep.mubr.msk.bf16.mxu1 %vm895_vm4, %v3323_v0  ;;  %16953 = vmatprep.subr.bf16.mxu0 %v19760_v44  ;;  %v17993_v0 = vld [vmem:[#allocation2 + $0xc4] ss:$0 sps:$4 sm:$0x11]   ;;  %v15008_v48 = vcombine.low %v19805_v2, %v19821_v42  ;;  %v3720_v5 = vsel %vm1607_vm3, %v3710_v32, %v3719_v20  ;;  %v3728_v32 = vor.u32 %v3727_v54, %v3724_v52  ;;  %v4073_v31 = vrot.slane %v4071_v17, 4  ;;  %v19862_v14 = vld [vmem:[#allocation2 + $0x88] sm:$0xf] }
 0x19a   : > { %v3347_v30 = vsel %vm2862_vm5, %v3342_v3, %v3346_v49  ;;  %25387 = vst [vmem:[#allocation6_spill] sm:$0xff] %v19862_v14  ;;  %v3749_v52 = vshrl.u32 %v14989_v47, 16  ;;  %v3752_v54 = vshll.u32 %v14989_v47, 16 }
 0x19b   : > { %v4076_v35 = vshrl.u32 %v15008_v48, 16  ;;  %v3729_v17 = vsel %vm1607_vm3, %v3719_v20, %v3728_v32  ;;  %v4074_v43 = vor.u32 %v4073_v31, %v4070_v37  ;;  %v19881_v31 = vld [vmem:[#allocation2 + $0x98] sm:$0xf] }
 0x19c   : > { %16954 = vmatpush3.bf16.msra.mxu0 %v19760_v44  ;;  %25390 = vst [vmem:[#allocation9_spill] sm:$0xff] %v19881_v31 }
 0x19d   : > { %16955 = vmatprep.subr.bf16.mxu0 %v19782_v36  ;;  %v4078_v3 = vrot.slane %v4076_v35, 3  ;;  %v3751_v35 = vrot.slane %v3749_v52, 3 }
 0x19f   : > { %16900 = vmatmul.mubr.msk.bf16.gmra.mxu0 %vm895_vm4, %v3693_v12  ;;  %16876 = vmatmul.mubr.msk.bf16.gmra.mxu1 %vm895_vm4, %v3331_v11  ;;  %v3350_v12 = vor.u32 %v3348_v51, %v3346_v49  ;;  %v4079_v11 = vshll.u32 %v15008_v48, 16  ;;  %v3737_v49 = vor.u32 %v3736_v59, %v3733_v61  ;;  %v3743_v48 = vshll.u32 %v14988_v29, 16  ;;  %v19871_v61 = vld [vmem:[#allocation2 + $0x90] sm:$0xf] }
 0x1a0   : > { %16903 = vmatprep.mubr.msk.bf16.mxu0 %vm895_vm4, %v3702_v57  ;;  %16879 = vmatprep.mubr.msk.bf16.mxu1 %vm895_vm4, %v3339_v56  ;;  %v3360_v57 = vshll.u32 %v17993_v0, 16  ;;  %v15009_v56 = vcombine.low %v19849_v24, %v19840_v45  ;;  %v3740_v0 = vshrl.u32 %v14988_v29, 16  ;;  %25388 = vst [vmem:[#allocation7_spill] sm:$0xff] %v19871_v61 }
 0x1a1   : > { %16956 = vmatpush3.bf16.msra.mxu0 %v19782_v36  ;;  %v3355_v6 = vsel %vm2862_vm5, %v3350_v12, %v3354_v22  ;;  %v4081_v51 = vrot.slane %v4079_v11, 4  ;;  %v3745_v29 = vrot.slane %v3743_v48, 4  ;;  %v3738_v47 = vsel %vm1607_vm3, %v3728_v32, %v3737_v49 }
 0x1a2   : > { %16957 = vmatprep.subr.bf16.mxu0 %v19810_v41  ;;  %v3362_v12 = vrot.slane %v3360_v57, 1  ;;  %v4085_v55 = vshrl.u32 %v15009_v56, 16  ;;  %v4088_v9 = vshll.u32 %v15009_v56, 16  ;;  %v3742_v59 = vrot.slane %v3740_v0, 3  ;;  %v19876_v56 = vld [vmem:[#allocation2 + $0x8c] sm:$0xf] }
 0x1a3   : > { %v3754_v11 = vrot.slane %v3752_v54, 4  ;;  %v4082_v57 = vor.u32 %v4081_v51, %v4078_v3  ;;  %v15011_v37 = vcombine.low %v19876_v56, %v19871_v61 }
 0x1a4   : > { %v3746_v54 = vor.u32 %v3745_v29, %v3742_v59 }
 0x1a5   : > { %16958 = vmatpush3.bf16.msra.mxu0 %v19810_v41  ;;  %v4083_v32 = vsel %vm1607_vm3, %v4074_v43, %v4082_v57  ;;  %v3755_v3 = vor.u32 %v3754_v11, %v3751_v35 }
 0x1a6   : > { %17015 = vmatprep.subr.bf16.mxu0 %v19837_v10 }
 0x1a7   : > { %16904 = vmatmul.mubr.msk.bf16.gmra.mxu0 %vm895_vm4, %v3711_v63  ;;  %16880 = vmatmul.mubr.msk.bf16.gmra.mxu1 %vm895_vm4, %v3347_v30  ;;  %v15010_v63 = vcombine.low %v19852_v58, %v19862_v14  ;;  %v3358_v30 = vor.u32 %v3356_v62, %v3354_v22  ;;  %v19873_v14 = vld [vmem:[#allocation2 + $0x94] sm:$0xf]  ;;  %v4087_v22 = vrot.slane %v4085_v55, 3  ;;  %v4090_v62 = vrot.slane %v4088_v9, 4 }
 0x1a8   : > { %16907 = vmatprep.mubr.msk.bf16.mxu0 %vm895_vm4, %v3720_v5  ;;  %16883 = vmatprep.mubr.msk.bf16.mxu1 %vm895_vm4, %v3355_v6  ;;  %v19869_v5 = vld [vmem:[#allocation2 + $0x6c] sm:$0xf]  ;;  %25389 = vst [vmem:[#allocation8_spill] sm:$0xff] %v19873_v14  ;;  %v15012_v48 = vcombine.low %v19873_v14, %v19881_v31  ;;  %v4106_v55 = vshll.u32 %v15011_v37, 16  ;;  %v3747_v31 = vsel %vm1607_vm3, %v3737_v49, %v3746_v54  ;;  %v19896_v14 = vld [vmem:[#allocation2 + $0x9c] sm:$0xf] }
 0x1a9   : > { %v4094_v6 = vshrl.u32 %v15010_v63, 16  ;;  %v4097_v45 = vshll.u32 %v15010_v63, 16  ;;  %v3363_v20 = vsel %vm2862_vm5, %v3358_v30, %v3362_v12  ;;  %v14990_v0 = vcombine.low %v19869_v5, %v19869_v5 }
 0x1aa   : > { %v4091_v51 = vor.u32 %v4090_v62, %v4087_v22  ;;  %v4103_v12 = vshrl.u32 %v15011_v37, 16  ;;  %v4112_v43 = vshrl.u32 %v15012_v48, 16  ;;  %v4115_v30 = vshll.u32 %v15012_v48, 16  ;;  %v19905_v37 = vld [vmem:[#allocation2 + $0xa8] sm:$0xf] }
 0x1ab   : > { %v4096_v63 = vrot.slane %v4094_v6, 3  ;;  %v4099_v52 = vrot.slane %v4097_v45, 4  ;;  %v3758_v9 = vshrl.u32 %v14990_v0, 16  ;;  %v19898_v6 = vld [vmem:[#allocation2 + $0xa4] sm:$0xf]  ;;  %v4108_v29 = vrot.slane %v4106_v55, 4 }
 0x1ac   : > { %v4092_v45 = vsel %vm1607_vm3, %v4082_v57, %v4091_v51  ;;  %v4105_v59 = vrot.slane %v4103_v12, 3  ;;  %v4114_v49 = vrot.slane %v4112_v43, 3  ;;  %v4117_v62 = vrot.slane %v4115_v30, 4  ;;  %v19917_v55 = vld [vmem:[#allocation2 + $0xb4] sm:$0xf] }
 0x1ad   : > { %v4100_v61 = vor.u32 %v4099_v52, %v4096_v63  ;;  %v3760_v11 = vrot.slane %v3758_v9, 3  ;;  %v15040_v9 = vcombine.low %v19667_v28, %v19660_v60 }
 0x1ae   : > { %v4118_v52 = vor.u32 %v4117_v62, %v4114_v49 }
 0x1af   : > { %16908 = vmatmul.mubr.msk.bf16.gmra.mxu0 %vm895_vm4, %v3729_v17  ;;  %16884 = vmatmul.mubr.msk.bf16.gmra.mxu1 %vm895_vm4, %v3363_v20  ;;  %v3761_v17 = vshll.u32 %v14990_v0, 16  ;;  %v19892_v20 = vld [vmem:[#allocation2 + $0xa0] sm:$0xf]  ;;  %v4101_v57 = vsel %vm1607_vm3, %v4091_v51, %v4100_v61 }
 0x1b0   : > { %16911 = vmatprep.mubr.msk.bf16.mxu0 %vm895_vm4, %v3738_v47  ;;  %16927 = vmatprep.mubr.msk.bf16.mxu1 %vm895_vm4, %v4083_v32  ;;  %v3756_v47 = vsel %vm1607_vm3, %v3746_v54, %v3755_v3  ;;  %v15013_v35 = vcombine.low %v19896_v14, %v19892_v20  ;;  %v15014_v32 = vcombine.low %v19898_v6, %v19905_v37  ;;  %v19914_v54 = vld [vmem:[#allocation2 + $0xb0] sm:$0xf] }
 0x1b1   : > { %v3763_v22 = vrot.slane %v3761_v17, 4  ;;  %v19923_v17 = vld [vmem:[#allocation2 + $0xac] sm:$0xf] }
 0x1b2   : > { %v4121_v0 = vshrl.u32 %v15013_v35, 16  ;;  %v4124_v48 = vshll.u32 %v15013_v35, 16  ;;  %v4130_v12 = vshrl.u32 %v15014_v32, 16 }
 0x1b3   : > { %v3764_v63 = vor.u32 %v3763_v22, %v3760_v11 }
 0x1b5   : > { %v3765_v51 = vsel %vm1607_vm3, %v3755_v3, %v3764_v63  ;;  %v19956_v63 = vld [vmem:[%s25264_s4 + $0xb0] sm:$0xff]  }
 0x1b7   : > { %16912 = vmatmul.mubr.msk.bf16.gmra.mxu0 %vm895_vm4, %v3747_v31  ;;  %16928 = vmatmul.mubr.msk.bf16.vlgmr.msra.gmra.mxu1 %vm895_vm4, %v4092_v45  ;;  %v4109_v31 = vor.u32 %v4108_v29, %v4105_v59  ;;  %v4126_v45 = vrot.slane %v4124_v48, 4  ;;  %v19930_v59 = vld [vmem:[#allocation2 + $0xb8] sm:$0xf]  ;;  %v15041_v48 = vcombine.low %v19664_v23, %v19689_v7  ;;  %v19964_v23 = vld [vmem:[#allocation2 + $0xc8] sm:$0xf] }
 0x1b8   : > { %16915 = vmatprep.mubr.msk.bf16.mxu0 %vm895_vm4, %v3756_v47  ;;  %16984 = vmatpush3.bf16.msra.mxu1 %v19644_v13  ;;  %v4133_v13 = vshll.u32 %v15014_v32, 16  ;;  %v4123_v47 = vrot.slane %v4121_v0, 3  ;;  %v15016_v28 = vcombine.low %v19917_v55, %v19930_v59  ;;  %v19947_v0 = vld [vmem:[#allocation2 + $0xc4] sm:$0xf] }
 0x1b9   : > { %16931 = vmatprep.mubr.msk.bf16.mxu1 %vm895_vm4, %v4101_v57  ;;  %16985 = vmatprep.subr.bf16.mxu1 %v19760_v44  ;;  %v4110_v30 = vsel %vm1607_vm3, %v4100_v61, %v4109_v31  ;;  %v4119_v60 = vsel %vm1607_vm3, %v4109_v31, %v4118_v52  ;;  %v4132_v61 = vrot.slane %v4130_v12, 3  ;;  %v19943_v57 = vld [vmem:[#allocation2 + $0xc0] sm:$0xf]  ;;  %v19958_v12 = vld [vmem:[#allocation2 + $0xbc] sm:$0xf]  ;;  %v15018_v7 = vcombine.low %v19947_v0, %v19964_v23 }
 0x1ba   : > { %v4135_v29 = vrot.slane %v4133_v13, 4  ;;  %v4127_v35 = vor.u32 %v4126_v45, %v4123_v47  ;;  %v4148_v49 = vshrl.u32 %v15016_v28, 16  ;;  %v4151_v62 = vshll.u32 %v15016_v28, 16  ;;  %v19981_v47 = vld [vmem:[%s25264_s4 + $0xa8] sm:$0xff]  }
 0x1bc   : > { %16986 = vmatpush3.bf16.msra.mxu1 %v19760_v44  ;;  %v19925_v43 = vpop.f32.mrf.mxu0  ;;  %v15015_v44 = vcombine.low %v19923_v17, %v19914_v54  ;;  %v4136_v31 = vor.u32 %v4135_v29, %v4132_v61  ;;  %v4128_v13 = vsel %vm1607_vm3, %v4118_v52, %v4127_v35  ;;  %v4166_v61 = vshrl.u32 %v15018_v7, 16 }
 0x1bd   : > { %16987 = vmatprep.subr.bf16.mxu1 %v19782_v36  ;;  %v4169_v29 = vshll.u32 %v15018_v7, 16 }
 0x1be   : > { %v19938_v3 = vpop.f32.mrf.mxu0  ;;  %v4139_v11 = vshrl.u32 %v15015_v44, 16  ;;  %v4142_v22 = vshll.u32 %v15015_v44, 16  ;;  %v4137_v52 = vsel %vm1607_vm3, %v4127_v35, %v4136_v31  ;;  %v15043_v35 = vcombine.low %v19691_v40, %v19714_v4 }
 0x1bf   : > { %16916 = vmatmul.mubr.msk.bf16.gmra.mxu0 %vm895_vm4, %v3765_v51  ;;  %16932 = vmatmul.mubr.msk.bf16.gmra.mxu1 %vm895_vm4, %v4110_v30  ;;  %v15017_v30 = vcombine.low %v19958_v12, %v19943_v57  ;;  %v4168_v4 = vrot.slane %v4166_v61, 3 }
 0x1c0   : > { %16959 = vmatprep.mubr.msk.bf16.mxu0 %vm895_vm4, %v15040_v9  ;;  %16935 = vmatprep.mubr.msk.bf16.mxu1 %vm895_vm4, %v4119_v60  ;;  %v19945_v32 = vpop.f32.mrf.mxu0  ;;  %v4141_v51 = vrot.slane %v4139_v11, 3  ;;  %v4144_v9 = vrot.slane %v4142_v22, 4  ;;  %v19989_v22 = vld [vmem:[#allocation2 + $0xcc] sm:$0xf] }
 0x1c1   : > { %16988 = vmatpush3.bf16.msra.mxu1 %v19782_v36  ;;  %v15042_v36 = vcombine.low %v19684_v34, %v19687_v26  ;;  %v4150_v34 = vrot.slane %v4148_v49, 3  ;;  %v4153_v26 = vrot.slane %v4151_v62, 4  ;;  %v4157_v44 = vshrl.u32 %v15017_v30, 16 }
 0x1c2   : > { %16989 = vmatprep.subr.bf16.mxu1 %v19810_v41  ;;  %v4145_v45 = vor.u32 %v4144_v9, %v4141_v51  ;;  %v4160_v60 = vshll.u32 %v15017_v30, 16  ;;  %v15044_v49 = vcombine.low %v19709_v38, %v19716_v25  ;;  %v19999_v51 = vld [vmem:[%s25264_s4 + $0xa0] sm:$0xff]   ;;  %v4171_v9 = vrot.slane %v4169_v29, 4  ;;  %v20015_v30 = vld [vmem:[%s25264_s4 + $0xd8] sm:$0xff]  }
 0x1c3   : > { %v4154_v28 = vor.u32 %v4153_v26, %v4150_v34  ;;  %v15019_v25 = vcombine.low %v19989_v22, %v19989_v22 }
 0x1c4   : > { %v4172_v26 = vor.u32 %v4171_v9, %v4168_v4  ;;  %v18027_v4 = vld [vmem:[#allocation2 + $0x10] sm:$0xff]   ;;  %v18028_v9 = vld [vmem:[#allocation2 + $0x18] sm:$0xff]  }
 0x1c5   : > { %16990 = vmatpush3.bf16.msra.mxu1 %v19810_v41  ;;  %v19973_v41 = vpop.f32.mrf.mxu0  ;;  %v4155_v40 = vsel %vm1607_vm3, %v4145_v45, %v4154_v28  ;;  %v4175_v7 = vshrl.u32 %v15019_v25, 16 }
 0x1c6   : > { %17047 = vmatprep.subr.bf16.mxu1 %v19837_v10 }
 0x1c7   : > { %16960 = vmatmul.mubr.msk.bf16.vlgmr.msra.gmra.mxu0 %vm895_vm4, %v15041_v48  ;;  %16936 = vmatmul.mubr.msk.bf16.gmra.mxu1 %vm895_vm4, %v4128_v13  ;;  %v4146_v48 = vsel %vm1607_vm3, %v4136_v31, %v4145_v45  ;;  %v4162_v13 = vrot.slane %v4160_v60, 4  ;;  %v15045_v45 = vcombine.low %v19723_v39, %v19739_v33  ;;  %v4177_v39 = vrot.slane %v4175_v7, 3 }
 0x1c8   : > { %17016 = vmatpush3.bf16.msra.mxu0 %v19837_v10  ;;  %16963 = vmatprep.mubr.msk.bf16.mxu0 %vm895_vm4, %v15042_v36  ;;  %v4159_v36 = vrot.slane %v4157_v44, 3  ;;  %v15046_v44 = vcombine.low %v19734_v18, %v19743_v27 }
 0x1c9   : > { %16939 = vmatprep.mubr.msk.bf16.mxu1 %vm895_vm4, %v4137_v52  ;;  %17017 = vmatprep.subr.bf16.mxu0 %v19956_v63  ;;  %v4178_v52 = vshll.u32 %v15019_v25, 16  ;;  %v18035_v25 = vld [vmem:[#allocation2 + $0x30] sm:$0xff]  }
 0x1ca   : > { %v4163_v31 = vor.u32 %v4162_v13, %v4159_v36  ;;  %v15068_v13 = vcombine.low %v19802_v21, %v19805_v2  ;;  %v15069_v21 = vcombine.low %v19821_v42, %v19849_v24  ;;  %v25391_v24 = vld [vmem:[#allocation4_spill] sm:$0xff] }
 0x1cb   : > { %v4180_v33 = vrot.slane %v4178_v52, 4  ;;  %v20064_v52 = vld [vmem:[#allocation2 + $0x28] sm:$0xff]  }
 0x1cc   : > { %v19983_v11 = vpop.f32.mrf.mxu0  ;;  %17018 = vmatpush3.bf16.msra.mxu0 %v19956_v63  ;;  %v4164_v60 = vsel %vm1607_vm3, %v4154_v28, %v4163_v31  ;;  %v4173_v29 = vsel %vm1607_vm3, %v4163_v31, %v4172_v26  ;;  %v15049_v31 = vcombine.low %v19792_v16, %v19824_v1  ;;  %v4912_v16 = vshll.u32 %v18028_v9, 16 }
 0x1cd   : > { %17019 = vmatprep.subr.bf16.mxu0 %v19981_v47  ;;  %v4181_v27 = vor.u32 %v4180_v33, %v4177_v39  ;;  %v4936_v1 = vshll.u32 %v18035_v25, 16  ;;  %v20082_v39 = vld [vmem:[#allocation2 + $0x38] sm:$0xff]   ;;  %v20084_v33 = vld [vmem:[#allocation2 + $0x40] sm:$0xff]  }
 0x1ce   : > { %v19993_v62 = vpop.f32.mrf.mxu0 }
 0x1cf   : > { %16964 = vmatmul.mubr.msk.bf16.gmra.mxu0 %vm895_vm4, %v15043_v35  ;;  %16940 = vmatmul.mubr.msk.bf16.gmra.mxu1 %vm895_vm4, %v4146_v48  ;;  %v15048_v48 = vcombine.low %v19770_v46, %v19786_v50  ;;  %v4182_v36 = vsel %vm1607_vm3, %v4172_v26, %v4181_v27  ;;  %v4907_v50 = vshll.u32 %v18027_v4, 16  ;;  %v15050_v26 = vcombine.low %v19826_v19, %v19831_v8 }
 0x1d0   : > { %16967 = vmatprep.mubr.msk.bf16.mxu0 %vm895_vm4, %v15044_v49  ;;  %v20005_v38 = vpop.f32.mrf.mxu0  ;;  %16943 = vmatprep.mubr.msk.bf16.mxu1 %vm895_vm4, %v4155_v40  ;;  %v15047_v49 = vcombine.low %v19750_v53, %v19784_v15  ;;  %v18031_v15 = vld [vmem:[#allocation2 + $0x20] sm:$0xff]   ;;  %v4905_v8 = vshrl.u32 %v18027_v4, 16  ;;  %v4928_v27 = vshll.u32 %v20064_v52, 16 }
 0x1d1   : > { %17020 = vmatpush3.bf16.msra.mxu0 %v19981_v47  ;;  %v4920_v7 = vshll.u32 %v18031_v15, 16  ;;  %v4909_v42 = vrot.slane %v4907_v50, 1  ;;  %v4914_v50 = vrot.slane %v4912_v16, 1 }
 0x1d2   : > { %17021 = vmatprep.subr.bf16.mxu0 %v19999_v51  ;;  %v20017_v34 = vpop.f32.mrf.mxu0  ;;  %v4930_v16 = vrot.slane %v4928_v27, 1  ;;  %v4932_v27 = vshrl.u32 %v20064_v52, 16 }
 0x1d5   : > { %17022 = vmatpush3.bf16.msra.mxu0 %v19999_v51 }
 0x1d6   : > { %17079 = vmatprep.subr.bf16.mxu0 %v20015_v30 }
 0x1d7   : > { %v20026_v61 = vpop.f32.mrf.mxu0  ;;  %16968 = vmatmul.mubr.msk.bf16.gmra.mxu0 %vm895_vm4, %v15045_v45  ;;  %16944 = vmatmul.mubr.msk.bf16.gmra.mxu1 %vm895_vm4, %v4164_v60  ;;  %v15070_v60 = vcombine.low %v25391_v24, %v19852_v58  ;;  %v4922_v58 = vrot.slane %v4920_v7, 1  ;;  %v4916_v7 = vshrl.u32 %v18028_v9, 16 }
 0x1d8   : > { %16971 = vmatprep.mubr.msk.bf16.mxu0 %vm895_vm4, %v15046_v44  ;;  %16947 = vmatprep.mubr.msk.bf16.mxu1 %vm895_vm4, %v4173_v29 }
 0x1d9   : > { %v20033_v35 = vpop.f32.mrf.mxu0 }
 0x1db   : > { %v20035_v18 = vpop.f32.mrf.mxu0 }
 0x1dd   : > { %v20037_v28 = vpop.f32.mrf.mxu0 }
 0x1df   : > { %v20046_v40 = vpop.f32.mrf.mxu0  ;;  %16972 = vmatmul.mubr.msk.bf16.gmra.mxu0 %vm895_vm4, %v15047_v49  ;;  %16948 = vmatmul.mubr.msk.bf16.gmra.mxu1 %vm895_vm4, %v4182_v36  ;;  %v20091_v36 = vld [vmem:[#allocation2 + $0x48] sm:$0xff]  }
 0x1e0   : > { %16975 = vmatprep.mubr.msk.bf16.mxu0 %vm895_vm4, %v15048_v48  ;;  %16991 = vmatprep.mubr.msk.bf16.mxu1 %vm895_vm4, %v15068_v13  ;;  %v25394_v13 = vld [vmem:[#allocation5_spill] sm:$0xff] }
 0x1e1   : > { %v20052_v53 = vpop.f32.mrf.mxu0  ;;  %v15051_v4 = vcombine.low %v25394_v13, %v19869_v5  ;;  %v20105_v5 = vld [vmem:[#allocation2 + $0x50] sm:$0xff]  }
 0x1e3   : > { %v20054_v46 = vpop.f32.mrf.mxu0 }
 0x1e5   : > { %v20058_v2 = vpop.f32.mrf.mxu0 }
 0x1e7   : > { %v20066_v45 = vpop.f32.mrf.mxu0  ;;  %16976 = vmatmul.mubr.msk.bf16.gmra.mxu0 %vm895_vm4, %v15049_v31  ;;  %v20069_v44 = vpop.f32.mrf.mxu1  ;;  %16992 = vmatmul.mubr.msk.bf16.vlgmr.msra.gmra.mxu1 %vm895_vm4, %v15069_v21  ;;  %v4924_v21 = vshrl.u32 %v18031_v15, 16  ;;  %v4938_v31 = vrot.slane %v4936_v1, 1  ;;  %v25399_v1 = vld [vmem:[#allocation7_spill] sm:$0xff] }
 0x1e8   : > { %16979 = vmatprep.mubr.msk.bf16.mxu0 %vm895_vm4, %v15050_v26  ;;  %17048 = vmatpush3.bf16.msra.mxu1 %v19837_v10  ;;  %v4910_v10 = vor.u32 %v4909_v42, %v4905_v8  ;;  %v4944_v8 = vshll.u32 %v20082_v39, 16 }
 0x1e9   : > { %v20076_v19 = vpop.f32.mrf.mxu0  ;;  %16995 = vmatprep.mubr.msk.bf16.mxu1 %vm895_vm4, %v15070_v60  ;;  %v20079_v29 = vpop.f32.mrf.mxu1  ;;  %17049 = vmatprep.subr.bf16.mxu1 %v19956_v63  ;;  %v25397_v60 = vld [vmem:[#allocation6_spill] sm:$0xff]  ;;  %v4926_v15 = vor.u32 %v4924_v21, %v4922_v58  ;;  %v4918_v21 = vor.u32 %v4916_v7, %v4914_v50  ;;  %v20130_v7 = vld [vmem:[#allocation2 + $0x60] sm:$0xff]  }
 0x1ea   : > { %v15071_v42 = vcombine.low %v25397_v60, %v19876_v56  ;;  %v4915_v56 = vsel %vm2862_vm5, %v4910_v10, %v4914_v50  ;;  %v25403_v10 = vld [vmem:[#allocation9_spill] sm:$0xff]  ;;  %v4968_v50 = vshll.u32 %v20105_v5, 16 }
 0x1eb   : > { %v20087_v49 = vpop.f32.mrf.mxu0  ;;  %v20089_v48 = vpop.f32.mrf.mxu1  ;;  %v4923_v52 = vsel %vm2862_vm5, %v4918_v21, %v4922_v58  ;;  %v4956_v58 = vshrl.u32 %v20084_v33, 16 }
 0x1ec   : > { %25392 = vst [vmem:[#allocation4_spill] sm:$0xff] %v20087_v49  ;;  %25393 = vst [vmem:[#allocation10_spill] sm:$0xff] %v20089_v48  ;;  %17050 = vmatpush3.bf16.msra.mxu1 %v19956_v63  ;;  %v4952_v48 = vshll.u32 %v20084_v33, 16  ;;  %v25398_v63 = vld [vmem:[#allocation8_spill] sm:$0xff]  ;;  %v20117_v49 = vld [vmem:[#allocation2 + $0x58] sm:$0xff]  }
 0x1ed   : > { %v20096_v26 = vpop.f32.mrf.mxu0  ;;  %v20098_v24 = vpop.f32.mrf.mxu1  ;;  %17051 = vmatprep.subr.bf16.mxu1 %v19981_v47  ;;  %v15072_v13 = vcombine.low %v25399_v1, %v25398_v63  ;;  %v15073_v1 = vcombine.low %v25403_v10, %v19896_v14  ;;  %v20139_v14 = vld [vmem:[%s25265_s5] ss:$0 sm:$0xff]  ;;  %v20167_v33 = vld [vmem:[%s25264_s4 + $0xd0] sm:$0xff]   ;;  %v20188_v10 = vld [vmem:[#allocation2 + $0x78] sm:$0xff]  }
 0x1ee   : > { %25395 = vst [vmem:[#allocation5_spill] sm:$0xff] %v20096_v26  ;;  %25396 = vst [vmem:[#allocation11_spill] sm:$0xff] %v20098_v24  ;;  %v4940_v26 = vshrl.u32 %v18035_v25, 16  ;;  %v4960_v24 = vshll.u32 %v20091_v36, 16 }
 0x1ef   : > { %v20109_v9 = vpop.f32.mrf.mxu0  ;;  %16980 = vmatmul.mubr.msk.bf16.gmra.mxu0 %vm895_vm4, %v15051_v4  ;;  %v20113_v60 = vpop.f32.mrf.mxu1  ;;  %16996 = vmatmul.mubr.msk.bf16.gmra.mxu1 %vm895_vm4, %v15071_v42  ;;  %v4946_v42 = vrot.slane %v4944_v8, 1  ;;  %v15074_v8 = vcombine.low %v19892_v20, %v19898_v6 }
 0x1f0   : > { %25400 = vst [vmem:[#allocation6_spill] sm:$0xff] %v20113_v60  ;;  %17023 = vmatprep.mubr.msk.bf16.mxu0 %vm895_vm4, %v4915_v56  ;;  %16999 = vmatprep.mubr.msk.bf16.mxu1 %vm895_vm4, %v15072_v13  ;;  %v4942_v25 = vor.u32 %v4940_v26, %v4938_v31  ;;  %v4954_v60 = vrot.slane %v4952_v48, 1  ;;  %v4931_v13 = vsel %vm2862_vm5, %v4926_v15, %v4930_v16  ;;  %v4948_v56 = vshrl.u32 %v20082_v39, 16  ;;  %v20149_v39 = vld [vmem:[#allocation2 + $0x70] sm:$0xff]  }
 0x1f1   : > { %v20122_v63 = vpop.f32.mrf.mxu0  ;;  %v20124_v4 = vpop.f32.mrf.mxu1  ;;  %17052 = vmatpush3.bf16.msra.mxu1 %v19981_v47  ;;  %v4934_v26 = vor.u32 %v4932_v27, %v4930_v16  ;;  %v4962_v15 = vrot.slane %v4960_v24, 1  ;;  %v4976_v16 = vshll.u32 %v20117_v49, 16  ;;  %v4970_v24 = vrot.slane %v4968_v50, 1 }
 0x1f2   : > { %25401 = vst [vmem:[#allocation8_spill] sm:$0xff] %v20122_v63  ;;  %25402 = vst [vmem:[#allocation7_spill] sm:$0xff] %v20124_v4  ;;  %17053 = vmatprep.subr.bf16.mxu1 %v19999_v51  ;;  %v20155_v27 = vsel %vm2862_vm5, %v4942_v25, %v4946_v42  ;;  %v4950_v6 = vor.u32 %v4948_v56, %v4946_v42  ;;  %v4984_v25 = vshll.u32 %v20130_v7, 16  ;;  %v4972_v56 = vshrl.u32 %v20105_v5, 16 }
 0x1f3   : > { %v20141_v48 = vpop.f32.mrf.mxu0  ;;  %v20143_v47 = vpop.f32.mrf.mxu1  ;;  %v20152_v21 = vsel %vm2862_vm5, %v4934_v26, %v4938_v31  ;;  %v4958_v31 = vor.u32 %v4956_v58, %v4954_v60  ;;  %v20171_v26 = vld [vmem:[#allocation2 + $0x68] sm:$0xff]   ;;  %v5308_v42 = vshll.u32 %v20149_v39, 16  ;;  %v1913_v5 = vadd.f32 %v20139_v14, %v19938_v3 }
 0x1f4   : > { %25404 = vst [vmem:[#allocation9_spill] sm:$0xff] %v20141_v48  ;;  %25405 = vst [vmem:[#allocation12_spill] sm:$0xff] %v20143_v47  ;;  %v4964_v47 = vshrl.u32 %v20091_v36, 16  ;;  %v1915_v36 = vadd.f32 %v19925_v43, %v20139_v14  ;;  %v20186_v58 = vsel %vm2862_vm5, %v4950_v6, %v4954_v60  ;;  %v4992_v6 = vshll.u32 %v20171_v26, 16  ;;  %v5604_v60 = vld [vmem:[#allocation2 + $0x1c] sm:$0xf] }
 0x1f5   : > { %v20160_v48 = vpop.f32.mrf.mxu0  ;;  %v20162_v20 = vpop.f32.mrf.mxu1  ;;  %17054 = vmatpush3.bf16.msra.mxu1 %v19999_v51  ;;  %v20205_v3 = vsel %vm2862_vm5, %v4958_v31, %v4962_v15  ;;  %v20220_v31 = vld [vmem:[#allocation2 + $0x70] ss:$0 sps:$4 sm:$0x11]  }
 0x1f6   : > { %25406 = vst [vmem:[#allocation13_spill] sm:$0xff] %v20160_v48  ;;  %25407 = vst [vmem:[#allocation14_spill] sm:$0xff] %v20162_v20  ;;  %17111 = vmatprep.subr.bf16.mxu1 %v20015_v30  ;;  %v4966_v43 = vor.u32 %v4964_v47, %v4962_v15  ;;  %v4978_v20 = vrot.slane %v4976_v16, 1  ;;  %v20210_v16 = vld [vmem:[%s25264_s4 + $0xc8] sm:$0xff]   ;;  %v4988_v15 = vshrl.u32 %v20130_v7, 16  ;;  %v4994_v63 = vrot.slane %v4992_v6, 1 }
 0x1f7   : > { %v16769_v50 = vpop.f32.mrf.mxu0  ;;  %17024 = vmatmul.mubr.msk.bf16.vlgmr.msra.gmra.mxu0 %vm895_vm4, %v4923_v52  ;;  %v20182_v51 = vpop.f32.mrf.mxu1  ;;  %17000 = vmatmul.mubr.msk.bf16.gmra.mxu1 %vm895_vm4, %v15073_v1  ;;  %v4980_v1 = vshrl.u32 %v20117_v49, 16  ;;  %v4986_v49 = vrot.slane %v4984_v25, 1 }
 0x1f8   : > { %25408 = vst [vmem:[#allocation15_spill] sm:$0xff] %v20182_v51  ;;  %v20193_v48 = vadd.f32 %v16769_v50, %v1915_v36  ;;  %17080 = vmatpush3.bf16.msra.mxu0 %v20015_v30  ;;  %17027 = vmatprep.mubr.msk.bf16.mxu0 %vm895_vm4, %v4931_v13  ;;  %v4974_v13 = vor.u32 %v4972_v56, %v4970_v24  ;;  %v5310_v51 = vrot.slane %v5308_v42, 1 }
 0x1f9   : > { %v2445_v52 = vpop.f32.mrf.mxu0  ;;  %17003 = vmatprep.mubr.msk.bf16.mxu1 %vm895_vm4, %v15074_v8  ;;  %v20201_v47 = vpop.f32.mrf.mxu1  ;;  %17081 = vmatprep.subr.bf16.mxu0 %v20167_v33  ;;  %v1916_v36 = vadd.f32 %v19945_v32, %v20139_v14  ;;  %v20225_v25 = vsel %vm2862_vm5, %v4966_v43, %v4970_v24  ;;  %v4982_v56 = vor.u32 %v4980_v1, %v4978_v20  ;;  %v5313_v32 = vshll.u32 %v20188_v10, 16  ;;  %v5603_v24 = vld [vmem:[#allocation2 + $0x18] sm:$0x8] }
 0x1fa   : > { %25409 = vst [vmem:[#allocation16_spill] sm:$0xff] %v20193_v48  ;;  %25410 = vst [vmem:[#allocation17_spill] sm:$0xff] %v20201_v47  ;;  %v20215_v8 = vadd.f32 %v2445_v52, %v1913_v5  ;;  %v20228_v5 = vld [vmem:[#allocation2 + $0x80] sm:$0xff]   ;;  %v1914_v50 = vadd.f32 %v20139_v14, %v19973_v41  ;;  %v20241_v42 = vsel %vm2862_vm5, %v4974_v13, %v4978_v20 }
 0x1fb   : > { %v16770_v48 = vpop.f32.mrf.mxu0  ;;  %v20222_v47 = vpop.f32.mrf.mxu1  ;;  %v5606_v52 = vld [vmem:[#allocation2 + $0x24] sm:$0xf]  ;;  %v4990_v4 = vor.u32 %v4988_v15, %v4986_v49  ;;  %v20243_v41 = vld [vmem:[#allocation2 + $0x20] sm:$0xf]  ;;  %v5315_v6 = vrot.slane %v5313_v32, 1  ;;  %v5321_v15 = vshll.u32 %v20228_v5, 16 }
 0x1fc   : > { %25411 = vst [vmem:[#allocation18_spill] sm:$0xff] %v20215_v8  ;;  %25412 = vst [vmem:[#allocation19_spill] sm:$0xff] %v20222_v47  ;;  %v20232_v7 = vadd.f32 %v16770_v48, %v1916_v36  ;;  %17082 = vmatpush3.bf16.msra.mxu0 %v20167_v33  ;;  %v4996_v8 = vshrl.u32 %v20171_v26, 16  ;;  %v5306_v47 = vshrl.u32 %v20149_v39, 16  ;;  %v5608_v48 = vld [vmem:[#allocation2 + $0x2c] sm:$0xf]  ;;  %v15162_v36 = vcombine.low %v5603_v24, %v5604_v60 }
 0x1fd   : > { %v2448_v43 = vpop.f32.mrf.mxu0  ;;  %v20237_v1 = vpop.f32.mrf.mxu1  ;;  %17083 = vmatprep.subr.bf16.mxu0 %v20210_v16  ;;  %25415 = vst [vmem:[#allocation22_spill] sm:$0xff] %v20243_v41  ;;  %v1919_v26 = vadd.f32 %v19983_v11, %v20139_v14  ;;  %v20250_v39 = vsel %vm2862_vm5, %v4982_v56, %v4986_v49  ;;  %v15163_v20 = vcombine.low %v20243_v41, %v5606_v52  ;;  %v5607_v56 = vld [vmem:[#allocation2 + $0x28] sm:$0xf]  ;;  %v20308_v41 = vld [vmem:[#allocation2 + $0x30] sm:$0xf] }
 0x1fe   : > { %25413 = vst [vmem:[#allocation20_spill] sm:$0xff] %v20232_v7  ;;  %25414 = vst [vmem:[#allocation21_spill] sm:$0xff] %v20237_v1  ;;  %v20247_v7 = vadd.f32 %v2448_v43, %v1914_v50  ;;  %v20255_v1 = vld [vmem:[%s25264_s4 + $0xc0] sm:$0xff]   ;;  %v25416_v11 = vcombine.low %v19905_v37, %v19923_v17  ;;  %v5311_v49 = vor.u32 %v5310_v51, %v5306_v47  ;;  %v5000_v50 = vshll.u32 %v20220_v31, 16 }
 0x1ff   : > { %v16773_v13 = vpop.f32.mrf.mxu0  ;;  %17028 = vmatmul.mubr.msk.bf16.gmra.mxu0 %vm895_vm4, %v20152_v21  ;;  %v20260_v60 = vpop.f32.mrf.mxu1  ;;  %v1917_v52 = vadd.f32 %v20139_v14, %v19993_v62  ;;  %v25417_v37 = vcombine.low %v19914_v54, %v19917_v55  ;;  %v5317_v17 = vshrl.u32 %v20188_v10, 16  ;;  %v15164_v21 = vcombine.low %v5607_v56, %v5608_v48  ;;  %v20293_v48 = vld [vmem:[%s25264_s4 + $0xf8] sm:$0xff]   ;;  %v20302_v56 = vld [vmem:[#allocation2 + $0x90] sm:$0xff]   ;;  %25421 = vst [vmem:[#allocation26_spill] sm:$0xff] %v20308_v41 }
 0x200   : > { %17004 = vmatmul.mubr.msk.bf16.gmra.mxu1 %vm895_vm4, %v25416_v11  ;;  %v20270_v24 = vadd.f32 %v16773_v13, %v1919_v26  ;;  %17031 = vmatprep.mubr.msk.bf16.mxu0 %vm895_vm4, %v20155_v27  ;;  %v20283_v62 = vsel %vm2862_vm5, %v4990_v4, %v4994_v63  ;;  %v4998_v31 = vor.u32 %v4996_v8, %v4994_v63  ;;  %v5692_v32 = vshrl.u32 %v15162_v36, 16  ;;  %v5610_v26 = vld [vmem:[#allocation2 + $0x34] sm:$0xf]  ;;  %v20300_v11 = vld [vmem:[#allocation2 + $0x88] sm:$0xff]  }
 0x201   : > { %17007 = vmatprep.mubr.msk.bf16.mxu1 %vm895_vm4, %v25417_v37  ;;  %v2461_v51 = vpop.f32.mrf.mxu0  ;;  %v20279_v47 = vpop.f32.mrf.mxu1  ;;  %17084 = vmatpush3.bf16.msra.mxu0 %v20210_v16  ;;  %v5695_v43 = vshll.u32 %v15162_v36, 16  ;;  %v1920_v27 = vadd.f32 %v20005_v38, %v20139_v14  ;;  %v5700_v55 = vshrl.u32 %v15163_v20, 16  ;;  %v5703_v10 = vshll.u32 %v15163_v20, 16 }
 0x202   : > { %v20287_v54 = vadd.f32 %v2461_v51, %v1917_v52  ;;  %17085 = vmatprep.subr.bf16.mxu0 %v20255_v1  ;;  %v20298_v63 = vsel %vm2862_vm5, %v5311_v49, %v5315_v6  ;;  %v5319_v8 = vor.u32 %v5317_v17, %v5315_v6  ;;  %v5002_v38 = vrot.slane %v5000_v50, 1 }
 0x203   : > { %v16774_v4 = vpop.f32.mrf.mxu0  ;;  %v20295_v13 = vpop.f32.mrf.mxu1  ;;  %v5323_v36 = vrot.slane %v5321_v15, 1  ;;  %v1918_v20 = vadd.f32 %v20139_v14, %v20017_v34  ;;  %v5709_v37 = vshrl.u32 %v15164_v21, 16  ;;  %v5712_v51 = vshll.u32 %v15164_v21, 16 }
 0x204   : > { %25418 = vst [vmem:[#allocation23_spill] sm:$0xff] %v20287_v54  ;;  %25419 = vst [vmem:[#allocation24_spill] sm:$0xff] %v20295_v13  ;;  %v20306_v52 = vadd.f32 %v16774_v4, %v1920_v27  ;;  %v20314_v49 = vsel %vm2862_vm5, %v4998_v31, %v5002_v38  ;;  %v5694_v6 = vrot.slane %v5692_v32, 3  ;;  %v5697_v50 = vrot.slane %v5695_v43, 4 }
 0x205   : > { %v2464_v54 = vpop.f32.mrf.mxu0  ;;  %v20310_v13 = vpop.f32.mrf.mxu1  ;;  %17086 = vmatpush3.bf16.msra.mxu0 %v20255_v1  ;;  %v15165_v15 = vcombine.low %v20308_v41, %v5610_v26  ;;  %v1923_v34 = vadd.f32 %v20026_v61, %v20139_v14  ;;  %v5702_v21 = vrot.slane %v5700_v55, 3  ;;  %v5705_v27 = vrot.slane %v5703_v10, 4  ;;  %v20336_v55 = vld [vmem:[#allocation2 + $0x98] sm:$0xff]  }
 0x206   : > { %25420 = vst [vmem:[#allocation25_spill] sm:$0xff] %v20306_v52  ;;  %v20319_v17 = vadd.f32 %v2464_v54, %v1918_v20  ;;  %17143 = vmatprep.subr.bf16.mxu0 %v20293_v48  ;;  %v25422_v31 = vcombine.low %v19930_v59, %v19958_v12  ;;  %v20331_v32 = vsel %vm2862_vm5, %v5319_v8, %v5323_v36  ;;  %v5325_v61 = vshrl.u32 %v20228_v5, 16  ;;  %v5612_v26 = vld [vmem:[#allocation2 + $0x3c] sm:$0xf] }
 0x207   : > { %v16777_v4 = vpop.f32.mrf.mxu0  ;;  %17032 = vmatmul.mubr.msk.bf16.gmra.mxu0 %vm895_vm4, %v20186_v58  ;;  %v20324_v52 = vpop.f32.mrf.mxu1  ;;  %v5329_v43 = vshll.u32 %v20300_v11, 16  ;;  %v5337_v54 = vshll.u32 %v20302_v56, 16  ;;  %v1921_v58 = vadd.f32 %v20139_v14, %v20033_v35  ;;  %v25424_v59 = vcombine.low %v19943_v57, %v19947_v0 }
 0x208   : > { %17008 = vmatmul.mubr.msk.bf16.gmra.mxu1 %vm895_vm4, %v25422_v31  ;;  %v20340_v10 = vadd.f32 %v16777_v4, %v1923_v34  ;;  %17035 = vmatprep.mubr.msk.bf16.mxu0 %vm895_vm4, %v20205_v3  ;;  %v5711_v12 = vrot.slane %v5709_v37, 3  ;;  %v5714_v5 = vrot.slane %v5712_v51, 4  ;;  %v5698_v20 = vor.u32 %v5697_v50, %v5694_v6  ;;  %v20351_v4 = vld [vmem:[#allocation2 + $0xa0] sm:$0xff]   ;;  %v20357_v37 = vld [vmem:[#allocation2 + $0x38] sm:$0xf] }
 0x209   : > { %17011 = vmatprep.mubr.msk.bf16.mxu1 %vm895_vm4, %v25424_v59  ;;  %v2477_v8 = vpop.f32.mrf.mxu0  ;;  %v20348_v38 = vpop.f32.mrf.mxu1  ;;  %v5333_v31 = vshrl.u32 %v20300_v11, 16  ;;  %v5718_v35 = vshrl.u32 %v15165_v15, 16  ;;  %v5721_v34 = vshll.u32 %v15165_v15, 16  ;;  %v1924_v3 = vadd.f32 %v20035_v18, %v20139_v14  ;;  %25427 = vst [vmem:[#allocation30_spill] sm:$0xff] %v20357_v37  ;;  %v5614_v51 = vld [vmem:[#allocation2 + $0x44] sm:$0xf] }
 0x20a   : > { %25423 = vst [vmem:[#allocation27_spill] sm:$0xff] %v20340_v10  ;;  %25425 = vst [vmem:[#allocation28_spill] sm:$0xff] %v20348_v38  ;;  %v20355_v41 = vadd.f32 %v2477_v8, %v1921_v58  ;;  %v5706_v57 = vor.u32 %v5705_v27, %v5702_v21  ;;  %v5327_v0 = vor.u32 %v5325_v61, %v5323_v36  ;;  %v5331_v6 = vrot.slane %v5329_v43, 1  ;;  %v20368_v21 = vld [vmem:[#allocation2 + $0x40] sm:$0xf] }
 0x20b   : > { %v16778_v59 = vpop.f32.mrf.mxu0  ;;  %v20359_v10 = vpop.f32.mrf.mxu1  ;;  %v5339_v50 = vrot.slane %v5337_v54, 1  ;;  %v5345_v11 = vshll.u32 %v20336_v55, 16  ;;  %v15166_v15 = vcombine.low %v20357_v37, %v5612_v26  ;;  %v1922_v38 = vadd.f32 %v20139_v14, %v20037_v28  ;;  %25428 = vst [vmem:[#allocation31_spill] sm:$0xff] %v20368_v21  ;;  %v25443_v37 = vld [vmem:[#allocation8_spill] sm:$0xff] }
 0x20c   : > { %25426 = vst [vmem:[#allocation29_spill] sm:$0xff] %v20355_v41  ;;  %v20365_v18 = vadd.f32 %v16778_v59, %v1924_v3  ;;  %v5715_v58 = vor.u32 %v5714_v5, %v5711_v12  ;;  %v5341_v36 = vshrl.u32 %v20302_v56, 16  ;;  %v5720_v8 = vrot.slane %v5718_v35, 3 }
 0x20d   : > { %v2480_v27 = vpop.f32.mrf.mxu0  ;;  %v20370_v61 = vpop.f32.mrf.mxu1  ;;  %v5723_v43 = vrot.slane %v5721_v34, 4  ;;  %v5353_v54 = vshll.u32 %v20351_v4, 16  ;;  %v15167_v41 = vcombine.low %v20368_v21, %v5614_v51  ;;  %v1927_v26 = vadd.f32 %v20046_v40, %v20139_v14 }
 0x20e   : > { %v20376_v28 = vadd.f32 %v2480_v27, %v1922_v38  ;;  %v20379_v12 = vsel %vm1607_vm3, %v5698_v20, %v5706_v57  ;;  %v20382_v56 = vsel %vm2862_vm5, %v5327_v0, %v5331_v6  ;;  %v25429_v34 = vcombine.low %v19964_v23, %v19989_v22  ;;  %v20401_v22 = vld [vmem:[#allocation2 + $0xa8] sm:$0xff]  }
 0x20f   : > { %v16781_v5 = vpop.f32.mrf.mxu0  ;;  %17036 = vmatmul.mubr.msk.bf16.gmra.mxu0 %vm895_vm4, %v20225_v25  ;;  %v20386_v35 = vpop.f32.mrf.mxu1  ;;  %v5343_v40 = vor.u32 %v5341_v36, %v5339_v50  ;;  %v5347_v38 = vrot.slane %v5345_v11, 1  ;;  %v5727_v3 = vshrl.u32 %v15166_v15, 16  ;;  %v5730_v51 = vshll.u32 %v15166_v15, 16 }
 0x210   : > { %17012 = vmatmul.mubr.msk.bf16.gmra.mxu1 %vm895_vm4, %v25429_v34  ;;  %v1925_v20 = vadd.f32 %v20139_v14, %v20052_v53  ;;  %v20394_v0 = vadd.f32 %v16781_v5, %v1927_v26  ;;  %17039 = vmatprep.mubr.msk.bf16.mxu0 %vm895_vm4, %v20241_v42  ;;  %v5335_v25 = vor.u32 %v5333_v31, %v5331_v6  ;;  %v5349_v23 = vshrl.u32 %v20336_v55, 16 }
 0x211   : > { %17055 = vmatprep.mubr.msk.bf16.mxu1 %vm895_vm4, %v20298_v63  ;;  %v2493_v59 = vpop.f32.mrf.mxu0  ;;  %v20403_v11 = vpop.f32.mrf.mxu1  ;;  %v5724_v15 = vor.u32 %v5723_v43, %v5720_v8  ;;  %v5355_v36 = vrot.slane %v5353_v54, 1  ;;  %v5736_v27 = vshrl.u32 %v15167_v41, 16  ;;  %v5739_v53 = vshll.u32 %v15167_v41, 16 }
 0x212   : > { %v1928_v26 = vadd.f32 %v20054_v46, %v20139_v14  ;;  %v20407_v5 = vadd.f32 %v2493_v59, %v1925_v20  ;;  %v20410_v42 = vsel %vm1607_vm3, %v5706_v57, %v5715_v58  ;;  %v20413_v63 = vsel %vm2862_vm5, %v5335_v25, %v5339_v50  ;;  %v20426_v50 = vld [vmem:[#allocation2 + $0x4c] sm:$0xf] }
 0x213   : > { %v16782_v55 = vpop.f32.mrf.mxu0  ;;  %v20415_v31 = vpop.f32.mrf.mxu1  ;;  %v20418_v6 = vsel %vm2862_vm5, %v5343_v40, %v5347_v38  ;;  %v5351_v8 = vor.u32 %v5349_v23, %v5347_v38  ;;  %v5729_v43 = vrot.slane %v5727_v3, 3  ;;  %v5732_v41 = vrot.slane %v5730_v51, 4  ;;  %25430 = vst [vmem:[#allocation32_spill] sm:$0xff] %v20426_v50 }
 0x214   : > { %v1926_v46 = vadd.f32 %v20139_v14, %v20058_v2  ;;  %v20422_v54 = vadd.f32 %v16782_v55, %v1928_v26  ;;  %v5357_v57 = vshrl.u32 %v20351_v4, 16  ;;  %v5361_v34 = vshll.u32 %v20401_v22, 16  ;;  %v20436_v2 = vld [vmem:[#allocation2 + $0xb0] sm:$0xff]   ;;  %v20444_v55 = vld [vmem:[#allocation2 + $0x48] sm:$0xf] }
 0x215   : > { %v2496_v20 = vpop.f32.mrf.mxu0  ;;  %v20428_v25 = vpop.f32.mrf.mxu1  ;;  %v20431_v40 = vsel %vm1607_vm3, %v5715_v58, %v5724_v15  ;;  %v20434_v38 = vsel %vm2862_vm5, %v5351_v8, %v5355_v36  ;;  %v5738_v3 = vrot.slane %v5736_v27, 3  ;;  %v5741_v51 = vrot.slane %v5739_v53, 4  ;;  %25431 = vst [vmem:[#allocation33_spill] sm:$0xff] %v20444_v55  ;;  %v20446_v58 = vld [vmem:[#allocation2 + $0x54] sm:$0xf] }
 0x216   : > { %v1931_v4 = vadd.f32 %v20066_v45, %v20139_v14  ;;  %v2308_v23 = vadd.f32 %v20069_v44, %v20139_v14  ;;  %v20442_v59 = vadd.f32 %v2496_v20, %v1926_v46  ;;  %v5359_v26 = vor.u32 %v5357_v57, %v5355_v36  ;;  %25432 = vst [vmem:[#allocation34_spill] sm:$0xff] %v20446_v58  ;;  %v20465_v57 = vld [vmem:[#allocation2 + $0x50] sm:$0xf] }
 0x217   : > { %v1929_v8 = vadd.f32 %v20139_v14, %v20076_v19  ;;  %v16785_v27 = vpop.f32.mrf.mxu0  ;;  %17040 = vmatmul.mubr.msk.bf16.gmra.mxu0 %vm895_vm4, %v20250_v39  ;;  %v16801_v53 = vpop.f32.mrf.mxu1  ;;  %v5733_v45 = vor.u32 %v5732_v41, %v5729_v43  ;;  %v15168_v44 = vcombine.low %v20444_v55, %v20426_v50  ;;  %v2306_v36 = vadd.f32 %v20139_v14, %v20079_v29  ;;  %v25437_v55 = vld [vmem:[#allocation11_spill] sm:$0xff] }
 0x218   : > { %17056 = vmatmul.mubr.msk.bf16.vlgmr.msra.gmra.mxu1 %vm895_vm4, %v20331_v32  ;;  %v20458_v46 = vadd.f32 %v16785_v27, %v1931_v4  ;;  %17043 = vmatprep.mubr.msk.bf16.mxu0 %vm895_vm4, %v20283_v62  ;;  %v20462_v19 = vadd.f32 %v16801_v53, %v2308_v23  ;;  %v5363_v39 = vrot.slane %v5361_v34, 1  ;;  %25433 = vst [vmem:[#allocation35_spill] sm:$0xff] %v20465_v57  ;;  %v5365_v41 = vshrl.u32 %v20401_v22, 16  ;;  %v25435_v4 = vld [vmem:[#allocation10_spill] sm:$0xff] }
 0x219   : > { %17112 = vmatpush3.bf16.msra.mxu1 %v20015_v30  ;;  %v2509_v32 = vpop.f32.mrf.mxu0  ;;  %17059 = vmatprep.mubr.msk.bf16.mxu1 %vm895_vm4, %v20382_v56  ;;  %v2646_v43 = vpop.f32.mrf.mxu1  ;;  %v20470_v29 = vor.u32 %v5741_v51, %v5738_v3  ;;  %v5369_v62 = vshll.u32 %v20436_v2, 16  ;;  %v15169_v20 = vcombine.low %v20465_v57, %v20446_v58  ;;  %v25434_v30 = vld [vmem:[#allocation4_spill] sm:$0xff]  ;;  %v2309_v23 = vadd.f32 %v25435_v4, %v20139_v14  ;;  %v25436_v57 = vld [vmem:[#allocation5_spill] sm:$0xff] }
 0x21a   : > { %17113 = vmatprep.subr.bf16.mxu1 %v20167_v33  ;;  %v1932_v34 = vadd.f32 %v25434_v30, %v20139_v14  ;;  %v20480_v27 = vadd.f32 %v2509_v32, %v1929_v8  ;;  %v20482_v56 = vadd.f32 %v2646_v43, %v2306_v36  ;;  %v20485_v51 = vsel %vm1607_vm3, %v5724_v15, %v5733_v45  ;;  %v20500_v15 = vld [vmem:[#allocation2 + $0xb8] sm:$0xff]  }
 0x21b   : > { %v16786_v53 = vpop.f32.mrf.mxu0  ;;  %v16802_v3 = vpop.f32.mrf.mxu1  ;;  %v20488_v22 = vsel %vm2862_vm5, %v5359_v26, %v5363_v39  ;;  %v5745_v50 = vshrl.u32 %v15168_v44, 16  ;;  %v5373_v58 = vshrl.u32 %v20436_v2, 16  ;;  %v1930_v30 = vadd.f32 %v20139_v14, %v25436_v57 }
 0x21c   : > { %v2307_v8 = vadd.f32 %v20139_v14, %v25437_v55  ;;  %v20495_v32 = vadd.f32 %v16786_v53, %v1932_v34  ;;  %v20497_v36 = vadd.f32 %v16802_v3, %v2309_v23  ;;  %v20504_v4 = vsel %vm1607_vm3, %v5733_v45, %v20470_v29  ;;  %v25439_v34 = vld [vmem:[#allocation6_spill] sm:$0xff] }
 0x21d   : > { %17114 = vmatpush3.bf16.msra.mxu1 %v20167_v33  ;;  %v2512_v43 = vpop.f32.mrf.mxu0  ;;  %v2649_v26 = vpop.f32.mrf.mxu1  ;;  %v5367_v2 = vor.u32 %v5365_v41, %v5363_v39  ;;  %v5748_v21 = vshll.u32 %v15168_v44, 16  ;;  %v5371_v57 = vrot.slane %v5369_v62, 1  ;;  %v1935_v55 = vadd.f32 %v20109_v9, %v20139_v14  ;;  %v20515_v3 = vld [vmem:[#allocation2 + $0x5c] sm:$0xf] }
 0x21e   : > { %25438 = vst [vmem:[#allocation4_spill] sm:$0xff] %v20497_v36  ;;  %17115 = vmatprep.subr.bf16.mxu1 %v20210_v16  ;;  %v2312_v23 = vadd.f32 %v25439_v34, %v20139_v14  ;;  %v20511_v33 = vadd.f32 %v2512_v43, %v1930_v30  ;;  %v20513_v53 = vadd.f32 %v2649_v26, %v2307_v8  ;;  %25442 = vst [vmem:[#allocation11_spill] sm:$0xff] %v20515_v3  ;;  %v20523_v30 = vld [vmem:[#allocation2 + $0xc0] sm:$0xff]  }
 0x21f   : > { %v1933_v45 = vadd.f32 %v20139_v14, %v25443_v37  ;;  %v16789_v39 = vpop.f32.mrf.mxu0  ;;  %17044 = vmatmul.mubr.msk.bf16.gmra.mxu0 %vm895_vm4, %v20314_v49  ;;  %v16805_v44 = vpop.f32.mrf.mxu1  ;;  %v5747_v9 = vrot.slane %v5745_v50, 3  ;;  %v5754_v41 = vshrl.u32 %v15169_v20, 16  ;;  %v5757_v62 = vshll.u32 %v15169_v20, 16  ;;  %v25444_v8 = vld [vmem:[#allocation7_spill] sm:$0xff] }
 0x220   : > { %25440 = vst [vmem:[#allocation10_spill] sm:$0xff] %v20511_v33  ;;  %25441 = vst [vmem:[#allocation5_spill] sm:$0xff] %v20513_v53  ;;  %17060 = vmatmul.mubr.msk.bf16.gmra.mxu1 %vm895_vm4, %v20413_v63  ;;  %v2310_v43 = vadd.f32 %v20139_v14, %v25444_v8  ;;  %v20527_v26 = vadd.f32 %v16789_v39, %v1935_v55  ;;  %17087 = vmatprep.mubr.msk.bf16.mxu0 %vm895_vm4, %v20379_v12  ;;  %v5377_v49 = vshll.u32 %v20500_v15, 16  ;;  %v20536_v63 = vld [vmem:[#allocation2 + $0x58] sm:$0xf]  ;;  %v25449_v39 = vld [vmem:[#allocation12_spill] sm:$0xff] }
 0x221   : > { %v20531_v37 = vadd.f32 %v16805_v44, %v2312_v23  ;;  %17063 = vmatprep.mubr.msk.bf16.mxu1 %vm895_vm4, %v20418_v6  ;;  %25447 = vst [vmem:[#allocation7_spill] sm:$0xff] %v20536_v63  ;;  %v2525_v50 = vpop.f32.mrf.mxu0  ;;  %v2662_v20 = vpop.f32.mrf.mxu1  ;;  %v5750_v34 = vrot.slane %v5748_v21, 4  ;;  %v20539_v53 = vsel %vm2862_vm5, %v5367_v2, %v5371_v57  ;;  %17116 = vmatpush3.bf16.msra.mxu1 %v20210_v16  ;;  %v5381_v55 = vshrl.u32 %v20500_v15, 16  ;;  %v25448_v23 = vld [vmem:[#allocation9_spill] sm:$0xff]  ;;  %v20553_v21 = vld [vmem:[#allocation2 + $0x64] sm:$0xf] }
 0x222   : > { %25445 = vst [vmem:[#allocation6_spill] sm:$0xff] %v20527_v26  ;;  %v15170_v12 = vcombine.low %v20536_v63, %v20515_v3  ;;  %v1936_v6 = vadd.f32 %v25448_v23, %v20139_v14  ;;  %v2313_v44 = vadd.f32 %v25449_v39, %v20139_v14  ;;  %v20549_v8 = vadd.f32 %v2525_v50, %v1933_v45  ;;  %v20557_v63 = vld [vmem:[#allocation2 + $0xc8] sm:$0xff]   ;;  %v25453_v23 = vld [vmem:[#allocation13_spill] sm:$0xff]  ;;  %v25454_v45 = vld [vmem:[#allocation14_spill] sm:$0xff] }
 0x223   : > { %25446 = vst [vmem:[#allocation8_spill] sm:$0xff] %v20531_v37  ;;  %v20551_v37 = vadd.f32 %v2662_v20, %v2310_v43  ;;  %25452 = vst [vmem:[#allocation36_spill] sm:$0xff] %v20553_v21  ;;  %17117 = vmatprep.subr.bf16.mxu1 %v20255_v1  ;;  %v16790_v16 = vpop.f32.mrf.mxu0  ;;  %v16806_v2 = vpop.f32.mrf.mxu1  ;;  %v5756_v15 = vrot.slane %v5754_v41, 3  ;;  %v5759_v26 = vrot.slane %v5757_v62, 4  ;;  %v5375_v33 = vor.u32 %v5373_v58, %v5371_v57  ;;  %v20572_v58 = vld [vmem:[%s25264_s4 + $0xf0] sm:$0xff]  }
 0x224   : > { %25450 = vst [vmem:[#allocation9_spill] sm:$0xff] %v20549_v8  ;;  %v5385_v3 = vshll.u32 %v20523_v30, 16  ;;  %v1934_v39 = vadd.f32 %v20139_v14, %v25453_v23  ;;  %v2311_v43 = vadd.f32 %v20139_v14, %v25454_v45  ;;  %v20563_v50 = vadd.f32 %v16790_v16, %v1936_v6  ;;  %v25457_v6 = vld [vmem:[#allocation15_spill] sm:$0xff] }
 0x225   : > { %25451 = vst [vmem:[#allocation12_spill] sm:$0xff] %v20551_v37  ;;  %v20565_v20 = vadd.f32 %v16806_v2, %v2313_v44  ;;  %v20567_v37 = vld [vmem:[#allocation2 + $0x60] sm:$0xf]  ;;  %v2528_v8 = vpop.f32.mrf.mxu0  ;;  %v2665_v41 = vpop.f32.mrf.mxu1  ;;  %v5751_v57 = vor.u32 %v5750_v34, %v5747_v9  ;;  %v5379_v62 = vrot.slane %v5377_v49, 1  ;;  %v5763_v36 = vshrl.u32 %v15170_v12, 16  ;;  %17118 = vmatpush3.bf16.msra.mxu1 %v20255_v1 }
 0x226   : > { %25456 = vst [vmem:[#allocation14_spill] sm:$0xff] %v20567_v37  ;;  %v15171_v23 = vcombine.low %v20567_v37, %v20553_v21  ;;  %v2316_v44 = vadd.f32 %v25457_v6, %v20139_v14  ;;  %v20579_v16 = vadd.f32 %v2528_v8, %v1934_v39  ;;  %v20581_v2 = vadd.f32 %v2665_v41, %v2311_v43  ;;  %v25458_v39 = vld [vmem:[#allocation17_spill] sm:$0xff]  ;;  %v25459_v43 = vld [vmem:[#allocation16_spill] sm:$0xff] }
 0x227   : > { %25455 = vst [vmem:[#allocation13_spill] sm:$0xff] %v20565_v20  ;;  %v5766_v45 = vshll.u32 %v15170_v12, 16  ;;  %17175 = vmatprep.subr.bf16.mxu1 %v20293_v48  ;;  %v16833_v20 = vpop.f32.mrf.mxu0  ;;  %17088 = vmatmul.mubr.msk.bf16.vlgmr.msra.gmra.mxu0 %vm895_vm4, %v20410_v42  ;;  %v16809_v9 = vpop.f32.mrf.mxu1  ;;  %v20588_v49 = vor.u32 %v5759_v26, %v5756_v15  ;;  %v20591_v1 = vsel %vm2862_vm5, %v5375_v33, %v5379_v62  ;;  %v5387_v34 = vrot.slane %v5385_v3, 1  ;;  %v20611_v15 = vld [vmem:[%s25264_s4 + $0xe8] sm:$0xff]  }
 0x228   : > { %17064 = vmatmul.mubr.msk.bf16.gmra.mxu1 %vm895_vm4, %v20434_v38  ;;  %v5393_v8 = vshll.u32 %v20557_v63, 16  ;;  %v2314_v12 = vadd.f32 %v20139_v14, %v25458_v39  ;;  %v20597_v41 = vadd.f32 %v16833_v20, %v25459_v43  ;;  %17144 = vmatpush3.bf16.msra.mxu0 %v20293_v48  ;;  %v20602_v42 = vadd.f32 %v16809_v9, %v2316_v44  ;;  %v25462_v44 = vld [vmem:[#allocation19_spill] sm:$0xff]  ;;  %v20620_v21 = vld [vmem:[#allocation2 + $0x6c] sm:$0xf] }
 0x229   : > { %17091 = vmatprep.mubr.msk.bf16.mxu0 %vm895_vm4, %v20431_v40  ;;  %v5389_v38 = vshrl.u32 %v20523_v30, 16  ;;  %v3057_v33 = vpop.f32.mrf.mxu0  ;;  %17067 = vmatprep.mubr.msk.bf16.mxu1 %vm895_vm4, %v20488_v22  ;;  %v2678_v3 = vpop.f32.mrf.mxu1  ;;  %v5383_v26 = vor.u32 %v5381_v55, %v5379_v62  ;;  %v5765_v20 = vrot.slane %v5763_v36, 3  ;;  %v5772_v6 = vshrl.u32 %v15171_v23, 16  ;;  %v25463_v30 = vld [vmem:[#allocation18_spill] sm:$0xff] }
 0x22a   : > { %25460 = vst [vmem:[#allocation15_spill] sm:$0xff] %v20597_v41  ;;  %25461 = vst [vmem:[#allocation17_spill] sm:$0xff] %v20602_v42  ;;  %17145 = vmatprep.subr.bf16.mxu0 %v20572_v58  ;;  %v5775_v40 = vshll.u32 %v15171_v23, 16  ;;  %v2317_v9 = vadd.f32 %v25462_v44, %v20139_v14  ;;  %v20616_v39 = vadd.f32 %v3057_v33, %v25463_v30  ;;  %v5768_v22 = vrot.slane %v5766_v45, 4  ;;  %v25467_v33 = vld [vmem:[#allocation21_spill] sm:$0xff] }
 0x22b   : > { %v20618_v43 = vadd.f32 %v2678_v3, %v2314_v12  ;;  %25466 = vst [vmem:[#allocation18_spill] sm:$0xff] %v20620_v21  ;;  %v16834_v55 = vpop.f32.mrf.mxu0  ;;  %v16810_v62 = vpop.f32.mrf.mxu1  ;;  %v20624_v37 = vsel %vm1607_vm3, %v20470_v29, %v5751_v57  ;;  %v20628_v36 = vsel %vm1607_vm3, %v5751_v57, %v20588_v49  ;;  %v5391_v23 = vor.u32 %v5389_v38, %v5387_v34  ;;  %v18081_v42 = vld [vmem:[#allocation2 + $0xd0] ss:$0 sps:$4 sm:$0x11]   ;;  %v25468_v3 = vld [vmem:[#allocation20_spill] sm:$0xff] }
 0x22c   : > { %25464 = vst [vmem:[#allocation16_spill] sm:$0xff] %v20616_v39  ;;  %v5395_v44 = vrot.slane %v5393_v8, 1  ;;  %v2315_v12 = vadd.f32 %v20139_v14, %v25467_v33  ;;  %v20633_v45 = vadd.f32 %v16834_v55, %v25468_v3  ;;  %17146 = vmatpush3.bf16.msra.mxu0 %v20572_v58  ;;  %v20636_v30 = vadd.f32 %v16810_v62, %v2317_v9  ;;  %v20643_v57 = vld [vmem:[#allocation2 + $0x74] sm:$0xf]  ;;  %v20645_v38 = vld [vmem:[#allocation2 + $0x84] sm:$0xf] }
 0x22d   : > { %25465 = vst [vmem:[#allocation19_spill] sm:$0xff] %v20618_v43  ;;  %v20639_v29 = vsel %vm2862_vm5, %v5383_v26, %v5387_v34  ;;  %v20641_v43 = vld [vmem:[#allocation2 + $0x68] sm:$0xf]  ;;  %25472 = vst [vmem:[#allocation38_spill] sm:$0xff] %v20643_v57  ;;  %v3060_v8 = vpop.f32.mrf.mxu0  ;;  %v2681_v39 = vpop.f32.mrf.mxu1  ;;  %17147 = vmatprep.subr.bf16.mxu0 %v20611_v15  ;;  %v5774_v33 = vrot.slane %v5772_v6, 3  ;;  %v5777_v55 = vrot.slane %v5775_v40, 4  ;;  %v2320_v26 = vadd.f32 %v20260_v60, %v20139_v14 }
 0x22e   : > { %25469 = vst [vmem:[#allocation21_spill] sm:$0xff] %v20633_v45  ;;  %25470 = vst [vmem:[#allocation20_spill] sm:$0xff] %v20636_v30  ;;  %v5397_v3 = vshrl.u32 %v20557_v63, 16  ;;  %v20651_v9 = vcombine.low %v20641_v43, %v20620_v21  ;;  %v20653_v34 = vld [vmem:[#allocation2 + $0x70] sm:$0xf]  ;;  %v20658_v62 = vadd.f32 %v3060_v8, %v20247_v7  ;;  %v20660_v30 = vadd.f32 %v2681_v39, %v2315_v12  ;;  %v20669_v63 = vld [vmem:[%s25264_s4 + $0xe0] sm:$0xff]  }
 0x22f   : > { %25471 = vst [vmem:[#allocation37_spill] sm:$0xff] %v20641_v43  ;;  %25473 = vst [vmem:[#allocation39_spill] sm:$0xff] %v20645_v38  ;;  %v5769_v45 = vor.u32 %v5768_v22, %v5765_v20  ;;  %v20662_v41 = vld [vmem:[#allocation2 + $0x7c] sm:$0xf]  ;;  %v20664_v6 = vld [vmem:[#allocation2 + $0x80] sm:$0xf]  ;;  %v16837_v40 = vpop.f32.mrf.mxu0  ;;  %17092 = vmatmul.mubr.msk.bf16.gmra.mxu0 %vm895_vm4, %v20485_v51  ;;  %v16813_v60 = vpop.f32.mrf.mxu1  ;;  %v5396_v7 = vsel %vm2862_vm5, %v5391_v23, %v5395_v44  ;;  %v20678_v39 = vcombine.low %v20653_v34, %v20643_v57 }
 0x230   : > { %25474 = vst [vmem:[#allocation40_spill] sm:$0xff] %v20653_v34  ;;  %25475 = vst [vmem:[#allocation41_spill] sm:$0xff] %v20662_v41  ;;  %17068 = vmatmul.mubr.msk.bf16.gmra.mxu1 %vm895_vm4, %v20539_v53  ;;  %v5401_v20 = vshll.u32 %v18081_v42, 16  ;;  %v15192_v22 = vcombine.low %v20664_v6, %v20645_v38  ;;  %v2318_v12 = vadd.f32 %v20139_v14, %v20279_v47  ;;  %17095 = vmatprep.mubr.msk.bf16.mxu0 %vm895_vm4, %v20504_v4  ;;  %v6020_v53 = vld [vmem:[#allocation2 + $0x78] sm:$0x8] }
 0x231   : > { %25476 = vst [vmem:[#allocation42_spill] sm:$0xff] %v20664_v6  ;;  %v20685_v8 = vadd.f32 %v16837_v40, %v20270_v24  ;;  %v20689_v51 = vadd.f32 %v16813_v60, %v2320_v26  ;;  %17071 = vmatprep.mubr.msk.bf16.mxu1 %vm895_vm4, %v20591_v1  ;;  %v3073_v42 = vpop.f32.mrf.mxu0  ;;  %v2694_v23 = vpop.f32.mrf.mxu1  ;;  %17148 = vmatpush3.bf16.msra.mxu0 %v20611_v15  ;;  %v5781_v47 = vshrl.u32 %v20651_v9, 16  ;;  %v25477_v40 = vld [vmem:[#allocation24_spill] sm:$0xff]  ;;  %v25478_v26 = vld [vmem:[#allocation23_spill] sm:$0xff]  ;;  %v5784_v1 = vshll.u32 %v20651_v9, 16 }
 0x232   : > { %v20694_v57 = vor.u32 %v5777_v55, %v5774_v33  ;;  %v5399_v21 = vor.u32 %v5397_v3, %v5395_v44  ;;  %v15191_v24 = vcombine.low %v6020_v53, %v20662_v41  ;;  %v2321_v4 = vadd.f32 %v25477_v40, %v20139_v14  ;;  %v20706_v43 = vld [vmem:[#allocation2 + $0x8c] sm:$0xf]  ;;  %17149 = vmatprep.subr.bf16.mxu0 %v20669_v63  ;;  %v20712_v44 = vld [vmem:[%s25264_s4 + $0x118] sm:$0xff]   ;;  %v20726_v41 = vld [vmem:[#allocation2 + $0x88] sm:$0xf] }
 0x233   : > { %v20701_v60 = vadd.f32 %v3073_v42, %v25478_v26  ;;  %v20703_v34 = vadd.f32 %v2694_v23, %v2318_v12  ;;  %25481 = vst [vmem:[#allocation43_spill] sm:$0xff] %v20706_v43  ;;  %v16838_v33 = vpop.f32.mrf.mxu0  ;;  %v16814_v55 = vpop.f32.mrf.mxu1  ;;  %v20716_v3 = vsel %vm1607_vm3, %v20588_v49, %v5769_v45  ;;  %v5403_v53 = vrot.slane %v5401_v20, 1  ;;  %v25482_v23 = vld [vmem:[#allocation25_spill] sm:$0xff] }
 0x234   : > { %v6117_v12 = vshrl.u32 %v15192_v22, 16  ;;  %v6120_v42 = vshll.u32 %v15192_v22, 16  ;;  %v2319_v9 = vadd.f32 %v20139_v14, %v20310_v13  ;;  %v20721_v40 = vadd.f32 %v16838_v33, %v25482_v23  ;;  %25483 = vst [vmem:[#allocation25_spill] sm:$0xff] %v20726_v41  ;;  %v20728_v6 = vld [vmem:[#allocation2 + $0x94] sm:$0xf] }
 0x235   : > { %25479 = vst [vmem:[#allocation24_spill] sm:$0xff] %v20701_v60  ;;  %25480 = vst [vmem:[#allocation23_spill] sm:$0xff] %v20703_v34  ;;  %v20723_v26 = vadd.f32 %v16814_v55, %v2321_v4  ;;  %v5790_v38 = vshrl.u32 %v20678_v39, 16  ;;  %v3076_v34 = vpop.f32.mrf.mxu0  ;;  %v2697_v49 = vpop.f32.mrf.mxu1  ;;  %v5793_v20 = vshll.u32 %v20678_v39, 16  ;;  %v20733_v22 = vcombine.low %v20726_v41, %v20706_v43  ;;  %17150 = vmatpush3.bf16.msra.mxu0 %v20669_v63  ;;  %v20745_v39 = vld [vmem:[#allocation2 + $0x90] sm:$0xf] }
 0x236   : > { %25484 = vst [vmem:[#allocation44_spill] sm:$0xff] %v20728_v6  ;;  %v6109_v13 = vshrl.u32 %v15191_v24, 16  ;;  %v6112_v60 = vshll.u32 %v15191_v24, 16  ;;  %v2324_v4 = vadd.f32 %v20324_v52, %v20139_v14  ;;  %v20739_v33 = vadd.f32 %v3076_v34, %v20319_v17  ;;  %25487 = vst [vmem:[#allocation47_spill] sm:$0xff] %v20745_v39  ;;  %17207 = vmatprep.subr.bf16.mxu0 %v20712_v44  ;;  %v25489_v41 = vld [vmem:[#allocation27_spill] sm:$0xff] }
 0x237   : > { %v20741_v55 = vadd.f32 %v2697_v49, %v2319_v9  ;;  %v5779_v23 = vsel %vm1607_vm3, %v5769_v45, %v20694_v57  ;;  %v16841_v43 = vpop.f32.mrf.mxu0  ;;  %17096 = vmatmul.mubr.msk.bf16.gmra.mxu0 %vm895_vm4, %v20624_v37  ;;  %v16817_v24 = vpop.f32.mrf.mxu1  ;;  %v5783_v52 = vrot.slane %v5781_v47, 3  ;;  %v6119_v17 = vrot.slane %v6117_v12, 3  ;;  %v25488_v49 = vld [vmem:[#allocation28_spill] sm:$0xff] }
 0x238   : > { %25485 = vst [vmem:[#allocation45_spill] sm:$0xff] %v20739_v33  ;;  %17072 = vmatmul.mubr.msk.bf16.gmra.mxu1 %vm895_vm4, %v20639_v29  ;;  %v6122_v34 = vrot.slane %v6120_v42, 4  ;;  %v15194_v9 = vcombine.low %v20745_v39, %v20728_v6  ;;  %v2322_v45 = vadd.f32 %v20139_v14, %v25488_v49  ;;  %17099 = vmatprep.mubr.msk.bf16.mxu0 %vm895_vm4, %v20628_v36  ;;  %v5786_v29 = vrot.slane %v5784_v1, 4 }
 0x239   : > { %25486 = vst [vmem:[#allocation46_spill] sm:$0xff] %v20741_v55  ;;  %v20757_v55 = vadd.f32 %v16841_v43, %v25489_v41  ;;  %v20761_v37 = vadd.f32 %v16817_v24, %v2324_v4  ;;  %17075 = vmatprep.mubr.msk.bf16.mxu1 %vm895_vm4, %v5396_v7  ;;  %v3089_v47 = vpop.f32.mrf.mxu0  ;;  %v2710_v12 = vpop.f32.mrf.mxu1  ;;  %v5404_v42 = vsel %vm2862_vm5, %v5399_v21, %v5403_v53  ;;  %v6111_v33 = vrot.slane %v6109_v13, 3  ;;  %v25492_v43 = vld [vmem:[#allocation29_spill] sm:$0xff]  ;;  %v20773_v24 = vld [vmem:[#allocation2 + $0x78] sm:$0xf] }
 0x23a   : > { %v6114_v6 = vrot.slane %v6112_v60, 4  ;;  %v6126_v39 = vshrl.u32 %v20733_v22, 16  ;;  %v2325_v41 = vadd.f32 %v20359_v10, %v20139_v14  ;;  %v20769_v49 = vadd.f32 %v3089_v47, %v25492_v43  ;;  %v20778_v53 = vld [vmem:[#allocation2 + $0x9c] sm:$0xf]  ;;  %v20787_v47 = vld [vmem:[#allocation2 + $0xa4] sm:$0xf] }
 0x23b   : > { %25490 = vst [vmem:[#allocation28_spill] sm:$0xff] %v20757_v55  ;;  %25491 = vst [vmem:[#allocation27_spill] sm:$0xff] %v20761_v37  ;;  %v20771_v36 = vadd.f32 %v2710_v12, %v2322_v45  ;;  %v5792_v4 = vrot.slane %v5790_v38, 3  ;;  %v16842_v7 = vpop.f32.mrf.mxu0  ;;  %v16818_v1 = vpop.f32.mrf.mxu1  ;;  %v5795_v37 = vrot.slane %v5793_v20, 4  ;;  %v20775_v55 = vor.u32 %v6122_v34, %v6119_v17 }
 0x23c   : > { %v6129_v21 = vshll.u32 %v20733_v22, 16  ;;  %v6135_v60 = vshrl.u32 %v15194_v9, 16  ;;  %25494 = vst [vmem:[#allocation48_spill] sm:$0xff] %v20778_v53  ;;  %v2323_v10 = vadd.f32 %v20139_v14, %v20370_v61  ;;  %v20783_v13 = vadd.f32 %v16842_v7, %v20365_v18  ;;  %25495 = vst [vmem:[#allocation49_spill] sm:$0xff] %v20787_v47  ;;  %v20802_v7 = vld [vmem:[#allocation2 + $0xa0] sm:$0xf] }
 0x23d   : > { %25493 = vst [vmem:[#allocation29_spill] sm:$0xff] %v20771_v36  ;;  %v20785_v45 = vadd.f32 %v16818_v1, %v2325_v41  ;;  %v6138_v38 = vshll.u32 %v15194_v9, 16  ;;  %v3092_v12 = vpop.f32.mrf.mxu0  ;;  %v2713_v20 = vpop.f32.mrf.mxu1  ;;  %v5787_v17 = vor.u32 %v5786_v29, %v5783_v52  ;;  %v6115_v34 = vor.u32 %v6114_v6, %v6111_v33  ;;  %v20791_v36 = vld [vmem:[#allocation2 + $0x98] sm:$0xf] }
 0x23e   : > { %v15174_v22 = vcombine.low %v20773_v24, %v20773_v24  ;;  %v6128_v43 = vrot.slane %v6126_v39, 3  ;;  %v2328_v61 = vadd.f32 %v20386_v35, %v20139_v14  ;;  %v20796_v18 = vadd.f32 %v3092_v12, %v20376_v28 }
 0x23f   : > { %v20798_v41 = vadd.f32 %v2713_v20, %v2323_v10  ;;  %v15195_v9 = vcombine.low %v20791_v36, %v20778_v53  ;;  %v16845_v6 = vpop.f32.mrf.mxu0  ;;  %17100 = vmatmul.mubr.msk.bf16.gmra.mxu0 %vm895_vm4, %v20716_v3  ;;  %v16821_v33 = vpop.f32.mrf.mxu1  ;;  %v6124_v35 = vsel %vm1607_vm3, %v6115_v34, %v20775_v55  ;;  %v6131_v39 = vrot.slane %v6129_v21, 4  ;;  %v20847_v53 = vld [vmem:[#allocation2 + $0xa8] sm:$0xf] }
 0x240   : > { %17076 = vmatmul.mubr.msk.bf16.gmra.mxu1 %vm895_vm4, %v5404_v42  ;;  %v6137_v28 = vrot.slane %v6135_v60, 3  ;;  %v15196_v52 = vcombine.low %v20802_v7, %v20787_v47  ;;  %v2326_v29 = vadd.f32 %v20139_v14, %v20403_v11  ;;  %v20814_v1 = vadd.f32 %v16845_v6, %v20394_v0  ;;  %17103 = vmatprep.mubr.msk.bf16.mxu0 %vm895_vm4, %v5779_v23  ;;  %v18401_v14 = vld [vmem:[%s25265_s5] ss:$0 sm:$0xff] }
 0x241   : > { %v20817_v3 = vadd.f32 %v16821_v33, %v2328_v61  ;;  %17119 = vmatprep.mubr.msk.bf16.mxu1 %vm895_vm4, %v6124_v35  ;;  %v6140_v42 = vrot.slane %v6138_v38, 4  ;;  %v3105_v10 = vpop.f32.mrf.mxu0  ;;  %v5788_v21 = vsel %vm1607_vm3, %v20694_v57, %v5787_v17  ;;  %v20822_v60 = vor.u32 %v5795_v37, %v5792_v4  ;;  %v2726_v12 = vpop.f32.mrf.mxu1  ;;  %v20833_v35 = vld [vmem:[#allocation2 + $0xac] sm:$0xf]  ;;  %25498 = vst [vmem:[#allocation52_spill] sm:$0xff] %v20847_v53 }
 0x242   : > { %v5799_v20 = vshrl.u32 %v15174_v22, 16  ;;  %v5802_v34 = vshll.u32 %v15174_v22, 16  ;;  %v2329_v0 = vadd.f32 %v18401_v14, %v20415_v31  ;;  %v20829_v11 = vadd.f32 %v3105_v10, %v20407_v5  ;;  %25496 = vst [vmem:[#allocation50_spill] sm:$0xff] %v20833_v35  ;;  %v20841_v10 = vld [vmem:[#allocation2 + $0xb4] sm:$0xf] }
 0x243   : > { %v20831_v23 = vadd.f32 %v2726_v12, %v2326_v29  ;;  %v6144_v38 = vshrl.u32 %v15195_v9, 16  ;;  %v16846_v61 = vpop.f32.mrf.mxu0  ;;  %v16822_v6 = vpop.f32.mrf.mxu1  ;;  %v6132_v57 = vor.u32 %v6131_v39, %v6128_v43  ;;  %v6147_v37 = vshll.u32 %v15195_v9, 16  ;;  %25497 = vst [vmem:[#allocation51_spill] sm:$0xff] %v20841_v10 }
 0x244   : > { %v6153_v4 = vshrl.u32 %v15196_v52, 16  ;;  %v6156_v33 = vshll.u32 %v15196_v52, 16  ;;  %v2327_v22 = vadd.f32 %v18401_v14, %v20428_v25  ;;  %v20837_v47 = vadd.f32 %v16846_v61, %v20422_v54  ;;  %v20856_v14 = vld [vmem:[#allocation2 + $0xb0] sm:$0xf] }
 0x245   : > { %v20839_v31 = vadd.f32 %v16822_v6, %v2329_v0  ;;  %v6141_v5 = vor.u32 %v6140_v42, %v6137_v28  ;;  %v3108_v29 = vpop.f32.mrf.mxu0  ;;  %v5797_v12 = vsel %vm1607_vm3, %v5787_v17, %v20822_v60  ;;  %v2729_v43 = vpop.f32.mrf.mxu1  ;;  %v5801_v9 = vrot.slane %v5799_v20, 3  ;;  %25499 = vst [vmem:[#allocation53_spill] sm:$0xff] %v20856_v14 }
 0x246   : > { %v5804_v39 = vrot.slane %v5802_v34, 4  ;;  %v6133_v52 = vsel %vm1607_vm3, %v20775_v55, %v6132_v57  ;;  %v20850_v54 = vadd.f32 %v3108_v29, %v20442_v59  ;;  %v20852_v25 = vadd.f32 %v2729_v43, %v2327_v22 }
 0x247   : > { %v6146_v28 = vrot.slane %v6144_v38, 3  ;;  %v15197_v42 = vcombine.low %v20847_v53, %v20833_v35  ;;  %v16849_v17 = vpop.f32.mrf.mxu0  ;;  %17104 = vmatmul.mubr.msk.bf16.gmra.mxu0 %vm895_vm4, %v5788_v21  ;;  %v16865_v20 = vpop.f32.mrf.mxu1  ;;  %v6149_v55 = vrot.slane %v6147_v37, 4  ;;  %v6155_v34 = vrot.slane %v6153_v4, 3 }
 0x248   : > { %17120 = vmatmul.mubr.msk.bf16.vlgmr.msra.gmra.mxu1 %vm895_vm4, %v6133_v52  ;;  %v6158_v0 = vrot.slane %v6156_v33, 4  ;;  %v15198_v59 = vcombine.low %v20856_v14, %v20841_v10  ;;  %v20863_v61 = vadd.f32 %v16849_v17, %v20458_v46  ;;  %17107 = vmatprep.mubr.msk.bf16.mxu0 %vm895_vm4, %v5797_v12  ;;  %v20867_v38 = vadd.f32 %v16865_v20, %v20462_v19  ;;  %v25500_v52 = vld [vmem:[#allocation4_spill] sm:$0xff]  ;;  %v25517_v14 = vld [vmem:[#allocation26_spill] sm:$0xff] }
 0x249   : > { %17176 = vmatpush3.bf16.msra.mxu1 %v20293_v48  ;;  %v6142_v21 = vsel %vm1607_vm3, %v6132_v57, %v6141_v5  ;;  %v3121_v6 = vpop.f32.mrf.mxu0  ;;  %v3434_v37 = vpop.f32.mrf.mxu1  ;;  %v6162_v33 = vshrl.u32 %v15197_v42, 16  ;;  %v5805_v19 = vor.u32 %v5804_v39, %v5801_v9  ;;  %v6150_v12 = vor.u32 %v6149_v55, %v6146_v28  ;;  %v18402_v28 = vld [vmem:[#allocation2 + $0x1c] sm:$0xf] }
 0x24a   : > { %17123 = vmatprep.mubr.msk.bf16.mxu1 %vm895_vm4, %v6142_v21  ;;  %17177 = vmatprep.subr.bf16.mxu1 %v20572_v58  ;;  %v20874_v4 = vadd.f32 %v3121_v6, %v20480_v27  ;;  %v20877_v46 = vadd.f32 %v3434_v37, %v20482_v56  ;;  %v20879_v48 = vor.u32 %v6158_v0, %v6155_v34  ;;  %v6165_v57 = vshll.u32 %v15197_v42, 16  ;;  %v20888_v56 = vld [vmem:[#allocation2 + $0xbc] sm:$0xf]  ;;  %v20890_v21 = vld [vmem:[#allocation2 + $0xc4] sm:$0xf] }
 0x24b   : > { %v16850_v22 = vpop.f32.mrf.mxu0  ;;  %v16866_v29 = vpop.f32.mrf.mxu1  ;;  %v6171_v27 = vshrl.u32 %v15198_v59, 16  ;;  %v6174_v20 = vshll.u32 %v15198_v59, 16  ;;  %25501 = vst [vmem:[#allocation4_spill] sm:$0xff] %v20888_v56  ;;  %25502 = vst [vmem:[#allocation54_spill] sm:$0xff] %v20890_v21  ;;  %v5806_v39 = vsel %vm1607_vm3, %v20822_v60, %v5805_v19  ;;  %v25503_v42 = vld [vmem:[#allocation22_spill] sm:$0xff]  ;;  %v6151_v59 = vsel %vm1607_vm3, %v6141_v5, %v6150_v12 }
 0x24c   : > { %v20882_v43 = vadd.f32 %v16850_v22, %v20495_v32  ;;  %v20885_v17 = vadd.f32 %v16866_v29, %v25500_v52  ;;  %v15224_v55 = vcombine.low %v18402_v28, %v25503_v42  ;;  %v25504_v34 = vld [vmem:[#allocation10_spill] sm:$0xff]  ;;  %v6164_v37 = vrot.slane %v6162_v33, 3  ;;  %v20905_v29 = vld [vmem:[#allocation2 + $0xc0] sm:$0xf] }
 0x24d   : > { %17178 = vmatpush3.bf16.msra.mxu1 %v20572_v58  ;;  %v3124_v9 = vpop.f32.mrf.mxu0  ;;  %v3437_v32 = vpop.f32.mrf.mxu1  ;;  %v25505_v58 = vld [vmem:[#allocation5_spill] sm:$0xff]  ;;  %v20903_v22 = vld [vmem:[#allocation2 + $0xb8] sm:$0xf]  ;;  %25507 = vst [vmem:[#allocation10_spill] sm:$0xff] %v20905_v29  ;;  %v6160_v52 = vsel %vm1607_vm3, %v6150_v12, %v20879_v48  ;;  %v15200_v5 = vcombine.low %v20905_v29, %v20890_v21  ;;  %v25511_v21 = vld [vmem:[#allocation12_spill] sm:$0xff] }
 0x24e   : > { %17179 = vmatprep.subr.bf16.mxu1 %v20611_v15  ;;  %v20897_v0 = vadd.f32 %v3124_v9, %v25504_v34  ;;  %v20900_v6 = vadd.f32 %v3437_v32, %v25505_v58  ;;  %25506 = vst [vmem:[#allocation22_spill] sm:$0xff] %v20903_v22  ;;  %v6167_v9 = vrot.slane %v6165_v57, 4  ;;  %v15199_v28 = vcombine.low %v20903_v22, %v20888_v56  ;;  %v25508_v33 = vld [vmem:[#allocation6_spill] sm:$0xff]  ;;  %v25509_v32 = vld [vmem:[#allocation8_spill] sm:$0xff]  ;;  %v18403_v22 = vld [vmem:[#allocation2 + $0x24] sm:$0xf] }
 0x24f   : > { %v16853_v60 = vpop.f32.mrf.mxu0  ;;  %17108 = vmatmul.mubr.msk.bf16.gmra.mxu0 %vm895_vm4, %v5806_v39  ;;  %v16869_v19 = vpop.f32.mrf.mxu1  ;;  %v6173_v34 = vrot.slane %v6171_v27, 3  ;;  %v6176_v58 = vrot.slane %v6174_v20, 4  ;;  %v20931_v27 = vld [vmem:[#allocation2 + $0xcc] sm:$0xf] }
 0x250   : > { %17124 = vmatmul.mubr.msk.bf16.gmra.mxu1 %vm895_vm4, %v6151_v59  ;;  %v20916_v42 = vadd.f32 %v16853_v60, %v25508_v33  ;;  %17151 = vmatprep.mubr.msk.bf16.mxu0 %vm895_vm4, %v15224_v55  ;;  %v20920_v39 = vadd.f32 %v16869_v19, %v25509_v32  ;;  %v25510_v59 = vld [vmem:[#allocation9_spill] sm:$0xff]  ;;  %v6168_v19 = vor.u32 %v6167_v9, %v6164_v37  ;;  %v6180_v33 = vshrl.u32 %v15199_v28, 16  ;;  %v18404_v37 = vld [vmem:[#allocation2 + $0x28] sm:$0xf] }
 0x251   : > { %17127 = vmatprep.mubr.msk.bf16.mxu1 %vm895_vm4, %v6160_v52  ;;  %v3137_v12 = vpop.f32.mrf.mxu0  ;;  %v3450_v57 = vpop.f32.mrf.mxu1  ;;  %17180 = vmatpush3.bf16.msra.mxu1 %v20611_v15  ;;  %v6189_v32 = vshrl.u32 %v15200_v5, 16  ;;  %v6192_v52 = vshll.u32 %v15200_v5, 16  ;;  %25513 = vst [vmem:[#allocation6_spill] sm:$0xff] %v20931_v27  ;;  %v25514_v15 = vld [vmem:[#allocation13_spill] sm:$0xff]  ;;  %v15225_v9 = vcombine.low %v18403_v22, %v18404_v37  ;;  %v18405_v5 = vld [vmem:[#allocation2 + $0x2c] sm:$0xf] }
 0x252   : > { %v20925_v56 = vadd.f32 %v3137_v12, %v25510_v59  ;;  %v20928_v29 = vadd.f32 %v3450_v57, %v25511_v21  ;;  %17181 = vmatprep.subr.bf16.mxu1 %v20669_v63  ;;  %v20939_v12 = vor.u32 %v6176_v58, %v6173_v34  ;;  %v6183_v21 = vshll.u32 %v15199_v28, 16  ;;  %v20941_v57 = vld [vmem:[#allocation2 + $0xd0] sm:$0xf]  ;;  %v20943_v59 = vld [vmem:[#allocation2 + $0xd4] sm:$0xf] }
 0x253   : > { %v16854_v55 = vpop.f32.mrf.mxu0  ;;  %v16870_v60 = vpop.f32.mrf.mxu1  ;;  %25515 = vst [vmem:[#allocation8_spill] sm:$0xff] %v20941_v57  ;;  %25516 = vst [vmem:[#allocation9_spill] sm:$0xff] %v20943_v59  ;;  %v15226_v53 = vcombine.low %v18405_v5, %v25517_v14  ;;  %v20951_v34 = vld [vmem:[#allocation2 + $0xc8] sm:$0xf]  ;;  %v6169_v22 = vsel %vm1607_vm3, %v20879_v48, %v6168_v19  ;;  %v25522_v48 = vld [vmem:[#allocation17_spill] sm:$0xff] }
 0x254   : > { %25512 = vst [vmem:[#allocation5_spill] sm:$0xff] %v20928_v29  ;;  %v20934_v20 = vadd.f32 %v16854_v55, %v20563_v50  ;;  %v20937_v10 = vadd.f32 %v16870_v60, %v25514_v15  ;;  %v20949_v50 = vld [vmem:[%s25264_s4 + $0x110] sm:$0xff]   ;;  %25518 = vst [vmem:[#allocation12_spill] sm:$0xff] %v20951_v34  ;;  %v15201_v14 = vcombine.low %v20951_v34, %v20931_v27  ;;  %v6185_v5 = vrot.slane %v6183_v21, 4 }
 0x255   : > { %v3140_v35 = vpop.f32.mrf.mxu0  ;;  %v3453_v29 = vpop.f32.mrf.mxu1  ;;  %17182 = vmatpush3.bf16.msra.mxu1 %v20669_v63  ;;  %v6182_v63 = vrot.slane %v6180_v33, 3  ;;  %v25529_v34 = vld [vmem:[#allocation21_spill] sm:$0xff] }
 0x256   : > { %v20955_v28 = vadd.f32 %v3140_v35, %v20579_v16  ;;  %v20958_v58 = vadd.f32 %v3453_v29, %v20581_v2  ;;  %17239 = vmatprep.subr.bf16.mxu1 %v20712_v44  ;;  %v6191_v16 = vrot.slane %v6189_v32, 3  ;;  %v6194_v35 = vrot.slane %v6192_v52, 4  ;;  %v25520_v29 = vld [vmem:[#allocation15_spill] sm:$0xff]  ;;  %v20984_v52 = vld [vmem:[%s25264_s4 + $0x108] sm:$0xff]  }
 0x257   : > { %v16897_v55 = vpop.f32.mrf.mxu0  ;;  %17152 = vmatmul.mubr.msk.bf16.vlgmr.msra.gmra.mxu0 %vm895_vm4, %v15225_v9  ;;  %v16873_v60 = vpop.f32.mrf.mxu1  ;;  %v15202_v2 = vcombine.low %v20941_v57, %v20943_v59  ;;  %v6178_v9 = vsel %vm1607_vm3, %v6168_v19, %v20939_v12  ;;  %v6198_v19 = vshrl.u32 %v15201_v14, 16  ;;  %v6201_v59 = vshll.u32 %v15201_v14, 16  ;;  %v25532_v14 = vld [vmem:[#allocation31_spill] sm:$0xff] }
 0x258   : > { %25519 = vst [vmem:[#allocation13_spill] sm:$0xff] %v20958_v58  ;;  %17128 = vmatmul.mubr.msk.bf16.gmra.mxu1 %vm895_vm4, %v6169_v22  ;;  %v20970_v15 = vadd.f32 %v16897_v55, %v25520_v29  ;;  %17208 = vmatpush3.bf16.msra.mxu0 %v20712_v44  ;;  %v20975_v37 = vadd.f32 %v16873_v60, %v25522_v48  ;;  %v20986_v22 = vld [vmem:[#allocation2 + $0xd8] sm:$0xf]  ;;  %v25527_v60 = vld [vmem:[#allocation19_spill] sm:$0xff] }
 0x259   : > { %17155 = vmatprep.mubr.msk.bf16.mxu0 %vm895_vm4, %v15226_v53  ;;  %v3860_v33 = vpop.f32.mrf.mxu0  ;;  %17131 = vmatprep.mubr.msk.bf16.mxu1 %vm895_vm4, %v6178_v9  ;;  %v3466_v32 = vpop.f32.mrf.mxu1  ;;  %25524 = vst [vmem:[#allocation17_spill] sm:$0xff] %v20986_v22  ;;  %v25525_v53 = vld [vmem:[#allocation16_spill] sm:$0xff]  ;;  %v6195_v9 = vor.u32 %v6194_v35, %v6191_v16  ;;  %v6207_v27 = vshrl.u32 %v15202_v2, 16  ;;  %v6210_v57 = vshll.u32 %v15202_v2, 16  ;;  %v18407_v16 = vld [vmem:[#allocation2 + $0x3c] sm:$0xf] }
 0x25a   : > { %25521 = vst [vmem:[#allocation26_spill] sm:$0xff] %v20970_v15  ;;  %25523 = vst [vmem:[#allocation15_spill] sm:$0xff] %v20975_v37  ;;  %17209 = vmatprep.subr.bf16.mxu0 %v20949_v50  ;;  %v20989_v55 = vadd.f32 %v3860_v33, %v25525_v53  ;;  %v20992_v29 = vadd.f32 %v3466_v32, %v25527_v60  ;;  %v25530_v15 = vld [vmem:[#allocation20_spill] sm:$0xff]  ;;  %v6186_v33 = vor.u32 %v6185_v5, %v6182_v63  ;;  %v18406_v60 = vld [vmem:[#allocation2 + $0x34] sm:$0xf] }
 0x25b   : > { %v16898_v21 = vpop.f32.mrf.mxu0  ;;  %v16874_v48 = vpop.f32.mrf.mxu1  ;;  %v15203_v32 = vcombine.low %v20986_v22, %v20986_v22  ;;  %v15228_v35 = vcombine.low %v18407_v16, %v25532_v14  ;;  %v6200_v5 = vrot.slane %v6198_v19, 3 }
 0x25c   : > { %25526 = vst [vmem:[#allocation16_spill] sm:$0xff] %v20989_v55  ;;  %25528 = vst [vmem:[#allocation19_spill] sm:$0xff] %v20992_v29  ;;  %v20995_v37 = vadd.f32 %v16898_v21, %v25529_v34  ;;  %17210 = vmatpush3.bf16.msra.mxu0 %v20949_v50  ;;  %v20999_v58 = vadd.f32 %v16874_v48, %v25530_v15  ;;  %v25531_v29 = vld [vmem:[#allocation30_spill] sm:$0xff]  ;;  %v6187_v63 = vsel %vm1607_vm3, %v20939_v12, %v6186_v33 }
 0x25d   : > { %v3863_v53 = vpop.f32.mrf.mxu0  ;;  %v15227_v55 = vcombine.low %v18406_v60, %v25531_v29  ;;  %v3469_v2 = vpop.f32.mrf.mxu1  ;;  %17211 = vmatprep.subr.bf16.mxu0 %v20984_v52  ;;  %v21017_v29 = vld [vmem:[%s25264_s4 + $0x100] sm:$0xff]   ;;  %v6212_v60 = vrot.slane %v6210_v57, 4  ;;  %v6216_v19 = vshrl.u32 %v15203_v32, 16 }
 0x25e   : > { %v21007_v34 = vadd.f32 %v3863_v53, %v20658_v62  ;;  %v21010_v15 = vadd.f32 %v3469_v2, %v20660_v30  ;;  %v6196_v62 = vsel %vm1607_vm3, %v6186_v33, %v6195_v9  ;;  %v6203_v53 = vrot.slane %v6201_v59, 4  ;;  %v25533_v33 = vld [vmem:[#allocation24_spill] sm:$0xff] }
 0x25f   : > { %v16901_v21 = vpop.f32.mrf.mxu0  ;;  %17156 = vmatmul.mubr.msk.bf16.gmra.mxu0 %vm895_vm4, %v15227_v55  ;;  %v16877_v48 = vpop.f32.mrf.mxu1  ;;  %v6209_v30 = vrot.slane %v6207_v27, 3  ;;  %v6219_v55 = vshll.u32 %v15203_v32, 16  ;;  %v25535_v27 = vld [vmem:[#allocation23_spill] sm:$0xff] }
 0x260   : > { %17132 = vmatmul.mubr.msk.bf16.gmra.mxu1 %vm895_vm4, %v6187_v63  ;;  %v21023_v16 = vadd.f32 %v16901_v21, %v20685_v8  ;;  %17159 = vmatprep.mubr.msk.bf16.mxu0 %vm895_vm4, %v15228_v35  ;;  %v21027_v12 = vadd.f32 %v16877_v48, %v20689_v51  ;;  %v6204_v51 = vor.u32 %v6203_v53, %v6200_v5  ;;  %v6218_v48 = vrot.slane %v6216_v19, 3  ;;  %v25539_v5 = vld [vmem:[#allocation35_spill] sm:$0xff]  ;;  %v25540_v53 = vld [vmem:[#allocation32_spill] sm:$0xff] }
 0x261   : > { %17135 = vmatprep.mubr.msk.bf16.mxu1 %vm895_vm4, %v6196_v62  ;;  %v3876_v14 = vpop.f32.mrf.mxu0  ;;  %v3482_v2 = vpop.f32.mrf.mxu1  ;;  %17212 = vmatpush3.bf16.msra.mxu0 %v20984_v52  ;;  %v6213_v63 = vor.u32 %v6212_v60, %v6209_v30  ;;  %v6221_v62 = vrot.slane %v6219_v55, 4  ;;  %v15230_v30 = vcombine.low %v25540_v53, %v25539_v5  ;;  %v25544_v5 = vld [vmem:[#allocation29_spill] sm:$0xff] }
 0x262   : > { %v21032_v59 = vadd.f32 %v3876_v14, %v25533_v33  ;;  %v21035_v57 = vadd.f32 %v3482_v2, %v25535_v27  ;;  %17213 = vmatprep.subr.bf16.mxu0 %v21017_v29  ;;  %v18408_v14 = vld [vmem:[#allocation2 + $0x44] sm:$0xf]  ;;  %v25537_v33 = vld [vmem:[#allocation33_spill] sm:$0xff] }
 0x263   : > { %v16902_v8 = vpop.f32.mrf.mxu0  ;;  %v16878_v35 = vpop.f32.mrf.mxu1  ;;  %v25538_v27 = vld [vmem:[#allocation45_spill] sm:$0xff] }
 0x264   : > { %25534 = vst [vmem:[#allocation21_spill] sm:$0xff] %v21032_v59  ;;  %25536 = vst [vmem:[#allocation20_spill] sm:$0xff] %v21035_v57  ;;  %v21039_v21 = vadd.f32 %v16902_v8, %v20721_v40  ;;  %v21042_v32 = vadd.f32 %v16878_v35, %v20723_v26  ;;  %v15229_v59 = vcombine.low %v18408_v14, %v25537_v33  ;;  %v25541_v40 = vld [vmem:[#allocation46_spill] sm:$0xff]  ;;  %v25542_v35 = vld [vmem:[#allocation28_spill] sm:$0xff] }
 0x265   : > { %v3879_v22 = vpop.f32.mrf.mxu0  ;;  %v3485_v2 = vpop.f32.mrf.mxu1  ;;  %17214 = vmatpush3.bf16.msra.mxu0 %v21017_v29  ;;  %v6205_v26 = vsel %vm1607_vm3, %v6195_v9, %v6204_v51  ;;  %v6214_v8 = vsel %vm1607_vm3, %v6204_v51, %v6213_v63 }
 0x266   : > { %v21047_v57 = vadd.f32 %v3879_v22, %v25538_v27  ;;  %v21052_v60 = vadd.f32 %v3485_v2, %v25541_v40  ;;  %v25543_v22 = vld [vmem:[#allocation27_spill] sm:$0xff]  ;;  %v6222_v2 = vor.u32 %v6221_v62, %v6218_v48  ;;  %v25546_v62 = vld [vmem:[#allocation34_spill] sm:$0xff] }
 0x267   : > { %v16905_v19 = vpop.f32.mrf.mxu0  ;;  %17160 = vmatmul.mubr.msk.bf16.gmra.mxu0 %vm895_vm4, %v15229_v59  ;;  %v16881_v55 = vpop.f32.mrf.mxu1  ;;  %v25545_v48 = vld [vmem:[#allocation7_spill] sm:$0xff] }
 0x268   : > { %17136 = vmatmul.mubr.msk.bf16.gmra.mxu1 %vm895_vm4, %v6205_v26  ;;  %v21059_v14 = vadd.f32 %v16905_v19, %v25542_v35  ;;  %17163 = vmatprep.mubr.msk.bf16.mxu0 %vm895_vm4, %v15230_v30  ;;  %v21063_v33 = vadd.f32 %v16881_v55, %v25543_v22  ;;  %v6223_v19 = vsel %vm1607_vm3, %v6213_v63, %v6222_v2  ;;  %v25548_v22 = vld [vmem:[#allocation14_spill] sm:$0xff] }
 0x269   : > { %17139 = vmatprep.mubr.msk.bf16.mxu1 %vm895_vm4, %v6214_v8  ;;  %v3892_v9 = vpop.f32.mrf.mxu0  ;;  %v3498_v27 = vpop.f32.mrf.mxu1  ;;  %v15231_v8 = vcombine.low %v25546_v62, %v25545_v48  ;;  %v18115_v48 = vld [vmem:[#allocation2 + $0x1c] sm:$0xff]  }
 0x26a   : > { %v21067_v59 = vadd.f32 %v3892_v9, %v20769_v49  ;;  %v21070_v53 = vadd.f32 %v3498_v27, %v25544_v5  ;;  %v25549_v9 = vld [vmem:[#allocation11_spill] sm:$0xff] }
 0x26b   : > { %v16906_v51 = vpop.f32.mrf.mxu0  ;;  %v16882_v40 = vpop.f32.mrf.mxu1  ;;  %v15232_v27 = vcombine.low %v25549_v9, %v25548_v22  ;;  %v25553_v9 = vld [vmem:[#allocation25_spill] sm:$0xff] }
 0x26c   : > { %v21073_v26 = vadd.f32 %v16906_v51, %v20783_v13  ;;  %v21076_v30 = vadd.f32 %v16882_v40, %v20785_v45  ;;  %v25550_v13 = vld [vmem:[#allocation42_spill] sm:$0xff]  ;;  %v25551_v51 = vld [vmem:[#allocation41_spill] sm:$0xff] }
 0x26d   : > { %v3895_v55 = vpop.f32.mrf.mxu0  ;;  %v3501_v35 = vpop.f32.mrf.mxu1  ;;  %v15252_v45 = vcombine.low %v25551_v51, %v25550_v13 }
 0x26e   : > { %v21082_v49 = vadd.f32 %v3895_v55, %v20796_v18  ;;  %v21087_v5 = vadd.f32 %v3501_v35, %v20798_v41 }
 0x26f   : > { %v16909_v40 = vpop.f32.mrf.mxu0  ;;  %17164 = vmatmul.mubr.msk.bf16.gmra.mxu0 %vm895_vm4, %v15231_v8  ;;  %v16885_v63 = vpop.f32.mrf.mxu1 }
 0x270   : > { %25547 = vst [vmem:[#allocation30_spill] sm:$0xff] %v21082_v49  ;;  %17140 = vmatmul.mubr.msk.bf16.gmra.mxu1 %vm895_vm4, %v6223_v19  ;;  %v21094_v2 = vadd.f32 %v16909_v40, %v20814_v1  ;;  %17167 = vmatprep.mubr.msk.bf16.mxu0 %vm895_vm4, %v15232_v27  ;;  %v21098_v18 = vadd.f32 %v16885_v63, %v20817_v3  ;;  %v21107_v1 = vld [vmem:[#allocation2 + $0x24] sm:$0xff]   ;;  %v25559_v49 = vld [vmem:[#allocation18_spill] sm:$0xff] }
 0x271   : > { %17183 = vmatprep.mubr.msk.bf16.mxu1 %vm895_vm4, %v15252_v45  ;;  %v3908_v41 = vpop.f32.mrf.mxu0  ;;  %v3514_v55 = vpop.f32.mrf.mxu1  ;;  %v25554_v27 = vld [vmem:[#allocation39_spill] sm:$0xff]  ;;  %v25555_v45 = vld [vmem:[#allocation37_spill] sm:$0xff] }
 0x272   : > { %v21102_v62 = vadd.f32 %v3908_v41, %v20829_v11  ;;  %v21105_v8 = vadd.f32 %v3514_v55, %v20831_v23  ;;  %v15253_v13 = vcombine.low %v25554_v27, %v25553_v9  ;;  %v25556_v11 = vld [vmem:[#allocation36_spill] sm:$0xff]  ;;  %v6948_v23 = vshll.u32 %v18115_v48, 16  ;;  %v25560_v9 = vld [vmem:[#allocation47_spill] sm:$0xff] }
 0x273   : > { %v16910_v19 = vpop.f32.mrf.mxu0  ;;  %v16886_v35 = vpop.f32.mrf.mxu1  ;;  %v15233_v40 = vcombine.low %v25556_v11, %v25555_v45  ;;  %v25558_v55 = vld [vmem:[#allocation40_spill] sm:$0xff]  ;;  %v25561_v27 = vld [vmem:[#allocation43_spill] sm:$0xff] }
 0x274   : > { %25552 = vst [vmem:[#allocation31_spill] sm:$0xff] %v21105_v8  ;;  %v21110_v22 = vadd.f32 %v16910_v19, %v20837_v47  ;;  %v21113_v3 = vadd.f32 %v16886_v35, %v20839_v31  ;;  %v15234_v8 = vcombine.low %v25559_v49, %v25558_v55  ;;  %v6953_v35 = vshll.u32 %v21107_v1, 16  ;;  %v18118_v11 = vld [vmem:[#allocation2 + $0x2c] sm:$0xff]  }
 0x275   : > { %v3911_v51 = vpop.f32.mrf.mxu0  ;;  %v3517_v63 = vpop.f32.mrf.mxu1  ;;  %v15254_v45 = vcombine.low %v25561_v27, %v25560_v9 }
 0x276   : > { %v21120_v41 = vadd.f32 %v3911_v51, %v20850_v54  ;;  %v21125_v47 = vadd.f32 %v3517_v63, %v20852_v25  ;;  %v6950_v51 = vrot.slane %v6948_v23, 1  ;;  %v6946_v63 = vshrl.u32 %v18115_v48, 16  ;;  %v25563_v48 = vld [vmem:[#allocation44_spill] sm:$0xff] }
 0x277   : > { %v16913_v31 = vpop.f32.mrf.mxu0  ;;  %17168 = vmatmul.mubr.msk.bf16.gmra.mxu0 %vm895_vm4, %v15233_v40  ;;  %v16929_v19 = vpop.f32.mrf.mxu1 }
 0x278   : > { %25557 = vst [vmem:[#allocation24_spill] sm:$0xff] %v21120_v41  ;;  %17184 = vmatmul.mubr.msk.bf16.vlgmr.msra.gmra.mxu1 %vm895_vm4, %v15253_v13  ;;  %v21133_v54 = vadd.f32 %v16913_v31, %v20863_v61  ;;  %17171 = vmatprep.mubr.msk.bf16.mxu0 %vm895_vm4, %v15234_v8  ;;  %v21137_v49 = vadd.f32 %v16929_v19, %v20867_v38  ;;  %v6955_v38 = vrot.slane %v6953_v35, 1  ;;  %v21148_v31 = vld [vmem:[#allocation2 + $0x34] sm:$0xff]  }
 0x279   : > { %17240 = vmatpush3.bf16.msra.mxu1 %v20712_v44  ;;  %v3924_v25 = vpop.f32.mrf.mxu0  ;;  %17187 = vmatprep.mubr.msk.bf16.mxu1 %vm895_vm4, %v15254_v45  ;;  %v4253_v13 = vpop.f32.mrf.mxu1  ;;  %v6961_v45 = vshll.u32 %v18118_v11, 16  ;;  %v15255_v35 = vcombine.low %v25563_v48, %v20791_v36  ;;  %v6969_v36 = vshll.u32 %v21148_v31, 16  ;;  %v25588_v41 = vld [vmem:[#allocation54_spill] sm:$0xff] }
 0x27a   : > { %17241 = vmatprep.subr.bf16.mxu1 %v20949_v50  ;;  %v21143_v40 = vadd.f32 %v3924_v25, %v20874_v4  ;;  %v21146_v61 = vadd.f32 %v4253_v13, %v20877_v46  ;;  %v25562_v4 = vld [vmem:[#allocation38_spill] sm:$0xff]  ;;  %v6951_v46 = vor.u32 %v6950_v51, %v6946_v63 }
 0x27b   : > { %v16914_v8 = vpop.f32.mrf.mxu0  ;;  %v16930_v55 = vpop.f32.mrf.mxu1  ;;  %v15235_v9 = vcombine.low %v25562_v4, %v20773_v24 }
 0x27c   : > { %v21151_v44 = vadd.f32 %v16914_v8, %v20882_v43  ;;  %v21154_v23 = vadd.f32 %v16930_v55, %v20885_v17  ;;  %v6956_v24 = vsel %vm2862_vm5, %v6951_v46, %v6955_v38  ;;  %v18122_v55 = vld [vmem:[#allocation2 + $0x3c] sm:$0xff]   ;;  %v6965_v46 = vshrl.u32 %v18118_v11, 16 }
 0x27d   : > { %17242 = vmatpush3.bf16.msra.mxu1 %v20949_v50  ;;  %v3927_v19 = vpop.f32.mrf.mxu0  ;;  %v4256_v27 = vpop.f32.mrf.mxu1  ;;  %v25565_v50 = vld [vmem:[#allocation48_spill] sm:$0xff] }
 0x27e   : > { %17243 = vmatprep.subr.bf16.mxu1 %v20984_v52  ;;  %v21163_v43 = vadd.f32 %v3927_v19, %v20897_v0  ;;  %v21166_v17 = vadd.f32 %v4256_v27, %v20900_v6  ;;  %v15256_v25 = vcombine.low %v25565_v50, %v20802_v7  ;;  %v6963_v6 = vrot.slane %v6961_v45, 1 }
 0x27f   : > { %v16917_v13 = vpop.f32.mrf.mxu0  ;;  %17172 = vmatmul.mubr.msk.bf16.gmra.mxu0 %vm895_vm4, %v15235_v9  ;;  %v16933_v51 = vpop.f32.mrf.mxu1  ;;  %v6957_v19 = vshrl.u32 %v21107_v1, 16  ;;  %v6971_v27 = vrot.slane %v6969_v36, 1  ;;  %v25570_v36 = vld [vmem:[#allocation13_spill] sm:$0xff] }
 0x280   : > { %25564 = vst [vmem:[#allocation23_spill] sm:$0xff] %v21163_v43  ;;  %17188 = vmatmul.mubr.msk.bf16.gmra.mxu1 %vm895_vm4, %v15255_v35  ;;  %v21175_v8 = vadd.f32 %v16917_v13, %v20916_v42  ;;  %17215 = vmatprep.mubr.msk.bf16.mxu0 %vm895_vm4, %v6956_v24  ;;  %v21179_v0 = vadd.f32 %v16933_v51, %v20920_v39  ;;  %v25566_v42 = vld [vmem:[#allocation5_spill] sm:$0xff]  ;;  %v21191_v35 = vld [vmem:[#allocation2 + $0x44] sm:$0xff]   ;;  %v6977_v13 = vshll.u32 %v18122_v55, 16  ;;  %v25577_v43 = vld [vmem:[#allocation22_spill] sm:$0xff] }
 0x281   : > { %17191 = vmatprep.mubr.msk.bf16.mxu1 %vm895_vm4, %v15256_v25  ;;  %v3940_v7 = vpop.f32.mrf.mxu0  ;;  %v4269_v63 = vpop.f32.mrf.mxu1  ;;  %17244 = vmatpush3.bf16.msra.mxu1 %v20984_v52  ;;  %v6959_v45 = vor.u32 %v6957_v19, %v6955_v38  ;;  %v6967_v1 = vor.u32 %v6965_v46, %v6963_v6  ;;  %v25567_v24 = vld [vmem:[#allocation52_spill] sm:$0xff]  ;;  %v25568_v51 = vld [vmem:[#allocation49_spill] sm:$0xff] }
 0x282   : > { %v21185_v4 = vadd.f32 %v3940_v7, %v20925_v56  ;;  %v21188_v9 = vadd.f32 %v4269_v63, %v25566_v42  ;;  %17245 = vmatprep.subr.bf16.mxu1 %v21017_v29  ;;  %v15257_v7 = vcombine.low %v25568_v51, %v25567_v24  ;;  %v25571_v63 = vld [vmem:[#allocation53_spill] sm:$0xff] }
 0x283   : > { %v16918_v39 = vpop.f32.mrf.mxu0  ;;  %v16934_v48 = vpop.f32.mrf.mxu1  ;;  %v6964_v38 = vsel %vm2862_vm5, %v6959_v45, %v6963_v6  ;;  %v25574_v6 = vld [vmem:[#allocation15_spill] sm:$0xff]  ;;  %v18126_v51 = vld [vmem:[#allocation2 + $0x4c] sm:$0xff]  }
 0x284   : > { %v21194_v50 = vadd.f32 %v16918_v39, %v20934_v20  ;;  %v21197_v52 = vadd.f32 %v16934_v48, %v20937_v10  ;;  %v25572_v10 = vld [vmem:[#allocation50_spill] sm:$0xff]  ;;  %v6972_v39 = vsel %vm2862_vm5, %v6967_v1, %v6971_v27  ;;  %v6973_v1 = vshrl.u32 %v21148_v31, 16 }
 0x285   : > { %v3943_v56 = vpop.f32.mrf.mxu0  ;;  %v4272_v25 = vpop.f32.mrf.mxu1  ;;  %17246 = vmatpush3.bf16.msra.mxu1 %v21017_v29  ;;  %v15258_v19 = vcombine.low %v25572_v10, %v25571_v63  ;;  %v6985_v29 = vshll.u32 %v21191_v35, 16 }
 0x286   : > { %v21203_v11 = vadd.f32 %v3943_v56, %v20955_v28  ;;  %v21207_v20 = vadd.f32 %v4272_v25, %v25570_v36  ;;  %v25573_v28 = vld [vmem:[#allocation26_spill] sm:$0xff]  ;;  %v6979_v25 = vrot.slane %v6977_v13, 1  ;;  %v25576_v36 = vld [vmem:[#allocation19_spill] sm:$0xff] }
 0x287   : > { %v16961_v42 = vpop.f32.mrf.mxu0  ;;  %17216 = vmatmul.mubr.msk.bf16.vlgmr.msra.gmra.mxu0 %vm895_vm4, %v6964_v38  ;;  %v16937_v46 = vpop.f32.mrf.mxu1  ;;  %v25575_v38 = vld [vmem:[#allocation16_spill] sm:$0xff] }
 0x288   : > { %25569 = vst [vmem:[#allocation33_spill] sm:$0xff] %v21203_v11  ;;  %17192 = vmatmul.mubr.msk.bf16.gmra.mxu1 %vm895_vm4, %v15257_v7  ;;  %v21216_v48 = vadd.f32 %v16961_v42, %v25573_v28  ;;  %17219 = vmatprep.mubr.msk.bf16.mxu0 %vm895_vm4, %v6972_v39  ;;  %v21220_v45 = vadd.f32 %v16937_v46, %v25574_v6  ;;  %v6981_v42 = vshrl.u32 %v18122_v55, 16  ;;  %v6987_v39 = vrot.slane %v6985_v29, 1  ;;  %v21230_v46 = vld [vmem:[#allocation2 + $0x54] sm:$0xff]  }
 0x289   : > { %17195 = vmatprep.mubr.msk.bf16.mxu1 %vm895_vm4, %v15258_v19  ;;  %v4487_v56 = vpop.f32.mrf.mxu0  ;;  %v4285_v24 = vpop.f32.mrf.mxu1  ;;  %v6975_v6 = vor.u32 %v6973_v1, %v6971_v27  ;;  %v25582_v1 = vld [vmem:[#allocation4_spill] sm:$0xff] }
 0x28a   : > { %v21225_v7 = vadd.f32 %v4487_v56, %v25575_v38  ;;  %v21228_v63 = vadd.f32 %v4285_v24, %v25576_v36  ;;  %v6983_v11 = vor.u32 %v6981_v42, %v6979_v25  ;;  %v6993_v38 = vshll.u32 %v18126_v51, 16  ;;  %v25578_v24 = vld [vmem:[#allocation51_spill] sm:$0xff] }
 0x28b   : > { %v16962_v10 = vpop.f32.mrf.mxu0  ;;  %v16938_v28 = vpop.f32.mrf.mxu1  ;;  %v15259_v36 = vcombine.low %v25578_v24, %v25577_v43  ;;  %v6980_v29 = vsel %vm2862_vm5, %v6975_v6, %v6979_v25  ;;  %v7001_v43 = vshll.u32 %v21230_v46, 16  ;;  %v6989_v24 = vshrl.u32 %v21191_v35, 16 }
 0x28c   : > { %v21233_v19 = vadd.f32 %v16962_v10, %v20995_v37  ;;  %v21236_v13 = vadd.f32 %v16938_v28, %v20999_v58  ;;  %v25581_v37 = vld [vmem:[#allocation10_spill] sm:$0xff]  ;;  %v6988_v42 = vsel %vm2862_vm5, %v6983_v11, %v6987_v39  ;;  %v6995_v6 = vrot.slane %v6993_v38, 1 }
 0x28d   : > { %v4490_v31 = vpop.f32.mrf.mxu0  ;;  %v4288_v56 = vpop.f32.mrf.mxu1  ;;  %v15260_v10 = vcombine.low %v25582_v1, %v25581_v37  ;;  %v18137_v11 = vld [vmem:[#allocation2 + $0x7c] sm:$0xff]   ;;  %v25585_v37 = vld [vmem:[#allocation20_spill] sm:$0xff]  ;;  %v6991_v38 = vor.u32 %v6989_v24, %v6987_v39 }
 0x28e   : > { %v21241_v55 = vadd.f32 %v4490_v31, %v21007_v34  ;;  %v21245_v27 = vadd.f32 %v4288_v56, %v21010_v15  ;;  %v18130_v56 = vld [vmem:[#allocation2 + $0x5c] sm:$0xff]  }
 0x28f   : > { %v16965_v58 = vpop.f32.mrf.mxu0  ;;  %17220 = vmatmul.mubr.msk.bf16.gmra.mxu0 %vm895_vm4, %v6980_v29  ;;  %v16941_v28 = vpop.f32.mrf.mxu1  ;;  %v25592_v24 = vld [vmem:[#allocation6_spill] sm:$0xff] }
 0x290   : > { %25579 = vst [vmem:[#allocation45_spill] sm:$0xff] %v21241_v55  ;;  %25580 = vst [vmem:[#allocation35_spill] sm:$0xff] %v21245_v27  ;;  %17196 = vmatmul.mubr.msk.bf16.gmra.mxu1 %vm895_vm4, %v15259_v36  ;;  %v21254_v34 = vadd.f32 %v16965_v58, %v21023_v16  ;;  %17223 = vmatprep.mubr.msk.bf16.mxu0 %vm895_vm4, %v6988_v42  ;;  %v21258_v15 = vadd.f32 %v16941_v28, %v21027_v12  ;;  %v25583_v36 = vld [vmem:[#allocation21_spill] sm:$0xff]  ;;  %v6997_v58 = vshrl.u32 %v18126_v51, 16  ;;  %v21268_v28 = vld [vmem:[#allocation2 + $0x64] sm:$0xff]  }
 0x291   : > { %17199 = vmatprep.mubr.msk.bf16.mxu1 %vm895_vm4, %v15260_v10  ;;  %v4503_v25 = vpop.f32.mrf.mxu0  ;;  %v4301_v31 = vpop.f32.mrf.mxu1  ;;  %v7003_v42 = vrot.slane %v7001_v43, 1  ;;  %v21270_v10 = vld [vmem:[#allocation2 + $0x84] sm:$0xff]   ;;  %v7349_v43 = vshll.u32 %v18137_v11, 16 }
 0x292   : > { %v21263_v29 = vadd.f32 %v4503_v25, %v25583_v36  ;;  %v21266_v16 = vadd.f32 %v4301_v31, %v25585_v37  ;;  %v6999_v36 = vor.u32 %v6997_v58, %v6995_v6  ;;  %v7009_v31 = vshll.u32 %v18130_v56, 16  ;;  %v25587_v37 = vld [vmem:[#allocation12_spill] sm:$0xff] }
 0x293   : > { %v16966_v1 = vpop.f32.mrf.mxu0  ;;  %v16942_v12 = vpop.f32.mrf.mxu1  ;;  %v15261_v51 = vcombine.low %v25588_v41, %v25587_v37  ;;  %v7351_v37 = vrot.slane %v7349_v43, 1 }
 0x294   : > { %25584 = vst [vmem:[#allocation32_spill] sm:$0xff] %v21263_v29  ;;  %25586 = vst [vmem:[#allocation46_spill] sm:$0xff] %v21266_v16  ;;  %v21273_v27 = vadd.f32 %v16966_v1, %v21039_v21  ;;  %v21276_v35 = vadd.f32 %v16942_v12, %v21042_v32  ;;  %v6996_v29 = vsel %vm2862_vm5, %v6991_v38, %v6995_v6  ;;  %v25591_v21 = vld [vmem:[#allocation8_spill] sm:$0xff]  ;;  %v7354_v6 = vshll.u32 %v21270_v10, 16 }
 0x295   : > { %v4506_v25 = vpop.f32.mrf.mxu0  ;;  %v4304_v55 = vpop.f32.mrf.mxu1  ;;  %v15262_v32 = vcombine.low %v25592_v24, %v25591_v21  ;;  %v21289_v1 = vld [vmem:[#allocation2 + $0x6c] sm:$0xff]   ;;  %v7004_v12 = vsel %vm2862_vm5, %v6999_v36, %v7003_v42  ;;  %v7013_v24 = vshrl.u32 %v18130_v56, 16 }
 0x296   : > { %v21281_v16 = vadd.f32 %v4506_v25, %v21047_v57  ;;  %v21285_v39 = vadd.f32 %v4304_v55, %v21052_v60  ;;  %v7017_v57 = vshll.u32 %v21268_v28, 16  ;;  %v7011_v25 = vrot.slane %v7009_v31, 1 }
 0x297   : > { %v16969_v58 = vpop.f32.mrf.mxu0  ;;  %17224 = vmatmul.mubr.msk.bf16.gmra.mxu0 %vm895_vm4, %v6996_v29  ;;  %v16945_v41 = vpop.f32.mrf.mxu1  ;;  %v7005_v29 = vshrl.u32 %v21230_v46, 16  ;;  %v7356_v31 = vrot.slane %v7354_v6, 1 }
 0x298   : > { %25589 = vst [vmem:[#allocation28_spill] sm:$0xff] %v21281_v16  ;;  %25590 = vst [vmem:[#allocation27_spill] sm:$0xff] %v21285_v39  ;;  %17200 = vmatmul.mubr.msk.bf16.gmra.mxu1 %vm895_vm4, %v15261_v51  ;;  %v21297_v60 = vadd.f32 %v16969_v58, %v21059_v14  ;;  %17227 = vmatprep.mubr.msk.bf16.mxu0 %vm895_vm4, %v7004_v12  ;;  %v21301_v55 = vadd.f32 %v16945_v41, %v21063_v33  ;;  %v18140_v51 = vld [vmem:[#allocation2 + $0x8c] sm:$0xff]   ;;  %v7025_v58 = vshll.u32 %v21289_v1, 16 }
 0x299   : > { %17203 = vmatprep.mubr.msk.bf16.mxu1 %vm895_vm4, %v15262_v32  ;;  %v4519_v38 = vpop.f32.mrf.mxu0  ;;  %v4317_v36 = vpop.f32.mrf.mxu1  ;;  %v7019_v12 = vrot.slane %v7017_v57, 1  ;;  %v25596_v32 = vld [vmem:[#allocation17_spill] sm:$0xff]  ;;  %v7347_v16 = vshrl.u32 %v18137_v11, 16  ;;  %v7007_v43 = vor.u32 %v7005_v29, %v7003_v42 }
 0x29a   : > { %25593 = vst [vmem:[#allocation29_spill] sm:$0xff] %v21301_v55  ;;  %v21306_v21 = vadd.f32 %v4519_v38, %v21067_v59  ;;  %v21309_v14 = vadd.f32 %v4317_v36, %v21070_v53  ;;  %v25597_v39 = vld [vmem:[#allocation9_spill] sm:$0xff]  ;;  %v7015_v38 = vor.u32 %v7013_v24, %v7011_v25 }
 0x29b   : > { %v16970_v33 = vpop.f32.mrf.mxu0  ;;  %v16946_v41 = vpop.f32.mrf.mxu1  ;;  %v15263_v46 = vcombine.low %v25597_v39, %v25596_v32  ;;  %v21314_v55 = vld [vmem:[#allocation2 + $0x94] sm:$0xff]   ;;  %v7012_v11 = vsel %vm2862_vm5, %v7007_v43, %v7011_v25  ;;  %v7021_v25 = vshrl.u32 %v21268_v28, 16  ;;  %v18142_v32 = vld [vmem:[#allocation2 + $0x9c] sm:$0xff]   ;;  %v7358_v28 = vshrl.u32 %v21270_v10, 16 }
 0x29c   : > { %25594 = vst [vmem:[#allocation7_spill] sm:$0xff] %v21306_v21  ;;  %25595 = vst [vmem:[#allocation34_spill] sm:$0xff] %v21309_v14  ;;  %v21317_v59 = vadd.f32 %v16970_v33, %v21073_v26  ;;  %v21320_v56 = vadd.f32 %v16946_v41, %v21076_v30  ;;  %v21324_v57 = vld [vmem:[#allocation2 + $0x74] sm:$0xff]   ;;  %v7352_v14 = vor.u32 %v7351_v37, %v7347_v16  ;;  %v7362_v21 = vshll.u32 %v18140_v51, 16  ;;  %v25598_v43 = vld [vmem:[#allocation31_spill] sm:$0xff] }
 0x29d   : > { %v21322_v53 = vpop.f32.mrf.mxu0  ;;  %v4320_v36 = vpop.f32.mrf.mxu1  ;;  %v7020_v26 = vsel %vm2862_vm5, %v7015_v38, %v7019_v12  ;;  %v7027_v30 = vrot.slane %v7025_v58, 1  ;;  %v7370_v24 = vshll.u32 %v21314_v55, 16  ;;  %v7029_v58 = vshrl.u32 %v21289_v1, 16  ;;  %v21353_v1 = vld [vmem:[#allocation2 + $0xa4] sm:$0xff]  }
 0x29e   : > { %v21328_v39 = vadd.f32 %v4320_v36, %v21087_v5  ;;  %v7357_v29 = vsel %vm2862_vm5, %v7352_v14, %v7356_v31  ;;  %v7033_v33 = vshll.u32 %v21324_v57, 16  ;;  %v7364_v41 = vrot.slane %v7362_v21, 1 }
 0x29f   : > { %v16973_v42 = vpop.f32.mrf.mxu0  ;;  %17228 = vmatmul.mubr.msk.bf16.gmra.mxu0 %vm895_vm4, %v7012_v11  ;;  %v16949_v6 = vpop.f32.mrf.mxu1  ;;  %v7031_v36 = vor.u32 %v7029_v58, %v7027_v30  ;;  %v7360_v21 = vor.u32 %v7358_v28, %v7356_v31  ;;  %v7386_v28 = vshll.u32 %v21353_v1, 16 }
 0x2a0   : > { %17204 = vmatmul.mubr.msk.bf16.gmra.mxu1 %vm895_vm4, %v15263_v46  ;;  %v21336_v16 = vadd.f32 %v16973_v42, %v21094_v2  ;;  %17231 = vmatprep.mubr.msk.bf16.mxu0 %vm895_vm4, %v7020_v26  ;;  %v21341_v5 = vadd.f32 %v16949_v6, %v21098_v18  ;;  %v7023_v46 = vor.u32 %v7021_v25, %v7019_v12  ;;  %v7366_v42 = vshrl.u32 %v18140_v51, 16 }
 0x2a1   : > { %17247 = vmatprep.mubr.msk.bf16.mxu1 %vm895_vm4, %v7357_v29  ;;  %v4535_v37 = vpop.f32.mrf.mxu0  ;;  %v4333_v14 = vpop.f32.mrf.mxu1  ;;  %v7372_v26 = vrot.slane %v7370_v24, 1  ;;  %v7035_v10 = vrot.slane %v7033_v33, 1  ;;  %v7365_v24 = vsel %vm2862_vm5, %v7360_v21, %v7364_v41 }
 0x2a2   : > { %v21347_v2 = vadd.f32 %v4535_v37, %v21102_v62  ;;  %v21351_v38 = vadd.f32 %v4333_v14, %v25598_v43  ;;  %v18139_v62 = vld [vmem:[#allocation2 + $0x7c] ss:$0 sps:$4 sm:$0x11]   ;;  %v7368_v37 = vor.u32 %v7366_v42, %v7364_v41  ;;  %v7378_v14 = vshll.u32 %v18142_v32, 16 }
 0x2a3   : > { %v16974_v18 = vpop.f32.mrf.mxu0  ;;  %v16950_v11 = vpop.f32.mrf.mxu1  ;;  %v7028_v58 = vsel %vm2862_vm5, %v7023_v46, %v7027_v30  ;;  %v7041_v30 = vshll.u32 %v18139_v62, 16 }
 0x2a4   : > { %v21356_v6 = vadd.f32 %v16974_v18, %v21110_v22  ;;  %v21359_v12 = vadd.f32 %v16950_v11, %v21113_v3  ;;  %v7036_v3 = vsel %vm2862_vm5, %v7031_v36, %v7035_v10  ;;  %v7373_v33 = vsel %vm2862_vm5, %v7368_v37, %v7372_v26  ;;  %v18144_v11 = vld [vmem:[#allocation2 + $0xac] sm:$0xff]  }
 0x2a5   : > { %v21361_v29 = vpop.f32.mrf.mxu0  ;;  %v4336_v25 = vpop.f32.mrf.mxu1  ;;  %v7380_v36 = vrot.slane %v7378_v14, 1  ;;  %v7382_v37 = vshrl.u32 %v18142_v32, 16  ;;  %v7043_v14 = vrot.slane %v7041_v30, 1 }
 0x2a6   : > { %v21365_v51 = vadd.f32 %v4336_v25, %v21125_v47  ;;  %v7037_v47 = vshrl.u32 %v21324_v57, 16 }
 0x2a7   : > { %v16977_v22 = vpop.f32.mrf.mxu0  ;;  %17232 = vmatmul.mubr.msk.bf16.gmra.mxu0 %vm895_vm4, %v7028_v58  ;;  %v16993_v31 = vpop.f32.mrf.mxu1  ;;  %v21389_v58 = vld [vmem:[#allocation2 + $0xb4] sm:$0xff]  }
 0x2a8   : > { %25599 = vst [vmem:[#allocation14_spill] sm:$0xff] %v21365_v51  ;;  %17248 = vmatmul.mubr.msk.bf16.vlgmr.msra.gmra.mxu1 %vm895_vm4, %v7365_v24  ;;  %v21374_v43 = vadd.f32 %v16977_v22, %v21133_v54  ;;  %17235 = vmatprep.mubr.msk.bf16.mxu0 %vm895_vm4, %v7036_v3  ;;  %v21379_v41 = vadd.f32 %v16993_v31, %v21137_v49  ;;  %v7374_v54 = vshrl.u32 %v21314_v55, 16  ;;  %v7388_v49 = vrot.slane %v7386_v28, 1 }
 0x2a9   : > { %17251 = vmatprep.mubr.msk.bf16.mxu1 %vm895_vm4, %v7373_v33  ;;  %v4551_v46 = vpop.f32.mrf.mxu0  ;;  %v4688_v18 = vpop.f32.mrf.mxu1  ;;  %v7039_v42 = vor.u32 %v7037_v47, %v7035_v10  ;;  %v7384_v3 = vor.u32 %v7382_v37, %v7380_v36  ;;  %v7398_v37 = vshrl.u32 %v18144_v11, 16 }
 0x2aa   : > { %v21383_v21 = vadd.f32 %v4551_v46, %v21143_v40  ;;  %v21387_v57 = vadd.f32 %v4688_v18, %v21146_v61  ;;  %v7376_v22 = vor.u32 %v7374_v54, %v7372_v26  ;;  %v7394_v61 = vshll.u32 %v18144_v11, 16 }
 0x2ab   : > { %v16978_v25 = vpop.f32.mrf.mxu0  ;;  %v16994_v62 = vpop.f32.mrf.mxu1  ;;  %v7044_v31 = vsel %vm2862_vm5, %v7039_v42, %v7043_v14  ;;  %v7402_v26 = vshll.u32 %v21389_v58, 16  ;;  %v7390_v54 = vshrl.u32 %v21353_v1, 16 }
 0x2ac   : > { %v21392_v24 = vadd.f32 %v16978_v25, %v21151_v44  ;;  %v21395_v10 = vadd.f32 %v16994_v62, %v21154_v23  ;;  %v7381_v33 = vsel %vm2862_vm5, %v7376_v22, %v7380_v36  ;;  %v7389_v23 = vsel %vm2862_vm5, %v7384_v3, %v7388_v49  ;;  %v18146_v36 = vld [vmem:[#allocation2 + $0xbc] sm:$0xff]  }
 0x2ad   : > { %v21397_v40 = vpop.f32.mrf.mxu0  ;;  %v4691_v55 = vpop.f32.mrf.mxu1  ;;  %v7396_v18 = vrot.slane %v7394_v61, 1  ;;  %v7404_v14 = vrot.slane %v7402_v26, 1  ;;  %v7410_v1 = vshll.u32 %v18146_v36, 16 }
 0x2ae   : > { %v21401_v32 = vadd.f32 %v4691_v55, %v21166_v17  ;;  %v7392_v55 = vor.u32 %v7390_v54, %v7388_v49 }
 0x2af   : > { %v16981_v28 = vpop.f32.mrf.mxu0  ;;  %17236 = vmatmul.mubr.msk.bf16.gmra.mxu0 %vm895_vm4, %v7044_v31  ;;  %v16997_v44 = vpop.f32.mrf.mxu1  ;;  %v7400_v31 = vor.u32 %v7398_v37, %v7396_v18 }
 0x2b0   : > { %25600 = vst [vmem:[#allocation11_spill] sm:$0xff] %v21401_v32  ;;  %17252 = vmatmul.mubr.msk.bf16.gmra.mxu1 %vm895_vm4, %v7381_v33  ;;  %v21409_v47 = vadd.f32 %v16981_v28, %v21175_v8  ;;  %v21412_v30 = vadd.f32 %v16997_v44, %v21179_v0  ;;  %v18147_v0 = vld [vmem:[#allocation2 + $0xc4] sm:$0xff]   ;;  %v7397_v33 = vsel %vm2862_vm5, %v7392_v55, %v7396_v18  ;;  %v18148_v44 = vld [vmem:[#allocation2 + $0xcc] sm:$0xff]   ;;  %v7406_v18 = vshrl.u32 %v21389_v58, 16 }
 0x2b1   : > { %17255 = vmatprep.mubr.msk.bf16.mxu1 %vm895_vm4, %v7389_v23  ;;  %v4567_v17 = vpop.f32.mrf.mxu0  ;;  %v4704_v46 = vpop.f32.mrf.mxu1  ;;  %v7418_v49 = vshll.u32 %v18147_v0, 16  ;;  %v7426_v55 = vshll.u32 %v18148_v44, 16 }
 0x2b2   : > { %v21416_v42 = vadd.f32 %v4567_v17, %v21185_v4  ;;  %v21420_v25 = vadd.f32 %v4704_v46, %v21188_v9  ;;  %v7412_v17 = vrot.slane %v7410_v1, 1 }
 0x2b3   : > { %v16982_v62 = vpop.f32.mrf.mxu0  ;;  %v16998_v8 = vpop.f32.mrf.mxu1  ;;  %v7420_v37 = vrot.slane %v7418_v49, 1  ;;  %v7422_v49 = vshrl.u32 %v18147_v0, 16 }
 0x2b4   : > { %v21423_v22 = vadd.f32 %v16982_v62, %v21194_v50  ;;  %v21426_v3 = vadd.f32 %v16998_v8, %v21197_v52  ;;  %v7405_v50 = vsel %vm2862_vm5, %v7400_v31, %v7404_v14  ;;  %v7408_v31 = vor.u32 %v7406_v18, %v7404_v14 }
 0x2b5   : > { %v21428_v61 = vpop.f32.mrf.mxu0  ;;  %v4707_v4 = vpop.f32.mrf.mxu1  ;;  %v7430_v18 = vshrl.u32 %v18148_v44, 16 }
 0x2b6   : > { %v21431_v9 = vadd.f32 %v4707_v4, %v21207_v20 }
 0x2b7   : > { %v17025_v11 = vpop.f32.mrf.mxu0  ;;  %v17001_v28 = vpop.f32.mrf.mxu1 }
 0x2b8   : > { %25601 = vst [vmem:[#allocation42_spill] sm:$0xff] %v21431_v9  ;;  %17256 = vmatmul.mubr.msk.bf16.gmra.mxu1 %vm895_vm4, %v7397_v33  ;;  %v21437_v52 = vadd.f32 %v17025_v11, %v21216_v48  ;;  %v21440_v23 = vadd.f32 %v17001_v28, %v21220_v45  ;;  %v7414_v48 = vshrl.u32 %v18146_v36, 16  ;;  %v18149_v45 = vld [vmem:[#allocation2 + $0xd4] sm:$0xff]  }
 0x2b9   : > { %17259 = vmatprep.mubr.msk.bf16.mxu1 %vm895_vm4, %v7405_v50  ;;  %v5098_v20 = vpop.f32.mrf.mxu0  ;;  %v4720_v26 = vpop.f32.mrf.mxu1  ;;  %v7428_v50 = vrot.slane %v7426_v55, 1 }
 0x2ba   : > { %v21444_v46 = vadd.f32 %v5098_v20, %v21225_v7  ;;  %v21448_v54 = vadd.f32 %v4720_v26, %v21228_v63  ;;  %v7416_v58 = vor.u32 %v7414_v48, %v7412_v17  ;;  %v7413_v63 = vsel %vm2862_vm5, %v7408_v31, %v7412_v17  ;;  %v18150_v20 = vld [vmem:[#allocation2 + $0xdc] ss:$0 sps:$4 sm:$0x11]  }
 0x2bb   : > { %v17026_v62 = vpop.f32.mrf.mxu0  ;;  %v17002_v8 = vpop.f32.mrf.mxu1  ;;  %v7424_v48 = vor.u32 %v7422_v49, %v7420_v37  ;;  %v25603_v31 = vld [vmem:[#allocation46_spill] sm:$0xff] }
 0x2bc   : > { %v21451_v4 = vadd.f32 %v17026_v62, %v21233_v19  ;;  %v21454_v1 = vadd.f32 %v17002_v8, %v21236_v13  ;;  %v7421_v36 = vsel %vm2862_vm5, %v7416_v58, %v7420_v37  ;;  %v7434_v19 = vshll.u32 %v18149_v45, 16  ;;  %v25602_v62 = vld [vmem:[#allocation32_spill] sm:$0xff] }
 0x2bd   : > { %v21456_v7 = vpop.f32.mrf.mxu0  ;;  %v21458_v33 = vpop.f32.mrf.mxu1  ;;  %v7429_v37 = vsel %vm2862_vm5, %v7424_v48, %v7428_v50  ;;  %v25606_v48 = vld [vmem:[#allocation34_spill] sm:$0xff] }
 0x2bf   : > { %v17029_v11 = vpop.f32.mrf.mxu0 }
 0x2c0   : > { %v17005_v28 = vpop.f32.mrf.mxu1  ;;  %17260 = vmatmul.mubr.msk.bf16.gmra.mxu1 %vm895_vm4, %v7413_v63  ;;  %v21464_v14 = vadd.f32 %v17029_v11, %v21254_v34  ;;  %v7432_v63 = vor.u32 %v7430_v18, %v7428_v50  ;;  %v7436_v11 = vrot.slane %v7434_v19, 1  ;;  %v25604_v18 = vld [vmem:[#allocation29_spill] sm:$0xff] }
 0x2c1   : > { %v21467_v13 = vadd.f32 %v17005_v28, %v21258_v15  ;;  %17263 = vmatprep.mubr.msk.bf16.mxu1 %vm895_vm4, %v7421_v36  ;;  %v5114_v26 = vpop.f32.mrf.mxu0  ;;  %v7438_v28 = vshrl.u32 %v18149_v45, 16  ;;  %v7442_v36 = vshll.u32 %v18150_v20, 16 }
 0x2c2   : > { %v4736_v17 = vpop.f32.mrf.mxu1  ;;  %v21471_v8 = vadd.f32 %v5114_v26, %v25602_v62  ;;  %v7437_v19 = vsel %vm2862_vm5, %v7432_v63, %v7436_v11 }
 0x2c3   : > { %v21474_v55 = vadd.f32 %v4736_v17, %v25603_v31  ;;  %v17030_v58 = vpop.f32.mrf.mxu0  ;;  %v7440_v45 = vor.u32 %v7438_v28, %v7436_v11  ;;  %v7444_v20 = vrot.slane %v7442_v36, 1 }
 0x2c4   : > { %v17006_v34 = vpop.f32.mrf.mxu1  ;;  %v21477_v15 = vadd.f32 %v17030_v58, %v21273_v27  ;;  %v25605_v58 = vld [vmem:[#allocation7_spill] sm:$0xff] }
 0x2c5   : > { %v21480_v0 = vadd.f32 %v17006_v34, %v21276_v35  ;;  %v21482_v44 = vpop.f32.mrf.mxu0  ;;  %v7445_v11 = vsel %vm2862_vm5, %v7440_v45, %v7444_v20 }
 0x2c6   : > { %v21484_v26 = vpop.f32.mrf.mxu1 }
 0x2c7   : > { %v17033_v49 = vpop.f32.mrf.mxu0 }
 0x2c8   : > { %v17009_v17 = vpop.f32.mrf.mxu1  ;;  %17264 = vmatmul.mubr.msk.bf16.gmra.mxu1 %vm895_vm4, %v7429_v37  ;;  %v21490_v27 = vadd.f32 %v17033_v49, %v21297_v60 }
 0x2c9   : > { %v21493_v35 = vadd.f32 %v17009_v17, %v25604_v18  ;;  %17267 = vmatprep.mubr.msk.bf16.mxu1 %vm895_vm4, %v7437_v19  ;;  %v5130_v62 = vpop.f32.mrf.mxu0 }
 0x2ca   : > { %v4752_v31 = vpop.f32.mrf.mxu1  ;;  %v21497_v50 = vadd.f32 %v5130_v62, %v25605_v58 }
 0x2cb   : > { %v21500_v34 = vadd.f32 %v4752_v31, %v25606_v48  ;;  %v17034_v37 = vpop.f32.mrf.mxu0 }
 0x2cc   : > { %v17010_v63 = vpop.f32.mrf.mxu1  ;;  %v21503_v60 = vadd.f32 %v17034_v37, %v21317_v59 }
 0x2cd   : > { %v21506_v49 = vadd.f32 %v17010_v63, %v21320_v56  ;;  %v21509_v28 = vpop.f32.mrf.mxu0 }
 0x2ce   : > { %v21511_v36 = vpop.f32.mrf.mxu1 }
 0x2cf   : > { %25607 = vst [vmem:[#allocation41_spill] sm:$0xff] %v21511_v36  ;;  %v17037_v17 = vpop.f32.mrf.mxu0 }
 0x2d0   : > { %v17013_v19 = vpop.f32.mrf.mxu1  ;;  %17268 = vmatmul.mubr.msk.bf16.gmra.mxu1 %vm895_vm4, %v7445_v11  ;;  %v21515_v18 = vadd.f32 %v17037_v17, %v21336_v16 }
 0x2d1   : > { %v21518_v62 = vadd.f32 %v17013_v19, %v21341_v5  ;;  %v5146_v59 = vpop.f32.mrf.mxu0 }
 0x2d2   : > { %v4768_v31 = vpop.f32.mrf.mxu1  ;;  %v21521_v56 = vadd.f32 %v5146_v59, %v21347_v2 }
 0x2d3   : > { %v21524_v45 = vadd.f32 %v4768_v31, %v21351_v38  ;;  %v17038_v20 = vpop.f32.mrf.mxu0 }
 0x2d4   : > { %v17014_v58 = vpop.f32.mrf.mxu1  ;;  %v21527_v48 = vadd.f32 %v17038_v20, %v21356_v6 }
 0x2d5   : > { %v21530_v37 = vadd.f32 %v17014_v58, %v21359_v12  ;;  %v21532_v16 = vpop.f32.mrf.mxu0 }
 0x2d6   : > { %v21534_v5 = vpop.f32.mrf.mxu1 }
 0x2d7   : > { %25608 = vst [vmem:[#allocation25_spill] sm:$0xff] %v21534_v5  ;;  %v17041_v63 = vpop.f32.mrf.mxu0 }
 0x2d8   : > { %v17057_v11 = vpop.f32.mrf.mxu1  ;;  %v21537_v2 = vadd.f32 %v17041_v63, %v21374_v43  ;;  %v18151_v43 = vld [vmem:[%s25266_s6 + $0x18] sm:$0xff]  }
 0x2d9   : > { %v21540_v38 = vadd.f32 %v17057_v11, %v21379_v41  ;;  %v5162_v17 = vpop.f32.mrf.mxu0  ;;  %17271 = vmatprep.subr.bf16.mxu0 %v18151_v43  ;;  %17303 = vmatprep.subr.bf16.mxu1 %v18151_v43  ;;  %v18152_v11 = vld [vmem:[%s25266_s6 + $0x10] sm:$0xff]  }
 0x2da   : > { %v5475_v19 = vpop.f32.mrf.mxu1  ;;  %v21543_v6 = vadd.f32 %v5162_v17, %v21383_v21  ;;  %17272 = vmatpush3.bf16.msra.mxu0 %v18151_v43  ;;  %17304 = vmatpush3.bf16.msra.mxu1 %v18151_v43 }
 0x2db   : > { %v21546_v12 = vadd.f32 %v5475_v19, %v21387_v57  ;;  %v17042_v59 = vpop.f32.mrf.mxu0  ;;  %17273 = vmatprep.subr.bf16.mxu0 %v18152_v11  ;;  %17305 = vmatprep.subr.bf16.mxu1 %v18152_v11 }
 0x2dc   : > { %v17058_v31 = vpop.f32.mrf.mxu1  ;;  %v21549_v20 = vadd.f32 %v17042_v59, %v21392_v24 }
 0x2dd   : > { %v21552_v58 = vadd.f32 %v17058_v31, %v21395_v10  ;;  %v21557_v41 = vpop.f32.mrf.mxu0 }
 0x2de   : > { %25609 = vst [vmem:[#allocation39_spill] sm:$0xff] %v21557_v41  ;;  %v21559_v63 = vpop.f32.mrf.mxu1  ;;  %17274 = vmatpush3.bf16.msra.mxu0 %v18152_v11  ;;  %17306 = vmatpush3.bf16.msra.mxu1 %v18152_v11  ;;  %v18154_v11 = vld [vmem:[%s25266_s6] sm:$0xff]  }
 0x2df   : > { %25610 = vst [vmem:[#allocation37_spill] sm:$0xff] %v21559_v63  ;;  %v17045_v21 = vpop.f32.mrf.mxu0  ;;  %v21604_v63 = vld [vmem:[#allocation3 + $0x4] sm:$0xf] }
 0x2e0   : > { %v17061_v57 = vpop.f32.mrf.mxu1  ;;  %v21562_v24 = vadd.f32 %v17045_v21, %v21409_v47  ;;  %25615 = vst [vmem:[#allocation43_spill] sm:$0xff] %v21604_v63 }
 0x2e1   : > { %v21565_v10 = vadd.f32 %v17061_v57, %v21412_v30  ;;  %v5178_v17 = vpop.f32.mrf.mxu0 }
 0x2e2   : > { %v5491_v19 = vpop.f32.mrf.mxu1  ;;  %v21571_v59 = vadd.f32 %v5178_v17, %v21416_v42  ;;  %v18153_v42 = vld [vmem:[%s25266_s6 + $0x8] sm:$0xff]  }
 0x2e3   : > { %v21574_v31 = vadd.f32 %v5491_v19, %v21420_v25  ;;  %v17046_v43 = vpop.f32.mrf.mxu0  ;;  %17275 = vmatprep.subr.bf16.mxu0 %v18153_v42  ;;  %17307 = vmatprep.subr.bf16.mxu1 %v18153_v42 }
 0x2e4   : > { %v17062_v47 = vpop.f32.mrf.mxu1  ;;  %v21577_v30 = vadd.f32 %v17046_v43, %v21423_v22  ;;  %17276 = vmatpush3.bf16.msra.mxu0 %v18153_v42  ;;  %17308 = vmatpush3.bf16.msra.mxu1 %v18153_v42  ;;  %v8370_v42 = vld [vmem:[#allocation3] sm:$0x8] }
 0x2e5   : > { %v21580_v21 = vadd.f32 %v17062_v47, %v21426_v3  ;;  %v21585_v57 = vpop.f32.mrf.mxu0  ;;  %17277 = vmatprep.subr.bf16.mxu0 %v18154_v11  ;;  %17309 = vmatprep.subr.bf16.mxu1 %v18154_v11 }
 0x2e6   : > { %25611 = vst [vmem:[#allocation36_spill] sm:$0xff] %v21585_v57  ;;  %v21587_v25 = vpop.f32.mrf.mxu1 }
 0x2e7   : > { %25612 = vst [vmem:[#allocation40_spill] sm:$0xff] %v21587_v25  ;;  %v17089_v17 = vpop.f32.mrf.mxu0 }
 0x2e8   : > { %v17065_v19 = vpop.f32.mrf.mxu1  ;;  %v21590_v22 = vadd.f32 %v17089_v17, %v21437_v52  ;;  %v21606_v52 = vld [vmem:[#allocation3 + $0x8] sm:$0xf]  ;;  %17278 = vmatpush3.bf16.msra.mxu0 %v18154_v11  ;;  %17310 = vmatpush3.bf16.msra.mxu1 %v18154_v11 }
 0x2e9   : > { %v21593_v3 = vadd.f32 %v17065_v19, %v21440_v23  ;;  %v5901_v43 = vpop.f32.mrf.mxu0  ;;  %25616 = vst [vmem:[#allocation38_spill] sm:$0xff] %v21606_v52  ;;  %v21608_v19 = vld [vmem:[#allocation3 + $0xc] sm:$0xf] }
 0x2ea   : > { %25613 = vst [vmem:[#allocation18_spill] sm:$0xff] %v21590_v22  ;;  %v5507_v47 = vpop.f32.mrf.mxu1  ;;  %v21599_v25 = vadd.f32 %v5901_v43, %v21444_v46  ;;  %25617 = vst [vmem:[#allocation44_spill] sm:$0xff] %v21608_v19  ;;  %v15387_v22 = vcombine.low %v8370_v42, %v21604_v63  ;;  %v15388_v43 = vcombine.low %v21606_v52, %v21608_v19 }
 0x2eb   : > { %v21602_v9 = vadd.f32 %v5507_v47, %v21448_v54  ;;  %v17090_v23 = vpop.f32.mrf.mxu0 }
 0x2ec   : > { %25614 = vst [vmem:[#allocation47_spill] sm:$0xff] %v21599_v25  ;;  %v17066_v17 = vpop.f32.mrf.mxu1  ;;  %v21612_v46 = vadd.f32 %v17090_v23, %v21451_v4  ;;  %v8459_v32 = vshrl.u32 %v15387_v22, 16  ;;  %v8462_v57 = vshll.u32 %v15387_v22, 16  ;;  %v8467_v5 = vshrl.u32 %v15388_v43, 16  ;;  %v21623_v4 = vpop.permute.xlu0 %7761 }
 0x2ed   : > { %v21615_v54 = vadd.f32 %v17066_v17, %v21454_v1  ;;  %v21619_v47 = vpop.f32.mrf.mxu0  ;;  %v8470_v51 = vshll.u32 %v15388_v43, 16  ;;  %25621 = vst [vmem:[#allocation49_spill] sm:$0xff] %v21623_v4 }
 0x2ee   : > { %25618 = vst [vmem:[#allocation48_spill] sm:$0xff] %v21612_v46  ;;  %25619 = vst [vmem:[#allocation5_spill] sm:$0xff] %v21619_v47  ;;  %v21621_v25 = vpop.f32.mrf.mxu1  ;;  %v8461_v11 = vrot.slane %v8459_v32, 3  ;;  %v8464_v36 = vrot.slane %v8462_v57, 4  ;;  %v8469_v17 = vrot.slane %v8467_v5, 3 }
 0x2ef   : > { %25620 = vst [vmem:[#allocation52_spill] sm:$0xff] %v21621_v25  ;;  %v17093_v41 = vpop.f32.mrf.mxu0  ;;  %v8472_v19 = vrot.slane %v8470_v51, 4 }
 0x2f0   : > { %v17069_v42 = vpop.f32.mrf.mxu1  ;;  %v21626_v1 = vadd.f32 %v17093_v41, %v21464_v14  ;;  %v8465_v47 = vor.u32 %v8464_v36, %v8461_v11  ;;  %v21639_v14 = vpop.permute.xlu1 %7766 }
 0x2f1   : > { %v21629_v23 = vadd.f32 %v17069_v42, %v21467_v13  ;;  %v5917_v46 = vpop.f32.mrf.mxu0  ;;  %v21637_v32 = vor.u32 %v8472_v19, %v8469_v17  ;;  %25623 = vst [vmem:[#allocation53_spill] sm:$0xff] %v21639_v14 }
 0x2f2   : > { %v5523_v25 = vpop.f32.mrf.mxu1  ;;  %v21632_v22 = vadd.f32 %v5917_v46, %v21471_v8 }
 0x2f3   : > { %v21635_v43 = vadd.f32 %v5523_v25, %v21474_v55  ;;  %25622 = vst [vmem:[#allocation13_spill] sm:$0xff] %v21637_v32  ;;  %v17094_v57 = vpop.f32.mrf.mxu0  ;;  %v8474_v36 = vsel %vm1607_vm3, %v8465_v47, %v21637_v32  ;;  %v21654_v55 = vpop.permute.xlu0 %7771 }
 0x2f4   : > { %v17070_v4 = vpop.f32.mrf.mxu1  ;;  %v21642_v13 = vadd.f32 %v17094_v57, %v21477_v15  ;;  %17279 = vmatprep.mubr.msk.bf16.mxu0 %vm895_vm4, %v8474_v36  ;;  %25624 = vst [vmem:[#allocation50_spill] sm:$0xff] %v21654_v55  ;;  %v21662_v42 = vpop.permute.xlu1 %7776 }
 0x2f5   : > { %v21645_v51 = vadd.f32 %v17070_v4, %v21480_v0  ;;  %v21649_v8 = vpop.f32.mrf.mxu0  ;;  %25625 = vst [vmem:[#allocation26_spill] sm:$0xff] %v21662_v42 }
 0x2f6   : > { %v21651_v5 = vpop.f32.mrf.mxu1 }
 0x2f7   : > { %v17097_v41 = vpop.f32.mrf.mxu0  ;;  %v21670_v57 = vpop.permute.xlu0 %7661 }
 0x2f8   : > { %v17073_v25 = vpop.f32.mrf.mxu1  ;;  %v21657_v19 = vadd.f32 %v17097_v41, %v21490_v27 }
 0x2f9   : > { %v21660_v15 = vadd.f32 %v17073_v25, %v21493_v35  ;;  %v5933_v0 = vpop.f32.mrf.mxu0 }
 0x2fa   : > { %v5539_v46 = vpop.f32.mrf.mxu1  ;;  %v21665_v47 = vadd.f32 %v5933_v0, %v21497_v50  ;;  %v21682_v0 = vpop.permute.xlu1 %7666 }
 0x2fb   : > { %v21668_v11 = vadd.f32 %v5539_v46, %v21500_v34  ;;  %v17098_v4 = vpop.f32.mrf.mxu0  ;;  %25626 = vst [vmem:[#allocation15_spill] sm:$0xff] %v21682_v0 }
 0x2fc   : > { %v17074_v17 = vpop.f32.mrf.mxu1  ;;  %v21673_v27 = vadd.f32 %v17098_v4, %v21503_v60  ;;  %v21690_v4 = vpop.permute.xlu0 %8021 }
 0x2fd   : > { %v21676_v35 = vadd.f32 %v17074_v17, %v21506_v49  ;;  %v21678_v36 = vpop.f32.mrf.mxu0  ;;  %25627 = vst [vmem:[#allocation16_spill] sm:$0xff] %v21690_v4 }
 0x2fe   : > { %v21680_v41 = vpop.f32.mrf.mxu1 }
 0x2ff   : > { %v17101_v25 = vpop.f32.mrf.mxu0 }
 0x300   : > { %v17077_v50 = vpop.f32.mrf.mxu1  ;;  %v21685_v34 = vadd.f32 %v17101_v25, %v21515_v18 }
 0x301   : > { %v21688_v46 = vadd.f32 %v17077_v50, %v21518_v62  ;;  %v5949_v14 = vpop.f32.mrf.mxu0  ;;  %v21708_v50 = vpop.permute.xlu1 %8026 }
 0x302   : > { %v5555_v60 = vpop.f32.mrf.mxu1  ;;  %v21693_v49 = vadd.f32 %v5949_v14, %v21521_v56  ;;  %25630 = vst [vmem:[#allocation51_spill] sm:$0xff] %v21708_v50  ;;  %v21710_v14 = vpop.permute.xlu0 %7671 }
 0x303   : > { %v21696_v17 = vadd.f32 %v5555_v60, %v21524_v45  ;;  %v17102_v42 = vpop.f32.mrf.mxu0 }
 0x304   : > { %25628 = vst [vmem:[#allocation19_spill] sm:$0xff] %v21693_v49  ;;  %v17078_v55 = vpop.f32.mrf.mxu1  ;;  %v21699_v32 = vadd.f32 %v17102_v42, %v21527_v48 }
 0x305   : > { %v21702_v18 = vadd.f32 %v17078_v55, %v21530_v37  ;;  %v21704_v62 = vpop.f32.mrf.mxu0 }
 0x306   : > { %25629 = vst [vmem:[#allocation22_spill] sm:$0xff] %v21699_v32  ;;  %v21706_v25 = vpop.f32.mrf.mxu1  ;;  %v21724_v32 = vpop.permute.xlu1 %7676 }
 0x307   : > { %v17105_v4 = vpop.f32.mrf.mxu0  ;;  %25635 = vst [vmem:[#allocation12_spill] sm:$0xff] %v21724_v32 }
 0x308   : > { %v17121_v56 = vpop.f32.mrf.mxu1  ;;  %v21713_v45 = vadd.f32 %v17105_v4, %v21537_v2 }
 0x309   : > { %v21716_v60 = vadd.f32 %v17121_v56, %v21540_v38  ;;  %v5965_v48 = vpop.f32.mrf.mxu0 }
 0x30a   : > { %25631 = vst [vmem:[#allocation10_spill] sm:$0xff] %v21713_v45  ;;  %v6294_v42 = vpop.f32.mrf.mxu1  ;;  %v21719_v37 = vadd.f32 %v5965_v48, %v21543_v6  ;;  %v21739_v6 = vld [vmem:[%s25266_s6 + $0x38] sm:$0xff]   ;;  %v25693_v45 = vld [vmem:[#allocation35_spill] sm:$0xff] }
 0x30b   : > { %25632 = vst [vmem:[#allocation4_spill] sm:$0xff] %v21716_v60  ;;  %v21722_v55 = vadd.f32 %v6294_v42, %v21546_v12  ;;  %v17106_v0 = vpop.f32.mrf.mxu0  ;;  %25638 = vst [vmem:[#allocation6_spill] sm:$0xff] %v21739_v6  ;;  %v21741_v12 = vpop.permute.xlu0 %8031  ;;  %17335 = vmatprep.subr.bf16.mxu0 %v21739_v6  ;;  %17367 = vmatprep.subr.bf16.mxu1 %v21739_v6 }
 0x30c   : > { %25633 = vst [vmem:[#allocation21_spill] sm:$0xff] %v21719_v37  ;;  %v17122_v50 = vpop.f32.mrf.mxu1  ;;  %v21727_v49 = vadd.f32 %v17106_v0, %v21549_v20  ;;  %25639 = vst [vmem:[#allocation17_spill] sm:$0xff] %v21741_v12  ;;  %v21751_v42 = vpop.permute.xlu1 %8036  ;;  %v25689_v37 = vld [vmem:[#allocation23_spill] sm:$0xff] }
 0x30d   : > { %25634 = vst [vmem:[#allocation20_spill] sm:$0xff] %v21722_v55  ;;  %v21730_v2 = vadd.f32 %v17122_v50, %v21552_v58  ;;  %v21732_v38 = vpop.f32.mrf.mxu0  ;;  %25642 = vst [vmem:[#allocation32_spill] sm:$0xff] %v21751_v42 }
 0x30e   : > { %25636 = vst [vmem:[#allocation54_spill] sm:$0xff] %v21727_v49  ;;  %v21734_v4 = vpop.f32.mrf.mxu1 }
 0x30f   : > { %25637 = vst [vmem:[#allocation8_spill] sm:$0xff] %v21730_v2  ;;  %v17109_v56 = vpop.f32.mrf.mxu0  ;;  %v21759_v60 = vpop.permute.xlu0 %7681 }
 0x310   : > { %v17125_v48 = vpop.f32.mrf.mxu1  ;;  %v21746_v20 = vadd.f32 %v17109_v56, %v21562_v24  ;;  %25645 = vst [vmem:[#allocation7_spill] sm:$0xff] %v21759_v60 }
 0x311   : > { %v21749_v58 = vadd.f32 %v17125_v48, %v21565_v10  ;;  %v5981_v0 = vpop.f32.mrf.mxu0 }
 0x312   : > { %25640 = vst [vmem:[#allocation9_spill] sm:$0xff] %v21746_v20  ;;  %v6310_v50 = vpop.f32.mrf.mxu1  ;;  %v21754_v2 = vadd.f32 %v5981_v0, %v21571_v59  ;;  %v21773_v0 = vpop.permute.xlu1 %7686 }
 0x313   : > { %25641 = vst [vmem:[#allocation31_spill] sm:$0xff] %v21749_v58  ;;  %v21757_v12 = vadd.f32 %v6310_v50, %v21574_v31  ;;  %v17110_v55 = vpop.f32.mrf.mxu0  ;;  %25648 = vst [vmem:[#allocation56_spill] sm:$0xff] %v21773_v0 }
 0x314   : > { %25643 = vst [vmem:[#allocation46_spill] sm:$0xff] %v21754_v2  ;;  %v17126_v49 = vpop.f32.mrf.mxu1  ;;  %v21762_v24 = vadd.f32 %v17110_v55, %v21577_v30  ;;  %v21780_v30 = vpop.permute.xlu0 %8041 }
 0x315   : > { %25644 = vst [vmem:[#allocation29_spill] sm:$0xff] %v21757_v12  ;;  %v21765_v10 = vadd.f32 %v17126_v49, %v21580_v21  ;;  %v21767_v56 = vpop.f32.mrf.mxu0  ;;  %25650 = vst [vmem:[#allocation58_spill] sm:$0xff] %v21780_v30 }
 0x316   : > { %25646 = vst [vmem:[#allocation34_spill] sm:$0xff] %v21762_v24  ;;  %v21769_v48 = vpop.f32.mrf.mxu1 }
 0x317   : > { %25647 = vst [vmem:[#allocation55_spill] sm:$0xff] %v21765_v10  ;;  %v21771_v42 = vpop.f32.mrf.mxu0 }
 0x318   : > { %v17129_v59 = vpop.f32.mrf.mxu1 }
 0x319   : > { %v21776_v31 = vadd.f32 %v17129_v59, %v21593_v3  ;;  %v21778_v50 = vpop.f32.mrf.mxu0  ;;  %v21796_v59 = vpop.permute.xlu1 %8046 }
 0x31a   : > { %v6326_v6 = vpop.f32.mrf.mxu1  ;;  %25653 = vst [vmem:[#allocation61_spill] sm:$0xff] %v21796_v59 }
 0x31b   : > { %25649 = vst [vmem:[#allocation57_spill] sm:$0xff] %v21776_v31  ;;  %v21783_v21 = vadd.f32 %v6326_v6, %v21602_v9  ;;  %v21785_v49 = vpop.f32.mrf.mxu0  ;;  %v21800_v9 = vpop.permute.xlu0 %7691 }
 0x31c   : > { %v17130_v55 = vpop.f32.mrf.mxu1  ;;  %25654 = vst [vmem:[#allocation62_spill] sm:$0xff] %v21800_v9 }
 0x31d   : > { %25651 = vst [vmem:[#allocation59_spill] sm:$0xff] %v21783_v21  ;;  %v21788_v10 = vadd.f32 %v17130_v55, %v21615_v54  ;;  %v21792_v12 = vpop.f32.mrf.mxu0  ;;  %v21812_v63 = vpop.permute.xlu1 %7696 }
 0x31e   : > { %v21794_v3 = vpop.f32.mrf.mxu1  ;;  %25657 = vst [vmem:[#allocation65_spill] sm:$0xff] %v21812_v63 }
 0x31f   : > { %25652 = vst [vmem:[#allocation60_spill] sm:$0xff] %v21788_v10  ;;  %v21798_v31 = vpop.f32.mrf.mxu0 }
 0x320   : > { %v17133_v30 = vpop.f32.mrf.mxu1 }
 0x321   : > { %v21803_v6 = vadd.f32 %v17133_v30, %v21629_v23  ;;  %v21805_v21 = vpop.f32.mrf.mxu0  ;;  %v21821_v23 = vpop.permute.xlu0 %8051 }
 0x322   : > { %v6342_v54 = vpop.f32.mrf.mxu1  ;;  %25659 = vst [vmem:[#allocation67_spill] sm:$0xff] %v21821_v23  ;;  %v21830_v60 = vpop.permute.xlu1 %8056 }
 0x323   : > { %25655 = vst [vmem:[#allocation63_spill] sm:$0xff] %v21803_v6  ;;  %v21808_v55 = vadd.f32 %v6342_v54, %v21635_v43  ;;  %v21810_v0 = vpop.f32.mrf.mxu0  ;;  %25661 = vst [vmem:[#allocation69_spill] sm:$0xff] %v21830_v60 }
 0x324   : > { %v17134_v52 = vpop.f32.mrf.mxu1 }
 0x325   : > { %25656 = vst [vmem:[#allocation64_spill] sm:$0xff] %v21808_v55  ;;  %v21815_v59 = vadd.f32 %v17134_v52, %v21645_v51  ;;  %v21817_v10 = vpop.f32.mrf.mxu0  ;;  %v21837_v63 = vpop.permute.xlu0 %7701 }
 0x326   : > { %v21819_v24 = vpop.f32.mrf.mxu1  ;;  %25663 = vst [vmem:[#allocation71_spill] sm:$0xff] %v21837_v63  ;;  %v21848_v2 = vpop.permute.xlu1 %7706 }
 0x327   : > { %25658 = vst [vmem:[#allocation66_spill] sm:$0xff] %v21815_v59  ;;  %v21823_v30 = vpop.f32.mrf.mxu0  ;;  %25665 = vst [vmem:[#allocation73_spill] sm:$0xff] %v21848_v2 }
 0x328   : > { %v17137_v6 = vpop.f32.mrf.mxu1 }
 0x329   : > { %v21826_v43 = vadd.f32 %v17137_v6, %v21660_v15  ;;  %v21828_v54 = vpop.f32.mrf.mxu0 }
 0x32a   : > { %v6358_v55 = vpop.f32.mrf.mxu1 }
 0x32b   : > { %25660 = vst [vmem:[#allocation68_spill] sm:$0xff] %v21826_v43  ;;  %v21833_v52 = vadd.f32 %v6358_v55, %v21668_v11  ;;  %v21835_v51 = vpop.f32.mrf.mxu0 }
 0x32c   : > { %v17138_v59 = vpop.f32.mrf.mxu1 }
 0x32d   : > { %25662 = vst [vmem:[#allocation70_spill] sm:$0xff] %v21833_v52  ;;  %v21840_v23 = vadd.f32 %v17138_v59, %v21676_v35  ;;  %v21842_v58 = vpop.f32.mrf.mxu0  ;;  %v21855_v52 = vpop.permute.xlu0 %8061 }
 0x32e   : > { %v21844_v15 = vpop.f32.mrf.mxu1  ;;  %25667 = vst [vmem:[#allocation75_spill] sm:$0xff] %v21855_v52 }
 0x32f   : > { %25664 = vst [vmem:[#allocation72_spill] sm:$0xff] %v21840_v23  ;;  %v21846_v6 = vpop.f32.mrf.mxu0 }
 0x330   : > { %v17141_v43 = vpop.f32.mrf.mxu1 }
 0x331   : > { %v21851_v11 = vadd.f32 %v17141_v43, %v21688_v46  ;;  %v21853_v55 = vpop.f32.mrf.mxu0  ;;  %v21869_v46 = vpop.permute.xlu1 %8066 }
 0x332   : > { %v6374_v60 = vpop.f32.mrf.mxu1  ;;  %25673 = vst [vmem:[#allocation81_spill] sm:$0xff] %v21869_v46  ;;  %v21875_v52 = vpop.permute.xlu0 %7711 }
 0x333   : > { %25666 = vst [vmem:[#allocation74_spill] sm:$0xff] %v21851_v11  ;;  %v21858_v35 = vadd.f32 %v6374_v60, %v21696_v17  ;;  %v21860_v59 = vpop.f32.mrf.mxu0  ;;  %25676 = vst [vmem:[#allocation84_spill] sm:$0xff] %v21875_v52  ;;  %v25687_v52 = vld [vmem:[#allocation30_spill] sm:$0xff] }
 0x334   : > { %25669 = vst [vmem:[#allocation77_spill] sm:$0xff] %v21860_v59  ;;  %v17142_v23 = vpop.f32.mrf.mxu1 }
 0x335   : > { %25668 = vst [vmem:[#allocation76_spill] sm:$0xff] %v21858_v35  ;;  %v21863_v63 = vadd.f32 %v17142_v23, %v21702_v18  ;;  %v21865_v20 = vpop.f32.mrf.mxu0  ;;  %v21885_v23 = vpop.permute.xlu1 %7716 }
 0x336   : > { %25671 = vst [vmem:[#allocation79_spill] sm:$0xff] %v21865_v20  ;;  %v21867_v2 = vpop.f32.mrf.mxu1  ;;  %25681 = vst [vmem:[#allocation89_spill] sm:$0xff] %v21885_v23  ;;  %v21891_v46 = vpop.permute.xlu0 %8071  ;;  %v25690_v23 = vld [vmem:[#allocation33_spill] sm:$0xff] }
 0x337   : > { %25670 = vst [vmem:[#allocation78_spill] sm:$0xff] %v21863_v63  ;;  %25672 = vst [vmem:[#allocation80_spill] sm:$0xff] %v21867_v2  ;;  %v21871_v43 = vpop.f32.mrf.mxu0  ;;  %v25704_v20 = vld [vmem:[#allocation37_spill] sm:$0xff] }
 0x338   : > { %25674 = vst [vmem:[#allocation82_spill] sm:$0xff] %v21871_v43  ;;  %v21873_v11 = vpop.f32.mrf.mxu1  ;;  %25684 = vst [vmem:[#allocation92_spill] sm:$0xff] %v21891_v46  ;;  %v25691_v43 = vld [vmem:[#allocation45_spill] sm:$0xff]  ;;  %v25692_v46 = vld [vmem:[#allocation28_spill] sm:$0xff] }
 0x339   : > { %25675 = vst [vmem:[#allocation83_spill] sm:$0xff] %v21873_v11  ;;  %v21877_v17 = vpop.f32.mrf.mxu0 }
 0x33a   : > { %25677 = vst [vmem:[#allocation85_spill] sm:$0xff] %v21877_v17  ;;  %v21879_v60 = vpop.f32.mrf.mxu1  ;;  %v4591_v17 = vadd.f32 %v21322_v53, %v25687_v52 }
 0x33b   : > { %25678 = vst [vmem:[#allocation86_spill] sm:$0xff] %v21879_v60  ;;  %v21881_v35 = vpop.f32.mrf.mxu0  ;;  %v25688_v60 = vld [vmem:[#allocation24_spill] sm:$0xff] }
 0x33c   : > { %25679 = vst [vmem:[#allocation87_spill] sm:$0xff] %v21881_v35  ;;  %v21883_v18 = vpop.f32.mrf.mxu1  ;;  %v4595_v35 = vadd.f32 %v21361_v29, %v25688_v60  ;;  %v21915_v29 = vpop.permute.xlu1 %8076  ;;  %v25700_v60 = vld [vmem:[#allocation14_spill] sm:$0xff] }
 0x33d   : > { %25680 = vst [vmem:[#allocation88_spill] sm:$0xff] %v21883_v18  ;;  %v21887_v63 = vpop.f32.mrf.mxu0  ;;  %v4599_v18 = vadd.f32 %v21397_v40, %v25689_v37  ;;  %25696 = vst [vmem:[#allocation23_spill] sm:$0xff] %v21915_v29  ;;  %v5202_v40 = vadd.f32 %v21509_v28, %v4591_v17  ;;  %v25697_v37 = vld [vmem:[#allocation27_spill] sm:$0xff]  ;;  %v25706_v17 = vld [vmem:[#allocation42_spill] sm:$0xff] }
 0x33e   : > { %25682 = vst [vmem:[#allocation90_spill] sm:$0xff] %v21887_v63  ;;  %v21889_v9 = vpop.f32.mrf.mxu1  ;;  %v4603_v63 = vadd.f32 %v21428_v61, %v25690_v23  ;;  %v4796_v61 = vadd.f32 %v21484_v26, %v25697_v37  ;;  %v5206_v52 = vadd.f32 %v21532_v16, %v4595_v35  ;;  %v25702_v23 = vld [vmem:[#allocation36_spill] sm:$0xff]  ;;  %v21933_v26 = vpop.permute.xlu0 %7721  ;;  %v25705_v16 = vld [vmem:[#allocation5_spill] sm:$0xff] }
 0x33f   : > { %25683 = vst [vmem:[#allocation91_spill] sm:$0xff] %v21889_v9  ;;  %v21893_v2 = vpop.f32.mrf.mxu0  ;;  %v5194_v9 = vadd.f32 %v21456_v7, %v25691_v43  ;;  %v25698_v7 = vld [vmem:[#allocation41_spill] sm:$0xff] }
 0x340   : > { %25685 = vst [vmem:[#allocation93_spill] sm:$0xff] %v21893_v2  ;;  %v21895_v11 = vpop.f32.mrf.mxu1  ;;  %v5198_v2 = vadd.f32 %v21482_v44, %v25692_v46  ;;  %v4800_v43 = vadd.f32 %v25698_v7, %v21328_v39  ;;  %v25699_v44 = vld [vmem:[#allocation39_spill] sm:$0xff]  ;;  %v25707_v39 = vld [vmem:[#allocation40_spill] sm:$0xff] }
 0x341   : > { %25686 = vst [vmem:[#allocation94_spill] sm:$0xff] %v21895_v11  ;;  %v4792_v11 = vadd.f32 %v21458_v33, %v25693_v45  ;;  %v21911_v32 = vpop.f32.mrf.mxu0  ;;  %v5210_v46 = vadd.f32 %v25699_v44, %v4599_v18  ;;  %v25701_v33 = vld [vmem:[#allocation25_spill] sm:$0xff]  ;;  %v5997_v35 = vadd.f32 %v25705_v16, %v5194_v9  ;;  %v5575_v37 = vadd.f32 %v25707_v39, %v25706_v17  ;;  %v25708_v7 = vld [vmem:[#allocation52_spill] sm:$0xff] }
 0x342   : > { %25694 = vst [vmem:[#allocation30_spill] sm:$0xff] %v21911_v32  ;;  %v21913_v53 = vpop.f32.mrf.mxu1  ;;  %v4804_v45 = vadd.f32 %v25701_v33, %v25700_v60  ;;  %v5214_v32 = vadd.f32 %v25702_v23, %v4603_v63  ;;  %v6001_v18 = vadd.f32 %v21649_v8, %v5198_v2  ;;  %v6005_v63 = vadd.f32 %v21678_v36, %v5202_v40  ;;  %v25709_v2 = vld [vmem:[#allocation18_spill] sm:$0xff]  ;;  %v25714_v17 = vld [vmem:[#allocation77_spill] sm:$0xff] }
 0x343   : > { %25695 = vst [vmem:[#allocation24_spill] sm:$0xff] %v21913_v53  ;;  %v25703_v53 = vld [vmem:[#allocation11_spill] sm:$0xff]  ;;  %v21929_v59 = vpop.f32.mrf.mxu0  ;;  %v5579_v44 = vadd.f32 %v25708_v7, %v4792_v11  ;;  %v5583_v60 = vadd.f32 %v21651_v5, %v4796_v61  ;;  %v21949_v9 = vadd.f32 %v21732_v38, %v5210_v46  ;;  %v6625_v36 = vadd.f32 %v21771_v42, %v25709_v2  ;;  %v25711_v11 = vld [vmem:[#allocation48_spill] sm:$0xff]  ;;  %v7926_v7 = vld [vmem:[%s19007_s16 + $0x18] sm:$0xff] }
 0x344   : > { %v5571_v29 = vadd.f32 %v25704_v20, %v25703_v53  ;;  %v21931_v28 = vpop.f32.mrf.mxu1  ;;  %v6009_v20 = vadd.f32 %v21704_v62, %v5206_v52  ;;  %v5587_v53 = vadd.f32 %v21680_v41, %v4800_v43  ;;  %v5591_v16 = vadd.f32 %v21706_v25, %v4804_v45  ;;  %v25710_v41 = vld [vmem:[#allocation47_spill] sm:$0xff]  ;;  %v21994_v52 = vpop.permute.xlu0 %8081  ;;  %v25718_v2 = vld [vmem:[#allocation10_spill] sm:$0xff] }
 0x345   : > { %v21944_v33 = vpop.f32.mrf.mxu0  ;;  %v21958_v5 = vadd.f32 %v21767_v56, %v5214_v32  ;;  %v6623_v62 = vadd.f32 %v21778_v50, %v25710_v41  ;;  %v6626_v40 = vadd.f32 %v21785_v49, %v25711_v11  ;;  %v21965_v38 = vadd.f32 %v21769_v48, %v5575_v37  ;;  %v25715_v37 = vld [vmem:[#allocation79_spill] sm:$0xff]  ;;  %v25720_v41 = vld [vmem:[#allocation21_spill] sm:$0xff] }
 0x346   : > { %v21946_v23 = vpop.f32.mrf.mxu1  ;;  %v21953_v8 = vadd.f32 %v21734_v4, %v5571_v29  ;;  %v21969_v4 = vpop.permute.xlu1 %7726  ;;  %v6624_v42 = vadd.f32 %v21792_v12, %v5997_v35  ;;  %v6629_v32 = vadd.f32 %v21798_v31, %v21626_v1  ;;  %v21975_v56 = vadd.f32 %v21794_v3, %v5579_v44  ;;  %v7925_v1 = vld [vmem:[%s19007_s16 + $0x10] sm:$0xff] }
 0x347   : > { %v17217_v25 = vpop.f32.mrf.mxu0  ;;  %v21979_v49 = vadd.f32 %v21805_v21, %v21632_v22  ;;  %v21983_v48 = vadd.f32 %v21810_v0, %v21642_v13  ;;  %v21986_v29 = vadd.f32 %v21817_v10, %v6001_v18  ;;  %v21989_v12 = vadd.f32 %v21819_v24, %v5583_v60 }
 0x348   : > { %v21967_v61 = vpop.f32.mrf.mxu1  ;;  %v7236_v50 = vadd.f32 %v17217_v25, %v6625_v36  ;;  %v21998_v22 = vadd.f32 %v21823_v30, %v21657_v19  ;;  %v22003_v10 = vadd.f32 %v21828_v54, %v21665_v47  ;;  %v22007_v24 = vadd.f32 %v21835_v51, %v21673_v27  ;;  %v7923_v19 = vld [vmem:[%s19007_s16] sm:$0xff]  ;;  %v25719_v36 = vld [vmem:[#allocation82_spill] sm:$0xff] }
 0x349   : > { %v7139_v31 = vpop.f32.mrf.mxu0  ;;  %v22010_v43 = vadd.f32 %v21842_v58, %v6005_v63  ;;  %v22013_v46 = vadd.f32 %v21844_v15, %v5587_v53  ;;  %v22023_v27 = vadd.f32 %v21846_v6, %v21685_v34  ;;  %v25712_v58 = vld [vmem:[#allocation19_spill] sm:$0xff]  ;;  %v25713_v15 = vld [vmem:[#allocation22_spill] sm:$0xff]  ;;  %v22034_v18 = vadd.f32 %v25715_v37, %v6009_v20  ;;  %v25717_v6 = vld [vmem:[#allocation12_spill] sm:$0xff] }
 0x34a   : > { %v21992_v3 = vpop.f32.mrf.mxu1  ;;  %v7781_v13 = vmul.f32 %v21710_v14, %v7236_v50  ;;  %v7949_v0 = vadd.f32 %v7925_v1, %v7236_v50  ;;  %v7234_v21 = vadd.f32 %v7139_v31, %v6623_v62  ;;  %v22027_v51 = vadd.f32 %v21853_v55, %v25712_v58  ;;  %v22039_v63 = vpop.permute.xlu1 %8086  ;;  %v25721_v62 = vld [vmem:[#allocation85_spill] sm:$0xff]  ;;  %v25723_v50 = vld [vmem:[#allocation4_spill] sm:$0xff]  ;;  %v25724_v1 = vld [vmem:[#allocation83_spill] sm:$0xff] }
 0x34b   : > { %v17218_v30 = vpop.f32.mrf.mxu0  ;;  %v22031_v39 = vadd.f32 %v25714_v17, %v25713_v15  ;;  %25716 = vst [vmem:[#allocation33_spill] sm:$0xff] %v22039_v63  ;;  %v22047_v20 = vadd.f32 %v25719_v36, %v25718_v2  ;;  %v22051_v11 = vadd.f32 %v25721_v62, %v25720_v41  ;;  %v22058_v31 = vadd.f32 %v25724_v1, %v25723_v50  ;;  %v25728_v15 = vld [vmem:[#allocation90_spill] sm:$0xff]  ;;  %v25729_v37 = vld [vmem:[#allocation20_spill] sm:$0xff]  ;;  %v25735_v50 = vld [vmem:[#allocation93_spill] sm:$0xff] }
 0x34c   : > { %v22016_v14 = vpop.f32.mrf.mxu1  ;;  %v15983_v45 = vpack.c.bf16 %v7781_v13, %v7781_v13  ;;  %7973 = vst.msk [vmem:[%s19007_s16 + $0x10] sm:$0xff] %vm895_vm4, %v7949_v0  ;;  %v7779_v47 = vmul.f32 %v21670_v57, %v7234_v21  ;;  %v7947_v54 = vadd.f32 %v7923_v19, %v7234_v21  ;;  %v7237_v35 = vadd.f32 %v17218_v30, %v6626_v40  ;;  %v25722_v40 = vld [vmem:[#allocation80_spill] sm:$0xff]  ;;  %v25725_v30 = vld [vmem:[#allocation15_spill] sm:$0xff] }
 0x34d   : > { %v7142_v57 = vpop.f32.mrf.mxu0  ;;  %v22054_v25 = vadd.f32 %v25722_v40, %v5591_v16  ;;  %v7924_v13 = vld [vmem:[%s19007_s16 + $0x8] sm:$0xff]  ;;  %v22075_v17 = vadd.f32 %v25728_v15, %v21949_v9  ;;  %v25733_v9 = vld [vmem:[#allocation62_spill] sm:$0xff]  ;;  %v25734_v40 = vld [vmem:[#allocation9_spill] sm:$0xff] }
 0x34e   : > { %v22037_v44 = vpop.f32.mrf.mxu1  ;;  %7901 = vst.msk [vmem:[#allocation3 + $0x18] sm:$0xf] %vm307_vm0, %v15983_v45  ;;  %v15981_v34 = vpack.c.bf16 %v7779_v47, %v7779_v47  ;;  %v7782_v55 = vmul.f32 %v25717_v6, %v7237_v35  ;;  %v7950_v60 = vadd.f32 %v7926_v7, %v7237_v35  ;;  %v7235_v53 = vadd.f32 %v7142_v57, %v6624_v42  ;;  %v22063_v42 = vpop.permute.xlu0 %7731  ;;  %v25727_v35 = vld [vmem:[#allocation87_spill] sm:$0xff]  ;;  %v25730_v7 = vld [vmem:[#allocation86_spill] sm:$0xff]  ;;  %v25732_v6 = vld [vmem:[#allocation88_spill] sm:$0xff] }
 0x34f   : > { %7971 = vst.msk [vmem:[%s19007_s16] sm:$0xff] %vm895_vm4, %v7947_v54  ;;  %v17221_v0 = vpop.f32.mrf.mxu0  ;;  %v25726_v54 = vld [vmem:[#allocation54_spill] sm:$0xff]  ;;  %v22079_v57 = vadd.f32 %v25730_v7, %v25729_v37  ;;  %v22093_v1 = vadd.f32 %v25735_v50, %v25734_v40  ;;  %v22108_v37 = vpop.permute.xlu1 %7736  ;;  %v22121_v40 = vadd.f32 %v21944_v33, %v21958_v5  ;;  %v25743_v50 = vld [vmem:[#allocation29_spill] sm:$0xff] }
 0x350   : > { %v22061_v21 = vpop.f32.mrf.mxu1  ;;  %7899 = vst.msk [vmem:[#allocation3 + $0x10] sm:$0xf] %vm307_vm0, %v15981_v34  ;;  %v15984_v19 = vpack.c.bf16 %v7782_v55, %v7782_v55  ;;  %v7780_v16 = vmul.f32 %v25725_v30, %v7235_v53  ;;  %v7948_v45 = vadd.f32 %v7924_v13, %v7235_v53  ;;  %v7240_v47 = vadd.f32 %v17221_v0, %v6629_v32  ;;  %v25731_v34 = vld [vmem:[#allocation8_spill] sm:$0xff]  ;;  %v25736_v13 = vld [vmem:[#allocation46_spill] sm:$0xff]  ;;  %v25746_v33 = vld [vmem:[#allocation65_spill] sm:$0xff] }
 0x351   : > { %7974 = vst.msk [vmem:[%s19007_s16 + $0x18] sm:$0xff] %vm895_vm4, %v7950_v60  ;;  %v22071_v58 = vadd.f32 %v25727_v35, %v25726_v54  ;;  %v22083_v55 = vadd.f32 %v25732_v6, %v25731_v34  ;;  %v7929_v60 = vld [vmem:[%s19007_s16 + $0x30] sm:$0xff]  ;;  %v7155_v53 = vpop.f32.mrf.mxu0  ;;  %v25737_v0 = vld [vmem:[#allocation30_spill] sm:$0xff]  ;;  %v25738_v54 = vld [vmem:[#allocation91_spill] sm:$0xff] }
 0x352   : > { %v6777_v32 = vpop.f32.mrf.mxu1  ;;  %7902 = vst.msk [vmem:[#allocation3 + $0x1c] sm:$0xf] %vm307_vm0, %v15984_v19  ;;  %v15982_v2 = vpack.c.bf16 %v7780_v16, %v7780_v16  ;;  %v7785_v36 = vmul.f32 %v25733_v9, %v7240_v47  ;;  %v7953_v41 = vadd.f32 %v7929_v60, %v7240_v47  ;;  %v7238_v62 = vadd.f32 %v7155_v53, %v21979_v49  ;;  %v25739_v16 = vld [vmem:[#allocation31_spill] sm:$0xff]  ;;  %v25740_v35 = vld [vmem:[#allocation94_spill] sm:$0xff] }
 0x353   : > { %7972 = vst.msk [vmem:[%s19007_s16 + $0x8] sm:$0xff] %vm895_vm4, %v7948_v45  ;;  %v22097_v30 = vadd.f32 %v25737_v0, %v25736_v13  ;;  %v22101_v19 = vadd.f32 %v25738_v54, %v21953_v8  ;;  %v22105_v45 = vadd.f32 %v25740_v35, %v25739_v16  ;;  %v7927_v47 = vld [vmem:[%s19007_s16 + $0x20] sm:$0xff]  ;;  %v17222_v15 = vpop.f32.mrf.mxu0  ;;  %v25742_v53 = vld [vmem:[#allocation34_spill] sm:$0xff]  ;;  %v25744_v13 = vld [vmem:[#allocation24_spill] sm:$0xff]  ;;  %v22132_v54 = vpop.permute.xlu0 %8091 }
 0x354   : > { %v17198_v49 = vpop.f32.mrf.mxu1  ;;  %7900 = vst.msk [vmem:[#allocation3 + $0x14] sm:$0xf] %vm307_vm0, %v15982_v2  ;;  %v15987_v7 = vpack.c.bf16 %v7785_v36, %v7785_v36  ;;  %v25741_v34 = vld [vmem:[#allocation7_spill] sm:$0xff]  ;;  %v7951_v8 = vadd.f32 %v7927_v47, %v7238_v62  ;;  %v7241_v60 = vadd.f32 %v17222_v15, %v21983_v48  ;;  %v22117_v9 = vadd.f32 %v21929_v59, %v25742_v53  ;;  %v25747_v47 = vld [vmem:[#allocation57_spill] sm:$0xff] }
 0x355   : > { %7977 = vst.msk [vmem:[%s19007_s16 + $0x30] sm:$0xff] %vm895_vm4, %v7953_v41  ;;  %v7783_v6 = vmul.f32 %v25741_v34, %v7238_v62  ;;  %v22125_v2 = vadd.f32 %v25744_v13, %v25743_v50  ;;  %v25745_v36 = vld [vmem:[#allocation55_spill] sm:$0xff]  ;;  %v7930_v62 = vld [vmem:[%s19007_s16 + $0x38] sm:$0xff]  ;;  %v7158_v0 = vpop.f32.mrf.mxu0  ;;  %v22145_v15 = vadd.f32 %v21967_v61, %v25747_v47 }
 0x356   : > { %v22129_v41 = vadd.f32 %v21931_v28, %v25745_v36  ;;  %v6780_v48 = vpop.f32.mrf.mxu1  ;;  %7905 = vst.msk [vmem:[#allocation3 + $0x28] sm:$0xf] %vm307_vm0, %v15987_v7  ;;  %v7786_v5 = vmul.f32 %v25746_v33, %v7241_v60  ;;  %v7954_v16 = vadd.f32 %v7930_v62, %v7241_v60  ;;  %v7239_v35 = vadd.f32 %v7158_v0, %v21986_v29  ;;  %v25748_v34 = vld [vmem:[#allocation59_spill] sm:$0xff]  ;;  %v7928_v60 = vld [vmem:[%s19007_s16 + $0x28] sm:$0xff]  ;;  %v7933_v36 = vld [vmem:[%s19007_s16 + $0x50] sm:$0xff] }
 0x357   : > { %v15985_v59 = vpack.c.bf16 %v7783_v6, %v7783_v6  ;;  %7975 = vst.msk [vmem:[%s19007_s16 + $0x20] sm:$0xff] %vm895_vm4, %v7951_v8  ;;  %v22141_v28 = vadd.f32 %v21946_v23, %v21965_v38  ;;  %v22149_v7 = vadd.f32 %v21992_v3, %v25748_v34  ;;  %v25749_v6 = vld [vmem:[#allocation60_spill] sm:$0xff]  ;;  %v17225_v53 = vpop.f32.mrf.mxu0  ;;  %v22161_v3 = vld [vmem:[#allocation3 + $0x10] sm:$0xf]  ;;  %v25752_v62 = vld [vmem:[#allocation63_spill] sm:$0xff]  ;;  %v22178_v34 = vpop.permute.xlu1 %8096 }
 0x358   : > { %v22153_v8 = vadd.f32 %v22016_v14, %v25749_v6  ;;  %v17201_v29 = vpop.f32.mrf.mxu1  ;;  %v15988_v50 = vpack.c.bf16 %v7786_v5, %v7786_v5  ;;  %7978 = vst.msk [vmem:[%s19007_s16 + $0x38] sm:$0xff] %vm895_vm4, %v7954_v16  ;;  %v25750_v23 = vld [vmem:[#allocation56_spill] sm:$0xff]  ;;  %v7952_v61 = vadd.f32 %v7928_v60, %v7239_v35  ;;  %v7244_v13 = vadd.f32 %v17225_v53, %v21998_v22  ;;  %v25754_v16 = vld [vmem:[#allocation66_spill] sm:$0xff]  ;;  %v7931_v53 = vld [vmem:[%s19007_s16 + $0x40] sm:$0xff] }
 0x359   : > { %7903 = vst.msk [vmem:[#allocation3 + $0x20] sm:$0xf] %vm307_vm0, %v15985_v59  ;;  %v7784_v38 = vmul.f32 %v25750_v23, %v7239_v35  ;;  %25751 = vst [vmem:[#allocation45_spill] sm:$0xff] %v22161_v3  ;;  %v22165_v14 = vadd.f32 %v22037_v44, %v21975_v56  ;;  %v22170_v0 = vadd.f32 %v22061_v21, %v25752_v62  ;;  %v7171_v59 = vpop.f32.mrf.mxu0  ;;  %v25753_v33 = vld [vmem:[#allocation64_spill] sm:$0xff]  ;;  %v8377_v47 = vld [vmem:[#allocation3 + $0x1c] sm:$0xf] }
 0x35a   : > { %v22173_v5 = vadd.f32 %v6777_v32, %v25753_v33  ;;  %v22176_v35 = vadd.f32 %v17198_v49, %v25754_v16  ;;  %v6793_v22 = vpop.f32.mrf.mxu1  ;;  %7906 = vst.msk [vmem:[#allocation3 + $0x2c] sm:$0xf] %vm307_vm0, %v15988_v50  ;;  %v25755_v44 = vld [vmem:[#allocation84_spill] sm:$0xff]  ;;  %v7957_v6 = vadd.f32 %v7933_v36, %v7244_v13  ;;  %v7242_v60 = vadd.f32 %v7171_v59, %v22003_v10  ;;  %v8376_v32 = vld [vmem:[#allocation3 + $0x18] sm:$0xf] }
 0x35b   : > { %v15986_v56 = vpack.c.bf16 %v7784_v38, %v7784_v38  ;;  %7976 = vst.msk [vmem:[%s19007_s16 + $0x28] sm:$0xff] %vm895_vm4, %v7952_v61  ;;  %v7789_v21 = vmul.f32 %v25755_v44, %v7244_v13  ;;  %v17226_v49 = vpop.f32.mrf.mxu0  ;;  %v22187_v23 = vadd.f32 %v6780_v48, %v21989_v12  ;;  %v25757_v62 = vld [vmem:[#allocation68_spill] sm:$0xff]  ;;  %v8375_v38 = vld [vmem:[#allocation3 + $0x14] sm:$0xf]  ;;  %v15390_v63 = vcombine.low %v8376_v32, %v8377_v47  ;;  %v22194_v44 = vpop.permute.xlu0 %7741  ;;  %v25760_v13 = vld [vmem:[#allocation71_spill] sm:$0xff] }
 0x35c   : > { %v22190_v33 = vadd.f32 %v17201_v29, %v25757_v62  ;;  %v17202_v50 = vpop.f32.mrf.mxu1  ;;  %7981 = vst.msk [vmem:[%s19007_s16 + $0x50] sm:$0xff] %vm895_vm4, %v7957_v6  ;;  %v7787_v12 = vmul.f32 %v25760_v13, %v7242_v60  ;;  %v7955_v48 = vadd.f32 %v7931_v53, %v7242_v60  ;;  %v7245_v29 = vadd.f32 %v17226_v49, %v22007_v24  ;;  %v7934_v36 = vld [vmem:[%s19007_s16 + $0x58] sm:$0xff]  ;;  %v25763_v6 = vld [vmem:[#allocation89_spill] sm:$0xff]  ;;  %v7932_v49 = vld [vmem:[%s19007_s16 + $0x48] sm:$0xff] }
 0x35d   : > { %25756 = vst [vmem:[#allocation28_spill] sm:$0xff] %v22187_v23  ;;  %7904 = vst.msk [vmem:[#allocation3 + $0x24] sm:$0xf] %vm307_vm0, %v15986_v56  ;;  %v15991_v10 = vpack.c.bf16 %v7789_v21, %v7789_v21  ;;  %v7174_v59 = vpop.f32.mrf.mxu0  ;;  %v25761_v62 = vld [vmem:[#allocation70_spill] sm:$0xff]  ;;  %v15389_v47 = vcombine.low %v22161_v3, %v8375_v38  ;;  %v8485_v61 = vshrl.u32 %v15390_v63, 16  ;;  %v8488_v56 = vshll.u32 %v15390_v63, 16 }
 0x35e   : > { %25758 = vst [vmem:[#allocation35_spill] sm:$0xff] %v22190_v33  ;;  %v22203_v16 = vadd.f32 %v6793_v22, %v25761_v62  ;;  %v6796_v32 = vpop.f32.mrf.mxu1  ;;  %v15989_v21 = vpack.c.bf16 %v7787_v12, %v7787_v12  ;;  %7979 = vst.msk [vmem:[%s19007_s16 + $0x40] sm:$0xff] %vm895_vm4, %v7955_v48  ;;  %v7790_v60 = vmul.f32 %v25763_v6, %v7245_v29  ;;  %v7937_v22 = vld [vmem:[%s19007_s16 + $0x70] sm:$0xff]  ;;  %v25764_v62 = vld [vmem:[#allocation72_spill] sm:$0xff]  ;;  %v22216_v12 = vpop.permute.xlu1 %7746 }
 0x35f   : > { %7909 = vst.msk [vmem:[#allocation3 + $0x38] sm:$0xf] %vm307_vm0, %v15991_v10  ;;  %v7958_v24 = vadd.f32 %v7934_v36, %v7245_v29  ;;  %v7243_v53 = vadd.f32 %v7174_v59, %v22010_v43  ;;  %v17229_v13 = vpop.f32.mrf.mxu0  ;;  %v22214_v38 = vadd.f32 %v17202_v50, %v25764_v62  ;;  %v8476_v3 = vshrl.u32 %v15389_v47, 16  ;;  %v25766_v29 = vld [vmem:[#allocation73_spill] sm:$0xff]  ;;  %v8380_v6 = vld [vmem:[#allocation3 + $0x28] sm:$0xf] }
 0x360   : > { %25762 = vst [vmem:[#allocation27_spill] sm:$0xff] %v22203_v16  ;;  %v8479_v63 = vshll.u32 %v15389_v47, 16  ;;  %v8487_v16 = vrot.slane %v8485_v61, 3  ;;  %v17205_v10 = vpop.f32.mrf.mxu1  ;;  %7907 = vst.msk [vmem:[#allocation3 + $0x30] sm:$0xf] %vm307_vm0, %v15989_v21  ;;  %v15992_v48 = vpack.c.bf16 %v7790_v60, %v7790_v60  ;;  %v7248_v59 = vadd.f32 %v17229_v13, %v22023_v27  ;;  %v7935_v62 = vld [vmem:[%s19007_s16 + $0x60] sm:$0xff]  ;;  %v22227_v60 = vpop.permute.xlu0 %8101 }
 0x361   : > { %25765 = vst [vmem:[#allocation41_spill] sm:$0xff] %v22214_v38  ;;  %7982 = vst.msk [vmem:[%s19007_s16 + $0x58] sm:$0xff] %vm895_vm4, %v7958_v24  ;;  %v7788_v43 = vmul.f32 %v25766_v29, %v7243_v53  ;;  %v7956_v36 = vadd.f32 %v7932_v49, %v7243_v53  ;;  %v7187_v50 = vpop.f32.mrf.mxu0  ;;  %v8478_v38 = vrot.slane %v8476_v3, 3  ;;  %v22225_v61 = vadd.f32 %v6796_v32, %v22013_v46  ;;  %v8381_v21 = vld [vmem:[#allocation3 + $0x2c] sm:$0xf] }
 0x362   : > { %v8481_v47 = vrot.slane %v8479_v63, 4  ;;  %v8490_v33 = vrot.slane %v8488_v56, 4  ;;  %v6809_v23 = vpop.f32.mrf.mxu1  ;;  %7910 = vst.msk [vmem:[#allocation3 + $0x3c] sm:$0xf] %vm307_vm0, %v15992_v48  ;;  %v7793_v27 = vmul.f32 %v22063_v42, %v7248_v59  ;;  %v7961_v53 = vadd.f32 %v7937_v22, %v7248_v59  ;;  %v25767_v56 = vld [vmem:[#allocation74_spill] sm:$0xff] }
 0x363   : > { %v15990_v24 = vpack.c.bf16 %v7788_v43, %v7788_v43  ;;  %7980 = vst.msk [vmem:[%s19007_s16 + $0x48] sm:$0xff] %vm895_vm4, %v7956_v36  ;;  %v7246_v3 = vadd.f32 %v7187_v50, %v22027_v51  ;;  %v17230_v49 = vpop.f32.mrf.mxu0  ;;  %v22237_v13 = vadd.f32 %v17205_v10, %v25767_v56  ;;  %v15392_v48 = vcombine.low %v8380_v6, %v8381_v21  ;;  %v22242_v43 = vld [vmem:[%s25266_s6 + $0x30] sm:$0xff]   ;;  %v8378_v22 = vld [vmem:[#allocation3 + $0x20] sm:$0xf]  ;;  %v25769_v50 = vld [vmem:[#allocation76_spill] sm:$0xff] }
 0x364   : > { %v8482_v46 = vor.u32 %v8481_v47, %v8478_v38  ;;  %v22234_v32 = vor.u32 %v8490_v33, %v8487_v16  ;;  %v17206_v63 = vpop.f32.mrf.mxu1  ;;  %v8379_v29 = vld [vmem:[#allocation3 + $0x24] sm:$0xf]  ;;  %v15995_v42 = vpack.c.bf16 %v7793_v27, %v7793_v27  ;;  %7985 = vst.msk [vmem:[%s19007_s16 + $0x70] sm:$0xff] %vm895_vm4, %v7961_v53  ;;  %v7249_v16 = vadd.f32 %v17230_v49, %v22031_v39  ;;  %v7938_v38 = vld [vmem:[%s19007_s16 + $0x78] sm:$0xff]  ;;  %v25768_v36 = vld [vmem:[#allocation13_spill] sm:$0xff] }
 0x365   : > { %7908 = vst.msk [vmem:[#allocation3 + $0x34] sm:$0xf] %vm307_vm0, %v15990_v24  ;;  %v7791_v51 = vmul.f32 %v21933_v26, %v7246_v3  ;;  %v7959_v33 = vadd.f32 %v7935_v62, %v7246_v3  ;;  %v7190_v10 = vpop.f32.mrf.mxu0  ;;  %v22255_v47 = vadd.f32 %v6809_v23, %v25769_v50  ;;  %v15391_v21 = vcombine.low %v8378_v22, %v8379_v29  ;;  %v22259_v26 = vpop.permute.xlu1 %8106  ;;  %v7936_v23 = vld [vmem:[%s19007_s16 + $0x68] sm:$0xff]  ;;  %v25770_v49 = vld [vmem:[#allocation78_spill] sm:$0xff] }
 0x366   : > { %v8483_v59 = vsel %vm1607_vm3, %v25768_v36, %v8482_v46  ;;  %v8492_v6 = vsel %vm1607_vm3, %v8482_v46, %v22234_v32  ;;  %v22257_v24 = vpop.f32.mrf.mxu1  ;;  %7913 = vst.msk [vmem:[#allocation3 + $0x48] sm:$0xf] %vm307_vm0, %v15995_v42  ;;  %v7794_v62 = vmul.f32 %v22108_v37, %v7249_v16  ;;  %v7962_v27 = vadd.f32 %v7938_v38, %v7249_v16  ;;  %v7752_v37 = vpop.permute.xlu0 %7751 }
 0x367   : > { %v15993_v39 = vpack.c.bf16 %v7791_v51, %v7791_v51  ;;  %7983 = vst.msk [vmem:[%s19007_s16 + $0x60] sm:$0xff] %vm895_vm4, %v7959_v33  ;;  %v7247_v53 = vadd.f32 %v7190_v10, %v22034_v18  ;;  %17280 = vmatmul.mubr.msk.bf16.vlgmr.msra.gmra.mxu0 %vm895_vm4, %v8483_v59  ;;  %v17233_v3 = vpop.f32.mrf.mxu0  ;;  %v22270_v46 = vadd.f32 %v17206_v63, %v25770_v49  ;;  %v8494_v56 = vshrl.u32 %v15391_v21, 16  ;;  %v25771_v33 = vld [vmem:[#allocation6_spill] sm:$0xff]  ;;  %v22276_v18 = vld [vmem:[%s25266_s6 + $0x28] sm:$0xff]   ;;  %v7941_v10 = vld [vmem:[%s19007_s16 + $0x90] sm:$0xff] }
 0x368   : > { %17283 = vmatprep.mubr.msk.bf16.mxu0 %vm895_vm4, %v8492_v6  ;;  %v8497_v29 = vshll.u32 %v15391_v21, 16  ;;  %v8503_v42 = vshrl.u32 %v15392_v48, 16  ;;  %v17249_v51 = vpop.f32.mrf.mxu1  ;;  %17336 = vmatpush3.bf16.msra.mxu0 %v25771_v33  ;;  %v15996_v16 = vpack.c.bf16 %v7794_v62, %v7794_v62  ;;  %7986 = vst.msk [vmem:[%s19007_s16 + $0x78] sm:$0xff] %vm895_vm4, %v7962_v27  ;;  %v7252_v38 = vadd.f32 %v17233_v3, %v22047_v20  ;;  %v7942_v3 = vld [vmem:[%s19007_s16 + $0x98] sm:$0xff] }
 0x369   : > { %7911 = vst.msk [vmem:[#allocation3 + $0x40] sm:$0xf] %vm307_vm0, %v15993_v39  ;;  %v7792_v63 = vmul.f32 %v21969_v4, %v7247_v53  ;;  %v7960_v22 = vadd.f32 %v7936_v23, %v7247_v53  ;;  %17337 = vmatprep.subr.bf16.mxu0 %v22242_v43  ;;  %v7203_v36 = vpop.f32.mrf.mxu0  ;;  %v8496_v59 = vrot.slane %v8494_v56, 3  ;;  %v8506_v21 = vshll.u32 %v15392_v48, 16  ;;  %v7939_v53 = vld [vmem:[%s19007_s16 + $0x80] sm:$0xff]  ;;  %v7757_v33 = vpop.permute.xlu1 %7756 }
 0x36a   : > { %v8499_v6 = vrot.slane %v8497_v29, 4  ;;  %v8505_v50 = vrot.slane %v8503_v42, 3  ;;  %v7516_v39 = vpop.f32.mrf.mxu1  ;;  %7914 = vst.msk [vmem:[#allocation3 + $0x4c] sm:$0xf] %vm307_vm0, %v15996_v16  ;;  %v7797_v4 = vmul.f32 %v7752_v37, %v7252_v38  ;;  %v7965_v27 = vadd.f32 %v7941_v10, %v7252_v38  ;;  %v25772_v38 = vld [vmem:[#allocation17_spill] sm:$0xff] }
 0x36b   : > { %v15994_v62 = vpack.c.bf16 %v7792_v63, %v7792_v63  ;;  %7984 = vst.msk [vmem:[%s19007_s16 + $0x68] sm:$0xff] %vm895_vm4, %v7960_v22  ;;  %v7250_v20 = vadd.f32 %v7203_v36, %v22051_v11  ;;  %v17234_v23 = vpop.f32.mrf.mxu0  ;;  %v8508_v56 = vrot.slane %v8506_v21, 4  ;;  %v7613_v29 = vadd.f32 %v17249_v51, %v22058_v31  ;;  %v8285_v22 = vld [vmem:[%s19007_s16 + $0xd0] sm:$0xff] }
 0x36c   : > { %v8500_v49 = vor.u32 %v8499_v6, %v8496_v59  ;;  %v7611_v48 = vadd.f32 %v7516_v39, %v22079_v57  ;;  %v17250_v42 = vpop.f32.mrf.mxu1  ;;  %17338 = vmatpush3.bf16.msra.mxu0 %v22242_v43  ;;  %v15999_v37 = vpack.c.bf16 %v7797_v4, %v7797_v4  ;;  %7989 = vst.msk [vmem:[%s19007_s16 + $0x90] sm:$0xff] %vm895_vm4, %v7965_v27  ;;  %v8283_v59 = vld [vmem:[%s19007_s16 + $0xc0] sm:$0xff]  ;;  %v22317_v39 = vld [vmem:[#allocation3 + $0x34] sm:$0xf] }
 0x36d   : > { %7912 = vst.msk [vmem:[#allocation3 + $0x44] sm:$0xf] %vm307_vm0, %v15994_v62  ;;  %v7795_v11 = vmul.f32 %v22194_v44, %v7250_v20  ;;  %v7963_v16 = vadd.f32 %v7939_v53, %v7250_v20  ;;  %v7253_v63 = vadd.f32 %v17234_v23, %v22071_v58  ;;  %17339 = vmatprep.subr.bf16.mxu0 %v22276_v18  ;;  %v7206_v31 = vpop.f32.mrf.mxu0  ;;  %v22310_v58 = vld [vmem:[%s25266_s6 + $0x20] sm:$0xff]   ;;  %v7940_v62 = vld [vmem:[%s19007_s16 + $0x88] sm:$0xff] }
 0x36e   : > { %v8501_v57 = vsel %vm1607_vm3, %v22234_v32, %v8500_v49  ;;  %v22303_v51 = vor.u32 %v8508_v56, %v8505_v50  ;;  %v8141_v10 = vmul.f32 %v25772_v38, %v7613_v29  ;;  %v8309_v36 = vadd.f32 %v8285_v22, %v7613_v29  ;;  %v7519_v6 = vpop.f32.mrf.mxu1  ;;  %7917 = vst.msk [vmem:[#allocation3 + $0x58] sm:$0xf] %vm307_vm0, %v15999_v37  ;;  %v25773_v53 = vld [vmem:[#allocation16_spill] sm:$0xff]  ;;  %v22339_v37 = vld [vmem:[#allocation3 + $0x30] sm:$0xf]  ;;  %v25774_v38 = vld [vmem:[#allocation50_spill] sm:$0xff] }
 0x36f   : > { %v15997_v44 = vpack.c.bf16 %v7795_v11, %v7795_v11  ;;  %7987 = vst.msk [vmem:[%s19007_s16 + $0x80] sm:$0xff] %vm895_vm4, %v7963_v16  ;;  %v7798_v21 = vmul.f32 %v7757_v33, %v7253_v63  ;;  %v7966_v32 = vadd.f32 %v7942_v3, %v7253_v63  ;;  %v7251_v50 = vadd.f32 %v7206_v31, %v22075_v17  ;;  %v17237_v27 = vpop.f32.mrf.mxu0  ;;  %v22331_v17 = vld [vmem:[%s25266_s6 + $0x58] sm:$0xff]   ;;  %v7945_v11 = vld [vmem:[%s19007_s16 + $0xb0] sm:$0xff] }
 0x370   : > { %17284 = vmatmul.mubr.msk.bf16.gmra.mxu0 %vm895_vm4, %v8501_v57  ;;  %v8510_v4 = vsel %vm1607_vm3, %v8500_v49, %v22303_v51  ;;  %v16007_v20 = vpack.c.bf16 %v8141_v10, %v8141_v10  ;;  %8333 = vst.msk [vmem:[%s19007_s16 + $0xd0] sm:$0xff] %vm895_vm4, %v8309_v36  ;;  %v8139_v23 = vmul.f32 %v25773_v53, %v7611_v48  ;;  %v22325_v3 = vpop.f32.mrf.mxu1 }
 0x371   : > { %v8307_v56 = vadd.f32 %v8283_v59, %v7611_v48  ;;  %17340 = vmatpush3.bf16.msra.mxu0 %v22276_v18  ;;  %7915 = vst.msk [vmem:[#allocation3 + $0x50] sm:$0xf] %vm307_vm0, %v15997_v44  ;;  %v16000_v49 = vpack.c.bf16 %v7798_v21, %v7798_v21  ;;  %v7796_v29 = vmul.f32 %v22216_v12, %v7251_v50  ;;  %v7219_v16 = vpop.f32.mrf.mxu0 }
 0x372   : > { %7990 = vst.msk [vmem:[%s19007_s16 + $0x98] sm:$0xff] %vm895_vm4, %v7966_v32  ;;  %v7964_v33 = vadd.f32 %v7940_v62, %v7251_v50  ;;  %17287 = vmatprep.mubr.msk.bf16.mxu0 %vm895_vm4, %v8510_v4  ;;  %v7256_v48 = vadd.f32 %v17237_v27, %v22093_v1  ;;  %v16005_v63 = vpack.c.bf16 %v8139_v23, %v8139_v23  ;;  %v7532_v57 = vpop.f32.mrf.mxu1  ;;  %v22365_v23 = vld [vmem:[#allocation3 + $0x3c] sm:$0xf] }
 0x373   : > { %8261 = vst.msk [vmem:[#allocation3 + $0x78] sm:$0xf] %vm307_vm0, %v16007_v20  ;;  %v7614_v22 = vadd.f32 %v17250_v42, %v22083_v55  ;;  %v15393_v12 = vcombine.low %v22339_v37, %v22317_v39  ;;  %v7612_v31 = vadd.f32 %v7519_v6, %v22101_v19  ;;  %17341 = vmatprep.subr.bf16.mxu0 %v22310_v58  ;;  %7918 = vst.msk [vmem:[#allocation3 + $0x5c] sm:$0xf] %vm307_vm0, %v16000_v49  ;;  %v8286_v55 = vld [vmem:[%s19007_s16 + $0xd8] sm:$0xff]  ;;  %v7943_v42 = vld [vmem:[%s19007_s16 + $0xa0] sm:$0xff]  ;;  %v17238_v19 = vpop.f32.mrf.mxu0 }
 0x374   : > { %8331 = vst.msk [vmem:[%s19007_s16 + $0xc0] sm:$0xff] %vm895_vm4, %v8307_v56  ;;  %v15998_v1 = vpack.c.bf16 %v7796_v29, %v7796_v29  ;;  %7988 = vst.msk [vmem:[%s19007_s16 + $0x88] sm:$0xff] %vm895_vm4, %v7964_v33  ;;  %v7801_v10 = vmul.f32 %v25774_v38, %v7256_v48  ;;  %v7969_v36 = vadd.f32 %v7945_v11, %v7256_v48  ;;  %v25775_v6 = vld [vmem:[#allocation32_spill] sm:$0xff]  ;;  %v17254_v62 = vpop.f32.mrf.mxu1  ;;  %v7946_v56 = vld [vmem:[%s19007_s16 + $0xb8] sm:$0xff] }
 0x375   : > { %v7254_v59 = vadd.f32 %v7219_v16, %v22097_v30  ;;  %8259 = vst.msk [vmem:[#allocation3 + $0x70] sm:$0xf] %vm307_vm0, %v16005_v63  ;;  %v8142_v44 = vmul.f32 %v25775_v6, %v7614_v22  ;;  %v8310_v21 = vadd.f32 %v8286_v55, %v7614_v22  ;;  %v8512_v32 = vshrl.u32 %v15393_v12, 16  ;;  %17342 = vmatpush3.bf16.msra.mxu0 %v22310_v58  ;;  %v25776_v30 = vld [vmem:[#allocation49_spill] sm:$0xff]  ;;  %v7222_v29 = vpop.f32.mrf.mxu0  ;;  %v25777_v11 = vld [vmem:[#allocation51_spill] sm:$0xff]  ;;  %v8284_v63 = vld [vmem:[%s19007_s16 + $0xc8] sm:$0xff] }
 0x376   : > { %v8515_v50 = vshll.u32 %v15393_v12, 16  ;;  %7916 = vst.msk [vmem:[#allocation3 + $0x54] sm:$0xf] %vm307_vm0, %v15998_v1  ;;  %v16003_v4 = vpack.c.bf16 %v7801_v10, %v7801_v10  ;;  %v7257_v53 = vadd.f32 %v17238_v19, %v22117_v9  ;;  %17399 = vmatprep.subr.bf16.mxu0 %v22331_v17  ;;  %v8140_v16 = vmul.f32 %v25777_v11, %v7612_v31  ;;  %v7535_v22 = vpop.f32.mrf.mxu1  ;;  %v25778_v12 = vld [vmem:[#allocation26_spill] sm:$0xff] }
 0x377   : > { %7993 = vst.msk [vmem:[%s19007_s16 + $0xb0] sm:$0xff] %vm895_vm4, %v7969_v36  ;;  %v7799_v27 = vmul.f32 %v25776_v30, %v7254_v59  ;;  %v7967_v20 = vadd.f32 %v7943_v42, %v7254_v59  ;;  %v16008_v49 = vpack.c.bf16 %v8142_v44, %v8142_v44  ;;  %8334 = vst.msk [vmem:[%s19007_s16 + $0xd8] sm:$0xff] %vm895_vm4, %v8310_v21  ;;  %v8514_v33 = vrot.slane %v8512_v32, 3  ;;  %v22378_v36 = vld [vmem:[#allocation3 + $0x38] sm:$0xf]  ;;  %v7944_v59 = vld [vmem:[%s19007_s16 + $0xa8] sm:$0xff] }
 0x378   : > { %v8517_v48 = vrot.slane %v8515_v50, 4  ;;  %7921 = vst.msk [vmem:[#allocation3 + $0x68] sm:$0xf] %vm307_vm0, %v16003_v4  ;;  %v7802_v1 = vmul.f32 %v25778_v12, %v7257_v53  ;;  %v7970_v38 = vadd.f32 %v7946_v56, %v7257_v53  ;;  %v7255_v10 = vadd.f32 %v7222_v29, %v22121_v40  ;;  %v8289_v44 = vld [vmem:[%s19007_s16 + $0xf0] sm:$0xff]  ;;  %v17257_v21 = vpop.f32.mrf.mxu1  ;;  %v8290_v11 = vld [vmem:[%s19007_s16 + $0xf8] sm:$0xff] }
 0x379   : > { %v16001_v9 = vpack.c.bf16 %v7799_v27, %v7799_v27  ;;  %7991 = vst.msk [vmem:[%s19007_s16 + $0xa0] sm:$0xff] %vm895_vm4, %v7967_v20  ;;  %v16006_v42 = vpack.c.bf16 %v8140_v16, %v8140_v16  ;;  %v8308_v19 = vadd.f32 %v8284_v63, %v7612_v31  ;;  %v15394_v6 = vcombine.low %v22378_v36, %v22365_v23  ;;  %v25779_v40 = vld [vmem:[#allocation53_spill] sm:$0xff]  ;;  %v8287_v27 = vld [vmem:[%s19007_s16 + $0xe0] sm:$0xff]  ;;  %v25781_v63 = vld [vmem:[#allocation58_spill] sm:$0xff] }
 0x37a   : > { %8262 = vst.msk [vmem:[#allocation3 + $0x7c] sm:$0xf] %vm307_vm0, %v16008_v49  ;;  %v8518_v55 = vor.u32 %v8517_v48, %v8514_v33  ;;  %v16004_v32 = vpack.c.bf16 %v7802_v1, %v7802_v1  ;;  %v7800_v50 = vmul.f32 %v25779_v40, %v7255_v10  ;;  %v7968_v4 = vadd.f32 %v7944_v59, %v7255_v10  ;;  %v22398_v49 = vld [vmem:[#allocation3 + $0x44] sm:$0xf]  ;;  %v7548_v29 = vpop.f32.mrf.mxu1  ;;  %v22407_v16 = vld [vmem:[#allocation3 + $0x4c] sm:$0xf] }
 0x37b   : > { %7919 = vst.msk [vmem:[#allocation3 + $0x60] sm:$0xf] %vm307_vm0, %v16001_v9  ;;  %v7617_v30 = vadd.f32 %v22325_v3, %v22105_v45  ;;  %8260 = vst.msk [vmem:[#allocation3 + $0x74] sm:$0xf] %vm307_vm0, %v16006_v42  ;;  %v8521_v20 = vshrl.u32 %v15394_v6, 16  ;;  %v8524_v53 = vshll.u32 %v15394_v6, 16  ;;  %v7615_v56 = vadd.f32 %v7532_v57, %v22125_v2 }
 0x37c   : > { %7994 = vst.msk [vmem:[%s19007_s16 + $0xb8] sm:$0xff] %vm895_vm4, %v7970_v38  ;;  %v8519_v31 = vsel %vm1607_vm3, %v22303_v51, %v8518_v55  ;;  %8332 = vst.msk [vmem:[%s19007_s16 + $0xc8] sm:$0xff] %vm895_vm4, %v8308_v19  ;;  %v16002_v33 = vpack.c.bf16 %v7800_v50, %v7800_v50  ;;  %v25780_v45 = vld [vmem:[#allocation67_spill] sm:$0xff]  ;;  %v7618_v48 = vadd.f32 %v17254_v62, %v22129_v41  ;;  %v17258_v38 = vpop.f32.mrf.mxu1  ;;  %v25782_v59 = vld [vmem:[#allocation69_spill] sm:$0xff] }
 0x37d   : > { %7922 = vst.msk [vmem:[#allocation3 + $0x6c] sm:$0xf] %vm307_vm0, %v16004_v32  ;;  %17288 = vmatmul.mubr.msk.bf16.gmra.mxu0 %vm895_vm4, %v8519_v31  ;;  %v8145_v51 = vmul.f32 %v25780_v45, %v7617_v30  ;;  %v8313_v3 = vadd.f32 %v8289_v44, %v7617_v30  ;;  %v8523_v2 = vrot.slane %v8521_v20, 3  ;;  %v8526_v57 = vrot.slane %v8524_v53, 4  ;;  %v22410_v1 = vld [vmem:[#allocation3 + $0x40] sm:$0xf] }
 0x37e   : > { %7992 = vst.msk [vmem:[%s19007_s16 + $0xa8] sm:$0xff] %vm895_vm4, %v7968_v4  ;;  %v8143_v9 = vmul.f32 %v25781_v63, %v7615_v56  ;;  %v8311_v12 = vadd.f32 %v8287_v27, %v7615_v56  ;;  %v8146_v41 = vmul.f32 %v25782_v59, %v7618_v48  ;;  %v8314_v62 = vadd.f32 %v8290_v11, %v7618_v48  ;;  %v22418_v19 = vld [vmem:[#allocation3 + $0x48] sm:$0xf]  ;;  %v7551_v50 = vpop.f32.mrf.mxu1 }
 0x37f   : > { %7920 = vst.msk [vmem:[#allocation3 + $0x64] sm:$0xf] %vm307_vm0, %v16002_v33  ;;  %v16011_v10 = vpack.c.bf16 %v8145_v51, %v8145_v51  ;;  %v15395_v42 = vcombine.low %v22410_v1, %v22398_v49  ;;  %v8527_v6 = vor.u32 %v8526_v57, %v8523_v2  ;;  %v7616_v32 = vadd.f32 %v7535_v22, %v22141_v28  ;;  %v8288_v31 = vld [vmem:[%s19007_s16 + $0xe8] sm:$0xff]  ;;  %v25783_v28 = vld [vmem:[#allocation61_spill] sm:$0xff] }
 0x380   : > { %8337 = vst.msk [vmem:[%s19007_s16 + $0xf0] sm:$0xff] %vm895_vm4, %v8313_v3  ;;  %v16009_v44 = vpack.c.bf16 %v8143_v9, %v8143_v9  ;;  %8335 = vst.msk [vmem:[%s19007_s16 + $0xe0] sm:$0xff] %vm895_vm4, %v8311_v12  ;;  %v15396_v40 = vcombine.low %v22418_v19, %v22407_v16  ;;  %v16012_v4 = vpack.c.bf16 %v8146_v41, %v8146_v41  ;;  %v17261_v45 = vpop.f32.mrf.mxu1  ;;  %v25784_v11 = vld [vmem:[#allocation92_spill] sm:$0xff]  ;;  %v22442_v12 = vld [vmem:[#allocation3 + $0x50] sm:$0xf] }
 0x381   : > { %8265 = vst.msk [vmem:[#allocation3 + $0x88] sm:$0xf] %vm307_vm0, %v16011_v10  ;;  %v8530_v30 = vshrl.u32 %v15395_v42, 16  ;;  %v8533_v27 = vshll.u32 %v15395_v42, 16  ;;  %v7621_v20 = vadd.f32 %v17257_v21, %v22145_v15  ;;  %v8528_v53 = vsel %vm1607_vm3, %v8518_v55, %v8527_v6  ;;  %v8293_v21 = vld [vmem:[%s19007_s16 + $0x110] sm:$0xff]  ;;  %v8291_v42 = vld [vmem:[%s19007_s16 + $0x100] sm:$0xff] }
 0x382   : > { %8338 = vst.msk [vmem:[%s19007_s16 + $0xf8] sm:$0xff] %vm895_vm4, %v8314_v62  ;;  %v8144_v22 = vmul.f32 %v25783_v28, %v7616_v32  ;;  %v8312_v56 = vadd.f32 %v8288_v31, %v7616_v32  ;;  %v8539_v33 = vshrl.u32 %v15396_v40, 16  ;;  %17291 = vmatprep.mubr.msk.bf16.mxu0 %vm895_vm4, %v8528_v53  ;;  %v8542_v48 = vshll.u32 %v15396_v40, 16  ;;  %v22437_v55 = vld [vmem:[#allocation3 + $0x54] sm:$0xf]  ;;  %v7564_v10 = vpop.f32.mrf.mxu1  ;;  %v25785_v32 = vld [vmem:[#allocation75_spill] sm:$0xff] }
 0x383   : > { %8263 = vst.msk [vmem:[#allocation3 + $0x80] sm:$0xf] %vm307_vm0, %v16009_v44  ;;  %8266 = vst.msk [vmem:[#allocation3 + $0x8c] sm:$0xf] %vm307_vm0, %v16012_v4  ;;  %v8532_v51 = vrot.slane %v8530_v30, 3  ;;  %v8535_v3 = vrot.slane %v8533_v27, 4  ;;  %v8149_v15 = vmul.f32 %v25784_v11, %v7621_v20  ;;  %v8317_v63 = vadd.f32 %v8293_v21, %v7621_v20 }
 0x384   : > { %v16010_v2 = vpack.c.bf16 %v8144_v22, %v8144_v22  ;;  %8336 = vst.msk [vmem:[%s19007_s16 + $0xe8] sm:$0xff] %vm895_vm4, %v8312_v56  ;;  %v8541_v57 = vrot.slane %v8539_v33, 3  ;;  %v7619_v9 = vadd.f32 %v7548_v29, %v22149_v7  ;;  %v8544_v41 = vrot.slane %v8542_v48, 4  ;;  %v8294_v30 = vld [vmem:[%s19007_s16 + $0x118] sm:$0xff]  ;;  %v22454_v27 = vld [vmem:[#allocation3 + $0x5c] sm:$0xf]  ;;  %v17262_v31 = vpop.f32.mrf.mxu1 }
 0x385   : > { %v8536_v59 = vor.u32 %v8535_v3, %v8532_v51  ;;  %v16015_v62 = vpack.c.bf16 %v8149_v15, %v8149_v15  ;;  %v7622_v44 = vadd.f32 %v17258_v38, %v22153_v8  ;;  %8341 = vst.msk [vmem:[%s19007_s16 + $0x110] sm:$0xff] %vm895_vm4, %v8317_v63  ;;  %v15397_v7 = vcombine.low %v22442_v12, %v22437_v55  ;;  %v25786_v20 = vld [vmem:[#allocation23_spill] sm:$0xff]  ;;  %v8292_v51 = vld [vmem:[%s19007_s16 + $0x108] sm:$0xff]  ;;  %v22464_v3 = vld [vmem:[#allocation3 + $0x58] sm:$0xf] }
 0x386   : > { %8264 = vst.msk [vmem:[#allocation3 + $0x84] sm:$0xf] %vm307_vm0, %v16010_v2  ;;  %v8147_v40 = vmul.f32 %v25785_v32, %v7619_v9  ;;  %v8315_v4 = vadd.f32 %v8291_v42, %v7619_v9  ;;  %v7620_v29 = vadd.f32 %v7551_v50, %v22165_v14  ;;  %v8545_v38 = vor.u32 %v8544_v41, %v8541_v57  ;;  %v25787_v14 = vld [vmem:[#allocation81_spill] sm:$0xff]  ;;  %v22473_v2 = vld [vmem:[#allocation3 + $0x60] sm:$0xf] }
 0x387   : > { %v8537_v8 = vsel %vm1607_vm3, %v8527_v6, %v8536_v59  ;;  %8269 = vst.msk [vmem:[#allocation3 + $0x98] sm:$0xf] %vm307_vm0, %v16015_v62  ;;  %v8150_v53 = vmul.f32 %v25786_v20, %v7622_v44  ;;  %v8318_v28 = vadd.f32 %v8294_v30, %v7622_v44  ;;  %v8548_v56 = vshrl.u32 %v15397_v7, 16  ;;  %v22466_v6 = vpop.f32.mrf.mxu1  ;;  %v8297_v41 = vld [vmem:[%s19007_s16 + $0x130] sm:$0xff]  ;;  %v8298_v30 = vld [vmem:[%s19007_s16 + $0x138] sm:$0xff] }
 0x388   : > { %17292 = vmatmul.mubr.msk.bf16.gmra.mxu0 %vm895_vm4, %v8537_v8  ;;  %v16013_v22 = vpack.c.bf16 %v8147_v40, %v8147_v40  ;;  %8339 = vst.msk [vmem:[%s19007_s16 + $0x100] sm:$0xff] %vm895_vm4, %v8315_v4  ;;  %v8551_v33 = vshll.u32 %v15397_v7, 16  ;;  %v8148_v50 = vmul.f32 %v25787_v14, %v7620_v29  ;;  %v8546_v48 = vsel %vm1607_vm3, %v8536_v59, %v8545_v38  ;;  %v8295_v40 = vld [vmem:[%s19007_s16 + $0x120] sm:$0xff]  ;;  %v22492_v8 = vld [vmem:[#allocation3 + $0x6c] sm:$0xf] }
 0x389   : > { %v16016_v11 = vpack.c.bf16 %v8150_v53, %v8150_v53  ;;  %8342 = vst.msk [vmem:[%s19007_s16 + $0x118] sm:$0xff] %vm895_vm4, %v8318_v28  ;;  %v8316_v15 = vadd.f32 %v8292_v51, %v7620_v29  ;;  %v15398_v21 = vcombine.low %v22464_v3, %v22454_v27  ;;  %17295 = vmatprep.mubr.msk.bf16.mxu0 %vm895_vm4, %v8546_v48  ;;  %v8550_v57 = vrot.slane %v8548_v56, 3  ;;  %v22479_v62 = vpop.f32.mrf.mxu1  ;;  %v22494_v20 = vld [vmem:[#allocation3 + $0x74] sm:$0xf]  ;;  %v22499_v28 = vld [vmem:[#allocation3 + $0x64] sm:$0xf] }
 0x38a   : > { %8267 = vst.msk [vmem:[#allocation3 + $0x90] sm:$0xf] %vm307_vm0, %v16013_v22  ;;  %v8553_v63 = vrot.slane %v8551_v33, 4  ;;  %v16014_v9 = vpack.c.bf16 %v8148_v50, %v8148_v50  ;;  %v7625_v59 = vadd.f32 %v17261_v45, %v22170_v0  ;;  %v7623_v32 = vadd.f32 %v7564_v10, %v22173_v5  ;;  %v22505_v14 = vld [vmem:[#allocation3 + $0x68] sm:$0xf] }
 0x38b   : > { %8270 = vst.msk [vmem:[#allocation3 + $0x9c] sm:$0xf] %vm307_vm0, %v16016_v11  ;;  %v8557_v42 = vshrl.u32 %v15398_v21, 16  ;;  %v8560_v44 = vshll.u32 %v15398_v21, 16  ;;  %v7626_v4 = vadd.f32 %v17262_v31, %v22176_v35  ;;  %v15399_v29 = vcombine.low %v22473_v2, %v22473_v2  ;;  %v22496_v53 = vpop.f32.mrf.mxu1  ;;  %v22507_v50 = vld [vmem:[#allocation3 + $0x70] sm:$0xf] }
 0x38c   : > { %8340 = vst.msk [vmem:[%s19007_s16 + $0x108] sm:$0xff] %vm895_vm4, %v8316_v15  ;;  %v8554_v7 = vor.u32 %v8553_v63, %v8550_v57  ;;  %v8153_v0 = vmul.f32 %v22132_v54, %v7625_v59  ;;  %v8321_v45 = vadd.f32 %v8297_v41, %v7625_v59  ;;  %v8151_v10 = vmul.f32 %v21994_v52, %v7623_v32  ;;  %v8787_v21 = vld [vmem:[#allocation3 + $0x60] sm:$0x8] }
 0x38d   : > { %8268 = vst.msk [vmem:[#allocation3 + $0x94] sm:$0xf] %vm307_vm0, %v16014_v9  ;;  %v8559_v5 = vrot.slane %v8557_v42, 3  ;;  %v8562_v35 = vrot.slane %v8560_v44, 4  ;;  %v8319_v31 = vadd.f32 %v8295_v40, %v7623_v32  ;;  %v8154_v56 = vmul.f32 %v22178_v34, %v7626_v4  ;;  %v17266_v51 = vpop.f32.mrf.mxu1  ;;  %v8112_v32 = vpop.permute.xlu0 %8111 }
 0x38e   : > { %v8555_v54 = vsel %vm1607_vm3, %v8545_v38, %v8554_v7  ;;  %v16019_v22 = vpack.c.bf16 %v8153_v0, %v8153_v0  ;;  %8345 = vst.msk [vmem:[%s19007_s16 + $0x130] sm:$0xff] %vm895_vm4, %v8321_v45  ;;  %v8322_v33 = vadd.f32 %v8298_v30, %v7626_v4  ;;  %v16017_v11 = vpack.c.bf16 %v8151_v10, %v8151_v10 }
 0x38f   : > { %v8563_v48 = vor.u32 %v8562_v35, %v8559_v5  ;;  %8343 = vst.msk [vmem:[%s19007_s16 + $0x120] sm:$0xff] %vm895_vm4, %v8319_v31  ;;  %v8566_v52 = vshrl.u32 %v15399_v29, 16  ;;  %v8569_v15 = vshll.u32 %v15399_v29, 16  ;;  %v16020_v38 = vpack.c.bf16 %v8154_v56, %v8154_v56  ;;  %v22520_v9 = vpop.f32.mrf.mxu1  ;;  %v22533_v35 = vld [vmem:[#allocation3 + $0x7c] sm:$0xf] }
 0x390   : > { %17296 = vmatmul.mubr.msk.bf16.gmra.mxu0 %vm895_vm4, %v8555_v54  ;;  %8273 = vst.msk [vmem:[#allocation3 + $0xa8] sm:$0xf] %vm307_vm0, %v16019_v22  ;;  %v15416_v34 = vcombine.low %v8787_v21, %v22499_v28  ;;  %v15417_v57 = vcombine.low %v22505_v14, %v22492_v8  ;;  %v15418_v63 = vcombine.low %v22507_v50, %v22494_v20  ;;  %8271 = vst.msk [vmem:[#allocation3 + $0xa0] sm:$0xf] %vm307_vm0, %v16017_v11  ;;  %v25789_v11 = vld [vmem:[#allocation33_spill] sm:$0xff] }
 0x391   : > { %8346 = vst.msk [vmem:[%s19007_s16 + $0x138] sm:$0xff] %vm895_vm4, %v8322_v33  ;;  %v22524_v59 = vadd.f32 %v22257_v24, %v22054_v25  ;;  %v8564_v41 = vsel %vm1607_vm3, %v8554_v7, %v8563_v48  ;;  %v8568_v42 = vrot.slane %v8566_v52, 3  ;;  %v8571_v44 = vrot.slane %v8569_v15, 4  ;;  %v25788_v24 = vld [vmem:[#allocation28_spill] sm:$0xff]  ;;  %v22535_v56 = vpop.f32.mrf.mxu1 }
 0x392   : > { %17299 = vmatprep.mubr.msk.bf16.mxu0 %vm895_vm4, %v8564_v41  ;;  %8274 = vst.msk [vmem:[#allocation3 + $0xac] sm:$0xf] %vm307_vm0, %v16020_v38  ;;  %v8876_v40 = vshrl.u32 %v15416_v34, 16  ;;  %v8879_v4 = vshll.u32 %v15416_v34, 16  ;;  %v8884_v30 = vshrl.u32 %v15417_v57, 16  ;;  %v8887_v0 = vshll.u32 %v15417_v57, 16  ;;  %v8117_v41 = vpop.permute.xlu1 %8116 }
 0x393   : > { %v8572_v45 = vor.u32 %v8571_v44, %v8568_v42  ;;  %v8893_v29 = vshrl.u32 %v15418_v63, 16  ;;  %v8896_v25 = vshll.u32 %v15418_v63, 16  ;;  %v7624_v5 = vadd.f32 %v22466_v6, %v25788_v24  ;;  %v8296_v7 = vld [vmem:[%s19007_s16 + $0x128] sm:$0xff]  ;;  %v22539_v38 = vld [vmem:[#allocation3 + $0x78] sm:$0xf]  ;;  %v25790_v44 = vld [vmem:[#allocation35_spill] sm:$0xff] }
 0x394   : > { %v8878_v10 = vrot.slane %v8876_v40, 3  ;;  %v8881_v31 = vrot.slane %v8879_v4, 4  ;;  %v8886_v54 = vrot.slane %v8884_v30, 3  ;;  %v8889_v22 = vrot.slane %v8887_v0, 4  ;;  %v8301_v40 = vld [vmem:[%s19007_s16 + $0x150] sm:$0xff]  ;;  %v25791_v4 = vld [vmem:[#allocation27_spill] sm:$0xff] }
 0x395   : > { %v8573_v33 = vsel %vm1607_vm3, %v8563_v48, %v8572_v45  ;;  %v8152_v52 = vmul.f32 %v25789_v11, %v7624_v5  ;;  %v8320_v15 = vadd.f32 %v8296_v7, %v7624_v5  ;;  %v8895_v21 = vrot.slane %v8893_v29, 3  ;;  %v25792_v0 = vld [vmem:[#allocation41_spill] sm:$0xff]  ;;  %v22551_v29 = vpop.permute.xlu0 %8121  ;;  %v22562_v11 = vld [vmem:[#allocation3 + $0x84] sm:$0xf] }
 0x396   : > { %v8882_v6 = vor.u32 %v8881_v31, %v8878_v10  ;;  %v8890_v34 = vor.u32 %v8889_v22, %v8886_v54  ;;  %v8898_v57 = vrot.slane %v8896_v25, 4  ;;  %v15419_v63 = vcombine.low %v22539_v38, %v22533_v35  ;;  %v8299_v10 = vld [vmem:[%s19007_s16 + $0x140] sm:$0xff]  ;;  %v8302_v31 = vld [vmem:[%s19007_s16 + $0x158] sm:$0xff]  ;;  %v7596_v54 = vpop.f32.mrf.mxu1 }
 0x397   : > { %v16018_v42 = vpack.c.bf16 %v8152_v52, %v8152_v52  ;;  %8344 = vst.msk [vmem:[%s19007_s16 + $0x128] sm:$0xff] %vm895_vm4, %v8320_v15  ;;  %v7629_v48 = vadd.f32 %v22479_v62, %v25790_v44  ;;  %v7627_v30 = vadd.f32 %v22496_v53, %v25791_v4  ;;  %v7630_v45 = vadd.f32 %v17266_v51, %v25792_v0  ;;  %v22564_v52 = vld [vmem:[#allocation3 + $0x8c] sm:$0xf]  ;;  %v8300_v44 = vld [vmem:[%s19007_s16 + $0x148] sm:$0xff]  ;;  %v18409_v4 = vld [vmem:[%s25266_s6 + $0x38] sm:$0xff]  }
 0x398   : > { %17300 = vmatmul.mubr.msk.bf16.gmra.mxu0 %vm895_vm4, %v8573_v33  ;;  %v8891_v25 = vsel %vm1607_vm3, %v8882_v6, %v8890_v34  ;;  %v8899_v24 = vor.u32 %v8898_v57, %v8895_v21  ;;  %v8902_v5 = vshrl.u32 %v15419_v63, 16  ;;  %v8905_v7 = vshll.u32 %v15419_v63, 16  ;;  %v22560_v33 = vld [vmem:[#allocation3 + $0x80] sm:$0xf] }
 0x399   : > { %17311 = vmatprep.mubr.msk.bf16.mxu1 %vm895_vm4, %v8891_v25  ;;  %8272 = vst.msk [vmem:[#allocation3 + $0xa4] sm:$0xf] %vm307_vm0, %v16018_v42  ;;  %v8157_v62 = vmul.f32 %v8112_v32, %v7629_v48  ;;  %v8325_v53 = vadd.f32 %v8301_v40, %v7629_v48  ;;  %v8155_v51 = vmul.f32 %v22227_v60, %v7627_v30  ;;  %v25793_v63 = vld [vmem:[#allocation43_spill] sm:$0xff]  ;;  %v25794_v42 = vld [vmem:[#allocation38_spill] sm:$0xff]  ;;  %v22572_v60 = vld [vmem:[#allocation3 + $0x88] sm:$0xf] }
 0x39a   : > { %v8323_v22 = vadd.f32 %v8299_v10, %v7627_v30  ;;  %v8900_v15 = vsel %vm1607_vm3, %v8890_v34, %v8899_v24  ;;  %v8904_v21 = vrot.slane %v8902_v5, 3  ;;  %v8907_v6 = vrot.slane %v8905_v7, 4  ;;  %v18410_v5 = vld [vmem:[#allocation3 + $0x18] sm:$0xf]  ;;  %v18411_v7 = vld [vmem:[#allocation3 + $0x14] sm:$0xf] }
 0x39b   : > { %v8158_v57 = vmul.f32 %v8117_v41, %v7630_v45  ;;  %v25795_v32 = vcombine.low %v25793_v63, %v25794_v42  ;;  %17312 = vmatmul.mubr.msk.bf16.vlgmr.msra.gmra.mxu1 %vm895_vm4, %v8900_v15  ;;  %v16023_v48 = vpack.c.bf16 %v8157_v62, %v8157_v62  ;;  %8349 = vst.msk [vmem:[%s19007_s16 + $0x150] sm:$0xff] %vm895_vm4, %v8325_v53  ;;  %v17270_v62 = vpop.f32.mrf.mxu1  ;;  %v22609_v63 = vld [vmem:[%s25266_s6 + $0x50] sm:$0xff]  }
 0x39c   : > { %v16021_v40 = vpack.c.bf16 %v8155_v51, %v8155_v51  ;;  %8347 = vst.msk [vmem:[%s19007_s16 + $0x140] sm:$0xff] %vm895_vm4, %v8323_v22  ;;  %v8326_v34 = vadd.f32 %v8302_v31, %v7630_v45  ;;  %v7628_v41 = vadd.f32 %v22520_v9, %v22225_v61  ;;  %17368 = vmatpush3.bf16.msra.mxu1 %v18409_v4  ;;  %v22588_v45 = vpop.permute.xlu1 %8126  ;;  %v8132_v51 = vpop.permute.xlu0 %8131  ;;  %v22620_v4 = vld [vmem:[#allocation3 + $0x90] sm:$0xf] }
 0x39d   : > { %17343 = vmatprep.mubr.msk.bf16.mxu0 %vm895_vm4, %v25795_v32  ;;  %v22584_v30 = vor.u32 %v8907_v6, %v8904_v21  ;;  %v16024_v0 = vpack.c.bf16 %v8158_v57, %v8158_v57  ;;  %v15420_v25 = vcombine.low %v22560_v33, %v22562_v11  ;;  %v15451_v10 = vcombine.low %v18411_v7, %v18410_v5  ;;  %v8305_v6 = vld [vmem:[%s19007_s16 + $0x170] sm:$0xff]  ;;  %v8303_v57 = vld [vmem:[%s19007_s16 + $0x160] sm:$0xff]  ;;  %v25796_v32 = vld [vmem:[#allocation44_spill] sm:$0xff] }
 0x39e   : > { %8277 = vst.msk [vmem:[#allocation3 + $0xb8] sm:$0xf] %vm307_vm0, %v16023_v48  ;;  %8275 = vst.msk [vmem:[#allocation3 + $0xb0] sm:$0xf] %vm307_vm0, %v16021_v40  ;;  %v8156_v61 = vmul.f32 %v22259_v26, %v7628_v41  ;;  %v8324_v9 = vadd.f32 %v8300_v44, %v7628_v41  ;;  %v15421_v31 = vcombine.low %v22572_v60, %v22564_v52  ;;  %17369 = vmatprep.subr.bf16.mxu1 %v22242_v43  ;;  %v25797_v44 = vld [vmem:[#allocation45_spill] sm:$0xff]  ;;  %v7599_v41 = vpop.f32.mrf.mxu1 }
 0x39f   : > { %8350 = vst.msk [vmem:[%s19007_s16 + $0x158] sm:$0xff] %vm895_vm4, %v8326_v34  ;;  %v7633_v53 = vadd.f32 %v22535_v56, %v22237_v13  ;;  %v8909_v22 = vsel %vm1607_vm3, %v8899_v24, %v22584_v30  ;;  %v8911_v15 = vshrl.u32 %v15420_v25, 16  ;;  %v8914_v21 = vshll.u32 %v15420_v25, 16 }
 0x3a0   : > { %8278 = vst.msk [vmem:[#allocation3 + $0xbc] sm:$0xf] %vm307_vm0, %v16024_v0  ;;  %v7631_v26 = vadd.f32 %v7596_v54, %v22255_v47  ;;  %17315 = vmatprep.mubr.msk.bf16.mxu1 %vm895_vm4, %v8909_v22  ;;  %v16022_v13 = vpack.c.bf16 %v8156_v61, %v8156_v61  ;;  %v8920_v56 = vshrl.u32 %v15421_v31, 16  ;;  %v8923_v24 = vshll.u32 %v15421_v31, 16  ;;  %17370 = vmatpush3.bf16.msra.mxu1 %v22242_v43  ;;  %v22622_v0 = vld [vmem:[#allocation3 + $0x94] sm:$0xf] }
 0x3a1   : > { %8348 = vst.msk [vmem:[%s19007_s16 + $0x148] sm:$0xff] %vm895_vm4, %v8324_v9  ;;  %v8161_v42 = vmul.f32 %v8132_v51, %v7633_v53  ;;  %v25798_v48 = vcombine.low %v25796_v32, %v25797_v44  ;;  %v8913_v47 = vrot.slane %v8911_v15, 3  ;;  %v8916_v54 = vrot.slane %v8914_v21, 4  ;;  %v8306_v9 = vld [vmem:[%s19007_s16 + $0x178] sm:$0xff]  ;;  %v22629_v43 = vld [vmem:[#allocation3 + $0x9c] sm:$0xf]  ;;  %17371 = vmatprep.subr.bf16.mxu1 %v22276_v18  ;;  %v8137_v15 = vpop.permute.xlu1 %8136 }
 0x3a2   : > { %v8329_v40 = vadd.f32 %v8305_v6, %v7633_v53  ;;  %v8159_v34 = vmul.f32 %v22551_v29, %v7631_v26  ;;  %8276 = vst.msk [vmem:[#allocation3 + $0xb4] sm:$0xf] %vm307_vm0, %v16022_v13  ;;  %v8922_v25 = vrot.slane %v8920_v56, 3  ;;  %v8925_v5 = vrot.slane %v8923_v24, 4  ;;  %v22627_v29 = vld [vmem:[#allocation3 + $0x98] sm:$0xf] }
 0x3a3   : > { %17344 = vmatmul.mubr.msk.bf16.vlgmr.msra.gmra.mxu0 %vm895_vm4, %v25798_v48  ;;  %v16027_v7 = vpack.c.bf16 %v8161_v42, %v8161_v42  ;;  %v8327_v61 = vadd.f32 %v8303_v57, %v7631_v26  ;;  %v22635_v31 = vld [vmem:[%s25266_s6 + $0x48] sm:$0xff]   ;;  %v8917_v53 = vor.u32 %v8916_v54, %v8913_v47  ;;  %v7634_v51 = vadd.f32 %v17270_v62, %v22270_v46  ;;  %v18412_v6 = vld [vmem:[#allocation3 + $0x1c] sm:$0xf]  ;;  %v18413_v26 = vld [vmem:[#allocation3 + $0x20] sm:$0xf] }
 0x3a4   : > { %17347 = vmatprep.mubr.msk.bf16.mxu0 %vm895_vm4, %v15451_v10  ;;  %8353 = vst.msk [vmem:[%s19007_s16 + $0x170] sm:$0xff] %vm895_vm4, %v8329_v40  ;;  %v16025_v10 = vpack.c.bf16 %v8159_v34, %v8159_v34  ;;  %v8304_v22 = vld [vmem:[%s19007_s16 + $0x168] sm:$0xff]  ;;  %17400 = vmatpush3.bf16.msra.mxu0 %v22331_v17  ;;  %v22642_v21 = vor.u32 %v8925_v5, %v8922_v25  ;;  %v22656_v32 = vld [vmem:[#allocation3 + $0xa0] sm:$0xf]  ;;  %v22665_v54 = vld [vmem:[#allocation3 + $0xac] sm:$0xf] }
 0x3a5   : > { %8281 = vst.msk [vmem:[#allocation3 + $0xc8] sm:$0xf] %vm307_vm0, %v16027_v7  ;;  %v15452_v57 = vcombine.low %v18412_v6, %v18413_v26  ;;  %v7632_v13 = vadd.f32 %v7599_v41, %v22524_v59  ;;  %v15422_v56 = vcombine.low %v22620_v4, %v22622_v0  ;;  %17401 = vmatprep.subr.bf16.mxu0 %v22609_v63  ;;  %v22658_v44 = vld [vmem:[#allocation3 + $0xa4] sm:$0xf]  ;;  %v18414_v5 = vld [vmem:[#allocation3 + $0x28] sm:$0xf] }
 0x3a6   : > { %8351 = vst.msk [vmem:[%s19007_s16 + $0x160] sm:$0xff] %vm895_vm4, %v8327_v61  ;;  %v8918_v46 = vsel %vm1607_vm3, %v22584_v30, %v8917_v53  ;;  %v8162_v62 = vmul.f32 %v8137_v15, %v7634_v51  ;;  %v8330_v24 = vadd.f32 %v8306_v9, %v7634_v51  ;;  %v15423_v42 = vcombine.low %v22627_v29, %v22629_v43  ;;  %v18415_v7 = vld [vmem:[#allocation3 + $0x24] sm:$0xf] }
 0x3a7   : > { %8279 = vst.msk [vmem:[#allocation3 + $0xc0] sm:$0xf] %vm307_vm0, %v16025_v10  ;;  %17372 = vmatpush3.bf16.msra.mxu1 %v22276_v18  ;;  %v8927_v59 = vsel %vm1607_vm3, %v8917_v53, %v22642_v21  ;;  %v8160_v30 = vmul.f32 %v22588_v45, %v7632_v13  ;;  %v8328_v48 = vadd.f32 %v8304_v22, %v7632_v13  ;;  %v8929_v47 = vshrl.u32 %v15422_v56, 16  ;;  %v22676_v53 = vld [vmem:[#allocation3 + $0xa8] sm:$0xf]  ;;  %v22682_v10 = vld [vmem:[%s25266_s6 + $0x40] sm:$0xff]  }
 0x3a8   : > { %17316 = vmatmul.mubr.msk.bf16.gmra.mxu1 %vm895_vm4, %v8918_v46  ;;  %17373 = vmatprep.subr.bf16.mxu1 %v22310_v58  ;;  %v16028_v40 = vpack.c.bf16 %v8162_v62, %v8162_v62  ;;  %8354 = vst.msk [vmem:[%s19007_s16 + $0x178] sm:$0xff] %vm895_vm4, %v8330_v24  ;;  %v8932_v18 = vshll.u32 %v15422_v56, 16  ;;  %v8938_v34 = vshrl.u32 %v15423_v42, 16  ;;  %v8941_v41 = vshll.u32 %v15423_v42, 16  ;;  %v22693_v46 = vld [vmem:[#allocation3 + $0xb0] sm:$0xf] }
 0x3a9   : > { %17319 = vmatprep.mubr.msk.bf16.mxu1 %vm895_vm4, %v8927_v59  ;;  %17402 = vmatpush3.bf16.msra.mxu0 %v22609_v63  ;;  %v16026_v25 = vpack.c.bf16 %v8160_v30, %v8160_v30  ;;  %8352 = vst.msk [vmem:[%s19007_s16 + $0x168] sm:$0xff] %vm895_vm4, %v8328_v48  ;;  %v8931_v45 = vrot.slane %v8929_v47, 3  ;;  %v15453_v61 = vcombine.low %v18415_v7, %v18414_v5  ;;  %v22686_v6 = vld [vmem:[#allocation3 + $0xb4] sm:$0xf]  ;;  %v22698_v42 = vld [vmem:[#allocation3 + $0xbc] sm:$0xf] }
 0x3aa   : > { %v15424_v9 = vcombine.low %v22656_v32, %v22658_v44  ;;  %17403 = vmatprep.subr.bf16.mxu0 %v22635_v31  ;;  %8282 = vst.msk [vmem:[#allocation3 + $0xcc] sm:$0xf] %vm307_vm0, %v16028_v40  ;;  %v8934_v51 = vrot.slane %v8932_v18, 4  ;;  %v8940_v22 = vrot.slane %v8938_v34, 3  ;;  %v8943_v15 = vrot.slane %v8941_v41, 4  ;;  %v22705_v47 = vld [vmem:[%s25266_s6 + $0x78] sm:$0xff]  }
 0x3ab   : > { %17348 = vmatmul.mubr.msk.bf16.gmra.mxu0 %vm895_vm4, %v15452_v57  ;;  %17374 = vmatpush3.bf16.msra.mxu1 %v22310_v58  ;;  %8280 = vst.msk [vmem:[#allocation3 + $0xc4] sm:$0xf] %vm307_vm0, %v16026_v25  ;;  %v15425_v56 = vcombine.low %v22676_v53, %v22665_v54  ;;  %v15426_v24 = vcombine.low %v22693_v46, %v22686_v6  ;;  %v22710_v18 = vld [vmem:[#allocation3 + $0xb8] sm:$0xf] }
 0x3ac   : > { %17351 = vmatprep.mubr.msk.bf16.mxu0 %vm895_vm4, %v15453_v61  ;;  %v8947_v26 = vshrl.u32 %v15424_v9, 16  ;;  %v8950_v13 = vshll.u32 %v15424_v9, 16  ;;  %17431 = vmatprep.subr.bf16.mxu1 %v22331_v17  ;;  %v8935_v57 = vor.u32 %v8934_v51, %v8931_v45  ;;  %v8944_v62 = vor.u32 %v8943_v15, %v8940_v22  ;;  %v18416_v45 = vld [vmem:[#allocation3 + $0x2c] sm:$0xf] }
 0x3ad   : > { %17404 = vmatpush3.bf16.msra.mxu0 %v22635_v31  ;;  %v8956_v30 = vshrl.u32 %v15425_v56, 16  ;;  %v8959_v48 = vshll.u32 %v15425_v56, 16  ;;  %v15427_v25 = vcombine.low %v22710_v18, %v22698_v42  ;;  %v15454_v5 = vcombine.low %v18416_v45, %v22339_v37 }
 0x3ae   : > { %v8949_v58 = vrot.slane %v8947_v26, 3  ;;  %v8952_v59 = vrot.slane %v8950_v13, 4  ;;  %17405 = vmatprep.subr.bf16.mxu0 %v22682_v10  ;;  %v8936_v17 = vsel %vm1607_vm3, %v22642_v21, %v8935_v57  ;;  %v8945_v40 = vsel %vm1607_vm3, %v8935_v57, %v8944_v62  ;;  %v22723_v26 = vld [vmem:[#allocation3 + $0xc0] sm:$0xf] }
 0x3af   : > { %v8958_v34 = vrot.slane %v8956_v30, 3  ;;  %v8961_v41 = vrot.slane %v8959_v48, 4  ;;  %v8965_v61 = vshrl.u32 %v15426_v24, 16  ;;  %v8968_v9 = vshll.u32 %v15426_v24, 16  ;;  %v18190_v30 = vld [vmem:[#allocation3 + $0x4] sm:$0xff]  }
 0x3b0   : > { %17320 = vmatmul.mubr.msk.bf16.gmra.mxu1 %vm895_vm4, %v8936_v17  ;;  %v8953_v7 = vor.u32 %v8952_v59, %v8949_v58  ;;  %v15455_v21 = vcombine.low %v22317_v39, %v22378_v36  ;;  %v8974_v22 = vshrl.u32 %v15427_v25, 16  ;;  %v8977_v15 = vshll.u32 %v15427_v25, 16  ;;  %v18191_v25 = vld [vmem:[#allocation3 + $0xc] sm:$0xff]  }
 0x3b1   : > { %17323 = vmatprep.mubr.msk.bf16.mxu1 %vm895_vm4, %v8945_v40  ;;  %17406 = vmatpush3.bf16.msra.mxu0 %v22682_v10  ;;  %v8962_v51 = vor.u32 %v8961_v41, %v8958_v34  ;;  %v8967_v13 = vrot.slane %v8965_v61, 3  ;;  %v8970_v56 = vrot.slane %v8968_v9, 4  ;;  %v15428_v39 = vcombine.low %v22723_v26, %v22723_v26 }
 0x3b2   : > { %17463 = vmatprep.subr.bf16.mxu0 %v22705_v47  ;;  %v8954_v37 = vsel %vm1607_vm3, %v8944_v62, %v8953_v7  ;;  %v8976_v36 = vrot.slane %v8974_v22, 3  ;;  %v8979_v24 = vrot.slane %v8977_v15, 4  ;;  %v15456_v58 = vcombine.low %v22365_v23, %v22410_v1 }
 0x3b3   : > { %17352 = vmatmul.mubr.msk.bf16.gmra.mxu0 %vm895_vm4, %v15454_v5  ;;  %v8963_v57 = vsel %vm1607_vm3, %v8953_v7, %v8962_v51  ;;  %v8971_v59 = vor.u32 %v8970_v56, %v8967_v13  ;;  %v15457_v62 = vcombine.low %v22398_v49, %v22418_v19  ;;  %v8983_v48 = vshrl.u32 %v15428_v39, 16 }
 0x3b4   : > { %17355 = vmatprep.mubr.msk.bf16.mxu0 %vm895_vm4, %v15455_v21  ;;  %v8986_v17 = vshll.u32 %v15428_v39, 16  ;;  %v8980_v40 = vor.u32 %v8979_v24, %v8976_v36  ;;  %v9715_v45 = vshll.u32 %v18190_v30, 16  ;;  %v15458_v49 = vcombine.low %v22407_v16, %v22442_v12  ;;  %v18193_v21 = vld [vmem:[#allocation3 + $0x14] sm:$0xff]   ;;  %v18194_v16 = vld [vmem:[#allocation3 + $0x1c] sm:$0xff]  }
 0x3b5   : > { %v8972_v34 = vsel %vm1607_vm3, %v8962_v51, %v8971_v59  ;;  %v8985_v5 = vrot.slane %v8983_v48, 3  ;;  %v15459_v1 = vcombine.low %v22437_v55, %v22464_v3  ;;  %v9713_v7 = vshrl.u32 %v18190_v30, 16  ;;  %v18198_v48 = vld [vmem:[#allocation3 + $0x34] sm:$0xff]  }
 0x3b6   : > { %v8981_v41 = vsel %vm1607_vm3, %v8971_v59, %v8980_v40  ;;  %v8988_v23 = vrot.slane %v8986_v17, 4  ;;  %v9717_v61 = vrot.slane %v9715_v45, 1  ;;  %v9720_v9 = vshll.u32 %v18191_v25, 16  ;;  %v18200_v45 = vld [vmem:[#allocation3 + $0x3c] sm:$0xff]  }
 0x3b7   : > { %v15477_v22 = vcombine.low %v22499_v28, %v22505_v14  ;;  %v15460_v55 = vcombine.low %v22454_v27, %v22473_v2  ;;  %v9728_v12 = vshll.u32 %v18193_v21, 16  ;;  %v9736_v13 = vshll.u32 %v18194_v16, 16  ;;  %v18195_v28 = vld [vmem:[#allocation3 + $0x24] sm:$0xff]   ;;  %v18196_v27 = vld [vmem:[#allocation3 + $0x2c] sm:$0xff]  }
 0x3b8   : > { %17324 = vmatmul.mubr.msk.bf16.gmra.mxu1 %vm895_vm4, %v8954_v37  ;;  %v8989_v19 = vor.u32 %v8988_v23, %v8985_v5  ;;  %v9718_v15 = vor.u32 %v9717_v61, %v9713_v7  ;;  %v9722_v37 = vrot.slane %v9720_v9, 1  ;;  %v15478_v14 = vcombine.low %v22492_v8, %v22507_v50  ;;  %v22769_v8 = vld [vmem:[%s25266_s6 + $0x70] sm:$0xff]   ;;  %v22796_v23 = vld [vmem:[%s25266_s6 + $0x60] sm:$0xff]  }
 0x3b9   : > { %17327 = vmatprep.mubr.msk.bf16.mxu1 %vm895_vm4, %v8963_v57  ;;  %v9730_v56 = vrot.slane %v9728_v12, 1  ;;  %v9724_v57 = vshrl.u32 %v18191_v25, 16  ;;  %v15479_v39 = vcombine.low %v22494_v20, %v22539_v38  ;;  %v9732_v36 = vshrl.u32 %v18193_v21, 16 }
 0x3ba   : > { %v8990_v51 = vsel %vm1607_vm3, %v8980_v40, %v8989_v19  ;;  %v9723_v3 = vsel %vm2862_vm5, %v9718_v15, %v9722_v37  ;;  %v9738_v24 = vrot.slane %v9736_v13, 1  ;;  %v9752_v38 = vshll.u32 %v18196_v27, 16  ;;  %v22810_v19 = vld [vmem:[%s25266_s6 + $0x98] sm:$0xff]  }
 0x3bb   : > { %17356 = vmatmul.mubr.msk.bf16.gmra.mxu0 %vm895_vm4, %v15456_v58  ;;  %v9726_v2 = vor.u32 %v9724_v57, %v9722_v37  ;;  %v18417_v58 = vld [vmem:[%s25266_s6 + $0x58] sm:$0xff]   ;;  %v9734_v59 = vor.u32 %v9732_v36, %v9730_v56  ;;  %v15480_v17 = vcombine.low %v22533_v35, %v22560_v33  ;;  %v9740_v40 = vshrl.u32 %v18194_v16, 16  ;;  %v18210_v57 = vld [vmem:[#allocation3 + $0x64] sm:$0xff]  }
 0x3bc   : > { %17359 = vmatprep.mubr.msk.bf16.mxu0 %vm895_vm4, %v15457_v62  ;;  %v9744_v62 = vshll.u32 %v18195_v28, 16  ;;  %v9748_v25 = vshrl.u32 %v18195_v28, 16  ;;  %v9760_v33 = vshll.u32 %v18198_v48, 16  ;;  %v15482_v7 = vcombine.low %v22564_v52, %v22620_v4  ;;  %v18206_v16 = vld [vmem:[#allocation3 + $0x54] sm:$0xff]   ;;  %v22829_v28 = vld [vmem:[#allocation3 + $0x5c] sm:$0xff]  }
 0x3bd   : > { %v9731_v20 = vsel %vm2862_vm5, %v9726_v2, %v9730_v56  ;;  %v9739_v50 = vsel %vm2862_vm5, %v9734_v59, %v9738_v24  ;;  %v9742_v5 = vor.u32 %v9740_v40, %v9738_v24  ;;  %v9756_v61 = vshrl.u32 %v18196_v27, 16  ;;  %v22836_v27 = vld [vmem:[#allocation3 + $0x10] sm:$0xf] }
 0x3be   : > { %v9746_v30 = vrot.slane %v9744_v62, 1  ;;  %v15483_v9 = vcombine.low %v22622_v0, %v22627_v29  ;;  %v9764_v21 = vshrl.u32 %v18198_v48, 16  ;;  %v9772_v12 = vshrl.u32 %v18200_v45, 16  ;;  %v18211_v59 = vld [vmem:[#allocation3 + $0x6c] sm:$0xff]  }
 0x3bf   : > { %v9792_v24 = vshll.u32 %v18206_v16, 16  ;;  %v9800_v2 = vshll.u32 %v22829_v28, 16  ;;  %v10116_v62 = vshll.u32 %v18210_v57, 16  ;;  %v9796_v40 = vshrl.u32 %v18206_v16, 16 }
 0x3c0   : > { %17328 = vmatmul.mubr.msk.bf16.gmra.mxu1 %vm895_vm4, %v8972_v34  ;;  %v22785_v34 = vld [vmem:[%s25266_s6 + $0x68] sm:$0xff]   ;;  %v9750_v35 = vor.u32 %v9748_v25, %v9746_v30  ;;  %v22851_v25 = vld [vmem:[#allocation3 + $0x20] sm:$0xf] }
 0x3c1   : > { %17331 = vmatprep.mubr.msk.bf16.mxu1 %vm895_vm4, %v8981_v41  ;;  %v15481_v41 = vcombine.low %v22562_v11, %v22572_v60  ;;  %v9747_v11 = vsel %vm2862_vm5, %v9742_v5, %v9746_v30  ;;  %v15486_v30 = vcombine.low %v22665_v54, %v22693_v46 }
 0x3c3   : > { %17360 = vmatmul.mubr.msk.bf16.gmra.mxu0 %vm895_vm4, %v15458_v49  ;;  %v9768_v49 = vshll.u32 %v18200_v45, 16 }
 0x3c4   : > { %17363 = vmatprep.mubr.msk.bf16.mxu0 %vm895_vm4, %v15459_v1  ;;  %v18202_v1 = vld [vmem:[#allocation3 + $0x44] sm:$0xff]  }
 0x3c5   : > { %v9776_v37 = vshll.u32 %v18202_v1, 16  ;;  %v9780_v13 = vshrl.u32 %v18202_v1, 16  ;;  %v10114_v1 = vshrl.u32 %v18210_v57, 16 }
 0x3c7   : > { %v9778_v29 = vrot.slane %v9776_v37, 1 }
 0x3c8   : > { %17332 = vmatmul.mubr.msk.bf16.gmra.mxu1 %vm895_vm4, %v8990_v51  ;;  %v9770_v51 = vrot.slane %v9768_v49, 1  ;;  %v22857_v49 = vld [vmem:[#allocation3 + $0x1c] sm:$0xf] }
 0x3c9   : > { %17375 = vmatprep.mubr.msk.bf16.mxu1 %vm895_vm4, %v15477_v22  ;;  %v18204_v22 = vld [vmem:[#allocation3 + $0x4c] sm:$0xff]   ;;  %v9782_v36 = vor.u32 %v9780_v13, %v9778_v29 }
 0x3ca   : > { %v9784_v0 = vshll.u32 %v18204_v22, 16  ;;  %v9788_v48 = vshrl.u32 %v18204_v22, 16 }
 0x3cb   : > { %17364 = vmatmul.mubr.msk.bf16.gmra.mxu0 %vm895_vm4, %v15460_v55  ;;  %v15484_v55 = vcombine.low %v22629_v43, %v22656_v32  ;;  %v10411_v32 = vld [vmem:[#allocation3 + $0xc] sm:$0x8] }
 0x3cc   : > { %17407 = vmatprep.mubr.msk.bf16.mxu0 %vm895_vm4, %v9723_v3  ;;  %v15485_v3 = vcombine.low %v22658_v44, %v22676_v53  ;;  %v9786_v56 = vrot.slane %v9784_v0, 1  ;;  %v22838_v44 = vld [vmem:[#allocation3 + $0x18] sm:$0xf] }
 0x3ce   : > { %v9787_v53 = vsel %vm2862_vm5, %v9782_v36, %v9786_v56  ;;  %v9790_v5 = vor.u32 %v9788_v48, %v9786_v56  ;;  %v22874_v36 = vld [vmem:[#allocation3 + $0x30] sm:$0xf] }
 0x3d0   : > { %17376 = vmatmul.mubr.msk.bf16.vlgmr.msra.gmra.mxu1 %vm895_vm4, %v15478_v14  ;;  %v9774_v14 = vor.u32 %v9772_v12, %v9770_v51  ;;  %v10125_v12 = vshrl.u32 %v18211_v59, 16 }
 0x3d1   : > { %17432 = vmatpush3.bf16.msra.mxu1 %v18417_v58  ;;  %17379 = vmatprep.mubr.msk.bf16.mxu1 %vm895_vm4, %v15479_v39  ;;  %v22832_v39 = vld [vmem:[#allocation3 + $0x14] sm:$0xf] }
 0x3d2   : > { %17433 = vmatprep.subr.bf16.mxu1 %v22609_v63  ;;  %v9779_v43 = vsel %vm2862_vm5, %v9774_v14, %v9778_v29  ;;  %v15572_v58 = vcombine.low %v22832_v39, %v22838_v44 }
 0x3d3   : > { %17408 = vmatmul.mubr.msk.bf16.vlgmr.msra.gmra.mxu0 %vm895_vm4, %v9731_v20  ;;  %v9794_v20 = vrot.slane %v9792_v24, 1 }
 0x3d4   : > { %17411 = vmatprep.mubr.msk.bf16.mxu0 %vm895_vm4, %v9739_v50  ;;  %17464 = vmatpush3.bf16.msra.mxu0 %v22705_v47  ;;  %v18213_v50 = vld [vmem:[#allocation3 + $0x64] ss:$0 sps:$4 sm:$0x11]   ;;  %v10511_v45 = vshll.u32 %v15572_v58, 16 }
 0x3d5   : > { %17434 = vmatpush3.bf16.msra.mxu1 %v22609_v63  ;;  %17465 = vmatprep.subr.bf16.mxu0 %v22769_v8  ;;  %v9754_v63 = vrot.slane %v9752_v38, 1  ;;  %v15571_v38 = vcombine.low %v10411_v32, %v22836_v27  ;;  %v9798_v54 = vor.u32 %v9796_v40, %v9794_v20  ;;  %v9808_v46 = vshll.u32 %v18213_v50, 16  ;;  %v22879_v32 = vld [vmem:[#allocation3 + $0x34] sm:$0xf]  ;;  %v18222_v50 = vld [vmem:[#allocation3 + $0x84] sm:$0xff]  }
 0x3d6   : > { %17435 = vmatprep.subr.bf16.mxu1 %v22635_v31 }
 0x3d7   : > { %v9755_v60 = vsel %vm2862_vm5, %v9750_v35, %v9754_v63  ;;  %v10118_v35 = vrot.slane %v10116_v62, 1 }
 0x3d8   : > { %17380 = vmatmul.mubr.msk.bf16.gmra.mxu1 %vm895_vm4, %v15480_v17  ;;  %17466 = vmatpush3.bf16.msra.mxu0 %v22769_v8  ;;  %v15487_v17 = vcombine.low %v22686_v6, %v22710_v18  ;;  %v10500_v6 = vshrl.u32 %v15571_v38, 16  ;;  %v10503_v18 = vshll.u32 %v15571_v38, 16 }
 0x3d9   : > { %17383 = vmatprep.mubr.msk.bf16.mxu1 %vm895_vm4, %v15481_v41  ;;  %17436 = vmatpush3.bf16.msra.mxu1 %v22635_v31  ;;  %v9762_v31 = vrot.slane %v9760_v33, 1  ;;  %v9802_v41 = vrot.slane %v9800_v2, 1  ;;  %v10121_v33 = vshll.u32 %v18211_v59, 16 }
 0x3da   : > { %17437 = vmatprep.subr.bf16.mxu1 %v22682_v10  ;;  %17467 = vmatprep.subr.bf16.mxu0 %v22785_v34  ;;  %v10502_v29 = vrot.slane %v10500_v6, 3  ;;  %v10505_v16 = vrot.slane %v10503_v18, 4 }
 0x3db   : > { %17412 = vmatmul.mubr.msk.bf16.gmra.mxu0 %vm895_vm4, %v9747_v11  ;;  %v9766_v15 = vor.u32 %v9764_v21, %v9762_v31  ;;  %v22854_v11 = vld [vmem:[#allocation3 + $0x24] sm:$0xf]  ;;  %v10123_v37 = vrot.slane %v10121_v33, 1  ;;  %v10145_v33 = vshll.u32 %v18222_v50, 16 }
 0x3dc   : > { %17415 = vmatprep.mubr.msk.bf16.mxu0 %vm895_vm4, %v9755_v60  ;;  %17468 = vmatpush3.bf16.msra.mxu0 %v22785_v34  ;;  %v18215_v60 = vld [vmem:[#allocation3 + $0x74] sm:$0xff]   ;;  %v10506_v2 = vor.u32 %v10505_v16, %v10502_v29 }
 0x3dd   : > { %17438 = vmatpush3.bf16.msra.mxu1 %v22682_v10  ;;  %17469 = vmatprep.subr.bf16.mxu0 %v22796_v23  ;;  %v9758_v10 = vor.u32 %v9756_v61, %v9754_v63  ;;  %v9771_v4 = vsel %vm2862_vm5, %v9766_v15, %v9770_v51  ;;  %v10508_v63 = vshrl.u32 %v15572_v58, 16  ;;  %v22862_v61 = vld [vmem:[#allocation3 + $0x28] sm:$0xf]  ;;  %v10513_v51 = vrot.slane %v10511_v45, 4  ;;  %v22883_v58 = vld [vmem:[#allocation3 + $0x2c] sm:$0xf] }
 0x3de   : > { %17495 = vmatprep.subr.bf16.mxu1 %v22705_v47  ;;  %v15574_v22 = vcombine.low %v22854_v11, %v22862_v61  ;;  %v10119_v15 = vor.u32 %v10118_v35, %v10114_v1  ;;  %v10129_v0 = vshll.u32 %v18215_v60, 16  ;;  %v10133_v59 = vshrl.u32 %v18215_v60, 16  ;;  %v22894_v45 = vld [vmem:[#allocation3 + $0x8c] sm:$0xff]   ;;  %v22896_v60 = vld [vmem:[#allocation3 + $0x40] sm:$0xf] }
 0x3df   : > { %v9763_v52 = vsel %vm2862_vm5, %v9758_v10, %v9762_v31  ;;  %v9795_v31 = vsel %vm2862_vm5, %v9790_v5, %v9794_v20  ;;  %v10510_v21 = vrot.slane %v10508_v63, 3  ;;  %v9804_v10 = vshrl.u32 %v22829_v28, 16 }
 0x3e0   : > { %17384 = vmatmul.mubr.msk.bf16.gmra.mxu1 %vm895_vm4, %v15482_v7  ;;  %17470 = vmatpush3.bf16.msra.mxu0 %v22796_v23  ;;  %v15573_v7 = vcombine.low %v22857_v49, %v22851_v25  ;;  %v10526_v57 = vshrl.u32 %v15574_v22, 16  ;;  %v10529_v28 = vshll.u32 %v15574_v22, 16  ;;  %v10124_v24 = vsel %vm2862_vm5, %v10119_v15, %v10123_v37  ;;  %v22914_v15 = vld [vmem:[%s25266_s6 + $0x90] sm:$0xff]  }
 0x3e1   : > { %17387 = vmatprep.mubr.msk.bf16.mxu1 %vm895_vm4, %v15483_v9  ;;  %17527 = vmatprep.subr.bf16.mxu0 %v22810_v19  ;;  %v9803_v9 = vsel %vm2862_vm5, %v9798_v54, %v9802_v41  ;;  %v9806_v56 = vor.u32 %v9804_v10, %v9802_v41  ;;  %v10514_v14 = vor.u32 %v10513_v51, %v10510_v21  ;;  %v22902_v21 = vld [vmem:[#allocation3 + $0x3c] sm:$0xf]  ;;  %v22904_v51 = vld [vmem:[#allocation3 + $0x44] sm:$0xf] }
 0x3e2   : > { %v10520_v13 = vshll.u32 %v15573_v7, 16  ;;  %v15575_v38 = vcombine.low %v22883_v58, %v22874_v36  ;;  %v10531_v40 = vrot.slane %v10529_v28, 4  ;;  %v15577_v10 = vcombine.low %v22902_v21, %v22896_v60 }
 0x3e3   : > { %17416 = vmatmul.mubr.msk.bf16.gmra.mxu0 %vm895_vm4, %v9763_v52  ;;  %v22870_v52 = vld [vmem:[#allocation3 + $0x7c] sm:$0xff]   ;;  %v10515_v48 = vsel %vm1607_vm3, %v10506_v2, %v10514_v14  ;;  %v22939_v2 = vld [vmem:[%s25266_s6 + $0x88] sm:$0xff]  }
 0x3e4   : > { %17419 = vmatprep.mubr.msk.bf16.mxu0 %vm895_vm4, %v9771_v4  ;;  %v9810_v4 = vrot.slane %v9808_v46, 1  ;;  %v10522_v20 = vrot.slane %v10520_v13, 4  ;;  %v10535_v54 = vshrl.u32 %v15575_v38, 16  ;;  %v10538_v46 = vshll.u32 %v15575_v38, 16 }
 0x3e5   : > { %v10141_v22 = vshrl.u32 %v22870_v52, 16  ;;  %v10149_v13 = vshrl.u32 %v18222_v50, 16  ;;  %v10553_v28 = vshrl.u32 %v15577_v10, 16  ;;  %v22942_v50 = vld [vmem:[#allocation3 + $0x54] sm:$0xf] }
 0x3e6   : > { %v10540_v29 = vrot.slane %v10538_v46, 4 }
 0x3e8   : > { %17388 = vmatmul.mubr.msk.bf16.gmra.mxu1 %vm895_vm4, %v15484_v55  ;;  %v15488_v55 = vcombine.low %v22698_v42, %v22723_v26  ;;  %v9811_v42 = vsel %vm2862_vm5, %v9806_v56, %v9810_v4  ;;  %v10131_v26 = vrot.slane %v10129_v0, 1  ;;  %v10147_v4 = vrot.slane %v10145_v33, 1  ;;  %v22961_v33 = vld [vmem:[%s25266_s6 + $0x80] sm:$0xff]  }
 0x3e9   : > { %17391 = vmatprep.mubr.msk.bf16.mxu1 %vm895_vm4, %v15485_v3  ;;  %v10517_v3 = vshrl.u32 %v15573_v7, 16  ;;  %v10537_v0 = vrot.slane %v10535_v54, 3 }
 0x3ea   : > { %v10135_v5 = vor.u32 %v10133_v59, %v10131_v26 }
 0x3eb   : > { %17420 = vmatmul.mubr.msk.bf16.gmra.mxu0 %vm895_vm4, %v9779_v43  ;;  %v10137_v43 = vshll.u32 %v22870_v52, 16  ;;  %v10519_v62 = vrot.slane %v10517_v3, 3  ;;  %v22920_v52 = vld [vmem:[#allocation3 + $0x48] sm:$0xf] }
 0x3ec   : > { %17423 = vmatprep.mubr.msk.bf16.mxu0 %vm895_vm4, %v9787_v53  ;;  %v10127_v53 = vor.u32 %v10125_v12, %v10123_v37  ;;  %v15578_v3 = vcombine.low %v22904_v51, %v22920_v52 }
 0x3ed   : > { %v10139_v63 = vrot.slane %v10137_v43, 1  ;;  %v10523_v35 = vor.u32 %v10522_v20, %v10519_v62  ;;  %v10151_v43 = vor.u32 %v10149_v13, %v10147_v4  ;;  %v22984_v13 = vld [vmem:[#allocation3 + $0x60] sm:$0xf] }
 0x3ee   : > { %v10132_v6 = vsel %vm2862_vm5, %v10127_v53, %v10131_v26  ;;  %v10541_v53 = vor.u32 %v10540_v29, %v10537_v0  ;;  %v22934_v26 = vld [vmem:[#allocation3 + $0x50] sm:$0xf]  ;;  %v10562_v62 = vshrl.u32 %v15578_v3, 16  ;;  %v10565_v20 = vshll.u32 %v15578_v3, 16 }
 0x3ef   : > { %v10140_v7 = vsel %vm2862_vm5, %v10135_v5, %v10139_v63  ;;  %v10524_v37 = vsel %vm1607_vm3, %v10514_v14, %v10523_v35  ;;  %v22927_v14 = vld [vmem:[#allocation3 + $0x9c] sm:$0xff]  }
 0x3f0   : > { %17392 = vmatmul.mubr.msk.bf16.gmra.mxu1 %vm895_vm4, %v15486_v30  ;;  %v22887_v30 = vld [vmem:[#allocation3 + $0x38] sm:$0xf] }
 0x3f1   : > { %17395 = vmatprep.mubr.msk.bf16.mxu1 %vm895_vm4, %v15487_v17  ;;  %v10528_v17 = vrot.slane %v10526_v57, 3  ;;  %v15576_v41 = vcombine.low %v22879_v32, %v22887_v30  ;;  %v10143_v57 = vor.u32 %v10141_v22, %v10139_v63  ;;  %v22951_v63 = vld [vmem:[#allocation3 + $0xa4] sm:$0xff]   ;;  %v18232_v22 = vld [vmem:[#allocation3 + $0xac] sm:$0xff]  }
 0x3f3   : > { %17424 = vmatmul.mubr.msk.bf16.gmra.mxu0 %vm895_vm4, %v9795_v31  ;;  %v10532_v18 = vor.u32 %v10531_v40, %v10528_v17  ;;  %v10544_v31 = vshrl.u32 %v15576_v41, 16  ;;  %v10547_v1 = vshll.u32 %v15576_v41, 16  ;;  %v10148_v59 = vsel %vm2862_vm5, %v10143_v57, %v10147_v4  ;;  %v22947_v17 = vld [vmem:[#allocation3 + $0x4c] sm:$0xf]  ;;  %v22988_v57 = vld [vmem:[#allocation3 + $0x64] sm:$0xf] }
 0x3f4   : > { %17427 = vmatprep.mubr.msk.bf16.mxu0 %vm895_vm4, %v9803_v9  ;;  %v10153_v9 = vshll.u32 %v22894_v45, 16  ;;  %v10555_v40 = vrot.slane %v10553_v28, 3  ;;  %v15579_v5 = vcombine.low %v22947_v17, %v22934_v26  ;;  %v10177_v4 = vshll.u32 %v22951_v63, 16 }
 0x3f5   : > { %v10533_v16 = vsel %vm1607_vm3, %v10523_v35, %v10532_v18  ;;  %v10549_v12 = vrot.slane %v10547_v1, 4  ;;  %v22956_v35 = vld [vmem:[#allocation3 + $0x58] sm:$0xf]  ;;  %v10542_v54 = vsel %vm1607_vm3, %v10532_v18, %v10541_v53  ;;  %v10564_v1 = vrot.slane %v10562_v62, 3 }
 0x3f6   : > { %v10155_v56 = vrot.slane %v10153_v9, 1  ;;  %v10571_v0 = vshrl.u32 %v15579_v5, 16  ;;  %v10173_v28 = vshrl.u32 %v22927_v14, 16 }
 0x3f8   : > { %17396 = vmatmul.mubr.msk.bf16.gmra.mxu1 %vm895_vm4, %v15488_v55  ;;  %v10546_v55 = vrot.slane %v10544_v31, 3  ;;  %v10156_v38 = vsel %vm2862_vm5, %v10151_v43, %v10155_v56  ;;  %v10179_v43 = vrot.slane %v10177_v4, 1  ;;  %v23010_v4 = vld [vmem:[#allocation3 + $0x70] sm:$0xf] }
 0x3f9   : > { %17439 = vmatprep.mubr.msk.bf16.mxu1 %vm895_vm4, %v10124_v24  ;;  %v10556_v24 = vshll.u32 %v15577_v10, 16 }
 0x3fb   : > { %17428 = vmatmul.mubr.msk.bf16.gmra.mxu0 %vm895_vm4, %v9811_v42  ;;  %v10558_v41 = vrot.slane %v10556_v24, 4 }
 0x3fc   : > { %17471 = vmatprep.mubr.msk.bf16.mxu0 %vm895_vm4, %v10515_v48  ;;  %v10169_v48 = vshll.u32 %v22927_v14, 16 }
 0x3fe   : > { %v10171_v9 = vrot.slane %v10169_v48, 1 }
 0x400   : > { %17440 = vmatmul.mubr.msk.bf16.vlgmr.msra.gmra.mxu1 %vm895_vm4, %v10132_v6  ;;  %v15580_v6 = vcombine.low %v22942_v50, %v22956_v35  ;;  %v10175_v14 = vor.u32 %v10173_v28, %v10171_v9 }
 0x401   : > { %17496 = vmatpush3.bf16.msra.mxu1 %v22705_v47  ;;  %17443 = vmatprep.mubr.msk.bf16.mxu1 %vm895_vm4, %v10140_v7  ;;  %v22918_v47 = vld [vmem:[#allocation3 + $0x94] sm:$0xff]   ;;  %v10567_v7 = vrot.slane %v10565_v20, 4 }
 0x402   : > { %17497 = vmatprep.subr.bf16.mxu1 %v22769_v8  ;;  %v10161_v42 = vshll.u32 %v22918_v47, 16  ;;  %v10165_v18 = vshrl.u32 %v22918_v47, 16  ;;  %v10574_v47 = vshll.u32 %v15579_v5, 16 }
 0x403   : > { %17472 = vmatmul.mubr.msk.bf16.vlgmr.msra.gmra.mxu0 %vm895_vm4, %v10524_v37  ;;  %v10559_v37 = vor.u32 %v10558_v41, %v10555_v40  ;;  %v10568_v3 = vor.u32 %v10567_v7, %v10564_v1  ;;  %v22999_v40 = vld [vmem:[#allocation3 + $0x68] sm:$0xf]  ;;  %v10181_v41 = vshrl.u32 %v22951_v63, 16  ;;  %v10828_v7 = vld [vmem:[#allocation3 + $0x6c] sm:$0x8] }
 0x404   : > { %17475 = vmatprep.mubr.msk.bf16.mxu0 %vm895_vm4, %v10533_v16  ;;  %17528 = vmatpush3.bf16.msra.mxu0 %v22810_v19  ;;  %v10163_v46 = vrot.slane %v10161_v42, 1  ;;  %v10580_v16 = vshrl.u32 %v15580_v6, 16  ;;  %v18234_v42 = vld [vmem:[#allocation3 + $0xb4] sm:$0xff]   ;;  %v10576_v62 = vrot.slane %v10574_v47, 4  ;;  %v15582_v5 = vcombine.low %v22988_v57, %v22999_v40 }
 0x405   : > { %17498 = vmatpush3.bf16.msra.mxu1 %v22769_v8  ;;  %17529 = vmatprep.subr.bf16.mxu0 %v22914_v15  ;;  %v10550_v8 = vor.u32 %v10549_v12, %v10546_v55  ;;  %v10583_v55 = vshll.u32 %v15580_v6, 16  ;;  %v23007_v6 = vld [vmem:[#allocation3 + $0x74] sm:$0xf]  ;;  %v10193_v1 = vshll.u32 %v18234_v42, 16  ;;  %v23012_v63 = vld [vmem:[#allocation3 + $0x78] sm:$0xf]  ;;  %v15600_v28 = vcombine.low %v10828_v7, %v23010_v4 }
 0x406   : > { %17499 = vmatprep.subr.bf16.mxu1 %v22785_v34  ;;  %v10167_v29 = vor.u32 %v10165_v18, %v10163_v46  ;;  %v10582_v20 = vrot.slane %v10580_v16, 3  ;;  %v10601_v47 = vshll.u32 %v15582_v5, 16  ;;  %v15601_v16 = vcombine.low %v23007_v6, %v23012_v63  ;;  %v23031_v7 = vld [vmem:[#allocation3 + $0x84] sm:$0xf] }
 0x407   : > { %v10551_v31 = vsel %vm1607_vm3, %v10541_v53, %v10550_v8  ;;  %v10560_v24 = vsel %vm1607_vm3, %v10550_v8, %v10559_v37  ;;  %v10573_v53 = vrot.slane %v10571_v0, 3  ;;  %v10569_v8 = vsel %vm1607_vm3, %v10559_v37, %v10568_v3 }
 0x408   : > { %17444 = vmatmul.mubr.msk.bf16.gmra.mxu1 %vm895_vm4, %v10148_v59  ;;  %17530 = vmatpush3.bf16.msra.mxu0 %v22914_v15  ;;  %v22994_v59 = vld [vmem:[#allocation3 + $0x5c] sm:$0xf]  ;;  %v10189_v0 = vshrl.u32 %v18232_v22, 16 }
 0x409   : > { %17447 = vmatprep.mubr.msk.bf16.mxu1 %vm895_vm4, %v10156_v38  ;;  %17500 = vmatpush3.bf16.msra.mxu1 %v22785_v34  ;;  %v10157_v34 = vshrl.u32 %v22894_v45, 16  ;;  %v22980_v45 = vld [vmem:[%s25266_s6 + $0xb8] sm:$0xff]   ;;  %v10585_v38 = vrot.slane %v10583_v55, 4  ;;  %v15581_v48 = vcombine.low %v22994_v59, %v22984_v13  ;;  %v10577_v18 = vor.u32 %v10576_v62, %v10573_v53 }
 0x40a   : > { %17501 = vmatprep.subr.bf16.mxu1 %v22796_v23  ;;  %17531 = vmatprep.subr.bf16.mxu0 %v22939_v2 }
 0x40b   : > { %17476 = vmatmul.mubr.msk.bf16.gmra.mxu0 %vm895_vm4, %v10542_v54  ;;  %v10159_v10 = vor.u32 %v10157_v34, %v10155_v56  ;;  %v10185_v56 = vshll.u32 %v18232_v22, 16  ;;  %v10180_v34 = vsel %vm2862_vm5, %v10175_v14, %v10179_v43  ;;  %v10592_v37 = vshll.u32 %v15581_v48, 16 }
 0x40c   : > { %17479 = vmatprep.mubr.msk.bf16.mxu0 %vm895_vm4, %v10551_v31  ;;  %17532 = vmatpush3.bf16.msra.mxu0 %v22939_v2  ;;  %v10183_v31 = vor.u32 %v10181_v41, %v10179_v43  ;;  %v10578_v22 = vsel %vm1607_vm3, %v10568_v3, %v10577_v18  ;;  %v10925_v14 = vshrl.u32 %v15601_v16, 16  ;;  %v10197_v41 = vshrl.u32 %v18234_v42, 16 }
 0x40d   : > { %17502 = vmatpush3.bf16.msra.mxu1 %v22796_v23  ;;  %17533 = vmatprep.subr.bf16.mxu0 %v22961_v33  ;;  %v10164_v12 = vsel %vm2862_vm5, %v10159_v10, %v10163_v46  ;;  %v10172_v23 = vsel %vm2862_vm5, %v10167_v29, %v10171_v9  ;;  %v10187_v54 = vrot.slane %v10185_v56, 1  ;;  %v18236_v46 = vld [vmem:[#allocation3 + $0xbc] sm:$0xff]   ;;  %v10586_v9 = vor.u32 %v10585_v38, %v10582_v20  ;;  %v18239_v20 = vld [vmem:[#allocation3 + $0xc4] ss:$0 sps:$4 sm:$0x11]  }
 0x40e   : > { %17559 = vmatprep.subr.bf16.mxu1 %v22810_v19  ;;  %v10589_v10 = vshrl.u32 %v15581_v48, 16  ;;  %v10598_v29 = vshrl.u32 %v15582_v5, 16  ;;  %v10195_v56 = vrot.slane %v10193_v1, 1  ;;  %v10594_v62 = vrot.slane %v10592_v37, 4 }
 0x40f   : > { %v10188_v55 = vsel %vm2862_vm5, %v10183_v31, %v10187_v54  ;;  %v10587_v43 = vsel %vm1607_vm3, %v10577_v18, %v10586_v9  ;;  %v10603_v48 = vrot.slane %v10601_v47, 4  ;;  %v10917_v31 = vshrl.u32 %v15600_v28, 16 }
 0x410   : > { %17448 = vmatmul.mubr.msk.bf16.gmra.mxu1 %vm895_vm4, %v10164_v12  ;;  %17534 = vmatpush3.bf16.msra.mxu0 %v22961_v33  ;;  %v10201_v12 = vshll.u32 %v18236_v46, 16  ;;  %v10591_v53 = vrot.slane %v10589_v10, 3  ;;  %v10600_v38 = vrot.slane %v10598_v29, 3  ;;  %v10920_v1 = vshll.u32 %v15600_v28, 16  ;;  %v23033_v29 = vld [vmem:[#allocation3 + $0x7c] sm:$0xf] }
 0x411   : > { %17451 = vmatprep.mubr.msk.bf16.mxu1 %vm895_vm4, %v10172_v23  ;;  %17591 = vmatprep.subr.bf16.mxu0 %v22980_v45  ;;  %v10191_v23 = vor.u32 %v10189_v0, %v10187_v54  ;;  %v23026_v54 = vld [vmem:[#allocation3 + $0x80] sm:$0xf]  ;;  %v10199_v18 = vor.u32 %v10197_v41, %v10195_v56  ;;  %v10205_v10 = vshrl.u32 %v18236_v46, 16  ;;  %v10209_v0 = vshll.u32 %v18239_v20, 16 }
 0x412   : > { %v10203_v5 = vrot.slane %v10201_v12, 1  ;;  %v10595_v37 = vor.u32 %v10594_v62, %v10591_v53  ;;  %v10604_v47 = vor.u32 %v10603_v48, %v10600_v38  ;;  %v15602_v42 = vcombine.low %v23033_v29, %v23026_v54  ;;  %v23037_v12 = vld [vmem:[#allocation3 + $0x88] sm:$0xf] }
 0x413   : > { %17480 = vmatmul.mubr.msk.bf16.gmra.mxu0 %vm895_vm4, %v10560_v24  ;;  %v23020_v24 = vld [vmem:[#allocation3 + $0x6c] sm:$0xf]  ;;  %v15603_v46 = vcombine.low %v23031_v7, %v23037_v12  ;;  %v10211_v20 = vrot.slane %v10209_v0, 1 }
 0x414   : > { %17483 = vmatprep.mubr.msk.bf16.mxu0 %vm895_vm4, %v10569_v8  ;;  %v10928_v8 = vshll.u32 %v15601_v16, 16  ;;  %v15583_v3 = vcombine.low %v23020_v24, %v23020_v24  ;;  %v10927_v16 = vrot.slane %v10925_v14, 3  ;;  %v10207_v53 = vor.u32 %v10205_v10, %v10203_v5 }
 0x415   : > { %v10596_v62 = vsel %vm1607_vm3, %v10586_v9, %v10595_v37  ;;  %v10605_v38 = vsel %vm1607_vm3, %v10595_v37, %v10604_v47  ;;  %v10934_v14 = vshrl.u32 %v15602_v42, 16 }
 0x416   : > { %v10607_v28 = vshrl.u32 %v15583_v3, 16  ;;  %v10212_v9 = vsel %vm2862_vm5, %v10207_v53, %v10211_v20 }
 0x417   : > { %v10936_v37 = vrot.slane %v10934_v14, 3 }
 0x418   : > { %17452 = vmatmul.mubr.msk.bf16.gmra.mxu1 %vm895_vm4, %v10180_v34  ;;  %v10196_v34 = vsel %vm2862_vm5, %v10191_v23, %v10195_v56  ;;  %v10204_v23 = vsel %vm2862_vm5, %v10199_v18, %v10203_v5  ;;  %v10919_v56 = vrot.slane %v10917_v31, 3  ;;  %v10609_v41 = vrot.slane %v10607_v28, 3  ;;  %v23050_v5 = vld [vmem:[#allocation3 + $0x94] sm:$0xf] }
 0x419   : > { %17455 = vmatprep.mubr.msk.bf16.mxu1 %vm895_vm4, %v10188_v55  ;;  %v10930_v55 = vrot.slane %v10928_v8, 4  ;;  %v10937_v8 = vshll.u32 %v15602_v42, 16  ;;  %v10946_v18 = vshll.u32 %v15603_v46, 16 }
 0x41b   : > { %17484 = vmatmul.mubr.msk.bf16.gmra.mxu0 %vm895_vm4, %v10578_v22  ;;  %v10610_v22 = vshll.u32 %v15583_v3, 16  ;;  %v10931_v48 = vor.u32 %v10930_v55, %v10927_v16  ;;  %v10939_v0 = vrot.slane %v10937_v8, 4  ;;  %v23058_v16 = vld [vmem:[#allocation3 + $0x98] sm:$0xf] }
 0x41c   : > { %17487 = vmatprep.mubr.msk.bf16.mxu0 %vm895_vm4, %v10587_v43  ;;  %v10922_v43 = vrot.slane %v10920_v1, 4  ;;  %v23053_v1 = vld [vmem:[#allocation3 + $0x8c] sm:$0xf] }
 0x41d   : > { %v10612_v3 = vrot.slane %v10610_v22, 4  ;;  %v10948_v22 = vrot.slane %v10946_v18, 4  ;;  %v10940_v53 = vor.u32 %v10939_v0, %v10936_v37  ;;  %v23077_v18 = vld [vmem:[#allocation3 + $0x9c] sm:$0xf] }
 0x41e   : > { %v10923_v31 = vor.u32 %v10922_v43, %v10919_v56  ;;  %v15633_v43 = vcombine.low %v22836_v27, %v22832_v39 }
 0x41f   : > { %v10613_v55 = vor.u32 %v10612_v3, %v10609_v41  ;;  %v23071_v3 = vld [vmem:[#allocation3 + $0xa0] sm:$0xf]  ;;  %v10941_v39 = vsel %vm1607_vm3, %v10931_v48, %v10940_v53 }
 0x420   : > { %17456 = vmatmul.mubr.msk.bf16.gmra.mxu1 %vm895_vm4, %v10196_v34  ;;  %v10943_v34 = vshrl.u32 %v15603_v46, 16  ;;  %v10932_v10 = vsel %vm1607_vm3, %v10923_v31, %v10931_v48  ;;  %v15605_v46 = vcombine.low %v23050_v5, %v23058_v16  ;;  %v15634_v48 = vcombine.low %v22838_v44, %v22857_v49 }
 0x421   : > { %17459 = vmatprep.mubr.msk.bf16.mxu1 %vm895_vm4, %v10204_v23  ;;  %v23048_v23 = vld [vmem:[#allocation3 + $0x90] sm:$0xf]  ;;  %v10614_v56 = vsel %vm1607_vm3, %v10604_v47, %v10613_v55 }
 0x422   : > { %v15604_v42 = vcombine.low %v23053_v1, %v23048_v23  ;;  %v10945_v28 = vrot.slane %v10943_v34, 3  ;;  %v10961_v8 = vshrl.u32 %v15605_v46, 16  ;;  %v10964_v41 = vshll.u32 %v15605_v46, 16  ;;  %v23073_v34 = vld [vmem:[#allocation3 + $0xa4] sm:$0xf] }
 0x423   : > { %17488 = vmatmul.mubr.msk.bf16.gmra.mxu0 %vm895_vm4, %v10596_v62  ;;  %v15635_v46 = vcombine.low %v22851_v25, %v22854_v11  ;;  %v23112_v25 = vld [vmem:[#allocation3 + $0xb4] sm:$0xf] }
 0x424   : > { %17491 = vmatprep.mubr.msk.bf16.mxu0 %vm895_vm4, %v10605_v38  ;;  %v10952_v62 = vshrl.u32 %v15604_v42, 16  ;;  %v10955_v20 = vshll.u32 %v15604_v42, 16  ;;  %v10949_v38 = vor.u32 %v10948_v22, %v10945_v28  ;;  %v10963_v0 = vrot.slane %v10961_v8, 3  ;;  %v23097_v22 = vld [vmem:[%s25266_s6 + $0xb0] sm:$0xff]  }
 0x425   : > { %v10966_v42 = vrot.slane %v10964_v41, 4  ;;  %v23108_v8 = vld [vmem:[#allocation3 + $0xb0] sm:$0xf]  ;;  %v23118_v41 = vld [vmem:[#allocation3 + $0xac] sm:$0xf] }
 0x426   : > { %v10954_v27 = vrot.slane %v10952_v62, 3  ;;  %v10957_v31 = vrot.slane %v10955_v20, 4  ;;  %v10950_v37 = vsel %vm1607_vm3, %v10940_v53, %v10949_v38 }
 0x427   : > { %v23069_v14 = vpop.f32.mrf.mxu0 }
 0x428   : > { %17460 = vmatmul.mubr.msk.bf16.gmra.mxu1 %vm895_vm4, %v10212_v9  ;;  %v15606_v9 = vcombine.low %v23077_v18, %v23071_v3 }
 0x429   : > { %17503 = vmatprep.mubr.msk.bf16.mxu1 %vm895_vm4, %v10932_v10  ;;  %v23075_v47 = vpop.f32.mrf.mxu0  ;;  %v23082_v10 = vld [vmem:[#allocation3 + $0xa8] sm:$0xf] }
 0x42a   : > { %v15607_v28 = vcombine.low %v23073_v34, %v23082_v10  ;;  %v10970_v44 = vshrl.u32 %v15606_v9, 16  ;;  %v10973_v49 = vshll.u32 %v15606_v9, 16 }
 0x42b   : > { %17492 = vmatmul.mubr.msk.bf16.gmra.mxu0 %vm895_vm4, %v10614_v56  ;;  %v23086_v55 = vpop.f32.mrf.mxu0 }
 0x42c   : > { %17535 = vmatprep.mubr.msk.bf16.mxu0 %vm895_vm4, %v15633_v43  ;;  %v10958_v43 = vor.u32 %v10957_v31, %v10954_v27  ;;  %v10979_v62 = vshrl.u32 %v15607_v28, 16  ;;  %v10982_v20 = vshll.u32 %v15607_v28, 16  ;;  %v10972_v31 = vrot.slane %v10970_v44, 3 }
 0x42d   : > { %v23102_v56 = vpop.f32.mrf.mxu0  ;;  %v10975_v9 = vrot.slane %v10973_v49, 4  ;;  %v15637_v44 = vcombine.low %v22874_v36, %v22879_v32  ;;  %v23157_v36 = vld [vmem:[#allocation3 + $0xc4] sm:$0xf]  ;;  %v23164_v32 = vld [vmem:[%s25266_s6 + $0xd8] sm:$0xff]  }
 0x42e   : > { %v10959_v27 = vsel %vm1607_vm3, %v10949_v38, %v10958_v43  ;;  %v10984_v28 = vrot.slane %v10982_v20, 4  ;;  %v15636_v38 = vcombine.low %v22862_v61, %v22883_v58 }
 0x42f   : > { %v10976_v49 = vor.u32 %v10975_v9, %v10972_v31  ;;  %v23166_v31 = vld [vmem:[#allocation3 + $0xbc] sm:$0xf] }
 0x430   : > { %17504 = vmatmul.mubr.msk.bf16.vlgmr.msra.gmra.mxu1 %vm895_vm4, %v10941_v39  ;;  %v23106_v53 = vpop.f32.mrf.mxu0  ;;  %v23123_v39 = vld [vmem:[%s25266_s6 + $0xa8] sm:$0xff]  }
 0x431   : > { %17560 = vmatpush3.bf16.msra.mxu1 %v22810_v19  ;;  %17507 = vmatprep.mubr.msk.bf16.mxu1 %vm895_vm4, %v10950_v37  ;;  %v10967_v19 = vor.u32 %v10966_v42, %v10963_v0  ;;  %v23128_v37 = vld [vmem:[#allocation3 + $0xb8] sm:$0xf]  ;;  %v10981_v42 = vrot.slane %v10979_v62, 3 }
 0x432   : > { %17561 = vmatprep.subr.bf16.mxu1 %v22914_v15  ;;  %v23115_v11 = vpop.f32.mrf.mxu0  ;;  %25799 = vst [vmem:[#allocation39_spill] sm:$0xff] %v23128_v37 }
 0x433   : > { %17536 = vmatmul.mubr.msk.bf16.vlgmr.msra.gmra.mxu0 %vm895_vm4, %v15634_v48  ;;  %v10968_v0 = vsel %vm1607_vm3, %v10958_v43, %v10967_v19  ;;  %v23144_v43 = vld [vmem:[%s25266_s6 + $0xa0] sm:$0xff]   ;;  %v10985_v61 = vor.u32 %v10984_v28, %v10981_v42  ;;  %v10977_v9 = vsel %vm1607_vm3, %v10967_v19, %v10976_v49  ;;  %v15638_v19 = vcombine.low %v22887_v30, %v22902_v21  ;;  %v23193_v30 = vld [vmem:[#allocation3 + $0xcc] sm:$0xf] }
 0x434   : > { %17539 = vmatprep.mubr.msk.bf16.mxu0 %vm895_vm4, %v15635_v46  ;;  %17592 = vmatpush3.bf16.msra.mxu0 %v22980_v45  ;;  %v23132_v48 = vpop.f32.mrf.mxu0  ;;  %v15609_v46 = vcombine.low %v23112_v25, %v23128_v37 }
 0x435   : > { %17562 = vmatpush3.bf16.msra.mxu1 %v22914_v15  ;;  %17593 = vmatprep.subr.bf16.mxu0 %v23097_v22  ;;  %v15608_v15 = vcombine.low %v23118_v41, %v23108_v8 }
 0x436   : > { %17563 = vmatprep.subr.bf16.mxu1 %v22939_v2  ;;  %v23152_v58 = vpop.f32.mrf.mxu0 }
 0x437   : > { %v10988_v62 = vshrl.u32 %v15608_v15, 16  ;;  %v10991_v20 = vshll.u32 %v15608_v15, 16  ;;  %25800 = vst [vmem:[#allocation14_spill] sm:$0xff] %v23152_v58 }
 0x438   : > { %17508 = vmatmul.mubr.msk.bf16.gmra.mxu1 %vm895_vm4, %v10959_v27  ;;  %17594 = vmatpush3.bf16.msra.mxu0 %v23097_v22  ;;  %v11000_v27 = vshll.u32 %v15609_v46, 16 }
 0x439   : > { %17511 = vmatprep.mubr.msk.bf16.mxu1 %vm895_vm4, %v10968_v0  ;;  %17564 = vmatpush3.bf16.msra.mxu1 %v22939_v2  ;;  %v10997_v2 = vshrl.u32 %v15609_v46, 16  ;;  %v23154_v0 = vld [vmem:[#allocation3 + $0xc0] sm:$0xf]  ;;  %v10990_v15 = vrot.slane %v10988_v62, 3  ;;  %v10993_v42 = vrot.slane %v10991_v20, 4  ;;  %v15639_v62 = vcombine.low %v22896_v60, %v22904_v51 }
 0x43a   : > { %17565 = vmatprep.subr.bf16.mxu1 %v22961_v33  ;;  %17595 = vmatprep.subr.bf16.mxu0 %v23123_v39  ;;  %25801 = vst [vmem:[#allocation25_spill] sm:$0xff] %v23154_v0  ;;  %v15610_v28 = vcombine.low %v23166_v31, %v23154_v0  ;;  %v23172_v46 = vld [vmem:[#allocation3 + $0xc8] sm:$0xf]  ;;  %v11002_v58 = vrot.slane %v11000_v27, 4 }
 0x43b   : > { %17540 = vmatmul.mubr.msk.bf16.gmra.mxu0 %vm895_vm4, %v15636_v38  ;;  %25802 = vst [vmem:[#allocation36_spill] sm:$0xff] %v23172_v46  ;;  %v15611_v37 = vcombine.low %v23157_v36, %v23172_v46  ;;  %v10994_v20 = vor.u32 %v10993_v42, %v10990_v15 }
 0x43c   : > { %17543 = vmatprep.mubr.msk.bf16.mxu0 %vm895_vm4, %v15637_v44  ;;  %17596 = vmatpush3.bf16.msra.mxu0 %v23123_v39  ;;  %v10999_v44 = vrot.slane %v10997_v2, 3  ;;  %v11006_v2 = vshrl.u32 %v15610_v28, 16  ;;  %v11009_v27 = vshll.u32 %v15610_v28, 16 }
 0x43d   : > { %17566 = vmatpush3.bf16.msra.mxu1 %v22961_v33  ;;  %17597 = vmatprep.subr.bf16.mxu0 %v23144_v43  ;;  %v10986_v33 = vsel %vm1607_vm3, %v10976_v49, %v10985_v61  ;;  %v23176_v38 = vpop.f32.mrf.mxu0  ;;  %v10995_v21 = vsel %vm1607_vm3, %v10985_v61, %v10994_v20  ;;  %v15641_v61 = vcombine.low %v22934_v26, %v22942_v50 }
 0x43e   : > { %17623 = vmatprep.subr.bf16.mxu1 %v22980_v45  ;;  %25803 = vst [vmem:[#allocation11_spill] sm:$0xff] %v23176_v38  ;;  %v11018_v38 = vshll.u32 %v15611_v37, 16  ;;  %v11008_v60 = vrot.slane %v11006_v2, 3  ;;  %v11011_v51 = vrot.slane %v11009_v27, 4 }
 0x43f   : > { %v23187_v49 = vpop.f32.mrf.mxu0 }
 0x440   : > { %17512 = vmatmul.mubr.msk.bf16.gmra.mxu1 %vm895_vm4, %v10977_v9  ;;  %17598 = vmatpush3.bf16.msra.mxu0 %v23144_v43  ;;  %v11003_v9 = vor.u32 %v11002_v58, %v10999_v44  ;;  %v11020_v28 = vrot.slane %v11018_v38, 4  ;;  %v15640_v58 = vcombine.low %v22920_v52, %v22947_v17 }
 0x441   : > { %17515 = vmatprep.mubr.msk.bf16.mxu1 %vm895_vm4, %v10986_v33  ;;  %17655 = vmatprep.subr.bf16.mxu0 %v23164_v32  ;;  %v23191_v46 = vpop.f32.mrf.mxu0  ;;  %v11015_v33 = vshrl.u32 %v15611_v37, 16  ;;  %v15612_v37 = vcombine.low %v23193_v30, %v23193_v30 }
 0x442   : > { %v11004_v15 = vsel %vm1607_vm3, %v10994_v20, %v11003_v9 }
 0x443   : > { %17544 = vmatmul.mubr.msk.bf16.gmra.mxu0 %vm895_vm4, %v15638_v19  ;;  %v23196_v0 = vpop.f32.mrf.mxu0  ;;  %v11017_v42 = vrot.slane %v11015_v33, 3  ;;  %v11012_v19 = vor.u32 %v11011_v51, %v11008_v60  ;;  %v11024_v2 = vshrl.u32 %v15612_v37, 16  ;;  %v11027_v27 = vshll.u32 %v15612_v37, 16 }
 0x444   : > { %17547 = vmatprep.mubr.msk.bf16.mxu0 %vm895_vm4, %v15639_v62  ;;  %v18274_v62 = vld [vmem:[#allocation3 + $0x10] sm:$0xff]  }
 0x445   : > { %v11021_v38 = vor.u32 %v11020_v28, %v11017_v42  ;;  %v11013_v52 = vsel %vm1607_vm3, %v11003_v9, %v11012_v19  ;;  %v11756_v33 = vshll.u32 %v18274_v62, 16  ;;  %v11026_v60 = vrot.slane %v11024_v2, 3 }
 0x446   : > { %v11029_v51 = vrot.slane %v11027_v27, 4  ;;  %v15643_v9 = vcombine.low %v22984_v13, %v22988_v57 }
 0x447   : > { %v11022_v26 = vsel %vm1607_vm3, %v11012_v19, %v11021_v38  ;;  %v11758_v28 = vrot.slane %v11756_v33, 1  ;;  %v11754_v19 = vshrl.u32 %v18274_v62, 16  ;;  %v15644_v33 = vcombine.low %v22999_v40, %v23020_v24 }
 0x448   : > { %17516 = vmatmul.mubr.msk.bf16.gmra.mxu1 %vm895_vm4, %v10995_v21  ;;  %v23207_v44 = vpop.f32.mrf.mxu0  ;;  %v15642_v21 = vcombine.low %v22956_v35, %v22994_v59  ;;  %v11030_v37 = vor.u32 %v11029_v51, %v11026_v60  ;;  %v15661_v59 = vcombine.low %v23010_v4, %v23007_v6  ;;  %v15662_v40 = vcombine.low %v23012_v63, %v23033_v29  ;;  %v23268_v63 = vld [vmem:[#allocation3 + $0x40] sm:$0xff]  }
 0x449   : > { %17519 = vmatprep.mubr.msk.bf16.mxu1 %vm895_vm4, %v11004_v15  ;;  %v18275_v15 = vld [vmem:[#allocation3 + $0x18] sm:$0xff]   ;;  %v11759_v13 = vor.u32 %v11758_v28, %v11754_v19  ;;  %v15663_v19 = vcombine.low %v23026_v54, %v23031_v7  ;;  %v23279_v54 = vld [vmem:[%s25266_s6 + $0xd0] sm:$0xff]  }
 0x44a   : > { %v23211_v20 = vpop.f32.mrf.mxu0  ;;  %v11031_v35 = vsel %vm1607_vm3, %v11021_v38, %v11030_v37  ;;  %v11765_v28 = vshrl.u32 %v18275_v15, 16  ;;  %v23259_v37 = vld [vmem:[%s25267_s7] ss:$0 sm:$0xff] }
 0x44b   : > { %17548 = vmatmul.mubr.msk.bf16.gmra.mxu0 %vm895_vm4, %v15640_v58  ;;  %v18278_v58 = vld [vmem:[#allocation3 + $0x20] sm:$0xff]   ;;  %v8765_v7 = vadd.f32 %v23069_v14, %v23259_v37  ;;  %v11801_v14 = vshll.u32 %v23268_v63, 16 }
 0x44c   : > { %17551 = vmatprep.mubr.msk.bf16.mxu0 %vm895_vm4, %v15641_v61  ;;  %v23214_v17 = vpop.f32.mrf.mxu0  ;;  %v11769_v57 = vshll.u32 %v18278_v58, 16  ;;  %v11773_v51 = vshrl.u32 %v18278_v58, 16 }
 0x44e   : > { %v23219_v50 = vpop.f32.mrf.mxu0  ;;  %v11771_v4 = vrot.slane %v11769_v57, 1  ;;  %v23274_v57 = vld [vmem:[#allocation3 + $0x38] sm:$0xff]  }
 0x450   : > { %17520 = vmatmul.mubr.msk.bf16.gmra.mxu1 %vm895_vm4, %v11013_v52  ;;  %v23225_v42 = vpop.f32.mrf.mxu0  ;;  %v11761_v52 = vshll.u32 %v18275_v15, 16 }
 0x451   : > { %17523 = vmatprep.mubr.msk.bf16.mxu1 %vm895_vm4, %v11022_v26  ;;  %v23242_v26 = vld [vmem:[#allocation3 + $0x28] sm:$0xff]  }
 0x452   : > { %v23229_v61 = vpop.f32.mrf.mxu0  ;;  %v11763_v62 = vrot.slane %v11761_v52, 1 }
 0x453   : > { %17552 = vmatmul.mubr.msk.bf16.gmra.mxu0 %vm895_vm4, %v15642_v21  ;;  %v18282_v21 = vld [vmem:[#allocation3 + $0x30] sm:$0xff]  }
 0x454   : > { %17555 = vmatprep.mubr.msk.bf16.mxu0 %vm895_vm4, %v15643_v9  ;;  %v23234_v2 = vpop.f32.mrf.mxu0  ;;  %v11764_v6 = vsel %vm2862_vm5, %v11759_v13, %v11763_v62  ;;  %v11777_v9 = vshll.u32 %v23242_v26, 16  ;;  %v11785_v58 = vshll.u32 %v18282_v21, 16 }
 0x456   : > { %v23238_v27 = vpop.f32.mrf.mxu0  ;;  %v11779_v15 = vrot.slane %v11777_v9, 1  ;;  %v8763_v9 = vadd.f32 %v23259_v37, %v23075_v47  ;;  %v8766_v47 = vadd.f32 %v23086_v55, %v23259_v37 }
 0x458   : > { %17524 = vmatmul.mubr.msk.bf16.gmra.mxu1 %vm895_vm4, %v11031_v35  ;;  %v23244_v38 = vpop.f32.mrf.mxu0  ;;  %v11775_v35 = vor.u32 %v11773_v51, %v11771_v4  ;;  %v11787_v51 = vrot.slane %v11785_v58, 1  ;;  %v23300_v58 = vld [vmem:[#allocation3 + $0x48] sm:$0xff]  }
 0x459   : > { %17567 = vmatprep.mubr.msk.bf16.mxu1 %vm895_vm4, %v15661_v59  ;;  %v11767_v59 = vor.u32 %v11765_v28, %v11763_v62  ;;  %v11809_v55 = vshll.u32 %v23300_v58, 16 }
 0x45a   : > { %v23249_v60 = vpop.f32.mrf.mxu0 }
 0x45b   : > { %17556 = vmatmul.mubr.msk.bf16.gmra.mxu0 %vm895_vm4, %v15644_v33  ;;  %v23254_v24 = vpop.f32.mrf.mxu1  ;;  %v11772_v62 = vsel %vm2862_vm5, %v11767_v59, %v11771_v4  ;;  %v23302_v59 = vld [vmem:[#allocation3 + $0x50] sm:$0xff]  }
 0x45c   : > { %17599 = vmatprep.mubr.msk.bf16.mxu0 %vm895_vm4, %v11764_v6  ;;  %v23263_v52 = vpop.f32.mrf.mxu0  ;;  %v11780_v6 = vsel %vm2862_vm5, %v11775_v35, %v11779_v15  ;;  %v11793_v35 = vshll.u32 %v23274_v57, 16 }
 0x45d   : > { %v23266_v13 = vpop.f32.mrf.mxu1 }
 0x45e   : > { %v23272_v29 = vpop.f32.mrf.mxu0 }
 0x45f   : > { %v23283_v33 = vpop.f32.mrf.mxu1 }
 0x460   : > { %17568 = vmatmul.mubr.msk.bf16.vlgmr.msra.gmra.mxu1 %vm895_vm4, %v15662_v40 }
 0x461   : > { %17624 = vmatpush3.bf16.msra.mxu1 %v22980_v45  ;;  %17571 = vmatprep.mubr.msk.bf16.mxu1 %vm895_vm4, %v15663_v19  ;;  %v23291_v40 = vpop.f32.mrf.mxu1  ;;  %v11789_v19 = vshrl.u32 %v18282_v21, 16  ;;  %v15665_v21 = vcombine.low %v23048_v23, %v23050_v5  ;;  %v11795_v5 = vrot.slane %v11793_v35, 1  ;;  %v11805_v35 = vshrl.u32 %v23268_v63, 16 }
 0x462   : > { %17625 = vmatprep.subr.bf16.mxu1 %v23097_v22  ;;  %25804 = vst [vmem:[#allocation37_spill] sm:$0xff] %v23291_v40  ;;  %v8767_v63 = vadd.f32 %v23259_v37, %v23115_v11  ;;  %v23373_v11 = vld [vmem:[#allocation3 + $0x68] sm:$0xff]  }
 0x463   : > { %v17345_v45 = vpop.f32.mrf.mxu0  ;;  %17600 = vmatmul.mubr.msk.bf16.vlgmr.msra.gmra.mxu0 %vm895_vm4, %v11772_v62  ;;  %v11781_v62 = vshrl.u32 %v23242_v26, 16  ;;  %v11791_v40 = vor.u32 %v11789_v19, %v11787_v51  ;;  %v11797_v19 = vshrl.u32 %v23274_v57, 16 }
 0x464   : > { %v23293_v28 = vadd.f32 %v17345_v45, %v8765_v7  ;;  %17603 = vmatprep.mubr.msk.bf16.mxu0 %vm895_vm4, %v11780_v6  ;;  %17656 = vmatpush3.bf16.msra.mxu0 %v23164_v32  ;;  %v15664_v7 = vcombine.low %v23037_v12, %v23053_v1  ;;  %v23322_v12 = vld [vmem:[#allocation3 + $0x58] sm:$0xff]   ;;  %v8764_v1 = vadd.f32 %v23259_v37, %v23102_v56  ;;  %v11817_v56 = vshll.u32 %v23302_v59, 16 }
 0x465   : > { %v9295_v4 = vpop.f32.mrf.mxu0  ;;  %17626 = vmatpush3.bf16.msra.mxu1 %v23097_v22  ;;  %17657 = vmatprep.subr.bf16.mxu0 %v23279_v54  ;;  %v23316_v22 = vld [vmem:[%s25266_s6 + $0xc8] sm:$0xff]  }
 0x466   : > { %v23310_v45 = vadd.f32 %v9295_v4, %v8763_v9  ;;  %17627 = vmatprep.subr.bf16.mxu1 %v23123_v39  ;;  %v11783_v9 = vor.u32 %v11781_v62, %v11779_v15  ;;  %v23340_v15 = vld [vmem:[%s25266_s6 + $0xc0] sm:$0xff]  }
 0x467   : > { %v17346_v6 = vpop.f32.mrf.mxu0  ;;  %25808 = vst [vmem:[#allocation52_spill] sm:$0xff] %v23340_v15 }
 0x468   : > { %25805 = vst [vmem:[#allocation5_spill] sm:$0xff] %v23310_v45  ;;  %v23326_v26 = vpop.f32.mrf.mxu1  ;;  %17572 = vmatmul.mubr.msk.bf16.gmra.mxu1 %vm895_vm4, %v15664_v7  ;;  %v23329_v4 = vadd.f32 %v17346_v6, %v8766_v47  ;;  %v11803_v45 = vrot.slane %v11801_v14, 1  ;;  %17658 = vmatpush3.bf16.msra.mxu0 %v23279_v54  ;;  %v8769_v14 = vadd.f32 %v23106_v53, %v23259_v37  ;;  %v11821_v6 = vshrl.u32 %v23302_v59, 16 }
 0x469   : > { %25806 = vst [vmem:[#allocation42_spill] sm:$0xff] %v23326_v26  ;;  %17575 = vmatprep.mubr.msk.bf16.mxu1 %vm895_vm4, %v15665_v21  ;;  %v9298_v23 = vpop.f32.mrf.mxu0  ;;  %17628 = vmatpush3.bf16.msra.mxu1 %v23123_v39  ;;  %v11788_v57 = vsel %vm2862_vm5, %v11783_v9, %v11787_v51  ;;  %v23351_v39 = vld [vmem:[#allocation3 + $0x60] sm:$0xff]   ;;  %v11796_v21 = vsel %vm2862_vm5, %v11791_v40, %v11795_v5  ;;  %v11825_v51 = vshll.u32 %v23322_v12, 16  ;;  %v11813_v40 = vshrl.u32 %v23300_v58, 16  ;;  %v23381_v58 = vld [vmem:[%s25266_s6 + $0xf8] sm:$0xff]  }
 0x46a   : > { %25807 = vst [vmem:[#allocation40_spill] sm:$0xff] %v23329_v4  ;;  %v23344_v47 = vpop.f32.mrf.mxu1  ;;  %v23346_v7 = vadd.f32 %v9298_v23, %v8764_v1  ;;  %17629 = vmatprep.subr.bf16.mxu1 %v23144_v43  ;;  %17659 = vmatprep.subr.bf16.mxu0 %v23316_v22  ;;  %v15667_v53 = vcombine.low %v23071_v3, %v23073_v34  ;;  %v11837_v4 = vshrl.u32 %v23351_v39, 16 }
 0x46b   : > { %25809 = vst [vmem:[#allocation18_spill] sm:$0xff] %v23344_v47  ;;  %v17349_v62 = vpop.f32.mrf.mxu0  ;;  %17604 = vmatmul.mubr.msk.bf16.gmra.mxu0 %vm895_vm4, %v11788_v57  ;;  %v11807_v23 = vor.u32 %v11805_v35, %v11803_v45  ;;  %v11799_v3 = vor.u32 %v11797_v19, %v11795_v5  ;;  %v11811_v57 = vrot.slane %v11809_v55, 1  ;;  %v8770_v55 = vadd.f32 %v23132_v48, %v23259_v37  ;;  %v23397_v47 = vld [vmem:[#allocation3 + $0x78] sm:$0xff]  }
 0x46c   : > { %25810 = vst [vmem:[#allocation47_spill] sm:$0xff] %v23346_v7  ;;  %v23363_v1 = vpop.f32.mrf.mxu1  ;;  %v23365_v9 = vadd.f32 %v17349_v62, %v8769_v14  ;;  %17607 = vmatprep.mubr.msk.bf16.mxu0 %vm895_vm4, %v11796_v21  ;;  %17660 = vmatpush3.bf16.msra.mxu0 %v23316_v22  ;;  %v11819_v7 = vrot.slane %v11817_v56, 1  ;;  %v23375_v14 = vld [vmem:[#allocation3 + $0x70] sm:$0xff]   ;;  %v11833_v35 = vshll.u32 %v23351_v39, 16  ;;  %v25819_v56 = vcombine.low %v23058_v16, %v23077_v18  ;;  %v23415_v16 = vld [vmem:[#allocation3 + $0x1c] sm:$0xf] }
 0x46d   : > { %25811 = vst [vmem:[#allocation48_spill] sm:$0xff] %v23363_v1  ;;  %v9311_v34 = vpop.f32.mrf.mxu0  ;;  %17630 = vmatpush3.bf16.msra.mxu1 %v23144_v43  ;;  %17661 = vmatprep.subr.bf16.mxu0 %v23340_v15  ;;  %v25815_v43 = vld [vmem:[#allocation39_spill] sm:$0xff]  ;;  %v11804_v21 = vsel %vm2862_vm5, %v11799_v3, %v11803_v45  ;;  %v25816_v1 = vld [vmem:[#allocation25_spill] sm:$0xff]  ;;  %v11812_v59 = vsel %vm2862_vm5, %v11807_v23, %v11811_v57  ;;  %v11829_v45 = vshrl.u32 %v23322_v12, 16  ;;  %v11841_v48 = vshll.u32 %v23373_v11, 16 }
 0x46e   : > { %25812 = vst [vmem:[#allocation19_spill] sm:$0xff] %v23365_v9  ;;  %v23385_v5 = vpop.f32.mrf.mxu1  ;;  %v23387_v19 = vadd.f32 %v9311_v34, %v8767_v63  ;;  %17687 = vmatprep.subr.bf16.mxu1 %v23164_v32  ;;  %v11827_v9 = vrot.slane %v11825_v51, 1  ;;  %v25817_v63 = vld [vmem:[#allocation14_spill] sm:$0xff]  ;;  %v11815_v3 = vor.u32 %v11813_v40, %v11811_v57  ;;  %25821 = vst [vmem:[#allocation10_spill] sm:$0xff] %v23415_v16  ;;  %v25822_v18 = vld [vmem:[#allocation11_spill] sm:$0xff] }
 0x46f   : > { %25813 = vst [vmem:[#allocation22_spill] sm:$0xff] %v23385_v5  ;;  %v17350_v62 = vpop.f32.mrf.mxu0  ;;  %v8768_v34 = vadd.f32 %v23259_v37, %v25817_v63  ;;  %v11823_v63 = vor.u32 %v11821_v6, %v11819_v7  ;;  %v8773_v23 = vadd.f32 %v25822_v18, %v23259_v37  ;;  %v12452_v6 = vld [vmem:[#allocation3 + $0x18] sm:$0x8]  ;;  %v23426_v57 = vld [vmem:[#allocation3 + $0x24] sm:$0xf]  ;;  %v12162_v18 = vshll.u32 %v23397_v47, 16 }
 0x470   : > { %25814 = vst [vmem:[#allocation77_spill] sm:$0xff] %v23387_v19  ;;  %v23401_v19 = vpop.f32.mrf.mxu1  ;;  %17576 = vmatmul.mubr.msk.bf16.gmra.mxu1 %vm895_vm4, %v25819_v56  ;;  %v23407_v5 = vadd.f32 %v17350_v62, %v8770_v55  ;;  %17662 = vmatpush3.bf16.msra.mxu0 %v23340_v15  ;;  %v11835_v56 = vrot.slane %v11833_v35, 1  ;;  %25826 = vst [vmem:[#allocation85_spill] sm:$0xff] %v23426_v57  ;;  %v11831_v15 = vor.u32 %v11829_v45, %v11827_v9 }
 0x471   : > { %25818 = vst [vmem:[#allocation79_spill] sm:$0xff] %v23401_v19  ;;  %17579 = vmatprep.mubr.msk.bf16.mxu1 %vm895_vm4, %v15667_v53  ;;  %v9314_v51 = vpop.f32.mrf.mxu0  ;;  %v12157_v19 = vshll.u32 %v23375_v14, 16  ;;  %17719 = vmatprep.subr.bf16.mxu0 %v23381_v58  ;;  %v25825_v53 = vld [vmem:[#allocation36_spill] sm:$0xff]  ;;  %v8771_v35 = vadd.f32 %v23259_v37, %v23187_v49  ;;  %v15755_v39 = vcombine.low %v12452_v6, %v23415_v16  ;;  %v12155_v6 = vshrl.u32 %v23375_v14, 16 }
 0x472   : > { %25820 = vst [vmem:[#allocation12_spill] sm:$0xff] %v23407_v5  ;;  %v23420_v55 = vpop.f32.mrf.mxu1  ;;  %v23422_v12 = vadd.f32 %v9314_v51, %v8768_v34  ;;  %v11820_v5 = vsel %vm2862_vm5, %v11815_v3, %v11819_v7  ;;  %v23432_v34 = vld [vmem:[#allocation3 + $0x80] sm:$0xff]   ;;  %v11828_v3 = vsel %vm2862_vm5, %v11823_v63, %v11827_v9  ;;  %v12164_v9 = vrot.slane %v12162_v18, 1  ;;  %v23459_v63 = vld [vmem:[#allocation3 + $0x2c] sm:$0xf] }
 0x473   : > { %25823 = vst [vmem:[#allocation82_spill] sm:$0xff] %v23420_v55  ;;  %v17353_v62 = vpop.f32.mrf.mxu0  ;;  %17608 = vmatmul.mubr.msk.bf16.gmra.mxu0 %vm895_vm4, %v11804_v21  ;;  %v18301_v55 = vld [vmem:[#allocation3 + $0x70] ss:$0 sps:$4 sm:$0x11]   ;;  %v11845_v21 = vshrl.u32 %v23373_v11, 16  ;;  %v12159_v26 = vrot.slane %v12157_v19, 1  ;;  %v23455_v11 = vsel %vm2862_vm5, %v11831_v15, %v11835_v56 }
 0x474   : > { %25824 = vst [vmem:[#allocation21_spill] sm:$0xff] %v23422_v12  ;;  %v23436_v51 = vpop.f32.mrf.mxu1  ;;  %v23438_v40 = vadd.f32 %v17353_v62, %v8773_v23  ;;  %17611 = vmatprep.mubr.msk.bf16.mxu0 %vm895_vm4, %v11812_v59  ;;  %v23442_v7 = vld [vmem:[#allocation3 + $0x20] sm:$0xf]  ;;  %v11843_v12 = vrot.slane %v11841_v48, 1  ;;  %v8774_v23 = vadd.f32 %v23191_v46, %v23259_v37  ;;  %v11849_v48 = vshll.u32 %v18301_v55, 16  ;;  %25829 = vst [vmem:[#allocation83_spill] sm:$0xff] %v23459_v63 }
 0x475   : > { %25828 = vst [vmem:[#allocation4_spill] sm:$0xff] %v23442_v7  ;;  %v9327_v45 = vpop.f32.mrf.mxu0  ;;  %v15756_v49 = vcombine.low %v23442_v7, %v23426_v57  ;;  %v12170_v19 = vshll.u32 %v23432_v34, 16  ;;  %v8772_v46 = vadd.f32 %v23259_v37, %v23196_v0  ;;  %v12541_v14 = vshrl.u32 %v15755_v39, 16 }
 0x476   : > { %25827 = vst [vmem:[#allocation80_spill] sm:$0xff] %v23438_v40  ;;  %v23450_v62 = vpop.f32.mrf.mxu1  ;;  %v23452_v59 = vadd.f32 %v9327_v45, %v8771_v35  ;;  %v11839_v40 = vor.u32 %v11837_v4, %v11835_v56  ;;  %v25831_v35 = vcombine.low %v23082_v10, %v23118_v41  ;;  %v12544_v4 = vshll.u32 %v15755_v39, 16  ;;  %v23476_v45 = vld [vmem:[#allocation3 + $0x28] sm:$0xf] }
 0x477   : > { %v17354_v16 = vpop.f32.mrf.mxu0  ;;  %v25832_v55 = vcombine.low %v23108_v8, %v23112_v25  ;;  %v12160_v18 = vor.u32 %v12159_v26, %v12155_v6  ;;  %v12166_v0 = vshrl.u32 %v23397_v47, 16  ;;  %25833 = vst [vmem:[#allocation54_spill] sm:$0xff] %v23476_v45  ;;  %v12549_v7 = vshrl.u32 %v15756_v49, 16  ;;  %v23486_v25 = vld [vmem:[#allocation3 + $0x34] sm:$0xf] }
 0x478   : > { %v23463_v57 = vpop.f32.mrf.mxu1  ;;  %17580 = vmatmul.mubr.msk.bf16.gmra.mxu1 %vm895_vm4, %v25831_v35  ;;  %v23469_v15 = vadd.f32 %v17354_v16, %v8774_v23  ;;  %v8777_v10 = vadd.f32 %v23207_v44, %v23259_v37  ;;  %v11847_v39 = vor.u32 %v11845_v21, %v11843_v12  ;;  %v15757_v8 = vcombine.low %v23476_v45, %v23459_v63  ;;  %v23490_v35 = vld [vmem:[#allocation3 + $0x88] sm:$0xff]   ;;  %v23492_v44 = vld [vmem:[#allocation3 + $0x90] sm:$0xff]  }
 0x479   : > { %25830 = vst [vmem:[#allocation15_spill] sm:$0xff] %v23463_v57  ;;  %17583 = vmatprep.mubr.msk.bf16.mxu1 %vm895_vm4, %v25832_v55  ;;  %v9330_v56 = vpop.f32.mrf.mxu0  ;;  %v12552_v57 = vshll.u32 %v15756_v49, 16  ;;  %25834 = vst [vmem:[#allocation87_spill] sm:$0xff] %v23486_v25  ;;  %v11844_v47 = vsel %vm2862_vm5, %v11839_v40, %v11843_v12  ;;  %v12168_v23 = vor.u32 %v12166_v0, %v12164_v9  ;;  %v11851_v49 = vrot.slane %v11849_v48, 1  ;;  %v23501_v63 = vld [vmem:[#allocation3 + $0x30] sm:$0xf] }
 0x47a   : > { %v23480_v41 = vpop.f32.mrf.mxu1  ;;  %v23482_v16 = vadd.f32 %v9330_v56, %v8772_v46  ;;  %v12172_v6 = vrot.slane %v12170_v19, 1  ;;  %v8775_v21 = vadd.f32 %v23259_v37, %v23211_v20  ;;  %v12543_v56 = vrot.slane %v12541_v14, 3  ;;  %25835 = vst [vmem:[#allocation90_spill] sm:$0xff] %v23501_v63 }
 0x47b   : > { %v17357_v26 = vpop.f32.mrf.mxu0  ;;  %17612 = vmatmul.mubr.msk.bf16.gmra.mxu0 %vm895_vm4, %v11820_v5  ;;  %v12546_v5 = vrot.slane %v12544_v4, 4  ;;  %v23504_v40 = vsel %vm2862_vm5, %v12160_v18, %v12164_v9  ;;  %v12551_v48 = vrot.slane %v12549_v7, 3  ;;  %v12554_v19 = vrot.slane %v12552_v57, 4 }
 0x47c   : > { %v23496_v46 = vpop.f32.mrf.mxu1  ;;  %v23498_v55 = vadd.f32 %v17357_v26, %v8777_v10  ;;  %17615 = vmatprep.mubr.msk.bf16.mxu0 %vm895_vm4, %v11828_v3  ;;  %v15758_v0 = vcombine.low %v23501_v63, %v23486_v25  ;;  %v8778_v20 = vadd.f32 %v23214_v17, %v23259_v37  ;;  %v12558_v3 = vshrl.u32 %v15757_v8, 16 }
 0x47d   : > { %v9343_v12 = vpop.f32.mrf.mxu0  ;;  %v12561_v14 = vshll.u32 %v15757_v8, 16  ;;  %v23515_v45 = vsel %vm2862_vm5, %v11847_v39, %v11851_v49  ;;  %v23518_v9 = vsel %vm2862_vm5, %v12168_v23, %v12172_v6  ;;  %v12178_v57 = vshll.u32 %v23490_v35, 16  ;;  %v23533_v49 = vld [vmem:[#allocation3 + $0x98] sm:$0xff]  }
 0x47e   : > { %v23510_v10 = vpop.f32.mrf.mxu1  ;;  %v23512_v26 = vadd.f32 %v9343_v12, %v8775_v21  ;;  %v12186_v7 = vshll.u32 %v23492_v44, 16  ;;  %v8776_v17 = vadd.f32 %v23259_v37, %v23219_v50  ;;  %v25836_v21 = vcombine.low %v25815_v43, %v23166_v31  ;;  %v23535_v12 = vld [vmem:[#allocation3 + $0x3c] sm:$0xf] }
 0x47f   : > { %v17358_v4 = vpop.f32.mrf.mxu0  ;;  %v12547_v39 = vor.u32 %v12546_v5, %v12543_v56  ;;  %v12174_v23 = vshrl.u32 %v23432_v34, 16  ;;  %25838 = vst [vmem:[#allocation86_spill] sm:$0xff] %v23535_v12  ;;  %v25839_v25 = vcombine.low %v25816_v1, %v23157_v36  ;;  %v12555_v63 = vor.u32 %v12554_v19, %v12551_v48  ;;  %v23550_v36 = vld [vmem:[#allocation3 + $0xa0] sm:$0xff]  }
 0x480   : > { %v23524_v18 = vpop.f32.mrf.mxu1  ;;  %17584 = vmatmul.mubr.msk.bf16.gmra.mxu1 %vm895_vm4, %v25836_v21  ;;  %v23530_v8 = vadd.f32 %v17358_v4, %v8778_v20  ;;  %v12182_v31 = vshrl.u32 %v23490_v35, 16  ;;  %v12567_v43 = vshrl.u32 %v15758_v0, 16  ;;  %v12570_v21 = vshll.u32 %v15758_v0, 16  ;;  %v23542_v20 = vld [vmem:[#allocation3 + $0x38] sm:$0xf] }
 0x481   : > { %17587 = vmatprep.mubr.msk.bf16.mxu1 %vm895_vm4, %v25839_v25  ;;  %v9346_v50 = vpop.f32.mrf.mxu0  ;;  %25840 = vst [vmem:[#allocation8_spill] sm:$0xff] %v23542_v20  ;;  %v8781_v34 = vadd.f32 %v23225_v42, %v23259_v37  ;;  %v12560_v4 = vrot.slane %v12558_v3, 3  ;;  %v23552_v1 = vld [vmem:[#allocation3 + $0x44] sm:$0xf]  ;;  %v12176_v35 = vor.u32 %v12174_v23, %v12172_v6  ;;  %v12180_v48 = vrot.slane %v12178_v57, 1 }
 0x482   : > { %25837 = vst [vmem:[#allocation20_spill] sm:$0xff] %v23530_v8  ;;  %v23546_v56 = vpop.f32.mrf.mxu1  ;;  %v23548_v5 = vadd.f32 %v9346_v50, %v8776_v17  ;;  %v12563_v8 = vrot.slane %v12561_v14, 4  ;;  %25841 = vst [vmem:[#allocation88_spill] sm:$0xff] %v23552_v1  ;;  %v12188_v19 = vrot.slane %v12186_v7, 1  ;;  %v15759_v42 = vcombine.low %v23542_v20, %v23535_v12 }
 0x483   : > { %v17361_v25 = vpop.f32.mrf.mxu0  ;;  %17616 = vmatmul.mubr.msk.bf16.gmra.mxu0 %vm895_vm4, %v23455_v11  ;;  %v8779_v0 = vadd.f32 %v23259_v37, %v23229_v61  ;;  %v12190_v14 = vshrl.u32 %v23492_v44, 16  ;;  %v12194_v50 = vshll.u32 %v23533_v49, 16  ;;  %v23567_v11 = vld [vmem:[#allocation3 + $0x40] sm:$0xf]  ;;  %v12556_v57 = vsel %vm1607_vm3, %v12547_v39, %v12555_v63 }
 0x484   : > { %v23560_v17 = vpop.f32.mrf.mxu1  ;;  %v23562_v3 = vadd.f32 %v17361_v25, %v8781_v34  ;;  %17619 = vmatprep.mubr.msk.bf16.mxu0 %vm895_vm4, %v11844_v47  ;;  %25844 = vst [vmem:[#allocation93_spill] sm:$0xff] %v23567_v11  ;;  %v12569_v7 = vrot.slane %v12567_v43, 3  ;;  %v12572_v23 = vrot.slane %v12570_v21, 4  ;;  %v15760_v61 = vcombine.low %v23567_v11, %v23552_v1 }
 0x485   : > { %25842 = vst [vmem:[#allocation62_spill] sm:$0xff] %v23560_v17  ;;  %v9359_v6 = vpop.f32.mrf.mxu0  ;;  %v8782_v34 = vadd.f32 %v23234_v2, %v23259_v37  ;;  %v12564_v44 = vor.u32 %v12563_v8, %v12560_v4  ;;  %v12202_v12 = vshll.u32 %v23550_v36, 16  ;;  %v12198_v17 = vshrl.u32 %v23533_v49, 16 }
 0x486   : > { %25843 = vst [vmem:[#allocation9_spill] sm:$0xff] %v23562_v3  ;;  %v23574_v25 = vpop.f32.mrf.mxu1  ;;  %v23576_v47 = vadd.f32 %v9359_v6, %v8779_v0  ;;  %v12192_v3 = vor.u32 %v12190_v14, %v12188_v19  ;;  %v12576_v39 = vshrl.u32 %v15759_v42, 16  ;;  %v12579_v43 = vshll.u32 %v15759_v42, 16  ;;  %v23591_v14 = vld [vmem:[#allocation3 + $0xa8] sm:$0xff]  }
 0x487   : > { %v17362_v20 = vpop.f32.mrf.mxu0  ;;  %v8780_v21 = vadd.f32 %v23259_v37, %v23238_v27  ;;  %v25845_v2 = vcombine.low %v25825_v53, %v23193_v30  ;;  %v12181_v8 = vsel %vm2862_vm5, %v12176_v35, %v12180_v48  ;;  %v12196_v4 = vrot.slane %v12194_v50, 1 }
 0x488   : > { %v23582_v1 = vpop.f32.mrf.mxu1  ;;  %v23588_v0 = vadd.f32 %v17362_v20, %v8782_v34  ;;  %v12184_v42 = vor.u32 %v12182_v31, %v12180_v48  ;;  %v12573_v27 = vor.u32 %v12572_v23, %v12569_v7  ;;  %v12585_v6 = vshrl.u32 %v15760_v61, 16 }
 0x489   : > { %17588 = vmatmul.mubr.msk.bf16.gmra.mxu1 %vm895_vm4, %v25845_v2  ;;  %v9362_v49 = vpop.f32.mrf.mxu0  ;;  %v12588_v11 = vshll.u32 %v15760_v61, 16  ;;  %v8785_v30 = vadd.f32 %v23244_v38, %v23259_v37  ;;  %v12565_v35 = vsel %vm1607_vm3, %v12555_v63, %v12564_v44  ;;  %v12204_v50 = vrot.slane %v12202_v12, 1  ;;  %v23610_v38 = vld [vmem:[#allocation3 + $0x54] sm:$0xf] }
 0x48a   : > { %17631 = vmatprep.mubr.msk.bf16.mxu1 %vm895_vm4, %v23504_v40  ;;  %v23597_v53 = vpop.f32.mrf.mxu1  ;;  %v23599_v20 = vadd.f32 %v9362_v49, %v8780_v21  ;;  %v23605_v40 = vsel %vm2862_vm5, %v12184_v42, %v12188_v19  ;;  %v23608_v31 = vsel %vm2862_vm5, %v12192_v3, %v12196_v4  ;;  %v12578_v48 = vrot.slane %v12576_v39, 3  ;;  %25846 = vst [vmem:[#allocation46_spill] sm:$0xff] %v23610_v38  ;;  %v23620_v19 = vld [vmem:[#allocation3 + $0x4c] sm:$0xf]  ;;  %v23622_v3 = vld [vmem:[#allocation3 + $0xb0] sm:$0xff]  }
 0x48b   : > { %v17365_v34 = vpop.f32.mrf.mxu0  ;;  %17620 = vmatmul.mubr.msk.bf16.gmra.mxu0 %vm895_vm4, %v23515_v45  ;;  %v12581_v7 = vrot.slane %v12579_v43, 4  ;;  %v8783_v23 = vadd.f32 %v23259_v37, %v23249_v60  ;;  %v12200_v45 = vor.u32 %v12198_v17, %v12196_v4  ;;  %v12210_v12 = vshll.u32 %v23591_v14, 16  ;;  %25847 = vst [vmem:[#allocation30_spill] sm:$0xff] %v23620_v19  ;;  %v23626_v49 = vld [vmem:[#allocation3 + $0x50] sm:$0xf] }
 0x48c   : > { %v23614_v61 = vpop.f32.mrf.mxu1  ;;  %v23616_v63 = vadd.f32 %v17365_v34, %v8785_v30  ;;  %17663 = vmatprep.mubr.msk.bf16.mxu0 %vm895_vm4, %v12556_v57  ;;  %v12574_v43 = vsel %vm1607_vm3, %v12564_v44, %v12573_v27  ;;  %v12587_v21 = vrot.slane %v12585_v6, 3  ;;  %v12590_v2 = vrot.slane %v12588_v11, 4  ;;  %25848 = vst [vmem:[#allocation91_spill] sm:$0xff] %v23626_v49  ;;  %v23637_v30 = vld [vmem:[#allocation3 + $0x48] sm:$0xf] }
 0x48d   : > { %v9375_v39 = vpop.f32.mrf.mxu0  ;;  %v12206_v60 = vshrl.u32 %v23550_v36, 16  ;;  %v8786_v42 = vadd.f32 %v23263_v52, %v23259_v37  ;;  %v23635_v4 = vsel %vm2862_vm5, %v12200_v45, %v12204_v50  ;;  %25850 = vst [vmem:[#allocation94_spill] sm:$0xff] %v23637_v30  ;;  %v15762_v44 = vcombine.low %v23626_v49, %v23610_v38 }
 0x48e   : > { %v23630_v57 = vpop.f32.mrf.mxu1  ;;  %v23632_v17 = vadd.f32 %v9375_v39, %v8783_v23  ;;  %v9158_v36 = vadd.f32 %v23254_v24, %v23259_v37  ;;  %v12582_v6 = vor.u32 %v12581_v7, %v12578_v48  ;;  %v15761_v52 = vcombine.low %v23637_v30, %v23620_v19  ;;  %v23717_v30 = vld [vmem:[#allocation3 + $0xc0] sm:$0xff]  }
 0x48f   : > { %v17366_v11 = vpop.f32.mrf.mxu0  ;;  %v12208_v34 = vor.u32 %v12206_v60, %v12204_v50  ;;  %v8784_v23 = vadd.f32 %v23259_v37, %v23272_v29  ;;  %v12218_v38 = vshll.u32 %v23622_v3, 16  ;;  %v9156_v24 = vadd.f32 %v23259_v37, %v23266_v13 }
 0x490   : > { %25849 = vst [vmem:[#allocation31_spill] sm:$0xff] %v23632_v17  ;;  %v17377_v39 = vpop.f32.mrf.mxu1  ;;  %v23649_v45 = vadd.f32 %v17366_v11, %v8786_v42  ;;  %v12212_v17 = vrot.slane %v12210_v12, 1  ;;  %v23658_v29 = vor.u32 %v12590_v2, %v12587_v21  ;;  %v12214_v7 = vshrl.u32 %v23591_v14, 16  ;;  %v23677_v11 = vld [vmem:[#allocation3 + $0x5c] sm:$0xf] }
 0x491   : > { %17632 = vmatmul.mubr.msk.bf16.vlgmr.msra.gmra.mxu1 %vm895_vm4, %v23518_v9  ;;  %v23654_v48 = vadd.f32 %v17377_v39, %v9158_v36  ;;  %v9378_v50 = vpop.f32.mrf.mxu0  ;;  %v23664_v9 = vld [vmem:[%s25266_s6 + $0xf0] sm:$0xff]   ;;  %v23670_v13 = vsel %vm1607_vm3, %v12573_v27, %v12582_v6  ;;  %v9159_v21 = vadd.f32 %v23283_v33, %v23259_v37  ;;  %v12594_v42 = vshrl.u32 %v15761_v52, 16  ;;  %25851 = vst [vmem:[#allocation7_spill] sm:$0xff] %v23677_v11 }
 0x492   : > { %17688 = vmatpush3.bf16.msra.mxu1 %v23164_v32  ;;  %17635 = vmatprep.mubr.msk.bf16.mxu1 %vm895_vm4, %v12181_v8  ;;  %v9496_v12 = vpop.f32.mrf.mxu1  ;;  %v23666_v60 = vadd.f32 %v9378_v50, %v8784_v23  ;;  %v12603_v32 = vshrl.u32 %v15762_v44, 16  ;;  %v12606_v8 = vshll.u32 %v15762_v44, 16  ;;  %v12597_v36 = vshll.u32 %v15761_v52, 16 }
 0x493   : > { %17689 = vmatprep.subr.bf16.mxu1 %v23279_v54  ;;  %v23674_v2 = vadd.f32 %v9496_v12, %v9156_v24  ;;  %v17409_v14 = vpop.f32.mrf.mxu0  ;;  %17664 = vmatmul.mubr.msk.bf16.vlgmr.msra.gmra.mxu0 %vm895_vm4, %v12565_v35  ;;  %v23684_v27 = vsel %vm2862_vm5, %v12208_v34, %v12212_v17  ;;  %v12216_v44 = vor.u32 %v12214_v7, %v12212_v17  ;;  %v12220_v33 = vrot.slane %v12218_v38, 1  ;;  %v23686_v24 = vld [vmem:[#allocation3 + $0xb8] sm:$0xff]   ;;  %v25852_v35 = vld [vmem:[#allocation37_spill] sm:$0xff]  ;;  %v23699_v38 = vld [vmem:[#allocation3 + $0x64] sm:$0xf] }
 0x494   : > { %v17378_v23 = vpop.f32.mrf.mxu1  ;;  %v23680_v39 = vadd.f32 %v17409_v14, %v23293_v28  ;;  %17667 = vmatprep.mubr.msk.bf16.mxu0 %vm895_vm4, %v12574_v43  ;;  %17720 = vmatpush3.bf16.msra.mxu0 %v23381_v58  ;;  %v9157_v52 = vadd.f32 %v23259_v37, %v25852_v35  ;;  %v12592_v28 = vsel %vm1607_vm3, %v12582_v6, %v23658_v29  ;;  %v12222_v43 = vshrl.u32 %v23622_v3, 16  ;;  %v23697_v34 = vld [vmem:[#allocation3 + $0x58] sm:$0xf]  ;;  %v25856_v7 = vld [vmem:[#allocation5_spill] sm:$0xff]  ;;  %v23711_v3 = vld [vmem:[%s25266_s6 + $0xe8] sm:$0xff]  }
 0x495   : > { %v23691_v50 = vadd.f32 %v17378_v23, %v9159_v21  ;;  %v9906_v12 = vpop.f32.mrf.mxu0  ;;  %25854 = vst [vmem:[#allocation29_spill] sm:$0xff] %v23697_v34  ;;  %25855 = vst [vmem:[#allocation24_spill] sm:$0xff] %v23699_v38  ;;  %17721 = vmatprep.subr.bf16.mxu0 %v23664_v9  ;;  %v12605_v21 = vrot.slane %v12603_v32, 3  ;;  %v12608_v23 = vrot.slane %v12606_v8, 4  ;;  %v25859_v6 = vld [vmem:[#allocation42_spill] sm:$0xff] }
 0x496   : > { %17690 = vmatpush3.bf16.msra.mxu1 %v23279_v54  ;;  %v9499_v17 = vpop.f32.mrf.mxu1  ;;  %v23703_v14 = vadd.f32 %v9906_v12, %v25856_v7  ;;  %v15763_v54 = vcombine.low %v23697_v34, %v23677_v11  ;;  %25858 = vst [vmem:[#allocation65_spill] sm:$0xff] %v23711_v3  ;;  %v9162_v35 = vadd.f32 %v25859_v6, %v23259_v37  ;;  %v12596_v12 = vrot.slane %v12594_v42, 3  ;;  %v23719_v32 = vld [vmem:[#allocation3 + $0x60] sm:$0xf]  ;;  %v25862_v11 = vld [vmem:[#allocation40_spill] sm:$0xff] }
 0x497   : > { %25853 = vst [vmem:[#allocation34_spill] sm:$0xff] %v23691_v50  ;;  %17691 = vmatprep.subr.bf16.mxu1 %v23316_v22  ;;  %v23715_v19 = vadd.f32 %v9499_v17, %v9157_v52  ;;  %v17410_v49 = vpop.f32.mrf.mxu0  ;;  %v12599_v7 = vrot.slane %v12597_v36, 4  ;;  %25861 = vst [vmem:[#allocation59_spill] sm:$0xff] %v23719_v32  ;;  %v12226_v52 = vshll.u32 %v23686_v24, 16  ;;  %v23732_v42 = vcombine.low %v23719_v32, %v23699_v38  ;;  %v25864_v36 = vld [vmem:[#allocation18_spill] sm:$0xff]  ;;  %v25866_v38 = vld [vmem:[#allocation47_spill] sm:$0xff] }
 0x498   : > { %25857 = vst [vmem:[#allocation55_spill] sm:$0xff] %v23703_v14  ;;  %v17381_v8 = vpop.f32.mrf.mxu1  ;;  %v23724_v34 = vadd.f32 %v17410_v49, %v25862_v11  ;;  %v23727_v14 = vsel %vm2862_vm5, %v12216_v44, %v12220_v33  ;;  %17722 = vmatpush3.bf16.msra.mxu0 %v23664_v9  ;;  %v9160_v17 = vadd.f32 %v23259_v37, %v25864_v36  ;;  %v23745_v11 = vld [vmem:[%s25266_s6 + $0xe0] sm:$0xff]   ;;  %v25868_v36 = vld [vmem:[#allocation52_spill] sm:$0xff] }
 0x499   : > { %25860 = vst [vmem:[#allocation57_spill] sm:$0xff] %v23715_v19  ;;  %17636 = vmatmul.mubr.msk.bf16.gmra.mxu1 %vm895_vm4, %v23605_v40  ;;  %v23737_v6 = vadd.f32 %v17381_v8, %v9162_v35  ;;  %v9909_v40 = vpop.f32.mrf.mxu0  ;;  %v12224_v49 = vor.u32 %v12222_v43, %v12220_v33  ;;  %v12612_v35 = vshrl.u32 %v15763_v54, 16  ;;  %v12615_v8 = vshll.u32 %v15763_v54, 16  ;;  %17723 = vmatprep.subr.bf16.mxu0 %v23711_v3  ;;  %v23799_v50 = vld [vmem:[#allocation3 + $0x68] sm:$0xf] }
 0x49a   : > { %25863 = vst [vmem:[#allocation60_spill] sm:$0xff] %v23724_v34  ;;  %17639 = vmatprep.mubr.msk.bf16.mxu1 %vm895_vm4, %v23608_v31  ;;  %17692 = vmatpush3.bf16.msra.mxu1 %v23316_v22  ;;  %v9512_v44 = vpop.f32.mrf.mxu1  ;;  %v23748_v32 = vadd.f32 %v9909_v40, %v25866_v38  ;;  %v23750_v34 = vor.u32 %v12608_v23, %v12605_v21  ;;  %v25869_v22 = vld [vmem:[#allocation48_spill] sm:$0xff]  ;;  %v12234_v38 = vshll.u32 %v23717_v30, 16  ;;  %v25871_v23 = vld [vmem:[#allocation19_spill] sm:$0xff]  ;;  %v12228_v54 = vrot.slane %v12226_v52, 1 }
 0x49b   : > { %25865 = vst [vmem:[#allocation56_spill] sm:$0xff] %v23737_v6  ;;  %17693 = vmatprep.subr.bf16.mxu1 %v25868_v36  ;;  %v9163_v31 = vadd.f32 %v25869_v22, %v23259_v37  ;;  %v23756_v33 = vadd.f32 %v9512_v44, %v9160_v17  ;;  %v17413_v43 = vpop.f32.mrf.mxu0  ;;  %17668 = vmatmul.mubr.msk.bf16.gmra.mxu0 %vm895_vm4, %v23670_v13  ;;  %v12621_v22 = vshrl.u32 %v23732_v42, 16  ;;  %v25873_v17 = vld [vmem:[#allocation22_spill] sm:$0xff]  ;;  %25878 = vst [vmem:[#allocation71_spill] sm:$0xff] %v23799_v50 }
 0x49c   : > { %25867 = vst [vmem:[#allocation63_spill] sm:$0xff] %v23748_v32  ;;  %v12600_v6 = vor.u32 %v12599_v7, %v12596_v12  ;;  %v17382_v21 = vpop.f32.mrf.mxu1  ;;  %v23762_v40 = vadd.f32 %v17413_v43, %v25871_v23  ;;  %17671 = vmatprep.mubr.msk.bf16.mxu0 %vm895_vm4, %v12592_v28  ;;  %v12230_v32 = vshrl.u32 %v23686_v24, 16  ;;  %17724 = vmatpush3.bf16.msra.mxu0 %v23711_v3  ;;  %v12624_v43 = vshll.u32 %v23732_v42, 16  ;;  %v23775_v23 = vld [vmem:[#allocation3 + $0xc8] sm:$0xff]   ;;  %v23784_v28 = vld [vmem:[%s25266_s6 + $0x118] sm:$0xff]  }
 0x49d   : > { %25870 = vst [vmem:[#allocation64_spill] sm:$0xff] %v23756_v33  ;;  %v9161_v44 = vadd.f32 %v23259_v37, %v25873_v17  ;;  %v23770_v13 = vadd.f32 %v17382_v21, %v9163_v31  ;;  %v9922_v12 = vpop.f32.mrf.mxu0  ;;  %v23778_v24 = vld [vmem:[#allocation3 + $0x6c] sm:$0xf]  ;;  %17725 = vmatprep.subr.bf16.mxu0 %v23745_v11  ;;  %v12614_v42 = vrot.slane %v12612_v35, 3  ;;  %v12617_v17 = vrot.slane %v12615_v8, 4 }
 0x49e   : > { %25872 = vst [vmem:[#allocation66_spill] sm:$0xff] %v23762_v40  ;;  %v12601_v7 = vsel %vm1607_vm3, %v23658_v29, %v12600_v6  ;;  %17694 = vmatpush3.bf16.msra.mxu1 %v25868_v36  ;;  %25875 = vst [vmem:[#allocation68_spill] sm:$0xff] %v23778_v24  ;;  %v9515_v52 = vpop.f32.mrf.mxu1  ;;  %v25876_v31 = vld [vmem:[#allocation77_spill] sm:$0xff]  ;;  %v12610_v29 = vsel %vm1607_vm3, %v12600_v6, %v23750_v34  ;;  %v25877_v36 = vld [vmem:[#allocation79_spill] sm:$0xff]  ;;  %v23797_v19 = vsel %vm2862_vm5, %v12224_v49, %v12228_v54 }
 0x49f   : > { %25874 = vst [vmem:[#allocation84_spill] sm:$0xff] %v23770_v13  ;;  %v23787_v21 = vadd.f32 %v9922_v12, %v25876_v31  ;;  %17751 = vmatprep.subr.bf16.mxu1 %v23381_v58  ;;  %v9166_v13 = vadd.f32 %v25877_v36, %v23259_v37  ;;  %v23794_v40 = vadd.f32 %v9515_v52, %v9161_v44  ;;  %v17414_v33 = vpop.f32.mrf.mxu0  ;;  %v12236_v3 = vrot.slane %v12234_v38, 1  ;;  %v23801_v12 = vld [vmem:[#allocation3 + $0x74] sm:$0xf]  ;;  %v25880_v6 = vld [vmem:[#allocation12_spill] sm:$0xff] }
 0x4a0   : > { %25879 = vst [vmem:[#allocation70_spill] sm:$0xff] %v23801_v12  ;;  %v17385_v31 = vpop.f32.mrf.mxu1  ;;  %v23806_v58 = vadd.f32 %v17414_v33, %v25880_v6  ;;  %v12232_v35 = vor.u32 %v12230_v32, %v12228_v54  ;;  %v12623_v8 = vrot.slane %v12621_v22, 3  ;;  %v15765_v44 = vcombine.low %v23799_v50, %v23778_v24  ;;  %17726 = vmatpush3.bf16.msra.mxu0 %v23745_v11  ;;  %v25881_v49 = vld [vmem:[#allocation82_spill] sm:$0xff]  ;;  %v23818_v6 = vld [vmem:[#allocation3 + $0x70] sm:$0xf] }
 0x4a1   : > { %17640 = vmatmul.mubr.msk.bf16.gmra.mxu1 %vm895_vm4, %v23635_v4  ;;  %v9164_v38 = vadd.f32 %v23259_v37, %v25881_v49  ;;  %v23813_v52 = vadd.f32 %v17385_v31, %v9166_v13  ;;  %v9925_v36 = vpop.f32.mrf.mxu0  ;;  %v12626_v4 = vrot.slane %v12624_v43, 4  ;;  %v12242_v33 = vshll.u32 %v23775_v23, 16  ;;  %25883 = vst [vmem:[#allocation72_spill] sm:$0xff] %v23818_v6  ;;  %17783 = vmatprep.subr.bf16.mxu0 %v23784_v28  ;;  %v25884_v54 = vld [vmem:[#allocation21_spill] sm:$0xff] }
 0x4a2   : > { %17643 = vmatprep.mubr.msk.bf16.mxu1 %vm895_vm4, %v23684_v27  ;;  %v9528_v32 = vpop.f32.mrf.mxu1  ;;  %v23822_v22 = vadd.f32 %v9925_v36, %v25884_v54  ;;  %v12618_v24 = vor.u32 %v12617_v17, %v12614_v42  ;;  %v12238_v49 = vshrl.u32 %v23717_v30, 16  ;;  %v15766_v13 = vcombine.low %v23818_v6, %v23801_v12  ;;  %v18327_v54 = vld [vmem:[#allocation3 + $0xd0] ss:$0 sps:$4 sm:$0x11]   ;;  %v23836_v42 = vld [vmem:[#allocation3 + $0x84] sm:$0xf] }
 0x4a3   : > { %25882 = vst [vmem:[#allocation89_spill] sm:$0xff] %v23813_v52  ;;  %v9167_v27 = vadd.f32 %v23436_v51, %v23259_v37  ;;  %v23829_v43 = vadd.f32 %v9528_v32, %v9164_v38  ;;  %v17417_v31 = vpop.f32.mrf.mxu0  ;;  %17672 = vmatmul.mubr.msk.bf16.gmra.mxu0 %vm895_vm4, %v12601_v7  ;;  %v23833_v50 = vsel %vm2862_vm5, %v12232_v35, %v12236_v3  ;;  %v12246_v36 = vshrl.u32 %v23775_v23, 16  ;;  %v25888_v17 = vld [vmem:[#allocation80_spill] sm:$0xff] }
 0x4a4   : > { %25885 = vst [vmem:[#allocation73_spill] sm:$0xff] %v23822_v22  ;;  %25887 = vst [vmem:[#allocation13_spill] sm:$0xff] %v23836_v42  ;;  %v17386_v30 = vpop.f32.mrf.mxu1  ;;  %v23839_v22 = vadd.f32 %v17417_v31, %v25888_v17  ;;  %17675 = vmatprep.mubr.msk.bf16.mxu0 %vm895_vm4, %v12610_v29  ;;  %v12240_v51 = vor.u32 %v12238_v49, %v12236_v3  ;;  %v12630_v38 = vshrl.u32 %v15765_v44, 16  ;;  %v12633_v32 = vshll.u32 %v15765_v44, 16  ;;  %v23853_v3 = vld [vmem:[#allocation3 + $0x7c] sm:$0xf] }
 0x4a5   : > { %25886 = vst [vmem:[#allocation74_spill] sm:$0xff] %v23829_v43  ;;  %v9165_v7 = vadd.f32 %v23259_v37, %v23450_v62  ;;  %v23844_v12 = vadd.f32 %v17386_v30, %v9167_v27  ;;  %v9938_v35 = vpop.f32.mrf.mxu0  ;;  %v23846_v6 = vor.u32 %v12626_v4, %v12623_v8  ;;  %v12244_v23 = vrot.slane %v12242_v33, 1  ;;  %v23848_v43 = vld [vmem:[#allocation3 + $0x80] sm:$0xf]  ;;  %25890 = vst [vmem:[#allocation78_spill] sm:$0xff] %v23853_v3 }
 0x4a6   : > { %25889 = vst [vmem:[#allocation76_spill] sm:$0xff] %v23848_v43  ;;  %v9531_v52 = vpop.f32.mrf.mxu1  ;;  %v23851_v31 = vadd.f32 %v9938_v35, %v23452_v59  ;;  %v12639_v17 = vshrl.u32 %v15766_v13, 16  ;;  %v12642_v29 = vshll.u32 %v15766_v13, 16  ;;  %v15785_v44 = vcombine.low %v23848_v43, %v23836_v42  ;;  %v25891_v62 = vld [vmem:[#allocation15_spill] sm:$0xff]  ;;  %v12869_v43 = vld [vmem:[#allocation3 + $0x78] sm:$0x8] }
 0x4a7   : > { %v9170_v49 = vadd.f32 %v25891_v62, %v23259_v37  ;;  %v23859_v27 = vadd.f32 %v9531_v52, %v9165_v7  ;;  %v17418_v8 = vpop.f32.mrf.mxu0  ;;  %v12619_v4 = vsel %vm1607_vm3, %v23750_v34, %v12618_v24  ;;  %v12250_v33 = vshll.u32 %v18327_v54, 16  ;;  %v23869_v62 = vld [vmem:[#allocation3 + $0x78] sm:$0xf] }
 0x4a8   : > { %v17389_v30 = vpop.f32.mrf.mxu1  ;;  %v23866_v59 = vadd.f32 %v17418_v8, %v23469_v15  ;;  %v12245_v13 = vsel %vm2862_vm5, %v12240_v51, %v12244_v23  ;;  %v12632_v35 = vrot.slane %v12630_v38, 3  ;;  %v12635_v42 = vrot.slane %v12633_v32, 4  ;;  %25892 = vst [vmem:[#allocation6_spill] sm:$0xff] %v23869_v62 }
 0x4a9   : > { %17644 = vmatmul.mubr.msk.bf16.gmra.mxu1 %vm895_vm4, %v23727_v14  ;;  %v9168_v52 = vadd.f32 %v23259_v37, %v23480_v41  ;;  %v23873_v7 = vadd.f32 %v17389_v30, %v9170_v49  ;;  %v9941_v34 = vpop.f32.mrf.mxu0  ;;  %v12628_v15 = vsel %vm1607_vm3, %v12618_v24, %v23846_v6  ;;  %v15784_v14 = vcombine.low %v12869_v43, %v23853_v3 }
 0x4aa   : > { %17647 = vmatprep.mubr.msk.bf16.mxu1 %vm895_vm4, %v23797_v19  ;;  %v9544_v54 = vpop.f32.mrf.mxu1  ;;  %v23881_v51 = vadd.f32 %v9941_v34, %v23482_v16  ;;  %v12641_v38 = vrot.slane %v12639_v17, 3  ;;  %v12644_v32 = vrot.slane %v12642_v29, 4  ;;  %v12966_v8 = vshrl.u32 %v15785_v44, 16  ;;  %v23888_v19 = vld [vmem:[#allocation3 + $0x8c] sm:$0xf] }
 0x4ab   : > { %v9171_v41 = vadd.f32 %v23496_v46, %v23259_v37  ;;  %v23885_v49 = vadd.f32 %v9544_v54, %v9168_v52  ;;  %v17421_v30 = vpop.f32.mrf.mxu0  ;;  %17676 = vmatmul.mubr.msk.bf16.gmra.mxu0 %vm895_vm4, %v12619_v4  ;;  %25895 = vst [vmem:[#allocation50_spill] sm:$0xff] %v23888_v19  ;;  %v12969_v24 = vshll.u32 %v15785_v44, 16  ;;  %v15767_v43 = vcombine.low %v23869_v62, %v23869_v62  ;;  %v23900_v54 = vld [vmem:[#allocation3 + $0x88] sm:$0xf]  ;;  %v23902_v62 = vld [vmem:[#allocation3 + $0x94] sm:$0xf] }
 0x4ac   : > { %25893 = vst [vmem:[#allocation17_spill] sm:$0xff] %v23881_v51  ;;  %v17390_v3 = vpop.f32.mrf.mxu1  ;;  %v23893_v16 = vadd.f32 %v17421_v30, %v23498_v55  ;;  %17679 = vmatprep.mubr.msk.bf16.mxu0 %vm895_vm4, %v12628_v15  ;;  %v12248_v17 = vor.u32 %v12246_v36, %v12244_v23  ;;  %v12636_v29 = vor.u32 %v12635_v42, %v12632_v35  ;;  %v12252_v46 = vrot.slane %v12250_v33, 1  ;;  %v23920_v35 = vld [vmem:[#allocation3 + $0x90] sm:$0xf] }
 0x4ad   : > { %25894 = vst [vmem:[#allocation16_spill] sm:$0xff] %v23885_v49  ;;  %v9169_v52 = vadd.f32 %v23259_v37, %v23510_v10  ;;  %v23898_v34 = vadd.f32 %v17390_v3, %v9171_v41  ;;  %v9954_v4 = vpop.f32.mrf.mxu0  ;;  %25896 = vst [vmem:[#allocation32_spill] sm:$0xff] %v23900_v54  ;;  %v12958_v44 = vshrl.u32 %v15784_v14, 16  ;;  %v12961_v49 = vshll.u32 %v15784_v14, 16  ;;  %v23914_v37 = vld [vmem:[%s25267_s7] ss:$0 sm:$0xff] }
 0x4ae   : > { %25897 = vst [vmem:[#allocation49_spill] sm:$0xff] %v23902_v62  ;;  %v9547_v51 = vpop.f32.mrf.mxu1  ;;  %v23905_v55 = vadd.f32 %v9954_v4, %v23512_v26  ;;  %v23907_v15 = vor.u32 %v12644_v32, %v12641_v38  ;;  %v15786_v36 = vcombine.low %v23900_v54, %v23888_v19  ;;  %v12968_v42 = vrot.slane %v12966_v8, 3  ;;  %25898 = vst [vmem:[#allocation51_spill] sm:$0xff] %v23920_v35  ;;  %v25899_v38 = vld [vmem:[#allocation20_spill] sm:$0xff] }
 0x4af   : > { %v9174_v10 = vadd.f32 %v23914_v37, %v23524_v18  ;;  %v23918_v23 = vadd.f32 %v9547_v51, %v9169_v52  ;;  %v17422_v3 = vpop.f32.mrf.mxu0  ;;  %v12971_v33 = vrot.slane %v12969_v24, 4  ;;  %v12648_v26 = vshrl.u32 %v15767_v43, 16  ;;  %v23952_v54 = vld [vmem:[#allocation3 + $0xa4] sm:$0xf] }
 0x4b0   : > { %v17393_v14 = vpop.f32.mrf.mxu1  ;;  %v23925_v32 = vadd.f32 %v17422_v3, %v25899_v38  ;;  %v12637_v8 = vsel %vm1607_vm3, %v23846_v6, %v12636_v29  ;;  %v12651_v41 = vshll.u32 %v15767_v43, 16  ;;  %v15787_v18 = vcombine.low %v23920_v35, %v23902_v62  ;;  %v25900_v62 = vld [vmem:[#allocation62_spill] sm:$0xff]  ;;  %25903 = vst [vmem:[#allocation53_spill] sm:$0xff] %v23952_v54 }
 0x4b1   : > { %17648 = vmatmul.mubr.msk.bf16.gmra.mxu1 %vm895_vm4, %v23833_v50  ;;  %v9172_v51 = vadd.f32 %v23914_v37, %v23546_v56  ;;  %v23933_v30 = vadd.f32 %v17393_v14, %v9174_v10  ;;  %v9957_v24 = vpop.f32.mrf.mxu0  ;;  %v12960_v52 = vrot.slane %v12958_v44, 3  ;;  %v12963_v50 = vrot.slane %v12961_v49, 4  ;;  %v23946_v49 = vld [vmem:[#allocation3 + $0x9c] sm:$0xf] }
 0x4b2   : > { %17651 = vmatprep.mubr.msk.bf16.mxu1 %vm895_vm4, %v12245_v13  ;;  %v9560_v4 = vpop.f32.mrf.mxu1  ;;  %v23937_v3 = vadd.f32 %v9957_v24, %v23548_v5  ;;  %v12646_v6 = vsel %vm1607_vm3, %v12636_v29, %v23907_v15  ;;  %v12975_v43 = vshrl.u32 %v15786_v36, 16  ;;  %v12978_v38 = vshll.u32 %v15786_v36, 16  ;;  %25901 = vst [vmem:[#allocation26_spill] sm:$0xff] %v23946_v49  ;;  %v25902_v5 = vld [vmem:[#allocation9_spill] sm:$0xff] }
 0x4b3   : > { %v9175_v19 = vadd.f32 %v23914_v37, %v25900_v62  ;;  %v23943_v56 = vadd.f32 %v9560_v4, %v9172_v51  ;;  %v17425_v10 = vpop.f32.mrf.mxu0  ;;  %17680 = vmatmul.mubr.msk.bf16.gmra.mxu0 %vm895_vm4, %v12637_v8  ;;  %v12972_v13 = vor.u32 %v12971_v33, %v12968_v42  ;;  %v12650_v44 = vrot.slane %v12648_v26, 3  ;;  %v23959_v8 = vld [vmem:[#allocation3 + $0x98] sm:$0xf] }
 0x4b4   : > { %v17394_v14 = vpop.f32.mrf.mxu1  ;;  %v23949_v24 = vadd.f32 %v17425_v10, %v25902_v5  ;;  %17683 = vmatprep.mubr.msk.bf16.mxu0 %vm895_vm4, %v12646_v6  ;;  %v12653_v29 = vrot.slane %v12651_v41, 4  ;;  %v12984_v36 = vshrl.u32 %v15787_v18, 16  ;;  %v12987_v35 = vshll.u32 %v15787_v18, 16  ;;  %25904 = vst [vmem:[#allocation67_spill] sm:$0xff] %v23959_v8  ;;  %v23966_v5 = vld [vmem:[#allocation3 + $0xa0] sm:$0xf] }
 0x4b5   : > { %v9173_v62 = vadd.f32 %v23914_v37, %v23574_v25  ;;  %v23956_v51 = vadd.f32 %v17394_v14, %v9175_v19  ;;  %v12253_v42 = vsel %vm2862_vm5, %v12248_v17, %v12252_v46  ;;  %v9970_v33 = vpop.f32.mrf.mxu0  ;;  %v12964_v26 = vor.u32 %v12963_v50, %v12960_v52  ;;  %25905 = vst [vmem:[#allocation58_spill] sm:$0xff] %v23966_v5 }
 0x4b6   : > { %v9563_v4 = vpop.f32.mrf.mxu1  ;;  %v23962_v10 = vadd.f32 %v9970_v33, %v23576_v47  ;;  %v12977_v41 = vrot.slane %v12975_v43, 3  ;;  %v12980_v6 = vrot.slane %v12978_v38, 4  ;;  %v15788_v18 = vcombine.low %v23959_v8, %v23946_v49  ;;  %v24090_v8 = vld [vmem:[#allocation3 + $0xb8] sm:$0xf] }
 0x4b7   : > { %v9178_v25 = vadd.f32 %v23914_v37, %v23582_v1  ;;  %v23970_v19 = vadd.f32 %v9563_v4, %v9173_v62  ;;  %v12973_v17 = vsel %vm1607_vm3, %v12964_v26, %v12972_v13  ;;  %v17426_v46 = vpop.f32.mrf.mxu0  ;;  %v15789_v52 = vcombine.low %v23966_v5, %v23952_v54  ;;  %25927 = vst [vmem:[#allocation27_spill] sm:$0xff] %v24090_v8 }
 0x4b8   : > { %v17397_v47 = vpop.f32.mrf.mxu1  ;;  %v23977_v50 = vadd.f32 %v17426_v46, %v23588_v0  ;;  %v12654_v43 = vor.u32 %v12653_v29, %v12650_v44  ;;  %v12986_v38 = vrot.slane %v12984_v36, 3  ;;  %v12989_v14 = vrot.slane %v12987_v35, 4  ;;  %v25906_v0 = vld [vmem:[#allocation4_spill] sm:$0xff]  ;;  %v25907_v46 = vld [vmem:[#allocation10_spill] sm:$0xff] }
 0x4b9   : > { %17652 = vmatmul.mubr.msk.bf16.gmra.mxu1 %vm895_vm4, %v12253_v42  ;;  %v9176_v1 = vadd.f32 %v23914_v37, %v23597_v53  ;;  %v23981_v62 = vadd.f32 %v17397_v47, %v9178_v25  ;;  %v9973_v33 = vpop.f32.mrf.mxu0  ;;  %v15817_v44 = vcombine.low %v25907_v46, %v25906_v0  ;;  %v12993_v29 = vshrl.u32 %v15788_v18, 16  ;;  %v24000_v0 = vld [vmem:[#allocation3 + $0xac] sm:$0xf] }
 0x4ba   : > { %17695 = vmatprep.mubr.msk.bf16.mxu1 %vm895_vm4, %v12973_v17  ;;  %v9576_v26 = vpop.f32.mrf.mxu1  ;;  %v23985_v4 = vadd.f32 %v9973_v33, %v23599_v20  ;;  %v12655_v42 = vsel %vm1607_vm3, %v23907_v15, %v12654_v43  ;;  %v9179_v35 = vadd.f32 %v23914_v37, %v23614_v61  ;;  %v12996_v25 = vshll.u32 %v15788_v18, 16  ;;  %25908 = vst [vmem:[#allocation69_spill] sm:$0xff] %v24000_v0 }
 0x4bb   : > { %v23993_v53 = vadd.f32 %v9576_v26, %v9176_v1  ;;  %v17429_v36 = vpop.f32.mrf.mxu0  ;;  %17684 = vmatmul.mubr.msk.bf16.gmra.mxu0 %vm895_vm4, %v12655_v42  ;;  %v13002_v17 = vshrl.u32 %v15789_v52, 16  ;;  %v12981_v33 = vor.u32 %v12980_v6, %v12977_v41  ;;  %v12990_v15 = vor.u32 %v12989_v14, %v12986_v38  ;;  %v24006_v42 = vld [vmem:[#allocation3 + $0xb4] sm:$0xf]  ;;  %v24012_v6 = vld [vmem:[#allocation3 + $0xa8] sm:$0xf] }
 0x4bc   : > { %v17398_v47 = vpop.f32.mrf.mxu1  ;;  %v23997_v20 = vadd.f32 %v17429_v36, %v23616_v63  ;;  %17727 = vmatprep.mubr.msk.bf16.mxu0 %vm895_vm4, %v15817_v44  ;;  %v13005_v43 = vshll.u32 %v15789_v52, 16  ;;  %v9177_v61 = vadd.f32 %v23914_v37, %v23630_v57  ;;  %25909 = vst [vmem:[#allocation61_spill] sm:$0xff] %v24006_v42  ;;  %v25910_v63 = vld [vmem:[#allocation31_spill] sm:$0xff]  ;;  %v12995_v41 = vrot.slane %v12993_v29, 3  ;;  %25911 = vst [vmem:[#allocation92_spill] sm:$0xff] %v24012_v6 }
 0x4bd   : > { %v24004_v1 = vadd.f32 %v17398_v47, %v9179_v35  ;;  %v9986_v26 = vpop.f32.mrf.mxu0  ;;  %v12982_v46 = vsel %vm1607_vm3, %v12972_v13, %v12981_v33  ;;  %v12998_v14 = vrot.slane %v12996_v25, 4  ;;  %v13004_v44 = vrot.slane %v13002_v17, 3  ;;  %v24018_v37 = vld [vmem:[#allocation3 + $0xb0] sm:$0xf] }
 0x4be   : > { %v9579_v18 = vpop.f32.mrf.mxu1  ;;  %v24010_v36 = vadd.f32 %v9986_v26, %v25910_v63  ;;  %v15790_v57 = vcombine.low %v24012_v6, %v24000_v0  ;;  %25912 = vst [vmem:[#allocation75_spill] sm:$0xff] %v24018_v37  ;;  %v12991_v13 = vsel %vm1607_vm3, %v12981_v33, %v12990_v15  ;;  %v13007_v29 = vrot.slane %v13005_v43, 4  ;;  %v25913_v26 = vld [vmem:[#allocation54_spill] sm:$0xff]  ;;  %v25914_v25 = vld [vmem:[#allocation85_spill] sm:$0xff]  ;;  %v25925_v6 = vld [vmem:[#allocation60_spill] sm:$0xff] }
 0x4bf   : > { %v24014_v52 = vadd.f32 %v9579_v18, %v9177_v61  ;;  %v17430_v38 = vpop.f32.mrf.mxu0  ;;  %v15791_v61 = vcombine.low %v24018_v37, %v24006_v42  ;;  %v15818_v17 = vcombine.low %v25914_v25, %v25913_v26  ;;  %v18419_v63 = vld [vmem:[%s25266_s6 + $0xf8] sm:$0xff]  }
 0x4c0   : > { %v17441_v35 = vpop.f32.mrf.mxu1  ;;  %v24023_v47 = vadd.f32 %v17430_v38, %v23649_v45  ;;  %v24039_v45 = vld [vmem:[%s25266_s6 + $0x110] sm:$0xff]   ;;  %v25915_v38 = vld [vmem:[#allocation90_spill] sm:$0xff]  ;;  %v13014_v42 = vshll.u32 %v15790_v57, 16 }
 0x4c1   : > { %17696 = vmatmul.mubr.msk.bf16.vlgmr.msra.gmra.mxu1 %vm895_vm4, %v12982_v46  ;;  %v24030_v18 = vadd.f32 %v17441_v35, %v23654_v48  ;;  %v9989_v33 = vpop.f32.mrf.mxu0  ;;  %v25916_v48 = vld [vmem:[#allocation83_spill] sm:$0xff] }
 0x4c2   : > { %17752 = vmatpush3.bf16.msra.mxu1 %v18419_v63  ;;  %17699 = vmatprep.mubr.msk.bf16.mxu1 %vm895_vm4, %v12991_v13  ;;  %v10283_v43 = vpop.f32.mrf.mxu1  ;;  %v24042_v46 = vadd.f32 %v9989_v33, %v23666_v60  ;;  %v15819_v35 = vcombine.low %v25916_v48, %v25915_v38  ;;  %v12999_v13 = vor.u32 %v12998_v14, %v12995_v41  ;;  %v13011_v63 = vshrl.u32 %v15790_v57, 16  ;;  %v24057_v48 = vld [vmem:[#allocation3 + $0xc4] sm:$0xf]  ;;  %v25919_v57 = vld [vmem:[#allocation55_spill] sm:$0xff] }
 0x4c3   : > { %17753 = vmatprep.subr.bf16.mxu1 %v23664_v9  ;;  %v24048_v26 = vadd.f32 %v10283_v43, %v23674_v2  ;;  %v17473_v25 = vpop.f32.mrf.mxu0  ;;  %17728 = vmatmul.mubr.msk.bf16.vlgmr.msra.gmra.mxu0 %vm895_vm4, %v15818_v17  ;;  %v24055_v60 = vor.u32 %v13007_v29, %v13004_v44  ;;  %v13020_v33 = vshrl.u32 %v15791_v61, 16  ;;  %v13023_v38 = vshll.u32 %v15791_v61, 16  ;;  %25917 = vst [vmem:[#allocation23_spill] sm:$0xff] %v24057_v48  ;;  %v25918_v2 = vld [vmem:[#allocation34_spill] sm:$0xff]  ;;  %v25921_v29 = vld [vmem:[#allocation65_spill] sm:$0xff] }
 0x4c4   : > { %v17442_v0 = vpop.f32.mrf.mxu1  ;;  %v24052_v37 = vadd.f32 %v17473_v25, %v23680_v39  ;;  %17731 = vmatprep.mubr.msk.bf16.mxu0 %vm895_vm4, %v15819_v35  ;;  %17784 = vmatpush3.bf16.msra.mxu0 %v23784_v28  ;;  %v13000_v14 = vsel %vm1607_vm3, %v12990_v15, %v12999_v13  ;;  %v24070_v61 = vld [vmem:[#allocation3 + $0xbc] sm:$0xf]  ;;  %v24072_v17 = vld [vmem:[#allocation3 + $0xc0] sm:$0xf]  ;;  %v13016_v15 = vrot.slane %v13014_v42, 4 }
 0x4c5   : > { %v24061_v43 = vadd.f32 %v17442_v0, %v25918_v2  ;;  %v10709_v41 = vpop.f32.mrf.mxu0  ;;  %17785 = vmatprep.subr.bf16.mxu0 %v24039_v45  ;;  %25922 = vst [vmem:[#allocation28_spill] sm:$0xff] %v24070_v61  ;;  %25923 = vst [vmem:[#allocation33_spill] sm:$0xff] %v24072_v17  ;;  %v24077_v0 = vld [vmem:[%s25266_s6 + $0x108] sm:$0xff]   ;;  %v13013_v2 = vrot.slane %v13011_v63, 3  ;;  %v13009_v54 = vsel %vm1607_vm3, %v12999_v13, %v24055_v60  ;;  %v13022_v5 = vrot.slane %v13020_v33, 3 }
 0x4c6   : > { %17754 = vmatpush3.bf16.msra.mxu1 %v23664_v9  ;;  %v10286_v39 = vpop.f32.mrf.mxu1  ;;  %v24067_v44 = vadd.f32 %v10709_v41, %v25919_v57  ;;  %v25924_v9 = vld [vmem:[#allocation57_spill] sm:$0xff]  ;;  %v15793_v41 = vcombine.low %v24072_v17, %v24057_v48  ;;  %v25928_v63 = vld [vmem:[#allocation56_spill] sm:$0xff]  ;;  %v15792_v13 = vcombine.low %v24090_v8, %v24070_v61 }
 0x4c7   : > { %17755 = vmatprep.subr.bf16.mxu1 %v25921_v29  ;;  %v24080_v35 = vadd.f32 %v10286_v39, %v25924_v9  ;;  %v17474_v25 = vpop.f32.mrf.mxu0  ;;  %v25930_v9 = vld [vmem:[#allocation8_spill] sm:$0xff] }
 0x4c8   : > { %25920 = vst [vmem:[#allocation81_spill] sm:$0xff] %v24067_v44  ;;  %v17445_v57 = vpop.f32.mrf.mxu1  ;;  %v24088_v49 = vadd.f32 %v17474_v25, %v25925_v6  ;;  %v13025_v44 = vrot.slane %v13023_v38, 4  ;;  %17786 = vmatpush3.bf16.msra.mxu0 %v24039_v45  ;;  %v24105_v6 = vld [vmem:[%s25266_s6 + $0x100] sm:$0xff]   ;;  %v13038_v61 = vshrl.u32 %v15793_v41, 16  ;;  %v13041_v17 = vshll.u32 %v15793_v41, 16 }
 0x4c9   : > { %17700 = vmatmul.mubr.msk.bf16.gmra.mxu1 %vm895_vm4, %v13000_v14  ;;  %v24094_v42 = vadd.f32 %v17445_v57, %v25928_v63  ;;  %v10712_v39 = vpop.f32.mrf.mxu0  ;;  %v25931_v14 = vld [vmem:[#allocation87_spill] sm:$0xff]  ;;  %v25934_v57 = vld [vmem:[#allocation93_spill] sm:$0xff]  ;;  %17787 = vmatprep.subr.bf16.mxu0 %v24077_v0  ;;  %v24130_v41 = vld [vmem:[#allocation3 + $0xd4] sm:$0xf] }
 0x4ca   : > { %25926 = vst [vmem:[#allocation35_spill] sm:$0xff] %v24088_v49  ;;  %17703 = vmatprep.mubr.msk.bf16.mxu1 %vm895_vm4, %v13009_v54  ;;  %v15820_v48 = vcombine.low %v25931_v14, %v25930_v9  ;;  %17756 = vmatpush3.bf16.msra.mxu1 %v25921_v29  ;;  %v10299_v33 = vpop.f32.mrf.mxu1  ;;  %v25932_v38 = vld [vmem:[#allocation63_spill] sm:$0xff]  ;;  %v25935_v54 = vld [vmem:[#allocation86_spill] sm:$0xff]  ;;  %v25936_v9 = vld [vmem:[#allocation64_spill] sm:$0xff] }
 0x4cb   : > { %25929 = vst [vmem:[#allocation41_spill] sm:$0xff] %v24094_v42  ;;  %v24108_v25 = vadd.f32 %v10712_v39, %v25932_v38  ;;  %v15821_v63 = vcombine.low %v25935_v54, %v25934_v57  ;;  %17757 = vmatprep.subr.bf16.mxu1 %v23745_v11  ;;  %v24115_v14 = vadd.f32 %v10299_v33, %v25936_v9  ;;  %v17477_v29 = vpop.f32.mrf.mxu0  ;;  %v25938_v42 = vld [vmem:[#allocation66_spill] sm:$0xff]  ;;  %v24122_v57 = vld [vmem:[#allocation3 + $0xcc] sm:$0xf]  ;;  %v25940_v54 = vld [vmem:[#allocation84_spill] sm:$0xff] }
 0x4cc   : > { %17732 = vmatmul.mubr.msk.bf16.gmra.mxu0 %vm895_vm4, %v15820_v48  ;;  %v17446_v8 = vpop.f32.mrf.mxu1  ;;  %v24119_v49 = vadd.f32 %v17477_v29, %v25938_v42  ;;  %v13017_v39 = vor.u32 %v13016_v15, %v13013_v2  ;;  %v13026_v38 = vor.u32 %v13025_v44, %v13022_v5  ;;  %25939 = vst [vmem:[#allocation44_spill] sm:$0xff] %v24122_v57  ;;  %v13032_v48 = vshll.u32 %v15792_v13, 16 }
 0x4cd   : > { %25933 = vst [vmem:[#allocation43_spill] sm:$0xff] %v24108_v25  ;;  %25937 = vst [vmem:[#allocation38_spill] sm:$0xff] %v24115_v14  ;;  %17735 = vmatprep.mubr.msk.bf16.mxu0 %vm895_vm4, %v15821_v63  ;;  %17788 = vmatpush3.bf16.msra.mxu0 %v24077_v0  ;;  %v24126_v33 = vadd.f32 %v17446_v8, %v25940_v54  ;;  %v10725_v9 = vpop.f32.mrf.mxu0  ;;  %v13029_v14 = vshrl.u32 %v15792_v13, 16  ;;  %v24128_v25 = vld [vmem:[#allocation3 + $0xd0] sm:$0xf]  ;;  %v13040_v13 = vrot.slane %v13038_v61, 3 }
 0x4ce   : > { %25941 = vst [vmem:[#allocation45_spill] sm:$0xff] %v24128_v25  ;;  %25942 = vst [vmem:[#allocation39_spill] sm:$0xff] %v24130_v41  ;;  %17758 = vmatpush3.bf16.msra.mxu1 %v23745_v11  ;;  %17789 = vmatprep.subr.bf16.mxu0 %v24105_v6  ;;  %v10302_v2 = vpop.f32.mrf.mxu1  ;;  %v13018_v5 = vsel %vm1607_vm3, %v24055_v60, %v13017_v39  ;;  %v24137_v44 = vadd.f32 %v10725_v9, %v23787_v21  ;;  %v24139_v8 = vld [vmem:[#allocation3 + $0xc8] sm:$0xf]  ;;  %v13043_v63 = vrot.slane %v13041_v17, 4  ;;  %v25949_v17 = vld [vmem:[#allocation94_spill] sm:$0xff] }
 0x4cf   : > { %25944 = vst [vmem:[#allocation14_spill] sm:$0xff] %v24139_v8  ;;  %17815 = vmatprep.subr.bf16.mxu1 %v23784_v28  ;;  %v24143_v15 = vadd.f32 %v10302_v2, %v23794_v40  ;;  %v17478_v42 = vpop.f32.mrf.mxu0  ;;  %v15794_v11 = vcombine.low %v24139_v8, %v24122_v57  ;;  %v13027_v60 = vsel %vm1607_vm3, %v13017_v39, %v13026_v38  ;;  %v25947_v40 = vld [vmem:[#allocation89_spill] sm:$0xff]  ;;  %v25950_v2 = vld [vmem:[#allocation88_spill] sm:$0xff]  ;;  %v13034_v8 = vrot.slane %v13032_v48, 4 }
 0x4d0   : > { %25943 = vst [vmem:[#allocation25_spill] sm:$0xff] %v24137_v44  ;;  %v17449_v29 = vpop.f32.mrf.mxu1  ;;  %v24150_v21 = vadd.f32 %v17478_v42, %v23806_v58  ;;  %v15795_v54 = vcombine.low %v24128_v25, %v24130_v41  ;;  %v15822_v57 = vcombine.low %v25950_v2, %v25949_v17  ;;  %v25952_v42 = vld [vmem:[#allocation91_spill] sm:$0xff]  ;;  %v24166_v25 = vld [vmem:[#allocation3 + $0xd8] sm:$0xf] }
 0x4d1   : > { %25945 = vst [vmem:[#allocation11_spill] sm:$0xff] %v24143_v15  ;;  %17704 = vmatmul.mubr.msk.bf16.gmra.mxu1 %vm895_vm4, %v13018_v5  ;;  %17790 = vmatpush3.bf16.msra.mxu0 %v24105_v6  ;;  %v24156_v9 = vadd.f32 %v17449_v29, %v25947_v40  ;;  %v10728_v61 = vpop.f32.mrf.mxu0  ;;  %v13031_v5 = vrot.slane %v13029_v14, 3  ;;  %v25951_v15 = vld [vmem:[#allocation73_spill] sm:$0xff]  ;;  %25954 = vst [vmem:[#allocation5_spill] sm:$0xff] %v24166_v25  ;;  %v25955_v44 = vld [vmem:[#allocation74_spill] sm:$0xff]  ;;  %v13050_v48 = vshll.u32 %v15794_v11, 16 }
 0x4d2   : > { %25946 = vst [vmem:[#allocation36_spill] sm:$0xff] %v24150_v21  ;;  %17707 = vmatprep.mubr.msk.bf16.mxu1 %vm895_vm4, %v13027_v60  ;;  %v10315_v39 = vpop.f32.mrf.mxu1  ;;  %v24162_v58 = vadd.f32 %v10728_v61, %v25951_v15  ;;  %v25953_v21 = vld [vmem:[#allocation30_spill] sm:$0xff]  ;;  %v13044_v60 = vor.u32 %v13043_v63, %v13040_v13  ;;  %v13056_v15 = vshrl.u32 %v15795_v54, 16  ;;  %v13059_v61 = vshll.u32 %v15795_v54, 16 }
 0x4d3   : > { %25948 = vst [vmem:[#allocation37_spill] sm:$0xff] %v24156_v9  ;;  %v15823_v41 = vcombine.low %v25953_v21, %v25952_v42  ;;  %v24169_v29 = vadd.f32 %v10315_v39, %v25955_v44  ;;  %v17481_v40 = vpop.f32.mrf.mxu0  ;;  %v13047_v9 = vshrl.u32 %v15794_v11, 16  ;;  %v13035_v2 = vor.u32 %v13034_v8, %v13031_v5 }
 0x4d4   : > { %17736 = vmatmul.mubr.msk.bf16.gmra.mxu0 %vm895_vm4, %v15822_v57  ;;  %v17450_v17 = vpop.f32.mrf.mxu1  ;;  %v24173_v14 = vadd.f32 %v17481_v40, %v23839_v22  ;;  %v15796_v39 = vcombine.low %v24166_v25, %v24166_v25  ;;  %v13052_v5 = vrot.slane %v13050_v48, 4  ;;  %v13058_v42 = vrot.slane %v13056_v15, 3  ;;  %v25958_v25 = vld [vmem:[#allocation17_spill] sm:$0xff]  ;;  %v25961_v15 = vld [vmem:[#allocation16_spill] sm:$0xff] }
 0x4d5   : > { %17739 = vmatprep.mubr.msk.bf16.mxu0 %vm895_vm4, %v15823_v41  ;;  %v24177_v21 = vadd.f32 %v17450_v17, %v23844_v12  ;;  %v10741_v44 = vpop.f32.mrf.mxu0  ;;  %v13036_v41 = vsel %vm1607_vm3, %v13026_v38, %v13035_v2  ;;  %v13045_v63 = vsel %vm1607_vm3, %v13035_v2, %v13044_v60  ;;  %v13049_v54 = vrot.slane %v13047_v9, 3  ;;  %v25956_v38 = vld [vmem:[#allocation29_spill] sm:$0xff]  ;;  %v25957_v17 = vld [vmem:[#allocation46_spill] sm:$0xff] }
 0x4d6   : > { %v10318_v57 = vpop.f32.mrf.mxu1  ;;  %v24182_v13 = vadd.f32 %v10741_v44, %v23851_v31  ;;  %v13061_v40 = vrot.slane %v13059_v61, 4  ;;  %v15824_v2 = vcombine.low %v25957_v17, %v25956_v38  ;;  %v13065_v44 = vshrl.u32 %v15796_v39, 16 }
 0x4d7   : > { %v24185_v22 = vadd.f32 %v10318_v57, %v23859_v27  ;;  %v17482_v11 = vpop.f32.mrf.mxu0  ;;  %v13068_v9 = vshll.u32 %v15796_v39, 16  ;;  %v13053_v38 = vor.u32 %v13052_v5, %v13049_v54  ;;  %v24222_v5 = vld [vmem:[#allocation3 + $0x24] sm:$0xff]  }
 0x4d8   : > { %v17453_v12 = vpop.f32.mrf.mxu1  ;;  %v24191_v8 = vadd.f32 %v17482_v11, %v23866_v59  ;;  %v25959_v59 = vld [vmem:[#allocation59_spill] sm:$0xff]  ;;  %v13062_v39 = vor.u32 %v13061_v40, %v13058_v42  ;;  %v13067_v17 = vrot.slane %v13065_v44, 3 }
 0x4d9   : > { %17708 = vmatmul.mubr.msk.bf16.gmra.mxu1 %vm895_vm4, %v13036_v41  ;;  %v24194_v31 = vadd.f32 %v17453_v12, %v23873_v7  ;;  %v10744_v27 = vpop.f32.mrf.mxu0  ;;  %v25960_v11 = vld [vmem:[#allocation7_spill] sm:$0xff] }
 0x4da   : > { %17711 = vmatprep.mubr.msk.bf16.mxu1 %vm895_vm4, %v13045_v63  ;;  %v10331_v57 = vpop.f32.mrf.mxu1  ;;  %v24200_v41 = vadd.f32 %v10744_v27, %v25958_v25  ;;  %v15825_v48 = vcombine.low %v25960_v11, %v25959_v59  ;;  %v13070_v59 = vrot.slane %v13068_v9, 4  ;;  %v18362_v11 = vld [vmem:[#allocation3 + $0x1c] sm:$0xff]   ;;  %v25963_v9 = vld [vmem:[#allocation24_spill] sm:$0xff] }
 0x4db   : > { %v24205_v61 = vadd.f32 %v10331_v57, %v25961_v15  ;;  %v17485_v7 = vpop.f32.mrf.mxu0 }
 0x4dc   : > { %17740 = vmatmul.mubr.msk.bf16.gmra.mxu0 %vm895_vm4, %v15824_v2  ;;  %v17454_v63 = vpop.f32.mrf.mxu1  ;;  %v24209_v12 = vadd.f32 %v17485_v7, %v23893_v16  ;;  %v13054_v16 = vsel %vm1607_vm3, %v13044_v60, %v13053_v38  ;;  %v13797_v7 = vshll.u32 %v18362_v11, 16 }
 0x4dd   : > { %17743 = vmatprep.mubr.msk.bf16.mxu0 %vm895_vm4, %v15825_v48  ;;  %v24213_v25 = vadd.f32 %v17454_v63, %v23898_v34  ;;  %v10757_v27 = vpop.f32.mrf.mxu0  ;;  %v13063_v34 = vsel %vm1607_vm3, %v13053_v38, %v13062_v39  ;;  %v13071_v48 = vor.u32 %v13070_v59, %v13067_v17  ;;  %v25965_v38 = vld [vmem:[#allocation68_spill] sm:$0xff] }
 0x4de   : > { %v10334_v57 = vpop.f32.mrf.mxu1  ;;  %v24216_v15 = vadd.f32 %v10757_v27, %v23905_v55 }
 0x4df   : > { %v24219_v2 = vadd.f32 %v10334_v57, %v23918_v23  ;;  %v17486_v54 = vpop.f32.mrf.mxu0  ;;  %v25962_v23 = vld [vmem:[#allocation71_spill] sm:$0xff]  ;;  %v25964_v57 = vld [vmem:[#allocation72_spill] sm:$0xff]  ;;  %v13072_v17 = vsel %vm1607_vm3, %v13062_v39, %v13071_v48  ;;  %v25968_v48 = vld [vmem:[#allocation6_spill] sm:$0xff] }
 0x4e0   : > { %v17457_v42 = vpop.f32.mrf.mxu1  ;;  %v24227_v40 = vadd.f32 %v17486_v54, %v23925_v32  ;;  %v15826_v60 = vcombine.low %v25963_v9, %v25962_v23  ;;  %v13802_v54 = vshll.u32 %v24222_v5, 16 }
 0x4e1   : > { %17712 = vmatmul.mubr.msk.bf16.gmra.mxu1 %vm895_vm4, %v13054_v16  ;;  %v24230_v44 = vadd.f32 %v17457_v42, %v23933_v30  ;;  %v10760_v55 = vpop.f32.mrf.mxu0  ;;  %v15827_v16 = vcombine.low %v25965_v38, %v25964_v57 }
 0x4e2   : > { %17715 = vmatprep.mubr.msk.bf16.mxu1 %vm895_vm4, %v13063_v34  ;;  %v10347_v63 = vpop.f32.mrf.mxu1  ;;  %v24236_v27 = vadd.f32 %v10760_v55, %v23937_v3  ;;  %v13799_v55 = vrot.slane %v13797_v7, 1  ;;  %v25969_v7 = vld [vmem:[#allocation70_spill] sm:$0xff] }
 0x4e3   : > { %v24241_v32 = vadd.f32 %v10347_v63, %v23943_v56  ;;  %v17489_v30 = vpop.f32.mrf.mxu0  ;;  %v18366_v56 = vld [vmem:[#allocation3 + $0x2c] sm:$0xff]   ;;  %v25966_v63 = vld [vmem:[#allocation76_spill] sm:$0xff] }
 0x4e4   : > { %17744 = vmatmul.mubr.msk.bf16.gmra.mxu0 %vm895_vm4, %v15826_v60  ;;  %v17458_v42 = vpop.f32.mrf.mxu1  ;;  %v24246_v34 = vadd.f32 %v17489_v30, %v23949_v24  ;;  %v25967_v24 = vld [vmem:[#allocation78_spill] sm:$0xff]  ;;  %v13804_v30 = vrot.slane %v13802_v54, 1 }
 0x4e5   : > { %17747 = vmatprep.mubr.msk.bf16.mxu0 %vm895_vm4, %v15827_v16  ;;  %v24250_v3 = vadd.f32 %v17458_v42, %v23956_v51  ;;  %v10773_v59 = vpop.f32.mrf.mxu0  ;;  %v15845_v57 = vcombine.low %v25967_v24, %v25966_v63  ;;  %v13795_v16 = vshrl.u32 %v18362_v11, 16  ;;  %v24261_v51 = vld [vmem:[#allocation3 + $0x34] sm:$0xff]   ;;  %v13810_v11 = vshll.u32 %v18366_v56, 16 }
 0x4e6   : > { %v10350_v23 = vpop.f32.mrf.mxu1  ;;  %v24254_v9 = vadd.f32 %v10773_v59, %v23962_v10  ;;  %v15828_v59 = vcombine.low %v25969_v7, %v25968_v48  ;;  %v13818_v24 = vshll.u32 %v24261_v51, 16 }
 0x4e7   : > { %v24257_v60 = vadd.f32 %v10350_v23, %v23970_v19  ;;  %v17490_v38 = vpop.f32.mrf.mxu0  ;;  %v13800_v23 = vor.u32 %v13799_v55, %v13795_v16  ;;  %v13812_v16 = vrot.slane %v13810_v11, 1  ;;  %v24300_v11 = vld [vmem:[#allocation3 + $0x44] sm:$0xff]  }
 0x4e8   : > { %v17461_v42 = vpop.f32.mrf.mxu1  ;;  %v24265_v39 = vadd.f32 %v17490_v38, %v23977_v50 }
 0x4e9   : > { %17716 = vmatmul.mubr.msk.bf16.gmra.mxu1 %vm895_vm4, %v13072_v17  ;;  %v24268_v10 = vadd.f32 %v17461_v42, %v23981_v62  ;;  %v10776_v19 = vpop.f32.mrf.mxu0  ;;  %v13805_v62 = vsel %vm2862_vm5, %v13800_v23, %v13804_v30  ;;  %v25972_v42 = vld [vmem:[#allocation32_spill] sm:$0xff] }
 0x4ea   : > { %17759 = vmatprep.mubr.msk.bf16.mxu1 %vm895_vm4, %v15845_v57  ;;  %v10363_v54 = vpop.f32.mrf.mxu1  ;;  %v24274_v63 = vadd.f32 %v10776_v19, %v23985_v4  ;;  %v25973_v19 = vld [vmem:[#allocation13_spill] sm:$0xff] }
 0x4eb   : > { %v24277_v17 = vadd.f32 %v10363_v54, %v23993_v53  ;;  %v17493_v50 = vpop.f32.mrf.mxu0  ;;  %v18370_v53 = vld [vmem:[#allocation3 + $0x3c] sm:$0xff]   ;;  %v15846_v48 = vcombine.low %v25973_v19, %v25972_v42 }
 0x4ec   : > { %17748 = vmatmul.mubr.msk.bf16.gmra.mxu0 %vm895_vm4, %v15828_v59  ;;  %v17462_v57 = vpop.f32.mrf.mxu1  ;;  %v24283_v38 = vadd.f32 %v17493_v50, %v23997_v20  ;;  %v13806_v59 = vshrl.u32 %v24222_v5, 16  ;;  %v25974_v54 = vld [vmem:[#allocation51_spill] sm:$0xff]  ;;  %v25975_v50 = vld [vmem:[#allocation50_spill] sm:$0xff] }
 0x4ed   : > { %17791 = vmatprep.mubr.msk.bf16.mxu0 %vm895_vm4, %v13805_v62  ;;  %v24287_v55 = vadd.f32 %v17462_v57, %v24004_v1  ;;  %v10789_v4 = vpop.f32.mrf.mxu0  ;;  %v15847_v62 = vcombine.low %v25975_v50, %v25974_v54  ;;  %v13814_v57 = vshrl.u32 %v18366_v56, 16  ;;  %v13826_v56 = vshll.u32 %v18370_v53, 16  ;;  %v25976_v50 = vld [vmem:[#allocation67_spill] sm:$0xff] }
 0x4ee   : > { %25970 = vst [vmem:[#allocation42_spill] sm:$0xff] %v24283_v38  ;;  %v10366_v7 = vpop.f32.mrf.mxu1  ;;  %v24293_v23 = vadd.f32 %v10789_v4, %v24010_v36  ;;  %v13808_v42 = vor.u32 %v13806_v59, %v13804_v30  ;;  %v13834_v30 = vshll.u32 %v24300_v11, 16  ;;  %v18374_v59 = vld [vmem:[#allocation3 + $0x4c] sm:$0xff]  }
 0x4ef   : > { %25971 = vst [vmem:[#allocation40_spill] sm:$0xff] %v24287_v55  ;;  %v24296_v20 = vadd.f32 %v10366_v7, %v24014_v52  ;;  %v17494_v1 = vpop.f32.mrf.mxu0  ;;  %v13820_v55 = vrot.slane %v13818_v24, 1  ;;  %v13816_v4 = vor.u32 %v13814_v57, %v13812_v16  ;;  %v13822_v57 = vshrl.u32 %v24261_v51, 16 }
 0x4f0   : > { %v17505_v38 = vpop.f32.mrf.mxu1  ;;  %v24304_v5 = vadd.f32 %v17494_v1, %v24023_v47 }
 0x4f1   : > { %17760 = vmatmul.mubr.msk.bf16.vlgmr.msra.gmra.mxu1 %vm895_vm4, %v15846_v48  ;;  %v24307_v36 = vadd.f32 %v17505_v38, %v24030_v18  ;;  %v10792_v52 = vpop.f32.mrf.mxu0  ;;  %v13813_v48 = vsel %vm2862_vm5, %v13808_v42, %v13812_v16  ;;  %v25978_v42 = vld [vmem:[#allocation81_spill] sm:$0xff]  ;;  %v13824_v51 = vor.u32 %v13822_v57, %v13820_v55 }
 0x4f2   : > { %17816 = vmatpush3.bf16.msra.mxu1 %v23784_v28  ;;  %17763 = vmatprep.mubr.msk.bf16.mxu1 %vm895_vm4, %v15847_v62  ;;  %v11102_v24 = vpop.f32.mrf.mxu1  ;;  %v24312_v19 = vadd.f32 %v10792_v52, %v24042_v46  ;;  %v13821_v28 = vsel %vm2862_vm5, %v13816_v4, %v13820_v55  ;;  %v25977_v62 = vld [vmem:[#allocation49_spill] sm:$0xff]  ;;  %v25980_v4 = vld [vmem:[#allocation26_spill] sm:$0xff] }
 0x4f3   : > { %17817 = vmatprep.subr.bf16.mxu1 %v24039_v45  ;;  %v24317_v47 = vadd.f32 %v11102_v24, %v24048_v26  ;;  %v17537_v18 = vpop.f32.mrf.mxu0  ;;  %v13828_v26 = vrot.slane %v13826_v56, 1  ;;  %v15848_v1 = vcombine.low %v25977_v62, %v25976_v50  ;;  %v13830_v56 = vshrl.u32 %v18370_v53, 16  ;;  %v25982_v50 = vld [vmem:[#allocation41_spill] sm:$0xff]  ;;  %v25984_v55 = vld [vmem:[#allocation38_spill] sm:$0xff] }
 0x4f4   : > { %17792 = vmatmul.mubr.msk.bf16.vlgmr.msra.gmra.mxu0 %vm895_vm4, %v13813_v48  ;;  %v17506_v38 = vpop.f32.mrf.mxu1  ;;  %v24323_v7 = vadd.f32 %v17537_v18, %v24052_v37  ;;  %v13836_v48 = vrot.slane %v13834_v30, 1  ;;  %v24342_v18 = vld [vmem:[#allocation3 + $0x54] sm:$0xff]   ;;  %v25983_v30 = vld [vmem:[#allocation43_spill] sm:$0xff] }
 0x4f5   : > { %17795 = vmatprep.mubr.msk.bf16.mxu0 %vm895_vm4, %v13821_v28  ;;  %v24327_v46 = vadd.f32 %v17506_v38, %v24061_v43  ;;  %v11336_v16 = vpop.f32.mrf.mxu0  ;;  %v25979_v43 = vld [vmem:[#allocation58_spill] sm:$0xff]  ;;  %v25981_v38 = vld [vmem:[#allocation35_spill] sm:$0xff] }
 0x4f6   : > { %17818 = vmatpush3.bf16.msra.mxu1 %v24039_v45  ;;  %v11105_v54 = vpop.f32.mrf.mxu1  ;;  %v24334_v52 = vadd.f32 %v11336_v16, %v25978_v42  ;;  %v15849_v24 = vcombine.low %v25980_v4, %v25979_v43  ;;  %v13842_v42 = vshll.u32 %v18374_v59, 16 }
 0x4f7   : > { %17819 = vmatprep.subr.bf16.mxu1 %v24077_v0  ;;  %v24338_v37 = vadd.f32 %v11105_v54, %v24080_v35  ;;  %v17538_v45 = vpop.f32.mrf.mxu0  ;;  %v13832_v54 = vor.u32 %v13830_v56, %v13828_v26 }
 0x4f8   : > { %v17509_v28 = vpop.f32.mrf.mxu1  ;;  %v24346_v16 = vadd.f32 %v17538_v45, %v25981_v38  ;;  %v13850_v45 = vshll.u32 %v24342_v18, 16  ;;  %v18378_v38 = vld [vmem:[#allocation3 + $0x5c] sm:$0xff]  }
 0x4f9   : > { %17764 = vmatmul.mubr.msk.bf16.gmra.mxu1 %vm895_vm4, %v15848_v1  ;;  %v24349_v62 = vadd.f32 %v17509_v28, %v25982_v50  ;;  %v11339_v35 = vpop.f32.mrf.mxu0  ;;  %v13829_v1 = vsel %vm2862_vm5, %v13824_v51, %v13828_v26  ;;  %v13844_v51 = vrot.slane %v13842_v42, 1  ;;  %v13846_v42 = vshrl.u32 %v18374_v59, 16 }
 0x4fa   : > { %17767 = vmatprep.mubr.msk.bf16.mxu1 %vm895_vm4, %v15849_v24  ;;  %17820 = vmatpush3.bf16.msra.mxu1 %v24077_v0  ;;  %v11118_v53 = vpop.f32.mrf.mxu1  ;;  %v24354_v43 = vadd.f32 %v11339_v35, %v25983_v30  ;;  %v13837_v24 = vsel %vm2862_vm5, %v13832_v54, %v13836_v48  ;;  %v25988_v35 = vld [vmem:[#allocation92_spill] sm:$0xff]  ;;  %v13838_v30 = vshrl.u32 %v24300_v11, 16 }
 0x4fb   : > { %17821 = vmatprep.subr.bf16.mxu1 %v24105_v6  ;;  %v24359_v57 = vadd.f32 %v11118_v53, %v25984_v55  ;;  %v17541_v4 = vpop.f32.mrf.mxu0  ;;  %v25989_v53 = vld [vmem:[#allocation53_spill] sm:$0xff] }
 0x4fc   : > { %17796 = vmatmul.mubr.msk.bf16.gmra.mxu0 %vm895_vm4, %v13829_v1  ;;  %v17510_v56 = vpop.f32.mrf.mxu1  ;;  %v24365_v0 = vadd.f32 %v17541_v4, %v24119_v49  ;;  %v15850_v54 = vcombine.low %v25989_v53, %v25988_v35  ;;  %v25990_v1 = vld [vmem:[#allocation25_spill] sm:$0xff]  ;;  %v25991_v49 = vld [vmem:[#allocation11_spill] sm:$0xff]  ;;  %v13840_v35 = vor.u32 %v13838_v30, %v13836_v48  ;;  %v25994_v53 = vld [vmem:[#allocation36_spill] sm:$0xff] }
 0x4fd   : > { %25985 = vst [vmem:[#allocation18_spill] sm:$0xff] %v24359_v57  ;;  %17799 = vmatprep.mubr.msk.bf16.mxu0 %vm895_vm4, %v13837_v24  ;;  %v24369_v26 = vadd.f32 %v17510_v56, %v24126_v33  ;;  %v11352_v28 = vpop.f32.mrf.mxu0  ;;  %v25992_v24 = vld [vmem:[#allocation75_spill] sm:$0xff]  ;;  %v25993_v33 = vld [vmem:[#allocation69_spill] sm:$0xff]  ;;  %v24383_v57 = vld [vmem:[#allocation3 + $0x64] sm:$0xff]  }
 0x4fe   : > { %25986 = vst [vmem:[#allocation47_spill] sm:$0xff] %v24365_v0  ;;  %17822 = vmatpush3.bf16.msra.mxu1 %v24105_v6  ;;  %v11121_v50 = vpop.f32.mrf.mxu1  ;;  %v24376_v55 = vadd.f32 %v11352_v28, %v25990_v1  ;;  %v15851_v56 = vcombine.low %v25993_v33, %v25992_v24  ;;  %v13852_v0 = vrot.slane %v13850_v45, 1  ;;  %v25995_v28 = vld [vmem:[#allocation37_spill] sm:$0xff]  ;;  %v13858_v24 = vshll.u32 %v18378_v38, 16 }
 0x4ff   : > { %25987 = vst [vmem:[#allocation52_spill] sm:$0xff] %v24369_v26  ;;  %v24379_v4 = vadd.f32 %v11121_v50, %v25991_v49  ;;  %v17542_v26 = vpop.f32.mrf.mxu0  ;;  %v13848_v49 = vor.u32 %v13846_v42, %v13844_v51  ;;  %v13845_v45 = vsel %vm2862_vm5, %v13840_v35, %v13844_v51  ;;  %v13866_v30 = vshll.u32 %v24383_v57, 16 }
 0x500   : > { %v17513_v6 = vpop.f32.mrf.mxu1  ;;  %v24387_v11 = vadd.f32 %v17542_v26, %v25994_v53  ;;  %v25999_v53 = vld [vmem:[#allocation27_spill] sm:$0xff] }
 0x501   : > { %17768 = vmatmul.mubr.msk.bf16.gmra.mxu1 %vm895_vm4, %v15850_v54  ;;  %v24390_v1 = vadd.f32 %v17513_v6, %v25995_v28  ;;  %v11355_v50 = vpop.f32.mrf.mxu0  ;;  %v13853_v26 = vsel %vm2862_vm5, %v13848_v49, %v13852_v0  ;;  %v26000_v28 = vld [vmem:[#allocation61_spill] sm:$0xff]  ;;  %v13854_v49 = vshrl.u32 %v24342_v18, 16 }
 0x502   : > { %17771 = vmatprep.mubr.msk.bf16.mxu1 %vm895_vm4, %v15851_v56  ;;  %v11134_v33 = vpop.f32.mrf.mxu1  ;;  %v24394_v59 = vadd.f32 %v11355_v50, %v24162_v58  ;;  %v18382_v56 = vld [vmem:[#allocation3 + $0x6c] sm:$0xff]   ;;  %v15852_v50 = vcombine.low %v26000_v28, %v25999_v53 }
 0x503   : > { %v24398_v54 = vadd.f32 %v11134_v33, %v24169_v29  ;;  %v17545_v48 = vpop.f32.mrf.mxu0  ;;  %v13860_v29 = vrot.slane %v13858_v24, 1  ;;  %v24421_v24 = vld [vmem:[#allocation3 + $0x74] sm:$0xff]   ;;  %v13856_v53 = vor.u32 %v13854_v49, %v13852_v0 }
 0x504   : > { %17800 = vmatmul.mubr.msk.bf16.gmra.mxu0 %vm895_vm4, %v13845_v45  ;;  %v17514_v6 = vpop.f32.mrf.mxu1  ;;  %v24404_v42 = vadd.f32 %v17545_v48, %v24173_v14  ;;  %v26001_v45 = vld [vmem:[#allocation33_spill] sm:$0xff] }
 0x505   : > { %25996 = vst [vmem:[#allocation48_spill] sm:$0xff] %v24398_v54  ;;  %17803 = vmatprep.mubr.msk.bf16.mxu0 %vm895_vm4, %v13853_v26  ;;  %v24408_v58 = vadd.f32 %v17514_v6, %v24177_v21  ;;  %v11368_v51 = vpop.f32.mrf.mxu0  ;;  %v26002_v54 = vld [vmem:[#allocation28_spill] sm:$0xff]  ;;  %v13862_v21 = vshrl.u32 %v18378_v38, 16  ;;  %v13868_v6 = vrot.slane %v13866_v30, 1  ;;  %v13861_v30 = vsel %vm2862_vm5, %v13856_v53, %v13860_v29 }
 0x506   : > { %25997 = vst [vmem:[#allocation19_spill] sm:$0xff] %v24404_v42  ;;  %v11137_v35 = vpop.f32.mrf.mxu1  ;;  %v24414_v33 = vadd.f32 %v11368_v51, %v24182_v13  ;;  %v15853_v14 = vcombine.low %v26002_v54, %v26001_v45 }
 0x507   : > { %25998 = vst [vmem:[#allocation22_spill] sm:$0xff] %v24408_v58  ;;  %v24419_v48 = vadd.f32 %v11137_v35, %v24185_v22  ;;  %v17546_v26 = vpop.f32.mrf.mxu0  ;;  %v13874_v58 = vshll.u32 %v18382_v56, 16  ;;  %v13864_v54 = vor.u32 %v13862_v21, %v13860_v29  ;;  %v18385_v35 = vld [vmem:[#allocation3 + $0x7c] sm:$0xff]   ;;  %v24446_v29 = vld [vmem:[#allocation3 + $0x84] sm:$0xff]   ;;  %v26004_v21 = vld [vmem:[#allocation14_spill] sm:$0xff] }
 0x508   : > { %v17517_v42 = vpop.f32.mrf.mxu1  ;;  %v24425_v18 = vadd.f32 %v17546_v26, %v24191_v8 }
 0x509   : > { %17772 = vmatmul.mubr.msk.bf16.gmra.mxu1 %vm895_vm4, %v15852_v50  ;;  %v24428_v13 = vadd.f32 %v17517_v42, %v24194_v31  ;;  %v11371_v22 = vpop.f32.mrf.mxu0  ;;  %v13869_v8 = vsel %vm2862_vm5, %v13864_v54, %v13868_v6  ;;  %v13876_v31 = vrot.slane %v13874_v58, 1  ;;  %v13882_v42 = vshll.u32 %v24421_v24, 16  ;;  %v26005_v58 = vld [vmem:[#allocation23_spill] sm:$0xff] }
 0x50a   : > { %17775 = vmatprep.mubr.msk.bf16.mxu1 %vm895_vm4, %v15853_v14  ;;  %v11150_v51 = vpop.f32.mrf.mxu1  ;;  %v24432_v38 = vadd.f32 %v11371_v22, %v24200_v41  ;;  %v13870_v41 = vshrl.u32 %v24383_v57, 16  ;;  %v13878_v14 = vshrl.u32 %v18382_v56, 16  ;;  %v15854_v53 = vcombine.low %v26005_v58, %v26004_v21  ;;  %v18388_v21 = vld [vmem:[#allocation3 + $0x8c] sm:$0xff]  }
 0x50b   : > { %v24436_v28 = vadd.f32 %v11150_v51, %v24205_v61  ;;  %v17549_v0 = vpop.f32.mrf.mxu0  ;;  %v26006_v51 = vld [vmem:[#allocation45_spill] sm:$0xff] }
 0x50c   : > { %17804 = vmatmul.mubr.msk.bf16.gmra.mxu0 %vm895_vm4, %v13861_v30  ;;  %v17518_v50 = vpop.f32.mrf.mxu1  ;;  %v24442_v49 = vadd.f32 %v17549_v0, %v24209_v12  ;;  %v13872_v22 = vor.u32 %v13870_v41, %v13868_v6  ;;  %v14198_v12 = vshll.u32 %v18385_v35, 16  ;;  %v26007_v30 = vld [vmem:[#allocation44_spill] sm:$0xff]  ;;  %v14203_v6 = vshll.u32 %v24446_v29, 16 }
 0x50d   : > { %17807 = vmatprep.mubr.msk.bf16.mxu0 %vm895_vm4, %v13869_v8  ;;  %v24449_v61 = vadd.f32 %v17518_v50, %v24213_v25  ;;  %v11384_v45 = vpop.f32.mrf.mxu0  ;;  %v15855_v0 = vcombine.low %v26007_v30, %v26006_v51  ;;  %v13880_v25 = vor.u32 %v13878_v14, %v13876_v31  ;;  %v13884_v50 = vrot.slane %v13882_v42, 1 }
 0x50e   : > { %v11153_v26 = vpop.f32.mrf.mxu1  ;;  %v24454_v54 = vadd.f32 %v11384_v45, %v24216_v15  ;;  %v18387_v15 = vld [vmem:[#allocation3 + $0x7c] ss:$0 sps:$4 sm:$0x11]   ;;  %v13877_v42 = vsel %vm2862_vm5, %v13872_v22, %v13876_v31  ;;  %v14200_v14 = vrot.slane %v14198_v12, 1  ;;  %v14205_v22 = vrot.slane %v14203_v6, 1  ;;  %v24486_v12 = vld [vmem:[#allocation3 + $0x94] sm:$0xff]  }
 0x50f   : > { %26003 = vst [vmem:[#allocation77_spill] sm:$0xff] %v24449_v61  ;;  %v24457_v57 = vadd.f32 %v11153_v26, %v24219_v2  ;;  %v17550_v8 = vpop.f32.mrf.mxu0 }
 0x510   : > { %v17521_v61 = vpop.f32.mrf.mxu1  ;;  %v24463_v56 = vadd.f32 %v17550_v8, %v24227_v40 }
 0x511   : > { %17776 = vmatmul.mubr.msk.bf16.gmra.mxu1 %vm895_vm4, %v15854_v53  ;;  %v24467_v41 = vadd.f32 %v17521_v61, %v24230_v44  ;;  %v11387_v2 = vpop.f32.mrf.mxu0  ;;  %v13885_v44 = vsel %vm2862_vm5, %v13880_v25, %v13884_v50  ;;  %v13886_v61 = vshrl.u32 %v24421_v24, 16  ;;  %v14196_v53 = vshrl.u32 %v18385_v35, 16 }
 0x512   : > { %17779 = vmatprep.mubr.msk.bf16.mxu1 %vm895_vm4, %v15855_v0  ;;  %v11166_v45 = vpop.f32.mrf.mxu1  ;;  %v24471_v26 = vadd.f32 %v11387_v2, %v24236_v27  ;;  %v26008_v27 = vld [vmem:[#allocation5_spill] sm:$0xff]  ;;  %v26009_v0 = vld [vmem:[#allocation39_spill] sm:$0xff] }
 0x513   : > { %v24475_v40 = vadd.f32 %v11166_v45, %v24241_v32  ;;  %v17553_v58 = vpop.f32.mrf.mxu0  ;;  %v15856_v31 = vcombine.low %v26009_v0, %v26008_v27  ;;  %v13890_v32 = vshll.u32 %v18387_v15, 16  ;;  %v13888_v24 = vor.u32 %v13886_v61, %v13884_v50  ;;  %v18390_v27 = vld [vmem:[#allocation3 + $0x9c] sm:$0xff]  }
 0x514   : > { %17808 = vmatmul.mubr.msk.bf16.gmra.mxu0 %vm895_vm4, %v13877_v42  ;;  %v17522_v51 = vpop.f32.mrf.mxu1  ;;  %v24481_v30 = vadd.f32 %v17553_v58, %v24246_v34  ;;  %v14201_v34 = vor.u32 %v14200_v14, %v14196_v53  ;;  %v14211_v45 = vshll.u32 %v18388_v21, 16  ;;  %v14219_v50 = vshll.u32 %v24486_v12, 16 }
 0x515   : > { %17811 = vmatprep.mubr.msk.bf16.mxu0 %vm895_vm4, %v13885_v44  ;;  %v24489_v8 = vadd.f32 %v17522_v51, %v24250_v3  ;;  %v11400_v25 = vpop.f32.mrf.mxu0  ;;  %v13892_v15 = vrot.slane %v13890_v32, 1  ;;  %v26010_v32 = vld [vmem:[#allocation42_spill] sm:$0xff] }
 0x516   : > { %v11169_v2 = vpop.f32.mrf.mxu1  ;;  %v24492_v35 = vadd.f32 %v11400_v25, %v24254_v9  ;;  %v14206_v6 = vsel %vm2862_vm5, %v14201_v34, %v14205_v22  ;;  %v14213_v51 = vrot.slane %v14211_v45, 1  ;;  %v14221_v34 = vrot.slane %v14219_v50, 1 }
 0x517   : > { %v24495_v42 = vadd.f32 %v11169_v2, %v24257_v60  ;;  %v17554_v58 = vpop.f32.mrf.mxu0  ;;  %v13893_v53 = vsel %vm2862_vm5, %v13888_v24, %v13892_v15  ;;  %v14215_v2 = vshrl.u32 %v18388_v21, 16  ;;  %v14227_v15 = vshll.u32 %v18390_v27, 16 }
 0x518   : > { %v17525_v44 = vpop.f32.mrf.mxu1  ;;  %v24500_v3 = vadd.f32 %v17554_v58, %v24265_v39  ;;  %v14207_v39 = vshrl.u32 %v24446_v29, 16 }
 0x519   : > { %17780 = vmatmul.mubr.msk.bf16.gmra.mxu1 %vm895_vm4, %v15856_v31  ;;  %v24504_v9 = vadd.f32 %v17525_v44, %v24268_v10  ;;  %v11403_v14 = vpop.f32.mrf.mxu0  ;;  %v26011_v44 = vld [vmem:[#allocation40_spill] sm:$0xff] }
 0x51a   : > { %17823 = vmatprep.mubr.msk.bf16.mxu1 %vm895_vm4, %v14206_v6  ;;  %v11182_v60 = vpop.f32.mrf.mxu1  ;;  %v24508_v61 = vadd.f32 %v11403_v14, %v24274_v63  ;;  %v18391_v63 = vld [vmem:[#allocation3 + $0xa4] sm:$0xff]   ;;  %v14209_v58 = vor.u32 %v14207_v39, %v14205_v22 }
 0x51b   : > { %v24513_v0 = vadd.f32 %v11182_v60, %v24277_v17  ;;  %v17557_v31 = vpop.f32.mrf.mxu0  ;;  %v14217_v17 = vor.u32 %v14215_v2, %v14213_v51  ;;  %v14235_v39 = vshll.u32 %v18391_v63, 16  ;;  %v14223_v2 = vshrl.u32 %v24486_v12, 16 }
 0x51c   : > { %17812 = vmatmul.mubr.msk.bf16.gmra.mxu0 %vm895_vm4, %v13893_v53  ;;  %v17526_v10 = vpop.f32.mrf.mxu1  ;;  %v24517_v25 = vadd.f32 %v17557_v31, %v26010_v32  ;;  %v14214_v60 = vsel %vm2862_vm5, %v14209_v58, %v14213_v51  ;;  %v14229_v51 = vrot.slane %v14227_v15, 1  ;;  %v18392_v32 = vld [vmem:[#allocation3 + $0xac] sm:$0xff]  }
 0x51d   : > { %v24520_v24 = vadd.f32 %v17526_v10, %v26011_v44  ;;  %v11416_v45 = vpop.f32.mrf.mxu0  ;;  %v14222_v22 = vsel %vm2862_vm5, %v14217_v17, %v14221_v34  ;;  %v24548_v17 = vld [vmem:[#allocation3 + $0xb4] sm:$0xff]  }
 0x51e   : > { %v11185_v6 = vpop.f32.mrf.mxu1  ;;  %v24523_v29 = vadd.f32 %v11416_v45, %v24293_v23 }
 0x51f   : > { %v24526_v14 = vadd.f32 %v11185_v6, %v24296_v20  ;;  %v17558_v53 = vpop.f32.mrf.mxu0  ;;  %v14237_v6 = vrot.slane %v14235_v39, 1 }
 0x520   : > { %v17569_v21 = vpop.f32.mrf.mxu1  ;;  %v24532_v50 = vadd.f32 %v17558_v53, %v24304_v5 }
 0x521   : > { %17824 = vmatmul.mubr.msk.bf16.vlgmr.msra.gmra.mxu1 %vm895_vm4, %v14214_v60  ;;  %v24535_v23 = vadd.f32 %v17569_v21, %v24307_v36  ;;  %v11419_v31 = vpop.f32.mrf.mxu0  ;;  %v14231_v36 = vshrl.u32 %v18390_v27, 16  ;;  %v14225_v60 = vor.u32 %v14223_v2, %v14221_v34  ;;  %v14243_v21 = vshll.u32 %v18392_v32, 16 }
 0x522   : > { %17827 = vmatprep.mubr.msk.bf16.mxu1 %vm895_vm4, %v14222_v22  ;;  %v11537_v20 = vpop.f32.mrf.mxu1  ;;  %v24539_v10 = vadd.f32 %v11419_v31, %v24312_v19  ;;  %v14251_v31 = vshll.u32 %v24548_v17, 16 }
 0x523   : > { %v24543_v58 = vadd.f32 %v11537_v20, %v24317_v47  ;;  %v17601_v5 = vpop.f32.mrf.mxu0  ;;  %v14233_v47 = vor.u32 %v14231_v36, %v14229_v51  ;;  %v14245_v2 = vrot.slane %v14243_v21, 1  ;;  %v26013_v36 = vld [vmem:[#allocation18_spill] sm:$0xff] }
 0x524   : > { %v17570_v44 = vpop.f32.mrf.mxu1  ;;  %v24546_v45 = vadd.f32 %v17601_v5, %v24323_v7  ;;  %v14230_v7 = vsel %vm2862_vm5, %v14225_v60, %v14229_v51  ;;  %v18394_v5 = vld [vmem:[#allocation3 + $0xbc] sm:$0xff]  }
 0x525   : > { %v24551_v19 = vadd.f32 %v17570_v44, %v24327_v46  ;;  %v11947_v15 = vpop.f32.mrf.mxu0  ;;  %v14238_v34 = vsel %vm2862_vm5, %v14233_v47, %v14237_v6  ;;  %v14239_v44 = vshrl.u32 %v18391_v63, 16 }
 0x526   : > { %v11540_v53 = vpop.f32.mrf.mxu1  ;;  %v24554_v12 = vadd.f32 %v11947_v15, %v24334_v52 }
 0x527   : > { %v24557_v22 = vadd.f32 %v11540_v53, %v24338_v37  ;;  %v17602_v27 = vpop.f32.mrf.mxu0  ;;  %v26014_v53 = vld [vmem:[#allocation47_spill] sm:$0xff] }
 0x528   : > { %v17573_v39 = vpop.f32.mrf.mxu1  ;;  %v24563_v46 = vadd.f32 %v17602_v27, %v24346_v16  ;;  %v18395_v27 = vld [vmem:[#allocation3 + $0xc4] sm:$0xff]  }
 0x529   : > { %17828 = vmatmul.mubr.msk.bf16.gmra.mxu1 %vm895_vm4, %v14230_v7  ;;  %v24567_v52 = vadd.f32 %v17573_v39, %v24349_v62  ;;  %v11950_v37 = vpop.f32.mrf.mxu0  ;;  %v14247_v62 = vshrl.u32 %v18392_v32, 16  ;;  %v14253_v7 = vrot.slane %v14251_v31, 1  ;;  %v14241_v39 = vor.u32 %v14239_v44, %v14237_v6 }
 0x52a   : > { %17831 = vmatprep.mubr.msk.bf16.mxu1 %vm895_vm4, %v14238_v34  ;;  %v11553_v20 = vpop.f32.mrf.mxu1  ;;  %v24571_v51 = vadd.f32 %v11950_v37, %v24354_v43  ;;  %v26015_v34 = vld [vmem:[#allocation52_spill] sm:$0xff]  ;;  %v14267_v44 = vshll.u32 %v18395_v27, 16 }
 0x52b   : > { %26012 = vst [vmem:[#allocation79_spill] sm:$0xff] %v24567_v52  ;;  %v24574_v60 = vadd.f32 %v11553_v20, %v26013_v36  ;;  %v17605_v16 = vpop.f32.mrf.mxu0  ;;  %v14249_v63 = vor.u32 %v14247_v62, %v14245_v2  ;;  %v14259_v20 = vshll.u32 %v18394_v5, 16 }
 0x52c   : > { %v17574_v15 = vpop.f32.mrf.mxu1  ;;  %v24577_v47 = vadd.f32 %v17605_v16, %v26014_v53  ;;  %v14246_v16 = vsel %vm2862_vm5, %v14241_v39, %v14245_v2 }
 0x52d   : > { %v24580_v52 = vadd.f32 %v17574_v15, %v26015_v34  ;;  %v11963_v43 = vpop.f32.mrf.mxu0  ;;  %v14254_v6 = vsel %vm2862_vm5, %v14249_v63, %v14253_v7  ;;  %v18396_v15 = vld [vmem:[#allocation3 + $0xcc] sm:$0xff]   ;;  %v14261_v39 = vrot.slane %v14259_v20, 1  ;;  %v14255_v34 = vshrl.u32 %v24548_v17, 16 }
 0x52e   : > { %v11556_v37 = vpop.f32.mrf.mxu1  ;;  %v24583_v21 = vadd.f32 %v11963_v43, %v24376_v55  ;;  %v26020_v43 = vld [vmem:[#allocation48_spill] sm:$0xff] }
 0x52f   : > { %v24586_v36 = vadd.f32 %v11556_v37, %v24379_v4  ;;  %v17606_v53 = vpop.f32.mrf.mxu0 }
 0x530   : > { %26016 = vst [vmem:[#allocation12_spill] sm:$0xff] %v24583_v21  ;;  %v17577_v32 = vpop.f32.mrf.mxu1  ;;  %v24592_v31 = vadd.f32 %v17606_v53, %v24387_v11 }
 0x531   : > { %26017 = vst [vmem:[#allocation82_spill] sm:$0xff] %v24586_v36  ;;  %17832 = vmatmul.mubr.msk.bf16.gmra.mxu1 %vm895_vm4, %v14246_v16  ;;  %v24595_v55 = vadd.f32 %v17577_v32, %v24390_v1  ;;  %v11966_v4 = vpop.f32.mrf.mxu0  ;;  %v26021_v16 = vld [vmem:[#allocation19_spill] sm:$0xff]  ;;  %v14263_v1 = vshrl.u32 %v18394_v5, 16  ;;  %v14269_v32 = vrot.slane %v14267_v44, 1  ;;  %v26022_v36 = vld [vmem:[#allocation22_spill] sm:$0xff] }
 0x532   : > { %26018 = vst [vmem:[#allocation21_spill] sm:$0xff] %v24592_v31  ;;  %17835 = vmatprep.mubr.msk.bf16.mxu1 %vm895_vm4, %v14254_v6  ;;  %v11569_v62 = vpop.f32.mrf.mxu1  ;;  %v24599_v2 = vadd.f32 %v11966_v4, %v24394_v59  ;;  %v18397_v6 = vld [vmem:[#allocation3 + $0xd4] sm:$0xff]   ;;  %v14257_v31 = vor.u32 %v14255_v34, %v14253_v7 }
 0x533   : > { %26019 = vst [vmem:[#allocation80_spill] sm:$0xff] %v24595_v55  ;;  %v24603_v37 = vadd.f32 %v11569_v62, %v26020_v43  ;;  %v17609_v11 = vpop.f32.mrf.mxu0  ;;  %v14275_v55 = vshll.u32 %v18396_v15, 16  ;;  %v14265_v4 = vor.u32 %v14263_v1, %v14261_v39  ;;  %v14283_v34 = vshll.u32 %v18397_v6, 16 }
 0x534   : > { %v17578_v63 = vpop.f32.mrf.mxu1  ;;  %v24606_v53 = vadd.f32 %v17609_v11, %v26021_v16  ;;  %v14262_v43 = vsel %vm2862_vm5, %v14257_v31, %v14261_v39  ;;  %v18398_v16 = vld [vmem:[#allocation3 + $0xdc] ss:$0 sps:$4 sm:$0x11]   ;;  %v14279_v1 = vshrl.u32 %v18396_v15, 16 }
 0x535   : > { %v24609_v21 = vadd.f32 %v17578_v63, %v26022_v36  ;;  %v11979_v59 = vpop.f32.mrf.mxu0  ;;  %v14270_v7 = vsel %vm2862_vm5, %v14265_v4, %v14269_v32  ;;  %v14277_v44 = vrot.slane %v14275_v55, 1  ;;  %v14271_v63 = vshrl.u32 %v18395_v27, 16 }
 0x536   : > { %v11572_v20 = vpop.f32.mrf.mxu1  ;;  %v24612_v17 = vadd.f32 %v11979_v59, %v24414_v33  ;;  %v14285_v27 = vrot.slane %v14283_v34, 1 }
 0x537   : > { %v24615_v62 = vadd.f32 %v11572_v20, %v24419_v48  ;;  %v17610_v11 = vpop.f32.mrf.mxu0  ;;  %v14273_v59 = vor.u32 %v14271_v63, %v14269_v32 }
 0x538   : > { %v17581_v5 = vpop.f32.mrf.mxu1  ;;  %v24621_v36 = vadd.f32 %v17610_v11, %v24425_v18 }
 0x539   : > { %17836 = vmatmul.mubr.msk.bf16.gmra.mxu1 %vm895_vm4, %v14262_v43  ;;  %v24624_v33 = vadd.f32 %v17581_v5, %v24428_v13  ;;  %v11982_v48 = vpop.f32.mrf.mxu0  ;;  %v14281_v13 = vor.u32 %v14279_v1, %v14277_v44  ;;  %v26024_v43 = vld [vmem:[#allocation77_spill] sm:$0xff]  ;;  %v14278_v32 = vsel %vm2862_vm5, %v14273_v59, %v14277_v44 }
 0x53a   : > { %17839 = vmatprep.mubr.msk.bf16.mxu1 %vm895_vm4, %v14270_v7  ;;  %v11585_v31 = vpop.f32.mrf.mxu1  ;;  %v24628_v39 = vadd.f32 %v11982_v48, %v24432_v38  ;;  %v14287_v7 = vshrl.u32 %v18397_v6, 16 }
 0x53b   : > { %26023 = vst [vmem:[#allocation15_spill] sm:$0xff] %v24624_v33  ;;  %v24631_v20 = vadd.f32 %v11585_v31, %v24436_v28  ;;  %v17613_v18 = vpop.f32.mrf.mxu0  ;;  %v14291_v33 = vshll.u32 %v18398_v16, 16  ;;  %v14286_v34 = vsel %vm2862_vm5, %v14281_v13, %v14285_v27 }
 0x53c   : > { %v17582_v55 = vpop.f32.mrf.mxu1  ;;  %v24634_v4 = vadd.f32 %v17613_v18, %v24442_v49  ;;  %v14289_v16 = vor.u32 %v14287_v7, %v14285_v27 }
 0x53d   : > { %v24637_v11 = vadd.f32 %v17582_v55, %v26024_v43  ;;  %v11995_v5 = vpop.f32.mrf.mxu0 }
 0x53e   : > { %v11588_v38 = vpop.f32.mrf.mxu1  ;;  %v24640_v15 = vadd.f32 %v11995_v5, %v24454_v54 }
 0x53f   : > { %v24643_v28 = vadd.f32 %v11588_v38, %v24457_v57  ;;  %v17614_v63 = vpop.f32.mrf.mxu0  ;;  %v14293_v57 = vrot.slane %v14291_v33, 1 }
 0x540   : > { %v17585_v49 = vpop.f32.mrf.mxu1  ;;  %v24649_v48 = vadd.f32 %v17614_v63, %v24463_v56 }
 0x541   : > { %17840 = vmatmul.mubr.msk.bf16.gmra.mxu1 %vm895_vm4, %v14278_v32  ;;  %v24652_v6 = vadd.f32 %v17585_v49, %v24467_v41  ;;  %v11998_v54 = vpop.f32.mrf.mxu0  ;;  %v14294_v55 = vsel %vm2862_vm5, %v14289_v16, %v14293_v57 }
 0x542   : > { %17843 = vmatprep.mubr.msk.bf16.mxu1 %vm895_vm4, %v14286_v34  ;;  %v11601_v31 = vpop.f32.mrf.mxu1  ;;  %v24656_v44 = vadd.f32 %v11998_v54, %v24471_v26 }
 0x543   : > { %v24659_v1 = vadd.f32 %v11601_v31, %v24475_v40  ;;  %v17617_v59 = vpop.f32.mrf.mxu0 }
 0x544   : > { %v17586_v18 = vpop.f32.mrf.mxu1  ;;  %v24662_v56 = vadd.f32 %v17617_v59, %v24481_v30 }
 0x545   : > { %v24665_v41 = vadd.f32 %v17586_v18, %v24489_v8  ;;  %v12011_v13 = vpop.f32.mrf.mxu0 }
 0x546   : > { %v11604_v27 = vpop.f32.mrf.mxu1  ;;  %v24669_v33 = vadd.f32 %v12011_v13, %v24492_v35 }
 0x547   : > { %v24672_v26 = vadd.f32 %v11604_v27, %v24495_v42  ;;  %v17618_v40 = vpop.f32.mrf.mxu0 }
 0x548   : > { %v24676_v30 = vadd.f32 %v17618_v40, %v24500_v3 }
 0x549   : > { %v17589_v43 = vpop.f32.mrf.mxu1  ;;  %17844 = vmatmul.mubr.msk.bf16.gmra.mxu1 %vm895_vm4, %v14294_v55  ;;  %v12014_v5 = vpop.f32.mrf.mxu0 }
 0x54a   : > { %v24679_v8 = vadd.f32 %v17589_v43, %v24504_v9  ;;  %v24682_v38 = vadd.f32 %v12014_v5, %v24508_v61  ;;  %v26025_v43 = vld [vmem:[#allocation79_spill] sm:$0xff] }
 0x54b   : > { %v11617_v7 = vpop.f32.mrf.mxu1  ;;  %v17621_v42 = vpop.f32.mrf.mxu0 }
 0x54c   : > { %v24685_v35 = vadd.f32 %v11617_v7, %v24513_v0  ;;  %v24688_v63 = vadd.f32 %v17621_v42, %v24517_v25 }
 0x54d   : > { %v17590_v32 = vpop.f32.mrf.mxu1  ;;  %v12027_v3 = vpop.f32.mrf.mxu0 }
 0x54e   : > { %v24691_v49 = vadd.f32 %v17590_v32, %v24520_v24  ;;  %v24694_v9 = vadd.f32 %v12027_v3, %v24523_v29 }
 0x54f   : > { %v11620_v34 = vpop.f32.mrf.mxu1  ;;  %v17622_v61 = vpop.f32.mrf.mxu0 }
 0x550   : > { %v24697_v16 = vadd.f32 %v11620_v34, %v24526_v14  ;;  %v24700_v0 = vadd.f32 %v17622_v61, %v24532_v50  ;;  %v26026_v61 = vld [vmem:[#allocation12_spill] sm:$0xff] }
 0x551   : > { %v17633_v54 = vpop.f32.mrf.mxu1  ;;  %v12030_v25 = vpop.f32.mrf.mxu0 }
 0x552   : > { %v24703_v57 = vadd.f32 %v17633_v54, %v24535_v23  ;;  %v24706_v24 = vadd.f32 %v12030_v25, %v24539_v10  ;;  %v26027_v25 = vld [vmem:[#allocation82_spill] sm:$0xff] }
 0x553   : > { %v12324_v31 = vpop.f32.mrf.mxu1  ;;  %v17665_v29 = vpop.f32.mrf.mxu0 }
 0x554   : > { %v24709_v59 = vadd.f32 %v12324_v31, %v24543_v58  ;;  %v24712_v14 = vadd.f32 %v17665_v29, %v24546_v45 }
 0x555   : > { %v17634_v18 = vpop.f32.mrf.mxu1  ;;  %v12750_v50 = vpop.f32.mrf.mxu0 }
 0x556   : > { %v24715_v55 = vadd.f32 %v17634_v18, %v24551_v19  ;;  %v24718_v23 = vadd.f32 %v12750_v50, %v24554_v12  ;;  %v26029_v50 = vld [vmem:[#allocation80_spill] sm:$0xff] }
 0x557   : > { %v12327_v13 = vpop.f32.mrf.mxu1  ;;  %v17666_v10 = vpop.f32.mrf.mxu0 }
 0x558   : > { %v24721_v27 = vadd.f32 %v12327_v13, %v24557_v22  ;;  %v24724_v58 = vadd.f32 %v17666_v10, %v24563_v46 }
 0x559   : > { %v17637_v40 = vpop.f32.mrf.mxu1  ;;  %v12753_v45 = vpop.f32.mrf.mxu0 }
 0x55a   : > { %v24727_v5 = vadd.f32 %v17637_v40, %v26025_v43  ;;  %v24730_v19 = vadd.f32 %v12753_v45, %v24571_v51 }
 0x55b   : > { %v12340_v7 = vpop.f32.mrf.mxu1  ;;  %v17669_v12 = vpop.f32.mrf.mxu0 }
 0x55c   : > { %v24733_v42 = vadd.f32 %v12340_v7, %v24574_v60  ;;  %v24736_v22 = vadd.f32 %v17669_v12, %v24577_v47  ;;  %v26028_v60 = vld [vmem:[#allocation21_spill] sm:$0xff] }
 0x55d   : > { %v17638_v32 = vpop.f32.mrf.mxu1  ;;  %v12766_v46 = vpop.f32.mrf.mxu0 }
 0x55e   : > { %v24739_v3 = vadd.f32 %v17638_v32, %v24580_v52  ;;  %v24742_v54 = vadd.f32 %v12766_v46, %v26026_v61 }
 0x55f   : > { %v12343_v34 = vpop.f32.mrf.mxu1  ;;  %v17670_v51 = vpop.f32.mrf.mxu0 }
 0x560   : > { %v24745_v31 = vadd.f32 %v12343_v34, %v26027_v25  ;;  %v24748_v18 = vadd.f32 %v17670_v51, %v26028_v60  ;;  %v26030_v51 = vld [vmem:[#allocation15_spill] sm:$0xff] }
 0x561   : > { %v17641_v29 = vpop.f32.mrf.mxu1  ;;  %v12769_v47 = vpop.f32.mrf.mxu0 }
 0x562   : > { %v24751_v13 = vadd.f32 %v17641_v29, %v26029_v50  ;;  %v24754_v52 = vadd.f32 %v12769_v47, %v24599_v2 }
 0x563   : > { %v12356_v10 = vpop.f32.mrf.mxu1  ;;  %v17673_v43 = vpop.f32.mrf.mxu0 }
 0x564   : > { %v24757_v40 = vadd.f32 %v12356_v10, %v24603_v37  ;;  %v24760_v7 = vadd.f32 %v17673_v43, %v24606_v53 }
 0x565   : > { %v17642_v45 = vpop.f32.mrf.mxu1  ;;  %v12782_v32 = vpop.f32.mrf.mxu0 }
 0x566   : > { %v24763_v12 = vadd.f32 %v17642_v45, %v24609_v21  ;;  %v24766_v34 = vadd.f32 %v12782_v32, %v24612_v17 }
 0x567   : > { %v12359_v46 = vpop.f32.mrf.mxu1  ;;  %v17674_v2 = vpop.f32.mrf.mxu0 }
 0x568   : > { %v24769_v61 = vadd.f32 %v12359_v46, %v24615_v62  ;;  %v24772_v37 = vadd.f32 %v17674_v2, %v24621_v36 }
 0x569   : > { %v17645_v25 = vpop.f32.mrf.mxu1  ;;  %v12785_v53 = vpop.f32.mrf.mxu0 }
 0x56a   : > { %v24775_v29 = vadd.f32 %v17645_v25, %v26030_v51  ;;  %v24778_v21 = vadd.f32 %v12785_v53, %v24628_v39 }
 0x56b   : > { %v12372_v60 = vpop.f32.mrf.mxu1  ;;  %v17677_v17 = vpop.f32.mrf.mxu0 }
 0x56c   : > { %v24781_v50 = vadd.f32 %v12372_v60, %v24631_v20  ;;  %v24784_v62 = vadd.f32 %v17677_v17, %v24634_v4 }
 0x56d   : > { %v17646_v47 = vpop.f32.mrf.mxu1  ;;  %v12798_v36 = vpop.f32.mrf.mxu0 }
 0x56e   : > { %v24787_v10 = vadd.f32 %v17646_v47, %v24637_v11  ;;  %v24790_v45 = vadd.f32 %v12798_v36, %v24640_v15 }
 0x56f   : > { %v12375_v43 = vpop.f32.mrf.mxu1  ;;  %v17678_v39 = vpop.f32.mrf.mxu0 }
 0x570   : > { %v24793_v32 = vadd.f32 %v12375_v43, %v24643_v28  ;;  %v24796_v20 = vadd.f32 %v17678_v39, %v24649_v48 }
 0x571   : > { %v17649_v46 = vpop.f32.mrf.mxu1  ;;  %v12801_v4 = vpop.f32.mrf.mxu0 }
 0x572   : > { %v24799_v2 = vadd.f32 %v17649_v46, %v24652_v6  ;;  %v24802_v11 = vadd.f32 %v12801_v4, %v24656_v44 }
 0x573   : > { %v12388_v25 = vpop.f32.mrf.mxu1  ;;  %v17681_v15 = vpop.f32.mrf.mxu0 }
 0x574   : > { %v24805_v51 = vadd.f32 %v12388_v25, %v24659_v1  ;;  %v24808_v28 = vadd.f32 %v17681_v15, %v24662_v56 }
 0x575   : > { %v17650_v53 = vpop.f32.mrf.mxu1  ;;  %v12814_v48 = vpop.f32.mrf.mxu0 }
 0x576   : > { %v24811_v60 = vadd.f32 %v17650_v53, %v24665_v41  ;;  %v24814_v6 = vadd.f32 %v12814_v48, %v24669_v33 }
 0x577   : > { %v12391_v17 = vpop.f32.mrf.mxu1  ;;  %v17682_v44 = vpop.f32.mrf.mxu0 }
 0x578   : > { %v24817_v47 = vadd.f32 %v12391_v17, %v24672_v26  ;;  %v24820_v1 = vadd.f32 %v17682_v44, %v24676_v30 }
 0x579   : > { %v17653_v36 = vpop.f32.mrf.mxu1  ;;  %v12817_v56 = vpop.f32.mrf.mxu0 }
 0x57a   : > { %v24823_v43 = vadd.f32 %v17653_v36, %v24679_v8  ;;  %v24826_v41 = vadd.f32 %v12817_v56, %v24682_v38 }
 0x57b   : > { %v12404_v39 = vpop.f32.mrf.mxu1  ;;  %v17685_v33 = vpop.f32.mrf.mxu0 }
 0x57c   : > { %v24829_v46 = vadd.f32 %v12404_v39, %v24685_v35  ;;  %v24832_v26 = vadd.f32 %v17685_v33, %v24688_v63 }
 0x57d   : > { %v17654_v4 = vpop.f32.mrf.mxu1  ;;  %v12830_v30 = vpop.f32.mrf.mxu0 }
 0x57e   : > { %v24835_v25 = vadd.f32 %v17654_v4, %v24691_v49  ;;  %v24838_v8 = vadd.f32 %v12830_v30, %v24694_v9 }
 0x57f   : > { %v12407_v15 = vpop.f32.mrf.mxu1  ;;  %v17686_v38 = vpop.f32.mrf.mxu0 }
 0x580   : > { %v24841_v53 = vadd.f32 %v12407_v15, %v24697_v16  ;;  %v24844_v35 = vadd.f32 %v17686_v38, %v24700_v0 }
 0x581   : > { %v17697_v48 = vpop.f32.mrf.mxu1  ;;  %v12833_v63 = vpop.f32.mrf.mxu0 }
 0x582   : > { %v24847_v17 = vadd.f32 %v17697_v48, %v24703_v57  ;;  %v24850_v49 = vadd.f32 %v12833_v63, %v24706_v24 }
 0x583   : > { %v13143_v44 = vpop.f32.mrf.mxu1  ;;  %v24855_v9 = vpop.f32.mrf.mxu0 }
 0x584   : > { %v24853_v36 = vadd.f32 %v13143_v44, %v24709_v59 }
 0x585   : > { %v17698_v16 = vpop.f32.mrf.mxu1  ;;  %v24860_v39 = vpop.f32.mrf.mxu0 }
 0x586   : > { %v24858_v56 = vadd.f32 %v17698_v16, %v24715_v55 }
 0x587   : > { %v13146_v0 = vpop.f32.mrf.mxu1  ;;  %v24865_v33 = vpop.f32.mrf.mxu0 }
 0x588   : > { %v24863_v57 = vadd.f32 %v13146_v0, %v24721_v27 }
 0x589   : > { %v17701_v4 = vpop.f32.mrf.mxu1  ;;  %v24870_v59 = vpop.f32.mrf.mxu0 }
 0x58a   : > { %26031 = vst [vmem:[#allocation20_spill] sm:$0xff] %v24863_v57  ;;  %v24868_v24 = vadd.f32 %v17701_v4, %v24727_v5 }
 0x58b   : > { %v13159_v30 = vpop.f32.mrf.mxu1 }
 0x58c   : > { %26032 = vst [vmem:[#allocation62_spill] sm:$0xff] %v24868_v24  ;;  %v24873_v15 = vadd.f32 %v13159_v30, %v24733_v42  ;;  %v24875_v55 = vpop.f32.mrf.mxu0 }
 0x58d   : > { %v17702_v38 = vpop.f32.mrf.mxu1 }
 0x58e   : > { %26033 = vst [vmem:[#allocation9_spill] sm:$0xff] %v24873_v15  ;;  %v24878_v48 = vadd.f32 %v17702_v38, %v24739_v3  ;;  %v24880_v27 = vpop.f32.mrf.mxu0 }
 0x58f   : > { %v13162_v63 = vpop.f32.mrf.mxu1 }
 0x590   : > { %26034 = vst [vmem:[#allocation4_spill] sm:$0xff] %v24878_v48  ;;  %v24883_v44 = vadd.f32 %v13162_v63, %v24745_v31  ;;  %v24885_v5 = vpop.f32.mrf.mxu0 }
 0x591   : > { %v17705_v16 = vpop.f32.mrf.mxu1 }
 0x592   : > { %26035 = vst [vmem:[#allocation10_spill] sm:$0xff] %v24883_v44  ;;  %v24888_v0 = vadd.f32 %v17705_v16, %v24751_v13  ;;  %v24890_v42 = vpop.f32.mrf.mxu0 }
 0x593   : > { %v13175_v4 = vpop.f32.mrf.mxu1 }
 0x594   : > { %26036 = vst [vmem:[#allocation31_spill] sm:$0xff] %v24888_v0  ;;  %v24893_v30 = vadd.f32 %v13175_v4, %v24757_v40  ;;  %v24895_v3 = vpop.f32.mrf.mxu0 }
 0x595   : > { %v17706_v38 = vpop.f32.mrf.mxu1 }
 0x596   : > { %26037 = vst [vmem:[#allocation54_spill] sm:$0xff] %v24893_v30  ;;  %v24898_v48 = vadd.f32 %v17706_v38, %v24763_v12  ;;  %v24900_v31 = vpop.f32.mrf.mxu0 }
 0x597   : > { %v13178_v63 = vpop.f32.mrf.mxu1 }
 0x598   : > { %26038 = vst [vmem:[#allocation85_spill] sm:$0xff] %v24898_v48  ;;  %v24903_v44 = vadd.f32 %v13178_v63, %v24769_v61  ;;  %v24905_v13 = vpop.f32.mrf.mxu0 }
 0x599   : > { %v17709_v16 = vpop.f32.mrf.mxu1 }
 0x59a   : > { %26039 = vst [vmem:[#allocation90_spill] sm:$0xff] %v24903_v44  ;;  %v24908_v0 = vadd.f32 %v17709_v16, %v24775_v29  ;;  %v24910_v40 = vpop.f32.mrf.mxu0 }
 0x59b   : > { %v13191_v4 = vpop.f32.mrf.mxu1 }
 0x59c   : > { %26040 = vst [vmem:[#allocation83_spill] sm:$0xff] %v24908_v0  ;;  %v24913_v30 = vadd.f32 %v13191_v4, %v24781_v50  ;;  %v24915_v12 = vpop.f32.mrf.mxu0 }
 0x59d   : > { %v17710_v38 = vpop.f32.mrf.mxu1 }
 0x59e   : > { %26041 = vst [vmem:[#allocation34_spill] sm:$0xff] %v24913_v30  ;;  %v24918_v48 = vadd.f32 %v17710_v38, %v24787_v10  ;;  %v24920_v61 = vpop.f32.mrf.mxu0 }
 0x59f   : > { %v13194_v63 = vpop.f32.mrf.mxu1 }
 0x5a0   : > { %26042 = vst [vmem:[#allocation55_spill] sm:$0xff] %v24918_v48  ;;  %v24923_v44 = vadd.f32 %v13194_v63, %v24793_v32  ;;  %v24925_v29 = vpop.f32.mrf.mxu0 }
 0x5a1   : > { %v17713_v16 = vpop.f32.mrf.mxu1 }
 0x5a2   : > { %26043 = vst [vmem:[#allocation65_spill] sm:$0xff] %v24923_v44  ;;  %v24928_v0 = vadd.f32 %v17713_v16, %v24799_v2  ;;  %v24930_v50 = vpop.f32.mrf.mxu0 }
 0x5a3   : > { %v13207_v4 = vpop.f32.mrf.mxu1 }
 0x5a4   : > { %26044 = vst [vmem:[#allocation57_spill] sm:$0xff] %v24928_v0  ;;  %v24933_v30 = vadd.f32 %v13207_v4, %v24805_v51  ;;  %v24935_v10 = vpop.f32.mrf.mxu0 }
 0x5a5   : > { %v17714_v38 = vpop.f32.mrf.mxu1 }
 0x5a6   : > { %26045 = vst [vmem:[#allocation60_spill] sm:$0xff] %v24933_v30  ;;  %v24938_v48 = vadd.f32 %v17714_v38, %v24811_v60  ;;  %v24940_v32 = vpop.f32.mrf.mxu0 }
 0x5a7   : > { %v13210_v63 = vpop.f32.mrf.mxu1 }
 0x5a8   : > { %26046 = vst [vmem:[#allocation56_spill] sm:$0xff] %v24938_v48  ;;  %v24943_v44 = vadd.f32 %v13210_v63, %v24817_v47  ;;  %v24945_v2 = vpop.f32.mrf.mxu0 }
 0x5a9   : > { %v17717_v16 = vpop.f32.mrf.mxu1 }
 0x5aa   : > { %26047 = vst [vmem:[#allocation8_spill] sm:$0xff] %v24943_v44  ;;  %v24948_v0 = vadd.f32 %v17717_v16, %v24823_v43  ;;  %v24950_v51 = vpop.f32.mrf.mxu0 }
 0x5ab   : > { %v13223_v4 = vpop.f32.mrf.mxu1 }
 0x5ac   : > { %26048 = vst [vmem:[#allocation87_spill] sm:$0xff] %v24948_v0  ;;  %v24953_v30 = vadd.f32 %v13223_v4, %v24829_v46  ;;  %v24955_v60 = vpop.f32.mrf.mxu0  ;;  %v13474_v4 = vadd.f32 %v24855_v9, %v24712_v14  ;;  %v13475_v0 = vadd.f32 %v24865_v33, %v24724_v58  ;;  %v14484_v9 = vld [vmem:[%s19007_s16] sm:$0xff]  ;;  %v13478_v33 = vadd.f32 %v24875_v55, %v24736_v22  ;;  %v14490_v55 = vld [vmem:[%s19007_s16 + $0x30] sm:$0xff] }
 0x5ad   : > { %v17718_v38 = vpop.f32.mrf.mxu1 }
 0x5ae   : > { %26049 = vst [vmem:[#allocation63_spill] sm:$0xff] %v24953_v30  ;;  %v24958_v48 = vadd.f32 %v17718_v38, %v24835_v25  ;;  %v24960_v47 = vpop.f32.mrf.mxu0  ;;  %v13472_v38 = vadd.f32 %v24860_v39, %v24718_v23  ;;  %v13473_v23 = vadd.f32 %v24870_v59, %v24730_v19  ;;  %v14485_v59 = vld [vmem:[%s19007_s16 + $0x8] sm:$0xff] }
 0x5af   : > { %v13226_v63 = vpop.f32.mrf.mxu1 }
 0x5b0   : > { %26050 = vst [vmem:[#allocation93_spill] sm:$0xff] %v24958_v48  ;;  %v24963_v44 = vadd.f32 %v13226_v63, %v24841_v53  ;;  %v24965_v43 = vpop.f32.mrf.mxu0 }
 0x5b1   : > { %v24967_v16 = vpop.f32.mrf.mxu1 }
 0x5b2   : > { %26051 = vst [vmem:[#allocation86_spill] sm:$0xff] %v24963_v44  ;;  %v24969_v46 = vpop.f32.mrf.mxu0  ;;  %v14486_v44 = vld [vmem:[%s19007_s16 + $0x10] sm:$0xff] }
 0x5b3   : > { %v24973_v30 = vpop.f32.mrf.mxu1 }
 0x5b4   : > { %v17793_v25 = vpop.f32.mrf.mxu0 }
 0x5b5   : > { %v24977_v53 = vpop.f32.mrf.mxu1  ;;  %v14085_v63 = vadd.f32 %v17793_v25, %v13474_v4 }
 0x5b6   : > { %26052 = vst [vmem:[#allocation64_spill] sm:$0xff] %v24977_v53  ;;  %v13988_v48 = vpop.f32.mrf.mxu0  ;;  %v14487_v53 = vld [vmem:[%s19007_s16 + $0x18] sm:$0xff] }
 0x5b7   : > { %v24982_v15 = vpop.f32.mrf.mxu1  ;;  %v14510_v24 = vadd.f32 %v14486_v44, %v14085_v63  ;;  %v14083_v14 = vadd.f32 %v13988_v48, %v13472_v38  ;;  %v13476_v38 = vadd.f32 %v24880_v27, %v24742_v54  ;;  %v14488_v27 = vld [vmem:[%s19007_s16 + $0x20] sm:$0xff] }
 0x5b8   : > { %v17794_v57 = vpop.f32.mrf.mxu0 }
 0x5b9   : > { %14534 = vst.msk [vmem:[%s19007_s16 + $0x10] sm:$0xff] %vm895_vm4, %v14510_v24  ;;  %v24989_v39 = vpop.f32.mrf.mxu1  ;;  %v14508_v4 = vadd.f32 %v14484_v9, %v14083_v14  ;;  %v14086_v25 = vadd.f32 %v17794_v57, %v13475_v0 }
 0x5ba   : > { %v13991_v58 = vpop.f32.mrf.mxu0 }
 0x5bb   : > { %14532 = vst.msk [vmem:[%s19007_s16] sm:$0xff] %vm895_vm4, %v14508_v4  ;;  %v24996_v48 = vpop.f32.mrf.mxu1  ;;  %v14511_v44 = vadd.f32 %v14487_v53, %v14086_v25  ;;  %v14084_v19 = vadd.f32 %v13991_v58, %v13473_v23  ;;  %v13479_v53 = vadd.f32 %v24885_v5, %v24748_v18  ;;  %v13477_v4 = vadd.f32 %v24890_v42, %v24754_v52  ;;  %v14491_v5 = vld [vmem:[%s19007_s16 + $0x38] sm:$0xff]  ;;  %v14489_v42 = vld [vmem:[%s19007_s16 + $0x28] sm:$0xff] }
 0x5bc   : > { %v17797_v24 = vpop.f32.mrf.mxu0 }
 0x5bd   : > { %14535 = vst.msk [vmem:[%s19007_s16 + $0x18] sm:$0xff] %vm895_vm4, %v14511_v44  ;;  %v25003_v57 = vpop.f32.mrf.mxu1  ;;  %v14509_v0 = vadd.f32 %v14485_v59, %v14084_v19  ;;  %v14089_v22 = vadd.f32 %v17797_v24, %v13478_v33  ;;  %v13482_v44 = vadd.f32 %v24895_v3, %v24760_v7  ;;  %v14494_v3 = vld [vmem:[%s19007_s16 + $0x50] sm:$0xff] }
 0x5be   : > { %v14004_v63 = vpop.f32.mrf.mxu0 }
 0x5bf   : > { %14533 = vst.msk [vmem:[%s19007_s16 + $0x8] sm:$0xff] %vm895_vm4, %v14509_v0  ;;  %v25010_v14 = vpop.f32.mrf.mxu1  ;;  %v14514_v9 = vadd.f32 %v14490_v55, %v14089_v22  ;;  %v14087_v54 = vadd.f32 %v14004_v63, %v13476_v38  ;;  %v13480_v38 = vadd.f32 %v24900_v31, %v24766_v34  ;;  %v13483_v63 = vadd.f32 %v24905_v13, %v24772_v37  ;;  %v14492_v31 = vld [vmem:[%s19007_s16 + $0x40] sm:$0xff]  ;;  %v14495_v13 = vld [vmem:[%s19007_s16 + $0x58] sm:$0xff] }
 0x5c0   : > { %v17798_v23 = vpop.f32.mrf.mxu0 }
 0x5c1   : > { %14538 = vst.msk [vmem:[%s19007_s16 + $0x30] sm:$0xff] %vm895_vm4, %v14514_v9  ;;  %v25017_v25 = vpop.f32.mrf.mxu1  ;;  %v14512_v58 = vadd.f32 %v14488_v27, %v14087_v54  ;;  %v14090_v18 = vadd.f32 %v17798_v23, %v13479_v53  ;;  %v13481_v27 = vadd.f32 %v24910_v40, %v24778_v21  ;;  %v14493_v40 = vld [vmem:[%s19007_s16 + $0x48] sm:$0xff] }
 0x5c2   : > { %v14007_v33 = vpop.f32.mrf.mxu0 }
 0x5c3   : > { %14536 = vst.msk [vmem:[%s19007_s16 + $0x20] sm:$0xff] %vm895_vm4, %v14512_v58  ;;  %v25024_v19 = vpop.f32.mrf.mxu1  ;;  %v14515_v59 = vadd.f32 %v14491_v5, %v14090_v18  ;;  %v14088_v52 = vadd.f32 %v14007_v33, %v13477_v4  ;;  %v13486_v18 = vadd.f32 %v24915_v12, %v24784_v62  ;;  %v14498_v12 = vld [vmem:[%s19007_s16 + $0x70] sm:$0xff] }
 0x5c4   : > { %v17801_v24 = vpop.f32.mrf.mxu0 }
 0x5c5   : > { %14539 = vst.msk [vmem:[%s19007_s16 + $0x38] sm:$0xff] %vm895_vm4, %v14515_v59  ;;  %v25031_v0 = vpop.f32.mrf.mxu1  ;;  %v14513_v22 = vadd.f32 %v14489_v42, %v14088_v52  ;;  %v14093_v7 = vadd.f32 %v17801_v24, %v13482_v44  ;;  %v13484_v59 = vadd.f32 %v24920_v61, %v24790_v45  ;;  %v14496_v61 = vld [vmem:[%s19007_s16 + $0x60] sm:$0xff] }
 0x5c6   : > { %v14020_v55 = vpop.f32.mrf.mxu0 }
 0x5c7   : > { %14537 = vst.msk [vmem:[%s19007_s16 + $0x28] sm:$0xff] %vm895_vm4, %v14513_v22  ;;  %v25038_v53 = vpop.f32.mrf.mxu1  ;;  %v14518_v9 = vadd.f32 %v14494_v3, %v14093_v7  ;;  %v14091_v34 = vadd.f32 %v14020_v55, %v13480_v38  ;;  %v13487_v38 = vadd.f32 %v24925_v29, %v24796_v20  ;;  %v13485_v55 = vadd.f32 %v24930_v50, %v24802_v11  ;;  %v14499_v29 = vld [vmem:[%s19007_s16 + $0x78] sm:$0xff]  ;;  %v14497_v50 = vld [vmem:[%s19007_s16 + $0x68] sm:$0xff] }
 0x5c8   : > { %v17802_v54 = vpop.f32.mrf.mxu0 }
 0x5c9   : > { %14542 = vst.msk [vmem:[%s19007_s16 + $0x50] sm:$0xff] %vm895_vm4, %v14518_v9  ;;  %v25045_v23 = vpop.f32.mrf.mxu1  ;;  %v14516_v4 = vadd.f32 %v14492_v31, %v14091_v34  ;;  %v14094_v37 = vadd.f32 %v17802_v54, %v13483_v63  ;;  %v13490_v31 = vadd.f32 %v24935_v10, %v24808_v28  ;;  %v14502_v10 = vld [vmem:[%s19007_s16 + $0x90] sm:$0xff] }
 0x5ca   : > { %v14023_v58 = vpop.f32.mrf.mxu0 }
 0x5cb   : > { %14540 = vst.msk [vmem:[%s19007_s16 + $0x40] sm:$0xff] %vm895_vm4, %v14516_v4  ;;  %v25052_v5 = vpop.f32.mrf.mxu1  ;;  %v14519_v33 = vadd.f32 %v14495_v13, %v14094_v37  ;;  %v14092_v21 = vadd.f32 %v14023_v58, %v13481_v27  ;;  %v13488_v37 = vadd.f32 %v24940_v32, %v24814_v6  ;;  %v14500_v32 = vld [vmem:[%s19007_s16 + $0x80] sm:$0xff] }
 0x5cc   : > { %v17805_v44 = vpop.f32.mrf.mxu0 }
 0x5cd   : > { %14543 = vst.msk [vmem:[%s19007_s16 + $0x58] sm:$0xff] %vm895_vm4, %v14519_v33  ;;  %v25059_v52 = vpop.f32.mrf.mxu1  ;;  %v14517_v42 = vadd.f32 %v14493_v40, %v14092_v21  ;;  %v14097_v62 = vadd.f32 %v17805_v44, %v13486_v18  ;;  %v13491_v33 = vadd.f32 %v24945_v2, %v24820_v1  ;;  %v14503_v2 = vld [vmem:[%s19007_s16 + $0x98] sm:$0xff] }
 0x5ce   : > { %v14036_v24 = vpop.f32.mrf.mxu0 }
 0x5cf   : > { %14541 = vst.msk [vmem:[%s19007_s16 + $0x48] sm:$0xff] %vm895_vm4, %v14517_v42  ;;  %v25066_v22 = vpop.f32.mrf.mxu1  ;;  %v14522_v7 = vadd.f32 %v14498_v12, %v14097_v62  ;;  %v14095_v45 = vadd.f32 %v14036_v24, %v13484_v59  ;;  %v13489_v59 = vadd.f32 %v24950_v51, %v24826_v41  ;;  %v13494_v24 = vadd.f32 %v24955_v60, %v24832_v26  ;;  %v14501_v41 = vld [vmem:[%s19007_s16 + $0x88] sm:$0xff]  ;;  %v14506_v26 = vld [vmem:[%s19007_s16 + $0xb0] sm:$0xff] }
 0x5d0   : > { %v17806_v3 = vpop.f32.mrf.mxu0 }
 0x5d1   : > { %14546 = vst.msk [vmem:[%s19007_s16 + $0x70] sm:$0xff] %vm895_vm4, %v14522_v7  ;;  %v25073_v63 = vpop.f32.mrf.mxu1  ;;  %v14520_v9 = vadd.f32 %v14496_v61, %v14095_v45  ;;  %v14098_v20 = vadd.f32 %v17806_v3, %v13487_v38  ;;  %v13492_v61 = vadd.f32 %v24960_v47, %v24838_v8 }
 0x5d2   : > { %v14039_v34 = vpop.f32.mrf.mxu0 }
 0x5d3   : > { %14544 = vst.msk [vmem:[%s19007_s16 + $0x60] sm:$0xff] %vm895_vm4, %v14520_v9  ;;  %v25080_v54 = vpop.f32.mrf.mxu1  ;;  %v14523_v27 = vadd.f32 %v14499_v29, %v14098_v20  ;;  %v14096_v11 = vadd.f32 %v14039_v34, %v13485_v55  ;;  %v13495_v20 = vadd.f32 %v24965_v43, %v24844_v35  ;;  %v13675_v34 = vadd.f32 %v24967_v16, %v24847_v17  ;;  %v14558_v16 = vld [vmem:[%s19007_s16 + $0xd0] sm:$0xff] }
 0x5d4   : > { %v17809_v4 = vpop.f32.mrf.mxu0 }
 0x5d5   : > { %14547 = vst.msk [vmem:[%s19007_s16 + $0x78] sm:$0xff] %vm895_vm4, %v14523_v27  ;;  %v25087_v13 = vpop.f32.mrf.mxu1  ;;  %v14521_v58 = vadd.f32 %v14497_v50, %v14096_v11  ;;  %v14101_v28 = vadd.f32 %v17809_v4, %v13490_v31  ;;  %v14504_v31 = vld [vmem:[%s19007_s16 + $0xa0] sm:$0xff]  ;;  %v13493_v11 = vadd.f32 %v24969_v46, %v24850_v49  ;;  %v13673_v4 = vadd.f32 %v24973_v30, %v24853_v36 }
 0x5d6   : > { %v14052_v18 = vpop.f32.mrf.mxu0  ;;  %v14556_v36 = vld [vmem:[%s19007_s16 + $0xc0] sm:$0xff] }
 0x5d7   : > { %14545 = vst.msk [vmem:[%s19007_s16 + $0x68] sm:$0xff] %vm895_vm4, %v14521_v58  ;;  %v25094_v21 = vpop.f32.mrf.mxu1  ;;  %v14526_v40 = vadd.f32 %v14502_v10, %v14101_v28  ;;  %v14099_v6 = vadd.f32 %v14052_v18, %v13488_v37  ;;  %v14507_v58 = vld [vmem:[%s19007_s16 + $0xb8] sm:$0xff]  ;;  %v26053_v10 = vld [vmem:[#allocation64_spill] sm:$0xff] }
 0x5d8   : > { %v17810_v44 = vpop.f32.mrf.mxu0  ;;  %v13676_v18 = vadd.f32 %v26053_v10, %v24858_v56  ;;  %v14559_v56 = vld [vmem:[%s19007_s16 + $0xd8] sm:$0xff]  ;;  %v14566_v10 = vld [vmem:[%s19007_s16 + $0x110] sm:$0xff] }
 0x5d9   : > { %14550 = vst.msk [vmem:[%s19007_s16 + $0x90] sm:$0xff] %vm895_vm4, %v14526_v40  ;;  %v25101_v42 = vpop.f32.mrf.mxu1  ;;  %v14524_v62 = vadd.f32 %v14500_v32, %v14099_v6  ;;  %v14102_v1 = vadd.f32 %v17810_v44, %v13491_v33  ;;  %v14505_v6 = vld [vmem:[%s19007_s16 + $0xa8] sm:$0xff] }
 0x5da   : > { %v14055_v12 = vpop.f32.mrf.mxu0  ;;  %v26054_v44 = vld [vmem:[#allocation20_spill] sm:$0xff] }
 0x5db   : > { %14548 = vst.msk [vmem:[%s19007_s16 + $0x80] sm:$0xff] %vm895_vm4, %v14524_v62  ;;  %v25108_v38 = vpop.f32.mrf.mxu1  ;;  %v14527_v7 = vadd.f32 %v14503_v2, %v14102_v1  ;;  %v14100_v45 = vadd.f32 %v14055_v12, %v13489_v59  ;;  %v13674_v59 = vadd.f32 %v24982_v15, %v26054_v44  ;;  %v26055_v12 = vld [vmem:[#allocation62_spill] sm:$0xff]  ;;  %v14557_v15 = vld [vmem:[%s19007_s16 + $0xc8] sm:$0xff] }
 0x5dc   : > { %v17813_v51 = vpop.f32.mrf.mxu0 }
 0x5dd   : > { %14551 = vst.msk [vmem:[%s19007_s16 + $0x98] sm:$0xff] %vm895_vm4, %v14527_v7  ;;  %v25115_v3 = vpop.f32.mrf.mxu1  ;;  %v14525_v55 = vadd.f32 %v14501_v41, %v14100_v45  ;;  %v14105_v9 = vadd.f32 %v17813_v51, %v13494_v24  ;;  %v13679_v24 = vadd.f32 %v24989_v39, %v26055_v12  ;;  %v26056_v51 = vld [vmem:[#allocation9_spill] sm:$0xff]  ;;  %v26057_v39 = vld [vmem:[#allocation4_spill] sm:$0xff] }
 0x5de   : > { %v14068_v60 = vpop.f32.mrf.mxu0 }
 0x5df   : > { %14549 = vst.msk [vmem:[%s19007_s16 + $0x88] sm:$0xff] %vm895_vm4, %v14525_v55  ;;  %v25122_v29 = vpop.f32.mrf.mxu1  ;;  %v14530_v8 = vadd.f32 %v14506_v26, %v14105_v9  ;;  %v14103_v47 = vadd.f32 %v14068_v60, %v13492_v61  ;;  %v13677_v61 = vadd.f32 %v24996_v48, %v26056_v51  ;;  %v14562_v26 = vld [vmem:[%s19007_s16 + $0xf0] sm:$0xff]  ;;  %v26058_v48 = vld [vmem:[#allocation10_spill] sm:$0xff] }
 0x5e0   : > { %v17814_v27 = vpop.f32.mrf.mxu0  ;;  %v14570_v51 = vld [vmem:[%s19007_s16 + $0x130] sm:$0xff] }
 0x5e1   : > { %14554 = vst.msk [vmem:[%s19007_s16 + $0xb0] sm:$0xff] %vm895_vm4, %v14530_v8  ;;  %v17825_v35 = vpop.f32.mrf.mxu1  ;;  %v14528_v43 = vadd.f32 %v14504_v31, %v14103_v47  ;;  %v14106_v50 = vadd.f32 %v17814_v27, %v13495_v20  ;;  %v13680_v20 = vadd.f32 %v25003_v57, %v26057_v39  ;;  %v13678_v27 = vadd.f32 %v25010_v14, %v26058_v48  ;;  %v26059_v57 = vld [vmem:[#allocation31_spill] sm:$0xff]  ;;  %v26060_v14 = vld [vmem:[#allocation54_spill] sm:$0xff] }
 0x5e2   : > { %v14462_v37 = vadd.f32 %v17825_v35, %v13675_v34  ;;  %v14071_v17 = vpop.f32.mrf.mxu0  ;;  %v14560_v34 = vld [vmem:[%s19007_s16 + $0xe0] sm:$0xff] }
 0x5e3   : > { %14552 = vst.msk [vmem:[%s19007_s16 + $0xa0] sm:$0xff] %vm895_vm4, %v14528_v43  ;;  %v14365_v49 = vpop.f32.mrf.mxu1  ;;  %v14531_v46 = vadd.f32 %v14507_v58, %v14106_v50  ;;  %v14104_v28 = vadd.f32 %v14071_v17, %v13493_v11  ;;  %v14563_v43 = vld [vmem:[%s19007_s16 + $0xf8] sm:$0xff]  ;;  %v14561_v17 = vld [vmem:[%s19007_s16 + $0xe8] sm:$0xff] }
 0x5e4   : > { %v14582_v33 = vadd.f32 %v14558_v16, %v14462_v37  ;;  %v14460_v40 = vadd.f32 %v14365_v49, %v13673_v4  ;;  %v13683_v4 = vadd.f32 %v25017_v25, %v26059_v57  ;;  %v13681_v49 = vadd.f32 %v25024_v19, %v26060_v14  ;;  %v26061_v25 = vld [vmem:[#allocation85_spill] sm:$0xff]  ;;  %v26062_v19 = vld [vmem:[#allocation90_spill] sm:$0xff] }
 0x5e5   : > { %14555 = vst.msk [vmem:[%s19007_s16 + $0xb8] sm:$0xff] %vm895_vm4, %v14531_v46  ;;  %v17826_v30 = vpop.f32.mrf.mxu1  ;;  %v14529_v32 = vadd.f32 %v14505_v6, %v14104_v28 }
 0x5e6   : > { %14606 = vst.msk [vmem:[%s19007_s16 + $0xd0] sm:$0xff] %vm895_vm4, %v14582_v33  ;;  %v14580_v62 = vadd.f32 %v14556_v36, %v14460_v40  ;;  %v14463_v1 = vadd.f32 %v17826_v30, %v13676_v18  ;;  %v13684_v33 = vadd.f32 %v25031_v0, %v26061_v25  ;;  %v14564_v36 = vld [vmem:[%s19007_s16 + $0x100] sm:$0xff]  ;;  %v14575_v25 = vld [vmem:[%s19007_s16 + $0x158] sm:$0xff] }
 0x5e7   : > { %14553 = vst.msk [vmem:[%s19007_s16 + $0xa8] sm:$0xff] %vm895_vm4, %v14529_v32  ;;  %v14368_v2 = vpop.f32.mrf.mxu1  ;;  %v13682_v32 = vadd.f32 %v25038_v53, %v26062_v19  ;;  %v26063_v0 = vld [vmem:[#allocation83_spill] sm:$0xff]  ;;  %v26064_v53 = vld [vmem:[#allocation34_spill] sm:$0xff] }
 0x5e8   : > { %14604 = vst.msk [vmem:[%s19007_s16 + $0xc0] sm:$0xff] %vm895_vm4, %v14580_v62  ;;  %v14583_v7 = vadd.f32 %v14559_v56, %v14463_v1  ;;  %v14461_v45 = vadd.f32 %v14368_v2, %v13674_v59  ;;  %v14567_v62 = vld [vmem:[%s19007_s16 + $0x118] sm:$0xff]  ;;  %v13687_v56 = vadd.f32 %v25045_v23, %v26063_v0  ;;  %v26065_v23 = vld [vmem:[#allocation55_spill] sm:$0xff] }
 0x5e9   : > { %v17829_v41 = vpop.f32.mrf.mxu1 }
 0x5ea   : > { %14607 = vst.msk [vmem:[%s19007_s16 + $0xd8] sm:$0xff] %vm895_vm4, %v14583_v7  ;;  %v14581_v55 = vadd.f32 %v14557_v15, %v14461_v45  ;;  %v14466_v9 = vadd.f32 %v17829_v41, %v13679_v24  ;;  %v14565_v24 = vld [vmem:[%s19007_s16 + $0x108] sm:$0xff]  ;;  %v13685_v45 = vadd.f32 %v25052_v5, %v26064_v53  ;;  %v26066_v5 = vld [vmem:[#allocation65_spill] sm:$0xff] }
 0x5eb   : > { %v14381_v60 = vpop.f32.mrf.mxu1 }
 0x5ec   : > { %14605 = vst.msk [vmem:[%s19007_s16 + $0xc8] sm:$0xff] %vm895_vm4, %v14581_v55  ;;  %v14586_v8 = vadd.f32 %v14562_v26, %v14466_v9  ;;  %v14464_v47 = vadd.f32 %v14381_v60, %v13677_v61  ;;  %v13688_v55 = vadd.f32 %v25059_v52, %v26065_v23  ;;  %v14568_v60 = vld [vmem:[%s19007_s16 + $0x120] sm:$0xff]  ;;  %v26067_v52 = vld [vmem:[#allocation57_spill] sm:$0xff] }
 0x5ed   : > { %v17830_v31 = vpop.f32.mrf.mxu1  ;;  %v13691_v48 = vadd.f32 %v25073_v63, %v26067_v52  ;;  %v26069_v63 = vld [vmem:[#allocation56_spill] sm:$0xff] }
 0x5ee   : > { %14610 = vst.msk [vmem:[%s19007_s16 + $0xf0] sm:$0xff] %vm895_vm4, %v14586_v8  ;;  %v14584_v11 = vadd.f32 %v14560_v34, %v14464_v47  ;;  %v14467_v35 = vadd.f32 %v17830_v31, %v13680_v20  ;;  %v13686_v20 = vadd.f32 %v25066_v22, %v26066_v5  ;;  %v14571_v34 = vld [vmem:[%s19007_s16 + $0x138] sm:$0xff]  ;;  %v26068_v22 = vld [vmem:[#allocation60_spill] sm:$0xff] }
 0x5ef   : > { %v14384_v50 = vpop.f32.mrf.mxu1 }
 0x5f0   : > { %14608 = vst.msk [vmem:[%s19007_s16 + $0xe0] sm:$0xff] %vm895_vm4, %v14584_v11  ;;  %v14587_v37 = vadd.f32 %v14563_v43, %v14467_v35  ;;  %v14465_v58 = vadd.f32 %v14384_v50, %v13678_v27  ;;  %v14569_v35 = vld [vmem:[%s19007_s16 + $0x128] sm:$0xff]  ;;  %v13689_v50 = vadd.f32 %v25080_v54, %v26068_v22 }
 0x5f1   : > { %v17833_v16 = vpop.f32.mrf.mxu1  ;;  %v26070_v54 = vld [vmem:[#allocation8_spill] sm:$0xff] }
 0x5f2   : > { %14611 = vst.msk [vmem:[%s19007_s16 + $0xf8] sm:$0xff] %vm895_vm4, %v14587_v37  ;;  %v14585_v46 = vadd.f32 %v14561_v17, %v14465_v58  ;;  %v14470_v28 = vadd.f32 %v17833_v16, %v13683_v4  ;;  %v14574_v37 = vld [vmem:[%s19007_s16 + $0x150] sm:$0xff]  ;;  %v13692_v17 = vadd.f32 %v25087_v13, %v26069_v63  ;;  %v26071_v13 = vld [vmem:[#allocation87_spill] sm:$0xff] }
 0x5f3   : > { %v14397_v18 = vpop.f32.mrf.mxu1 }
 0x5f4   : > { %14609 = vst.msk [vmem:[%s19007_s16 + $0xe8] sm:$0xff] %vm895_vm4, %v14585_v46  ;;  %v14590_v40 = vadd.f32 %v14566_v10, %v14470_v28  ;;  %v14468_v6 = vadd.f32 %v14397_v18, %v13681_v49  ;;  %v14572_v49 = vld [vmem:[%s19007_s16 + $0x140] sm:$0xff]  ;;  %v13690_v28 = vadd.f32 %v25094_v21, %v26070_v54 }
 0x5f5   : > { %v17834_v30 = vpop.f32.mrf.mxu1  ;;  %v26072_v21 = vld [vmem:[#allocation63_spill] sm:$0xff] }
 0x5f6   : > { %14614 = vst.msk [vmem:[%s19007_s16 + $0x110] sm:$0xff] %vm895_vm4, %v14590_v40  ;;  %v14588_v44 = vadd.f32 %v14564_v36, %v14468_v6  ;;  %v14471_v59 = vadd.f32 %v17834_v30, %v13684_v33  ;;  %v13695_v40 = vadd.f32 %v25101_v42, %v26071_v13  ;;  %v14573_v30 = vld [vmem:[%s19007_s16 + $0x148] sm:$0xff]  ;;  %v26073_v42 = vld [vmem:[#allocation93_spill] sm:$0xff] }
 0x5f7   : > { %v14400_v1 = vpop.f32.mrf.mxu1  ;;  %v13696_v0 = vadd.f32 %v25115_v3, %v26073_v42 }
 0x5f8   : > { %14612 = vst.msk [vmem:[%s19007_s16 + $0x100] sm:$0xff] %vm895_vm4, %v14588_v44  ;;  %v14591_v2 = vadd.f32 %v14567_v62, %v14471_v59  ;;  %v14469_v12 = vadd.f32 %v14400_v1, %v13682_v32  ;;  %v13693_v32 = vadd.f32 %v25108_v38, %v26072_v21  ;;  %v14578_v62 = vld [vmem:[%s19007_s16 + $0x170] sm:$0xff] }
 0x5f9   : > { %v17837_v7 = vpop.f32.mrf.mxu1 }
 0x5fa   : > { %14615 = vst.msk [vmem:[%s19007_s16 + $0x118] sm:$0xff] %vm895_vm4, %v14591_v2  ;;  %v14589_v15 = vadd.f32 %v14565_v24, %v14469_v12  ;;  %v14474_v41 = vadd.f32 %v17837_v7, %v13687_v56  ;;  %v14576_v12 = vld [vmem:[%s19007_s16 + $0x160] sm:$0xff]  ;;  %v26074_v24 = vld [vmem:[#allocation86_spill] sm:$0xff] }
 0x5fb   : > { %v14413_v61 = vpop.f32.mrf.mxu1  ;;  %v13694_v7 = vadd.f32 %v25122_v29, %v26074_v24 }
 0x5fc   : > { %14613 = vst.msk [vmem:[%s19007_s16 + $0x108] sm:$0xff] %vm895_vm4, %v14589_v15  ;;  %v14594_v9 = vadd.f32 %v14570_v51, %v14474_v41  ;;  %v14472_v26 = vadd.f32 %v14413_v61, %v13685_v45  ;;  %v14579_v15 = vld [vmem:[%s19007_s16 + $0x178] sm:$0xff]  ;;  %v14577_v61 = vld [vmem:[%s19007_s16 + $0x168] sm:$0xff] }
 0x5fd   : > { %v17838_v39 = vpop.f32.mrf.mxu1 }
 0x5fe   : > { %14618 = vst.msk [vmem:[%s19007_s16 + $0x130] sm:$0xff] %vm895_vm4, %v14594_v9  ;;  %v14592_v8 = vadd.f32 %v14568_v60, %v14472_v26  ;;  %v14475_v47 = vadd.f32 %v17838_v39, %v13688_v55 }
 0x5ff   : > { %v14416_v31 = vpop.f32.mrf.mxu1 }
 0x600   : > { %14616 = vst.msk [vmem:[%s19007_s16 + $0x120] sm:$0xff] %vm895_vm4, %v14592_v8  ;;  %v14595_v27 = vadd.f32 %v14571_v34, %v14475_v47  ;;  %v14473_v11 = vadd.f32 %v14416_v31, %v13686_v20 }
 0x601   : > { %v17841_v43 = vpop.f32.mrf.mxu1 }
 0x602   : > { %14619 = vst.msk [vmem:[%s19007_s16 + $0x138] sm:$0xff] %vm895_vm4, %v14595_v27  ;;  %v14593_v57 = vadd.f32 %v14569_v35, %v14473_v11  ;;  %v14478_v4 = vadd.f32 %v17841_v43, %v13691_v48 }
 0x603   : > { %v14429_v58 = vpop.f32.mrf.mxu1 }
 0x604   : > { %14617 = vst.msk [vmem:[%s19007_s16 + $0x128] sm:$0xff] %vm895_vm4, %v14593_v57  ;;  %v14598_v16 = vadd.f32 %v14574_v37, %v14478_v4  ;;  %v14476_v14 = vadd.f32 %v14429_v58, %v13689_v50 }
 0x605   : > { %v17842_v46 = vpop.f32.mrf.mxu1 }
 0x606   : > { %14622 = vst.msk [vmem:[%s19007_s16 + $0x150] sm:$0xff] %vm895_vm4, %v14598_v16  ;;  %v14596_v10 = vadd.f32 %v14572_v49, %v14476_v14  ;;  %v14479_v18 = vadd.f32 %v17842_v46, %v13692_v17 }
 0x607   : > { %v14432_v33 = vpop.f32.mrf.mxu1 }
 0x608   : > { %14620 = vst.msk [vmem:[%s19007_s16 + $0x140] sm:$0xff] %vm895_vm4, %v14596_v10  ;;  %v14599_v6 = vadd.f32 %v14575_v25, %v14479_v18  ;;  %v14477_v36 = vadd.f32 %v14432_v33, %v13690_v28 }
 0x609   : > { %v17845_v19 = vpop.f32.mrf.mxu1 }
 0x60a   : > { %14623 = vst.msk [vmem:[%s19007_s16 + $0x158] sm:$0xff] %vm895_vm4, %v14599_v6  ;;  %v14597_v44 = vadd.f32 %v14573_v30, %v14477_v36  ;;  %v14482_v59 = vadd.f32 %v17845_v19, %v13695_v40 }
 0x60b   : > { %v14445_v1 = vpop.f32.mrf.mxu1 }
 0x60c   : > { %14621 = vst.msk [vmem:[%s19007_s16 + $0x148] sm:$0xff] %vm895_vm4, %v14597_v44  ;;  %v14602_v56 = vadd.f32 %v14578_v62, %v14482_v59  ;;  %v14480_v2 = vadd.f32 %v14445_v1, %v13693_v32 }
 0x60d   : > { %v17846_v38 = vpop.f32.mrf.mxu1 }
 0x60e   : > { %14626 = vst.msk [vmem:[%s19007_s16 + $0x170] sm:$0xff] %vm895_vm4, %v14602_v56  ;;  %v14600_v53 = vadd.f32 %v14576_v12, %v14480_v2  ;;  %v14483_v45 = vadd.f32 %v17846_v38, %v13696_v0 }
 0x60f   : > { %v14448_v41 = vpop.f32.mrf.mxu1 }
 0x610   : > { %14624 = vst.msk [vmem:[%s19007_s16 + $0x160] sm:$0xff] %vm895_vm4, %v14600_v53  ;;  %v14603_v3 = vadd.f32 %v14579_v15, %v14483_v45  ;;  %v14481_v51 = vadd.f32 %v14448_v41, %v13694_v7 }
 0x612   : > { %14627 = vst.msk [vmem:[%s19007_s16 + $0x178] sm:$0xff] %vm895_vm4, %v14603_v3  ;;  %v14601_v23 = vadd.f32 %v14577_v61, %v14481_v51 }
 0x614   : > { %14625 = vst.msk [vmem:[%s19007_s16 + $0x168] sm:$0xff] %vm895_vm4, %v14601_v23 }
 0x615 PF: > { %s18_s27 = sadd.s32 1, %s18426_s27  }
 0x616   : > { %p15_p4 = scmp.ge.s32.totalorder %s18_s27, 4  }
 0x618   :  { %17 = sbr.rel (!%p15_p4) target bundleno = 1 (0x1), region = 98 }

</bundles_post_ra>
